<compile_context>
chip_gen: v7x
topology: tpu7x:2x2x1
jax: 0.10.0
libtpu: 0.0.40
codegen_flags: <defaults>
</compile_context>

<pallas_src>
import functools
import math

import jax
import jax.numpy as jnp
from jax.experimental import pallas as pl
from jax.experimental.pallas import tpu as pltpu


def _round_up(v: int, m: int) -> int:
    return (v + m - 1) // m * m


# ----------------------------------------------------------------------------
# Fused forward kernel: backbone -> (gradient head | hessian head)
# ----------------------------------------------------------------------------
def _fused_forward_kernel(x_ref, w_first_ref, w_back_ref, w_branch_ref,
                          w_grad_ref, w_gout_ref, w_hess_ref, w_hout_ref,
                          b_ref, gh_ref):
    H_PAD = w_first_ref.shape[1]          # padded backbone / hessian width
    S_PAD = w_gout_ref.shape[0]           # padded gradient-head width
    N_PAD = w_gout_ref.shape[1]           # padded gradient output width
    nb = w_back_ref.shape[0]              # backbone layers 1..nb
    ng = w_grad_ref.shape[0]              # gradient-head middle layers
    nh = w_hess_ref.shape[0]              # hessian-head middle layers

    def dense(a, w, bias_row, width, silu):
        # bf16 MXU matmul, f32 accumulation; bias + SiLU in f32 (EUP sigmoid).
        z = jnp.dot(a.astype(w.dtype), w, preferred_element_type=jnp.float32)
        z = z + b_ref[bias_row:bias_row + 1, :width]
        if silu:
            z = z * jax.nn.sigmoid(z)
        return z

    # Backbone (SiLU on every layer).
    a = dense(x_ref[...], w_first_ref[...], 0, H_PAD, True)
    for l in range(nb):
        a = dense(a, w_back_ref[l], 1 + l, H_PAD, True)

    # Fused branch layer: [grad_head[0] | hess_head[0]] in one wide matmul.
    z = dense(a, w_branch_ref[...], 1 + nb, S_PAD + H_PAD, True)
    g = z[:, :S_PAD]
    h = z[:, S_PAD:]

    # Gradient head (SiLU on middle layers, linear output layer).
    for l in range(ng):
        g = dense(g, w_grad_ref[l], 2 + nb + l, S_PAD, True)
    g = dense(g, w_gout_ref[...], 2 + nb + ng, N_PAD, False)

    # Hessian head (SiLU on middle layers, linear output layer).
    for l in range(nh):
        h = dense(h, w_hess_ref[l], 3 + nb + ng + l, H_PAD, True)
    h = dense(h, w_hout_ref[...], 3 + nb + ng + nh, w_hout_ref.shape[1], False)

    # Single lane-dense output slab: [g | h], each slice 128-lane aligned.
    gh_ref[:, :N_PAD] = g.astype(gh_ref.dtype)
    gh_ref[:, N_PAD:] = h.astype(gh_ref.dtype)


def _full_spec(shape):
    nd = len(shape)
    return pl.BlockSpec(shape, lambda i, nd=nd: (0,) * nd)


def fused_forward_call(x_pad, packed):
    """Single pallas_call running the whole MLP on padded, packed params."""
    m_pad = x_pad.shape[0]
    n_pad_g = packed["w_gout"].shape[1]
    n_pad_h = packed["w_hout"].shape[1]
    out_w = n_pad_g + n_pad_h

    args = (x_pad, packed["w_first"], packed["w_back"], packed["w_branch"],
            packed["w_grad"], packed["w_gout"], packed["w_hess"],
            packed["w_hout"], packed["b_all"])

    # Advisory cost estimate (helps XLA schedule around the custom call).
    weight_elems = sum(int(packed[k].size) for k in
                       ("w_first", "w_back", "w_branch", "w_grad",
                        "w_gout", "w_hess", "w_hout"))
    H_PAD = packed["w_first"].shape[1]
    S_PAD = packed["w_gout"].shape[0]
    silu_cols = (H_PAD * (1 + packed["w_back"].shape[0])
                 + (S_PAD + H_PAD)
                 + S_PAD * packed["w_grad"].shape[0]
                 + H_PAD * packed["w_hess"].shape[0])
    bytes_accessed = (sum(int(a.size) * a.dtype.itemsize for a in args)
                      + m_pad * out_w * 4)
    cost = pl.CostEstimate(flops=2 * m_pad * weight_elems,
                           transcendentals=m_pad * silu_cols,
                           bytes_accessed=bytes_accessed)

    return pl.pallas_call(
        _fused_forward_kernel,
        out_shape=jax.ShapeDtypeStruct((m_pad, out_w), jnp.float32),
        grid=(1,),
        in_specs=[_full_spec(a.shape) for a in args],
        out_specs=_full_spec((m_pad, out_w)),
        compiler_params=pltpu.CompilerParams(
            dimension_semantics=("arbitrary",),
            vmem_limit_bytes=32 << 20,
        ),
        cost_estimate=cost,
    )(*args)


# ----------------------------------------------------------------------------
# Parameter construction (torch.nn.Linear-style init) and packing
# ----------------------------------------------------------------------------
def init_linear_params(key, in_features, out_features, dtype=jnp.float32):
    """U(-1/sqrt(fan_in), +1/sqrt(fan_in)) for W:(in,out) and b:(out,)."""
    kw, kb = jax.random.split(key)
    bound = 1.0 / math.sqrt(in_features)
    w = jax.random.uniform(kw, (in_features, out_features), dtype,
                           minval=-bound, maxval=bound)
    b = jax.random.uniform(kb, (out_features,), dtype,
                           minval=-bound, maxval=bound)
    return w, b


def init_factorized_hessian_params(key, n: int):
    """Same layer stack as Factorized_Hessian_Model.__init__ (logical, f32)."""
    h_big = 100 * n * n
    h_small = 100 * n
    dims_backbone = [(n, h_big)] + [(h_big, h_big)] * 3
    dims_grad = [(h_big, h_small)] + [(h_small, h_small)] * 4 + [(h_small, n)]
    dims_hess = [(h_big, h_big)] * 5 + [(h_big, n * n)]

    params = {"backbone": [], "gradient_head": [], "hessian_head": []}
    for name, dims in (("backbone", dims_backbone),
                       ("gradient_head", dims_grad),
                       ("hessian_head", dims_hess)):
        for (fi, fo) in dims:
            key, sub = jax.random.split(key)
            params[name].append(init_linear_params(sub, fi, fo))
    return params


def pack_params(params, n: int, weight_dtype=jnp.bfloat16):
    """Zero-pad to lane-dense shapes, stack same-shape layers, pack biases."""
    H = 100 * n * n
    S = 100 * n
    H_PAD = _round_up(H, 128)
    S_PAD = _round_up(S, 128)
    N_PAD = _round_up(n, 128)
    NN_PAD = _round_up(n * n, 128)
    B_PAD = S_PAD + H_PAD

    def pad2(a, shape):
        return jnp.pad(a, [(0, s - d) for d, s in zip(a.shape, shape)])

    def pad_bias(b, width):
        return jnp.pad(b.reshape(1, -1), ((0, 0), (0, width - b.shape[-1])))

    bb = params["backbone"]
    gh = params["gradient_head"]
    hh = params["hessian_head"]

    w_first = pad2(bb[0][0], (N_PAD, H_PAD))
    w_back = jnp.stack([pad2(w, (H_PAD, H_PAD)) for (w, _) in bb[1:]])
    # Branch layer: grad_head[0] (H->S) and hess_head[0] (H->H) share input.
    w_branch = jnp.concatenate(
        [pad2(gh[0][0], (H_PAD, S_PAD)), pad2(hh[0][0], (H_PAD, H_PAD))],
        axis=1)
    w_grad = jnp.stack([pad2(w, (S_PAD, S_PAD)) for (w, _) in gh[1:-1]])
    w_gout = pad2(gh[-1][0], (S_PAD, N_PAD))
    w_hess = jnp.stack([pad2(w, (H_PAD, H_PAD)) for (w, _) in hh[1:-1]])
    w_hout = pad2(hh[-1][0], (H_PAD, NN_PAD))

    rows = [pad_bias(bb[0][1], B_PAD)]
    rows += [pad_bias(b, B_PAD) for (_, b) in bb[1:]]
    rows.append(jnp.concatenate([pad_bias(gh[0][1], S_PAD),
                                 pad_bias(hh[0][1], H_PAD)], axis=1))
    rows += [pad_bias(b, B_PAD) for (_, b) in gh[1:-1]]
    rows.append(pad_bias(gh[-1][1], B_PAD))
    rows += [pad_bias(b, B_PAD) for (_, b) in hh[1:-1]]
    rows.append(pad_bias(hh[-1][1], B_PAD))
    rows.append(jnp.zeros((1, B_PAD), jnp.float32))          # pad to 16 rows
    b_all = jnp.concatenate(rows, axis=0).astype(jnp.float32)

    return {
        "w_first": w_first.astype(weight_dtype),
        "w_back": w_back.astype(weight_dtype),
        "w_branch": w_branch.astype(weight_dtype),
        "w_grad": w_grad.astype(weight_dtype),
        "w_gout": w_gout.astype(weight_dtype),
        "w_hess": w_hess.astype(weight_dtype),
        "w_hout": w_hout.astype(weight_dtype),
        "b_all": b_all,
    }


# ----------------------------------------------------------------------------
# Public forward (pad -> fused kernel -> unpad/reshape)
# ----------------------------------------------------------------------------
def factorized_hessian_forward(packed, x, n: int):
    """x: (B, n) f32. Returns (g: (B, n), h: (B, n, n))."""
    batch = x.shape[0]
    m_pad = _round_up(batch, 8)
    k0_pad = packed["w_first"].shape[0]
    x_pad = jnp.zeros((m_pad, k0_pad), jnp.float32).at[:batch, :n].set(x)

    gh = fused_forward_call(x_pad, packed)

    n_pad_g = packed["w_gout"].shape[1]
    g = gh[:batch, :n]
    h = gh[:batch, n_pad_g:n_pad_g + n * n].reshape(batch, n, n)
    return g, h


# ----------------------------------------------------------------------------
# Pure-JAX reference (same bf16-weight / f32-accumulate precision path)
# ----------------------------------------------------------------------------
def _ref_forward(params, x, n: int, weight_dtype=jnp.bfloat16):
    def dense(a, w, b, silu):
        z = jnp.dot(a.astype(weight_dtype), w.astype(weight_dtype),
                    preferred_element_type=jnp.float32) + b
        if silu:
            z = z * jax.nn.sigmoid(z)
        return z

    for (w, b) in params["backbone"]:
        x = dense(x, w, b, True)
    g, h = x, x
    for (w, b) in params["gradient_head"][:-1]:
        g = dense(g, w, b, True)
    w, b = params["gradient_head"][-1]
    g = dense(g, w, b, False)
    for (w, b) in params["hessian_head"][:-1]:
        h = dense(h, w, b, True)
    w, b = params["hessian_head"][-1]
    h = dense(h, w, b, False).reshape(-1, n, n)
    return g, h


# ----------------------------------------------------------------------------
# main
# ----------------------------------------------------------------------------
if __name__ == "__main__":
    n = 2          # hidden widths: 100*n*n = 400 (-> 512), 100*n = 200 (-> 256)
    batch = 2

    key = jax.random.PRNGKey(0)
    key_params, key_x = jax.random.split(key)

    params = init_factorized_hessian_params(key_params, n)
    packed = pack_params(params, n)
    x = jax.random.normal(key_x, (batch, n), dtype=jnp.float32)

    fwd = jax.jit(functools.partial(factorized_hessian_forward, n=n))
    g, h = fwd(packed, x)
    g = jax.block_until_ready(g)
    h = jax.block_until_ready(h)

    assert g.shape == (batch, n), g.shape
    assert h.shape == (batch, n, n), h.shape

    # Cross-check against the pure-JAX reference (same precision path).
    g_ref, h_ref = _ref_forward(params, x, n)
    assert jnp.allclose(g, g_ref, atol=1e-3, rtol=1e-3), (g, g_ref)
    assert jnp.allclose(h, h_ref, atol=1e-3, rtol=1e-3), (h, h_ref)

    print("KERNEL_OK")
</pallas_src>

<mosaic_0001>
module attributes {stable_mosaic.version = 11 : i64} {
  func.func @_fused_forward_kernel(%arg0: i32, %arg1: memref<8x128xf32, #tpu.memory_space<vmem>>, %arg2: memref<128x512xbf16, #tpu.memory_space<vmem>>, %arg3: memref<3x512x512xbf16, #tpu.memory_space<vmem>>, %arg4: memref<512x768xbf16, #tpu.memory_space<vmem>>, %arg5: memref<4x256x256xbf16, #tpu.memory_space<vmem>>, %arg6: memref<256x128xbf16, #tpu.memory_space<vmem>>, %arg7: memref<4x512x512xbf16, #tpu.memory_space<vmem>>, %arg8: memref<512x128xbf16, #tpu.memory_space<vmem>>, %arg9: memref<16x768xf32, #tpu.memory_space<vmem>>, %arg10: memref<8x256xf32, #tpu.memory_space<vmem>>) attributes {dimension_semantics = [#tpu.dimension_semantics<arbitrary>], iteration_bounds = array<i64: 1>, scalar_prefetch = 0 : i64, scratch_operands = 0 : i64, tpu.core_type = #tpu.core_type<tc>, window_params = [{pipeline_mode = #tpu.pipeline_mode<synchronous>, transform_indices = @transform_0, window_bounds = array<i64: 8, 128>}, {pipeline_mode = #tpu.pipeline_mode<synchronous>, transform_indices = @transform_1, window_bounds = array<i64: 128, 512>}, {pipeline_mode = #tpu.pipeline_mode<synchronous>, transform_indices = @transform_2, window_bounds = array<i64: 3, 512, 512>}, {pipeline_mode = #tpu.pipeline_mode<synchronous>, transform_indices = @transform_3, window_bounds = array<i64: 512, 768>}, {pipeline_mode = #tpu.pipeline_mode<synchronous>, transform_indices = @transform_4, window_bounds = array<i64: 4, 256, 256>}, {pipeline_mode = #tpu.pipeline_mode<synchronous>, transform_indices = @transform_5, window_bounds = array<i64: 256, 128>}, {pipeline_mode = #tpu.pipeline_mode<synchronous>, transform_indices = @transform_6, window_bounds = array<i64: 4, 512, 512>}, {pipeline_mode = #tpu.pipeline_mode<synchronous>, transform_indices = @transform_7, window_bounds = array<i64: 512, 128>}, {pipeline_mode = #tpu.pipeline_mode<synchronous>, transform_indices = @transform_8, window_bounds = array<i64: 16, 768>}, {pipeline_mode = #tpu.pipeline_mode<synchronous>, transform_indices = @transform_9, window_bounds = array<i64: 8, 256>}]} {
    %c0 = arith.constant 0 : index
    %c0_0 = arith.constant 0 : index
    %0 = vector.load %arg1[%c0, %c0_0] : memref<8x128xf32, #tpu.memory_space<vmem>>, vector<8x128xf32>
    %c0_1 = arith.constant 0 : index
    %c0_2 = arith.constant 0 : index
    %1 = vector.load %arg2[%c0_1, %c0_2] : memref<128x512xbf16, #tpu.memory_space<vmem>>, vector<128x512xbf16>
    %2 = arith.truncf %0 : vector<8x128xf32> to vector<8x128xbf16>
    %cst = arith.constant dense<0.000000e+00> : vector<8x512xf32>
    %3 = tpu.matmul %2, %1, %cst {dimension_numbers = #tpu.dot_dimension_numbers<[1], [0], [0], [1], [0, 0, 1, 1], [], []>} : vector<8x128xbf16>, vector<128x512xbf16>, vector<8x512xf32> -> vector<8x512xf32>
    %c0_3 = arith.constant 0 : index
    %c0_4 = arith.constant 0 : index
    %4 = vector.load %arg9[%c0_3, %c0_4] : memref<16x768xf32, #tpu.memory_space<vmem>>, vector<1x512xf32>
    %5 = vector.broadcast %4 : vector<1x512xf32> to vector<8x512xf32>
    %6 = arith.addf %3, %5 : vector<8x512xf32>
    %7 = arith.negf %6 : vector<8x512xf32>
    %8 = math.exp %7 : vector<8x512xf32>
    %cst_5 = arith.constant 1.000000e+00 : f32
    %9 = vector.broadcast %cst_5 : f32 to vector<8x512xf32>
    %10 = arith.addf %9, %8 : vector<8x512xf32>
    %11 = arith.divf %9, %10 : vector<8x512xf32>
    %12 = arith.mulf %6, %11 : vector<8x512xf32>
    %c0_6 = arith.constant 0 : index
    %c0_7 = arith.constant 0 : index
    %c0_8 = arith.constant 0 : index
    %13 = vector.load %arg3[%c0_6, %c0_7, %c0_8] : memref<3x512x512xbf16, #tpu.memory_space<vmem>>, vector<1x512x512xbf16>
    %14 = vector.shape_cast %13 : vector<1x512x512xbf16> to vector<512x512xbf16>
    %15 = arith.truncf %12 : vector<8x512xf32> to vector<8x512xbf16>
    %cst_9 = arith.constant dense<0.000000e+00> : vector<8x512xf32>
    %16 = tpu.matmul %15, %14, %cst_9 {dimension_numbers = #tpu.dot_dimension_numbers<[1], [0], [0], [1], [0, 0, 1, 1], [], []>} : vector<8x512xbf16>, vector<512x512xbf16>, vector<8x512xf32> -> vector<8x512xf32>
    %c1 = arith.constant 1 : index
    %c0_10 = arith.constant 0 : index
    %17 = vector.load %arg9[%c1, %c0_10] : memref<16x768xf32, #tpu.memory_space<vmem>>, vector<1x512xf32>
    %18 = vector.broadcast %17 : vector<1x512xf32> to vector<8x512xf32>
    %19 = arith.addf %16, %18 : vector<8x512xf32>
    %20 = arith.negf %19 : vector<8x512xf32>
    %21 = math.exp %20 : vector<8x512xf32>
    %cst_11 = arith.constant 1.000000e+00 : f32
    %22 = vector.broadcast %cst_11 : f32 to vector<8x512xf32>
    %23 = arith.addf %22, %21 : vector<8x512xf32>
    %24 = arith.divf %22, %23 : vector<8x512xf32>
    %25 = arith.mulf %19, %24 : vector<8x512xf32>
    %c1_12 = arith.constant 1 : index
    %c0_13 = arith.constant 0 : index
    %c0_14 = arith.constant 0 : index
    %26 = vector.load %arg3[%c1_12, %c0_13, %c0_14] : memref<3x512x512xbf16, #tpu.memory_space<vmem>>, vector<1x512x512xbf16>
    %27 = vector.shape_cast %26 : vector<1x512x512xbf16> to vector<512x512xbf16>
    %28 = arith.truncf %25 : vector<8x512xf32> to vector<8x512xbf16>
    %cst_15 = arith.constant dense<0.000000e+00> : vector<8x512xf32>
    %29 = tpu.matmul %28, %27, %cst_15 {dimension_numbers = #tpu.dot_dimension_numbers<[1], [0], [0], [1], [0, 0, 1, 1], [], []>} : vector<8x512xbf16>, vector<512x512xbf16>, vector<8x512xf32> -> vector<8x512xf32>
    %c2 = arith.constant 2 : index
    %c0_16 = arith.constant 0 : index
    %30 = vector.load %arg9[%c2, %c0_16] : memref<16x768xf32, #tpu.memory_space<vmem>>, vector<1x512xf32>
    %31 = vector.broadcast %30 : vector<1x512xf32> to vector<8x512xf32>
    %32 = arith.addf %29, %31 : vector<8x512xf32>
    %33 = arith.negf %32 : vector<8x512xf32>
    %34 = math.exp %33 : vector<8x512xf32>
    %cst_17 = arith.constant 1.000000e+00 : f32
    %35 = vector.broadcast %cst_17 : f32 to vector<8x512xf32>
    %36 = arith.addf %35, %34 : vector<8x512xf32>
    %37 = arith.divf %35, %36 : vector<8x512xf32>
    %38 = arith.mulf %32, %37 : vector<8x512xf32>
    %c2_18 = arith.constant 2 : index
    %c0_19 = arith.constant 0 : index
    %c0_20 = arith.constant 0 : index
    %39 = vector.load %arg3[%c2_18, %c0_19, %c0_20] : memref<3x512x512xbf16, #tpu.memory_space<vmem>>, vector<1x512x512xbf16>
    %40 = vector.shape_cast %39 : vector<1x512x512xbf16> to vector<512x512xbf16>
    %41 = arith.truncf %38 : vector<8x512xf32> to vector<8x512xbf16>
    %cst_21 = arith.constant dense<0.000000e+00> : vector<8x512xf32>
    %42 = tpu.matmul %41, %40, %cst_21 {dimension_numbers = #tpu.dot_dimension_numbers<[1], [0], [0], [1], [0, 0, 1, 1], [], []>} : vector<8x512xbf16>, vector<512x512xbf16>, vector<8x512xf32> -> vector<8x512xf32>
    %c3 = arith.constant 3 : index
    %c0_22 = arith.constant 0 : index
    %43 = vector.load %arg9[%c3, %c0_22] : memref<16x768xf32, #tpu.memory_space<vmem>>, vector<1x512xf32>
    %44 = vector.broadcast %43 : vector<1x512xf32> to vector<8x512xf32>
    %45 = arith.addf %42, %44 : vector<8x512xf32>
    %46 = arith.negf %45 : vector<8x512xf32>
    %47 = math.exp %46 : vector<8x512xf32>
    %cst_23 = arith.constant 1.000000e+00 : f32
    %48 = vector.broadcast %cst_23 : f32 to vector<8x512xf32>
    %49 = arith.addf %48, %47 : vector<8x512xf32>
    %50 = arith.divf %48, %49 : vector<8x512xf32>
    %51 = arith.mulf %45, %50 : vector<8x512xf32>
    %c0_24 = arith.constant 0 : index
    %c0_25 = arith.constant 0 : index
    %52 = vector.load %arg4[%c0_24, %c0_25] : memref<512x768xbf16, #tpu.memory_space<vmem>>, vector<512x768xbf16>
    %53 = arith.truncf %51 : vector<8x512xf32> to vector<8x512xbf16>
    %cst_26 = arith.constant dense<0.000000e+00> : vector<8x768xf32>
    %54 = tpu.matmul %53, %52, %cst_26 {dimension_numbers = #tpu.dot_dimension_numbers<[1], [0], [0], [1], [0, 0, 1, 1], [], []>} : vector<8x512xbf16>, vector<512x768xbf16>, vector<8x768xf32> -> vector<8x768xf32>
    %c4 = arith.constant 4 : index
    %c0_27 = arith.constant 0 : index
    %55 = vector.load %arg9[%c4, %c0_27] : memref<16x768xf32, #tpu.memory_space<vmem>>, vector<1x768xf32>
    %56 = vector.broadcast %55 : vector<1x768xf32> to vector<8x768xf32>
    %57 = arith.addf %54, %56 : vector<8x768xf32>
    %58 = arith.negf %57 : vector<8x768xf32>
    %59 = math.exp %58 : vector<8x768xf32>
    %cst_28 = arith.constant 1.000000e+00 : f32
    %60 = vector.broadcast %cst_28 : f32 to vector<8x768xf32>
    %61 = arith.addf %60, %59 : vector<8x768xf32>
    %62 = arith.divf %60, %61 : vector<8x768xf32>
    %63 = arith.mulf %57, %62 : vector<8x768xf32>
    %64 = vector.extract_strided_slice %63 {offsets = [0, 0], sizes = [8, 256], strides = [1, 1]} : vector<8x768xf32> to vector<8x256xf32>
    %65 = vector.extract_strided_slice %63 {offsets = [0, 256], sizes = [8, 512], strides = [1, 1]} : vector<8x768xf32> to vector<8x512xf32>
    %c0_29 = arith.constant 0 : index
    %c0_30 = arith.constant 0 : index
    %c0_31 = arith.constant 0 : index
    %66 = vector.load %arg5[%c0_29, %c0_30, %c0_31] : memref<4x256x256xbf16, #tpu.memory_space<vmem>>, vector<1x256x256xbf16>
    %67 = vector.shape_cast %66 : vector<1x256x256xbf16> to vector<256x256xbf16>
    %68 = arith.truncf %64 : vector<8x256xf32> to vector<8x256xbf16>
    %cst_32 = arith.constant dense<0.000000e+00> : vector<8x256xf32>
    %69 = tpu.matmul %68, %67, %cst_32 {dimension_numbers = #tpu.dot_dimension_numbers<[1], [0], [0], [1], [0, 0, 1, 1], [], []>} : vector<8x256xbf16>, vector<256x256xbf16>, vector<8x256xf32> -> vector<8x256xf32>
    %c5 = arith.constant 5 : index
    %c0_33 = arith.constant 0 : index
    %70 = vector.load %arg9[%c5, %c0_33] : memref<16x768xf32, #tpu.memory_space<vmem>>, vector<1x256xf32>
    %71 = vector.broadcast %70 : vector<1x256xf32> to vector<8x256xf32>
    %72 = arith.addf %69, %71 : vector<8x256xf32>
    %73 = arith.negf %72 : vector<8x256xf32>
    %74 = math.exp %73 : vector<8x256xf32>
    %cst_34 = arith.constant 1.000000e+00 : f32
    %75 = vector.broadcast %cst_34 : f32 to vector<8x256xf32>
    %76 = arith.addf %75, %74 : vector<8x256xf32>
    %77 = arith.divf %75, %76 : vector<8x256xf32>
    %78 = arith.mulf %72, %77 : vector<8x256xf32>
    %c1_35 = arith.constant 1 : index
    %c0_36 = arith.constant 0 : index
    %c0_37 = arith.constant 0 : index
    %79 = vector.load %arg5[%c1_35, %c0_36, %c0_37] : memref<4x256x256xbf16, #tpu.memory_space<vmem>>, vector<1x256x256xbf16>
    %80 = vector.shape_cast %79 : vector<1x256x256xbf16> to vector<256x256xbf16>
    %81 = arith.truncf %78 : vector<8x256xf32> to vector<8x256xbf16>
    %cst_38 = arith.constant dense<0.000000e+00> : vector<8x256xf32>
    %82 = tpu.matmul %81, %80, %cst_38 {dimension_numbers = #tpu.dot_dimension_numbers<[1], [0], [0], [1], [0, 0, 1, 1], [], []>} : vector<8x256xbf16>, vector<256x256xbf16>, vector<8x256xf32> -> vector<8x256xf32>
    %c6 = arith.constant 6 : index
    %c0_39 = arith.constant 0 : index
    %83 = vector.load %arg9[%c6, %c0_39] : memref<16x768xf32, #tpu.memory_space<vmem>>, vector<1x256xf32>
    %84 = vector.broadcast %83 : vector<1x256xf32> to vector<8x256xf32>
    %85 = arith.addf %82, %84 : vector<8x256xf32>
    %86 = arith.negf %85 : vector<8x256xf32>
    %87 = math.exp %86 : vector<8x256xf32>
    %cst_40 = arith.constant 1.000000e+00 : f32
    %88 = vector.broadcast %cst_40 : f32 to vector<8x256xf32>
    %89 = arith.addf %88, %87 : vector<8x256xf32>
    %90 = arith.divf %88, %89 : vector<8x256xf32>
    %91 = arith.mulf %85, %90 : vector<8x256xf32>
    %c2_41 = arith.constant 2 : index
    %c0_42 = arith.constant 0 : index
    %c0_43 = arith.constant 0 : index
    %92 = vector.load %arg5[%c2_41, %c0_42, %c0_43] : memref<4x256x256xbf16, #tpu.memory_space<vmem>>, vector<1x256x256xbf16>
    %93 = vector.shape_cast %92 : vector<1x256x256xbf16> to vector<256x256xbf16>
    %94 = arith.truncf %91 : vector<8x256xf32> to vector<8x256xbf16>
    %cst_44 = arith.constant dense<0.000000e+00> : vector<8x256xf32>
    %95 = tpu.matmul %94, %93, %cst_44 {dimension_numbers = #tpu.dot_dimension_numbers<[1], [0], [0], [1], [0, 0, 1, 1], [], []>} : vector<8x256xbf16>, vector<256x256xbf16>, vector<8x256xf32> -> vector<8x256xf32>
    %c7 = arith.constant 7 : index
    %c0_45 = arith.constant 0 : index
    %96 = vector.load %arg9[%c7, %c0_45] : memref<16x768xf32, #tpu.memory_space<vmem>>, vector<1x256xf32>
    %97 = vector.broadcast %96 : vector<1x256xf32> to vector<8x256xf32>
    %98 = arith.addf %95, %97 : vector<8x256xf32>
    %99 = arith.negf %98 : vector<8x256xf32>
    %100 = math.exp %99 : vector<8x256xf32>
    %cst_46 = arith.constant 1.000000e+00 : f32
    %101 = vector.broadcast %cst_46 : f32 to vector<8x256xf32>
    %102 = arith.addf %101, %100 : vector<8x256xf32>
    %103 = arith.divf %101, %102 : vector<8x256xf32>
    %104 = arith.mulf %98, %103 : vector<8x256xf32>
    %c3_47 = arith.constant 3 : index
    %c0_48 = arith.constant 0 : index
    %c0_49 = arith.constant 0 : index
    %105 = vector.load %arg5[%c3_47, %c0_48, %c0_49] : memref<4x256x256xbf16, #tpu.memory_space<vmem>>, vector<1x256x256xbf16>
    %106 = vector.shape_cast %105 : vector<1x256x256xbf16> to vector<256x256xbf16>
    %107 = arith.truncf %104 : vector<8x256xf32> to vector<8x256xbf16>
    %cst_50 = arith.constant dense<0.000000e+00> : vector<8x256xf32>
    %108 = tpu.matmul %107, %106, %cst_50 {dimension_numbers = #tpu.dot_dimension_numbers<[1], [0], [0], [1], [0, 0, 1, 1], [], []>} : vector<8x256xbf16>, vector<256x256xbf16>, vector<8x256xf32> -> vector<8x256xf32>
    %c8 = arith.constant 8 : index
    %c0_51 = arith.constant 0 : index
    %109 = vector.load %arg9[%c8, %c0_51] : memref<16x768xf32, #tpu.memory_space<vmem>>, vector<1x256xf32>
    %110 = vector.broadcast %109 : vector<1x256xf32> to vector<8x256xf32>
    %111 = arith.addf %108, %110 : vector<8x256xf32>
    %112 = arith.negf %111 : vector<8x256xf32>
    %113 = math.exp %112 : vector<8x256xf32>
    %cst_52 = arith.constant 1.000000e+00 : f32
    %114 = vector.broadcast %cst_52 : f32 to vector<8x256xf32>
    %115 = arith.addf %114, %113 : vector<8x256xf32>
    %116 = arith.divf %114, %115 : vector<8x256xf32>
    %117 = arith.mulf %111, %116 : vector<8x256xf32>
    %c0_53 = arith.constant 0 : index
    %c0_54 = arith.constant 0 : index
    %118 = vector.load %arg6[%c0_53, %c0_54] : memref<256x128xbf16, #tpu.memory_space<vmem>>, vector<256x128xbf16>
    %119 = arith.truncf %117 : vector<8x256xf32> to vector<8x256xbf16>
    %cst_55 = arith.constant dense<0.000000e+00> : vector<8x128xf32>
    %120 = tpu.matmul %119, %118, %cst_55 {dimension_numbers = #tpu.dot_dimension_numbers<[1], [0], [0], [1], [0, 0, 1, 1], [], []>} : vector<8x256xbf16>, vector<256x128xbf16>, vector<8x128xf32> -> vector<8x128xf32>
    %c9 = arith.constant 9 : index
    %c0_56 = arith.constant 0 : index
    %121 = vector.load %arg9[%c9, %c0_56] : memref<16x768xf32, #tpu.memory_space<vmem>>, vector<1x128xf32>
    %122 = vector.broadcast %121 : vector<1x128xf32> to vector<8x128xf32>
    %123 = arith.addf %120, %122 : vector<8x128xf32>
    %c0_57 = arith.constant 0 : index
    %c0_58 = arith.constant 0 : index
    %c0_59 = arith.constant 0 : index
    %124 = vector.load %arg7[%c0_57, %c0_58, %c0_59] : memref<4x512x512xbf16, #tpu.memory_space<vmem>>, vector<1x512x512xbf16>
    %125 = vector.shape_cast %124 : vector<1x512x512xbf16> to vector<512x512xbf16>
    %126 = arith.truncf %65 : vector<8x512xf32> to vector<8x512xbf16>
    %cst_60 = arith.constant dense<0.000000e+00> : vector<8x512xf32>
    %127 = tpu.matmul %126, %125, %cst_60 {dimension_numbers = #tpu.dot_dimension_numbers<[1], [0], [0], [1], [0, 0, 1, 1], [], []>} : vector<8x512xbf16>, vector<512x512xbf16>, vector<8x512xf32> -> vector<8x512xf32>
    %c10 = arith.constant 10 : index
    %c0_61 = arith.constant 0 : index
    %128 = vector.load %arg9[%c10, %c0_61] : memref<16x768xf32, #tpu.memory_space<vmem>>, vector<1x512xf32>
    %129 = vector.broadcast %128 : vector<1x512xf32> to vector<8x512xf32>
    %130 = arith.addf %127, %129 : vector<8x512xf32>
    %131 = arith.negf %130 : vector<8x512xf32>
    %132 = math.exp %131 : vector<8x512xf32>
    %cst_62 = arith.constant 1.000000e+00 : f32
    %133 = vector.broadcast %cst_62 : f32 to vector<8x512xf32>
    %134 = arith.addf %133, %132 : vector<8x512xf32>
    %135 = arith.divf %133, %134 : vector<8x512xf32>
    %136 = arith.mulf %130, %135 : vector<8x512xf32>
    %c1_63 = arith.constant 1 : index
    %c0_64 = arith.constant 0 : index
    %c0_65 = arith.constant 0 : index
    %137 = vector.load %arg7[%c1_63, %c0_64, %c0_65] : memref<4x512x512xbf16, #tpu.memory_space<vmem>>, vector<1x512x512xbf16>
    %138 = vector.shape_cast %137 : vector<1x512x512xbf16> to vector<512x512xbf16>
    %139 = arith.truncf %136 : vector<8x512xf32> to vector<8x512xbf16>
    %cst_66 = arith.constant dense<0.000000e+00> : vector<8x512xf32>
    %140 = tpu.matmul %139, %138, %cst_66 {dimension_numbers = #tpu.dot_dimension_numbers<[1], [0], [0], [1], [0, 0, 1, 1], [], []>} : vector<8x512xbf16>, vector<512x512xbf16>, vector<8x512xf32> -> vector<8x512xf32>
    %c11 = arith.constant 11 : index
    %c0_67 = arith.constant 0 : index
    %141 = vector.load %arg9[%c11, %c0_67] : memref<16x768xf32, #tpu.memory_space<vmem>>, vector<1x512xf32>
    %142 = vector.broadcast %141 : vector<1x512xf32> to vector<8x512xf32>
    %143 = arith.addf %140, %142 : vector<8x512xf32>
    %144 = arith.negf %143 : vector<8x512xf32>
    %145 = math.exp %144 : vector<8x512xf32>
    %cst_68 = arith.constant 1.000000e+00 : f32
    %146 = vector.broadcast %cst_68 : f32 to vector<8x512xf32>
    %147 = arith.addf %146, %145 : vector<8x512xf32>
    %148 = arith.divf %146, %147 : vector<8x512xf32>
    %149 = arith.mulf %143, %148 : vector<8x512xf32>
    %c2_69 = arith.constant 2 : index
    %c0_70 = arith.constant 0 : index
    %c0_71 = arith.constant 0 : index
    %150 = vector.load %arg7[%c2_69, %c0_70, %c0_71] : memref<4x512x512xbf16, #tpu.memory_space<vmem>>, vector<1x512x512xbf16>
    %151 = vector.shape_cast %150 : vector<1x512x512xbf16> to vector<512x512xbf16>
    %152 = arith.truncf %149 : vector<8x512xf32> to vector<8x512xbf16>
    %cst_72 = arith.constant dense<0.000000e+00> : vector<8x512xf32>
    %153 = tpu.matmul %152, %151, %cst_72 {dimension_numbers = #tpu.dot_dimension_numbers<[1], [0], [0], [1], [0, 0, 1, 1], [], []>} : vector<8x512xbf16>, vector<512x512xbf16>, vector<8x512xf32> -> vector<8x512xf32>
    %c12 = arith.constant 12 : index
    %c0_73 = arith.constant 0 : index
    %154 = vector.load %arg9[%c12, %c0_73] : memref<16x768xf32, #tpu.memory_space<vmem>>, vector<1x512xf32>
    %155 = vector.broadcast %154 : vector<1x512xf32> to vector<8x512xf32>
    %156 = arith.addf %153, %155 : vector<8x512xf32>
    %157 = arith.negf %156 : vector<8x512xf32>
    %158 = math.exp %157 : vector<8x512xf32>
    %cst_74 = arith.constant 1.000000e+00 : f32
    %159 = vector.broadcast %cst_74 : f32 to vector<8x512xf32>
    %160 = arith.addf %159, %158 : vector<8x512xf32>
    %161 = arith.divf %159, %160 : vector<8x512xf32>
    %162 = arith.mulf %156, %161 : vector<8x512xf32>
    %c3_75 = arith.constant 3 : index
    %c0_76 = arith.constant 0 : index
    %c0_77 = arith.constant 0 : index
    %163 = vector.load %arg7[%c3_75, %c0_76, %c0_77] : memref<4x512x512xbf16, #tpu.memory_space<vmem>>, vector<1x512x512xbf16>
    %164 = vector.shape_cast %163 : vector<1x512x512xbf16> to vector<512x512xbf16>
    %165 = arith.truncf %162 : vector<8x512xf32> to vector<8x512xbf16>
    %cst_78 = arith.constant dense<0.000000e+00> : vector<8x512xf32>
    %166 = tpu.matmul %165, %164, %cst_78 {dimension_numbers = #tpu.dot_dimension_numbers<[1], [0], [0], [1], [0, 0, 1, 1], [], []>} : vector<8x512xbf16>, vector<512x512xbf16>, vector<8x512xf32> -> vector<8x512xf32>
    %c13 = arith.constant 13 : index
    %c0_79 = arith.constant 0 : index
    %167 = vector.load %arg9[%c13, %c0_79] : memref<16x768xf32, #tpu.memory_space<vmem>>, vector<1x512xf32>
    %168 = vector.broadcast %167 : vector<1x512xf32> to vector<8x512xf32>
    %169 = arith.addf %166, %168 : vector<8x512xf32>
    %170 = arith.negf %169 : vector<8x512xf32>
    %171 = math.exp %170 : vector<8x512xf32>
    %cst_80 = arith.constant 1.000000e+00 : f32
    %172 = vector.broadcast %cst_80 : f32 to vector<8x512xf32>
    %173 = arith.addf %172, %171 : vector<8x512xf32>
    %174 = arith.divf %172, %173 : vector<8x512xf32>
    %175 = arith.mulf %169, %174 : vector<8x512xf32>
    %c0_81 = arith.constant 0 : index
    %c0_82 = arith.constant 0 : index
    %176 = vector.load %arg8[%c0_81, %c0_82] : memref<512x128xbf16, #tpu.memory_space<vmem>>, vector<512x128xbf16>
    %177 = arith.truncf %175 : vector<8x512xf32> to vector<8x512xbf16>
    %cst_83 = arith.constant dense<0.000000e+00> : vector<8x128xf32>
    %178 = tpu.matmul %177, %176, %cst_83 {dimension_numbers = #tpu.dot_dimension_numbers<[1], [0], [0], [1], [0, 0, 1, 1], [], []>} : vector<8x512xbf16>, vector<512x128xbf16>, vector<8x128xf32> -> vector<8x128xf32>
    %c14 = arith.constant 14 : index
    %c0_84 = arith.constant 0 : index
    %179 = vector.load %arg9[%c14, %c0_84] : memref<16x768xf32, #tpu.memory_space<vmem>>, vector<1x128xf32>
    %180 = vector.broadcast %179 : vector<1x128xf32> to vector<8x128xf32>
    %181 = arith.addf %178, %180 : vector<8x128xf32>
    %c0_85 = arith.constant 0 : index
    %c0_86 = arith.constant 0 : index
    %182 = vector.load %arg10[%c0_85, %c0_86] : memref<8x256xf32, #tpu.memory_space<vmem>>, vector<8x128xf32>
    tpu.vector_store %arg10[%c0_85, %c0_86], %123 {strides = array<i32>} : memref<8x256xf32, #tpu.memory_space<vmem>>, vector<8x128xf32>,
    %c0_87 = arith.constant 0 : index
    %c128 = arith.constant 128 : index
    %183 = vector.load %arg10[%c0_87, %c128] : memref<8x256xf32, #tpu.memory_space<vmem>>, vector<8x128xf32>
    tpu.vector_store %arg10[%c0_87, %c128], %181 {strides = array<i32>} : memref<8x256xf32, #tpu.memory_space<vmem>>, vector<8x128xf32>,
    return
  }
  func.func @transform_0(%arg0: i32) -> (i32, i32) {
    %c0_i32 = arith.constant 0 : i32
    %c0_i32_0 = arith.constant 0 : i32
    %c0_i32_1 = arith.constant 0 : i32
    return %c0_i32, %c0_i32_0 : i32, i32
  }
  func.func @transform_1(%arg0: i32) -> (i32, i32) {
    %c0_i32 = arith.constant 0 : i32
    %c0_i32_0 = arith.constant 0 : i32
    %c0_i32_1 = arith.constant 0 : i32
    return %c0_i32, %c0_i32_0 : i32, i32
  }
  func.func @transform_2(%arg0: i32) -> (i32, i32, i32) {
    %c0_i32 = arith.constant 0 : i32
    %c0_i32_0 = arith.constant 0 : i32
    %c0_i32_1 = arith.constant 0 : i32
    %c0_i32_2 = arith.constant 0 : i32
    return %c0_i32, %c0_i32_0, %c0_i32_1 : i32, i32, i32
  }
  func.func @transform_3(%arg0: i32) -> (i32, i32) {
    %c0_i32 = arith.constant 0 : i32
    %c0_i32_0 = arith.constant 0 : i32
    %c0_i32_1 = arith.constant 0 : i32
    return %c0_i32, %c0_i32_0 : i32, i32
  }
  func.func @transform_4(%arg0: i32) -> (i32, i32, i32) {
    %c0_i32 = arith.constant 0 : i32
    %c0_i32_0 = arith.constant 0 : i32
    %c0_i32_1 = arith.constant 0 : i32
    %c0_i32_2 = arith.constant 0 : i32
    return %c0_i32, %c0_i32_0, %c0_i32_1 : i32, i32, i32
  }
  func.func @transform_5(%arg0: i32) -> (i32, i32) {
    %c0_i32 = arith.constant 0 : i32
    %c0_i32_0 = arith.constant 0 : i32
    %c0_i32_1 = arith.constant 0 : i32
    return %c0_i32, %c0_i32_0 : i32, i32
  }
  func.func @transform_6(%arg0: i32) -> (i32, i32, i32) {
    %c0_i32 = arith.constant 0 : i32
    %c0_i32_0 = arith.constant 0 : i32
    %c0_i32_1 = arith.constant 0 : i32
    %c0_i32_2 = arith.constant 0 : i32
    return %c0_i32, %c0_i32_0, %c0_i32_1 : i32, i32, i32
  }
  func.func @transform_7(%arg0: i32) -> (i32, i32) {
    %c0_i32 = arith.constant 0 : i32
    %c0_i32_0 = arith.constant 0 : i32
    %c0_i32_1 = arith.constant 0 : i32
    return %c0_i32, %c0_i32_0 : i32, i32
  }
  func.func @transform_8(%arg0: i32) -> (i32, i32) {
    %c0_i32 = arith.constant 0 : i32
    %c0_i32_0 = arith.constant 0 : i32
    %c0_i32_1 = arith.constant 0 : i32
    return %c0_i32, %c0_i32_0 : i32, i32
  }
  func.func @transform_9(%arg0: i32) -> (i32, i32) {
    %c0_i32 = arith.constant 0 : i32
    %c0_i32_0 = arith.constant 0 : i32
    %c0_i32_1 = arith.constant 0 : i32
    return %c0_i32, %c0_i32_0 : i32, i32
  }
}

</mosaic_0001>

<bundles_post_ra>
// kernel: factorized_hessian_forward.1
= control target key start
LH: loop header
LB: loop body
LE: loop exit
PB: predicated region body
PF: predicated region fallthrough
CT: control target
= control target key end

     0   :  { %14 = vsyncpa [#allocation3], 0  ;;  %s14666_s0 = inlined_call_operand.vmem [shape: f32[8,128], index: 0, kind: input, shape index: {}]   ;;  %s14667_s1 = inlined_call_operand.hbm [shape: bf16[128,512], index: 1, kind: input, shape index: {}]   ;;  %s14668_s2 = inlined_call_operand.hbm [shape: bf16[3,512,512], index: 2, kind: input, shape index: {}]   ;;  %s14669_s3 = inlined_call_operand.hbm [shape: bf16[512,768], index: 3, kind: input, shape index: {}]   ;;  %s14670_s4 = inlined_call_operand.hbm [shape: bf16[4,256,256], index: 4, kind: input, shape index: {}]   ;;  %s14671_s5 = inlined_call_operand.hbm [shape: bf16[256,128], index: 5, kind: input, shape index: {}]   ;;  %s14672_s6 = inlined_call_operand.hbm [shape: bf16[4,512,512], index: 6, kind: input, shape index: {}]   ;;  %s14673_s7 = inlined_call_operand.hbm [shape: bf16[512,128], index: 7, kind: input, shape index: {}]   ;;  %s14674_s8 = inlined_call_operand.hbm [shape: f32[16,768], index: 8, kind: input, shape index: {}]   ;;  %s14675_s9 = inlined_call_operand.vmem [shape: f32[8,256], index: 9, kind: output, shape index: {}]  }
   0x1   :  { %15 = vsyncpa [#allocation5], 0 }
   0x2   :  { %16 = vsyncpa [#allocation8], 0 }
   0x3   :  { %17 = vsyncpa [#allocation11], 0 }
   0x4   :  { %18 = vsyncpa [#allocation14], 0  ;;  %s14254_s30 = smov [#allocation4]   ;;  %s14255_s11 = smov [#allocation7]  }
   0x5   :  { %s38_s10 = sshll.u32 %s14254_s30, 4  ;;  %s62_s12 = sshll.u32 %s14255_s11, 4  ;;  %s39_s10 = int_to_ptr.vmem [resolvable:$true] %s38_s10  ;;  %s14323_s12 = int_to_ptr.vmem [resolvable:$true] %s62_s12 }
   0x6   :  { %s14068_s15 = scalar_lea.hbm %s14668_s2, 49152 }
   0x7   :  { %p14069_p0 = scmp.ne.s32.totalorder %s14668_s2, %s14068_s15  ;;  %p14072_p1 = scmp.lt.u32.totalorder %s14068_s15, %s14668_s2 }
   0x9   :  { %p14074_p2 = pnand %p14072_p1, %p14069_p0 }
   0xb   :  { %14077 = shalt.err (!%p14074_p2)
}
   0xc   :  { %s14078_s20 = scalar_lea.vmem %s39_s10, 49152  ;;  %p14083_p4 = scmp.lt.s32.totalorder %s39_s10, %s39_s10 }
   0xd   :  { %p14079_p3 = scmp.ne.s32.totalorder %s39_s10, %s14078_s20  ;;  %p14084_p5 = scmp.lt.s32.totalorder %s14078_s20, %s14078_s20 }
   0xf   :  { %p14085_p6 = por %p14084_p5, %p14083_p4 }
  0x11   :  { %p14086_p7 = pnand %p14085_p6, %p14079_p3 }
  0x13   :  { %14089 = shalt.err (!%p14086_p7)
}
  0x14   :  { %s14256_s21 = smov 256   ;;  %s14257_s22 = smov 16  }
  0x15   :  { %44 = dma.hbm_to_vmem [thread:$0]  %s14668_s2, 49152, %s39_s10, [#allocation5], %s14256_s21, %s14256_s21, %s14257_s22  }
  0x16   :  { %s14090_s27 = scalar_lea.hbm %s14670_s4, 16384 }
  0x17   :  { %p14091_p8 = scmp.ne.s32.totalorder %s14670_s4, %s14090_s27  ;;  %p14094_p9 = scmp.lt.u32.totalorder %s14090_s27, %s14670_s4 }
  0x19   :  { %p14096_p10 = pnand %p14094_p9, %p14091_p8 }
  0x1b   :  { %14099 = shalt.err (!%p14096_p10)
}
  0x1c   :  { %s14100_s13 = scalar_lea.vmem %s14323_s12, 16384  ;;  %p14105_p12 = scmp.lt.s32.totalorder %s14323_s12, %s14323_s12 }
  0x1d   :  { %p14101_p11 = scmp.ne.s32.totalorder %s14323_s12, %s14100_s13  ;;  %p14106_p13 = scmp.lt.s32.totalorder %s14100_s13, %s14100_s13 }
  0x1f   :  { %p14107_p0 = por %p14106_p13, %p14105_p12 }
  0x21   :  { %p14108_p1 = pnand %p14107_p0, %p14101_p11 }
  0x23   :  { %14111 = shalt.err (!%p14108_p1)
}
  0x24   :  { %s14258_s2 = smov 128   ;;  %s14259_s10 = smov 8  }
  0x25   :  { %68 = dma.hbm_to_vmem [thread:$0]  %s14670_s4, 16384, %s14323_s12, [#allocation8], %s14258_s2, %s14258_s2, %s14259_s10  }
  0x26   :  { %s14260_s16 = smov [#allocation10]   ;;  %s14261_s18 = smov [#allocation2]  }
  0x27   :  { %s86_s17 = sshll.u32 %s14260_s16, 4  ;;  %s26_s19 = sshll.u32 %s14261_s18, 4  ;;  %s87_s17 = int_to_ptr.vmem [resolvable:$true] %s86_s17  ;;  %s14357_s19 = int_to_ptr.vmem [resolvable:$true] %s26_s19 }
  0x28   :  { %s14112_s24 = scalar_lea.hbm %s14672_s6, 65536 }
  0x29   :  { %p14113_p2 = scmp.ne.s32.totalorder %s14672_s6, %s14112_s24  ;;  %p14116_p3 = scmp.lt.u32.totalorder %s14112_s24, %s14672_s6 }
  0x2b   :  { %p14118_p4 = pnand %p14116_p3, %p14113_p2 }
  0x2d   :  { %14121 = shalt.err (!%p14118_p4)
}
  0x2e   :  { %s14122_s4 = scalar_lea.vmem %s87_s17, 65536  ;;  %p14127_p6 = scmp.lt.s32.totalorder %s87_s17, %s87_s17 }
  0x2f   :  { %p14123_p5 = scmp.ne.s32.totalorder %s87_s17, %s14122_s4  ;;  %p14128_p7 = scmp.lt.s32.totalorder %s14122_s4, %s14122_s4 }
  0x31   :  { %p14129_p8 = por %p14128_p7, %p14127_p6 }
  0x33   :  { %p14130_p9 = pnand %p14129_p8, %p14123_p5 }
  0x35   :  { %14133 = shalt.err (!%p14130_p9)
}
  0x36   :  { %92 = dma.hbm_to_vmem [thread:$0]  %s14672_s6, 65536, %s87_s17, [#allocation11], %s14256_s21, %s14256_s21, %s14257_s22  }
  0x37   :  { %s14134_s13 = scalar_lea.hbm %s14667_s1, 4096 }
  0x38   :  { %p14135_p10 = scmp.ne.s32.totalorder %s14667_s1, %s14134_s13  ;;  %p14138_p11 = scmp.lt.u32.totalorder %s14134_s13, %s14667_s1 }
  0x3a   :  { %p14140_p12 = pnand %p14138_p11, %p14135_p10 }
  0x3c   :  { %14143 = shalt.err (!%p14140_p12)
}
  0x3d   :  { %s14144_s16 = scalar_lea.vmem %s14357_s19, 4096  ;;  %p14149_p0 = scmp.lt.s32.totalorder %s14357_s19, %s14357_s19 }
  0x3e   :  { %p14145_p13 = scmp.ne.s32.totalorder %s14357_s19, %s14144_s16  ;;  %p14150_p1 = scmp.lt.s32.totalorder %s14144_s16, %s14144_s16 }
  0x40   :  { %p14151_p2 = por %p14150_p1, %p14149_p0 }
  0x42   :  { %p14152_p3 = pnand %p14151_p2, %p14145_p13 }
  0x44   :  { %14155 = shalt.err (!%p14152_p3)
}
  0x45   :  { %32 = dma.hbm_to_vmem [thread:$0]  %s14667_s1, 4096, %s14357_s19, [#allocation3], %s14256_s21, %s14256_s21, %s14257_s22  }
  0x46   :  { %s14262_s18 = smov [#allocation6]   ;;  %s14156_s25 = scalar_lea.hbm %s14669_s3, 24576 }
  0x47   :  { %s50_s20 = sshll.u32 %s14262_s18, 4  ;;  %p14157_p4 = scmp.ne.s32.totalorder %s14669_s3, %s14156_s25  ;;  %s51_s20 = int_to_ptr.vmem [resolvable:$true] %s50_s20 }
  0x48   :  { %p14160_p5 = scmp.lt.u32.totalorder %s14156_s25, %s14669_s3 }
  0x4a   :  { %p14162_p6 = pnand %p14160_p5, %p14157_p4 }
  0x4c   :  { %14165 = shalt.err (!%p14162_p6)
}
  0x4d   :  { %s14166_s12 = scalar_lea.vmem %s51_s20, 24576  ;;  %p14171_p8 = scmp.lt.s32.totalorder %s51_s20, %s51_s20 }
  0x4e   :  { %p14167_p7 = scmp.ne.s32.totalorder %s51_s20, %s14166_s12  ;;  %p14172_p9 = scmp.lt.s32.totalorder %s14166_s12, %s14166_s12 }
  0x50   :  { %p14173_p10 = por %p14172_p9, %p14171_p8 }
  0x52   :  { %p14174_p11 = pnand %p14173_p10, %p14167_p7 }
  0x54   :  { %14177 = shalt.err (!%p14174_p11)
}
  0x55   :  { %s14263_s1 = smov 384   ;;  %s14264_s21 = smov 24  }
  0x56   :  { %56 = dma.hbm_to_vmem [thread:$0]  %s14669_s3, 24576, %s51_s20, [#allocation5], %s14263_s1, %s14263_s1, %s14264_s21  }
  0x57   :  { %s14265_s29 = smov [#allocation9]   ;;  %s14178_s2 = scalar_lea.hbm %s14671_s5, 2048 }
  0x58   :  { %s74_s30 = sshll.u32 %s14265_s29, 4  ;;  %p14179_p12 = scmp.ne.s32.totalorder %s14671_s5, %s14178_s2  ;;  %s75_s30 = int_to_ptr.vmem [resolvable:$true] %s74_s30 }
  0x59   :  { %p14182_p13 = scmp.lt.u32.totalorder %s14178_s2, %s14671_s5 }
  0x5b   :  { %p14184_p0 = pnand %p14182_p13, %p14179_p12 }
  0x5d   :  { %14187 = shalt.err (!%p14184_p0)
}
  0x5e   :  { %s14188_s6 = scalar_lea.vmem %s75_s30, 2048  ;;  %p14193_p2 = scmp.lt.s32.totalorder %s75_s30, %s75_s30 }
  0x5f   :  { %p14189_p1 = scmp.ne.s32.totalorder %s75_s30, %s14188_s6  ;;  %p14194_p3 = scmp.lt.s32.totalorder %s14188_s6, %s14188_s6 }
  0x61   :  { %p14195_p4 = por %p14194_p3, %p14193_p2 }
  0x63   :  { %p14196_p5 = pnand %p14195_p4, %p14189_p1 }
  0x65   :  { %14199 = shalt.err (!%p14196_p5)
}
  0x66   :  { %s14266_s3 = smov 64   ;;  %s14267_s17 = smov 4  }
  0x67   :  { %80 = dma.hbm_to_vmem [thread:$0]  %s14671_s5, 2048, %s75_s30, [#allocation8], %s14266_s3, %s14266_s3, %s14267_s17  }
  0x68   :  { %s14268_s23 = smov [#allocation12]   ;;  %s14269_s25 = smov [#allocation13]  }
  0x69   :  { %s98_s24 = sshll.u32 %s14268_s23, 4  ;;  %s110_s26 = sshll.u32 %s14269_s25, 4  ;;  %s99_s24 = int_to_ptr.vmem [resolvable:$true] %s98_s24  ;;  %s14418_s26 = int_to_ptr.vmem [resolvable:$true] %s110_s26 }
  0x6a   :  { %s14200_s4 = scalar_lea.hbm %s14673_s7, 4096 }
  0x6b   :  { %p14201_p6 = scmp.ne.s32.totalorder %s14673_s7, %s14200_s4  ;;  %p14204_p7 = scmp.lt.u32.totalorder %s14200_s4, %s14673_s7 }
  0x6d   :  { %p14206_p8 = pnand %p14204_p7, %p14201_p6 }
  0x6f   :  { %14209 = shalt.err (!%p14206_p8)
}
  0x70   :  { %s14210_s5 = scalar_lea.vmem %s99_s24, 4096  ;;  %p14215_p10 = scmp.lt.s32.totalorder %s99_s24, %s99_s24 }
  0x71   :  { %p14211_p9 = scmp.ne.s32.totalorder %s99_s24, %s14210_s5  ;;  %p14216_p11 = scmp.lt.s32.totalorder %s14210_s5, %s14210_s5 }
  0x73   :  { %p14217_p12 = por %p14216_p11, %p14215_p10 }
  0x75   :  { %p14218_p13 = pnand %p14217_p12, %p14211_p9 }
  0x77   :  { %14221 = shalt.err (!%p14218_p13)
}
  0x78   :  { %104 = dma.hbm_to_vmem [thread:$0]  %s14673_s7, 4096, %s99_s24, [#allocation11], %s14266_s3, %s14266_s3, %s14267_s17  }
  0x79   :  { %s14222_s13 = scalar_lea.hbm %s14674_s8, 1536 }
  0x7a   :  { %p14223_p0 = scmp.ne.s32.totalorder %s14674_s8, %s14222_s13  ;;  %p14226_p1 = scmp.lt.u32.totalorder %s14222_s13, %s14674_s8 }
  0x7c   :  { %p14228_p2 = pnand %p14226_p1, %p14223_p0 }
  0x7e   :  { %14231 = shalt.err (!%p14228_p2)
}
  0x7f   :  { %s14232_s16 = scalar_lea.vmem %s14418_s26, 1536  ;;  %p14237_p4 = scmp.lt.s32.totalorder %s14418_s26, %s14418_s26 }
  0x80   :  { %p14233_p3 = scmp.ne.s32.totalorder %s14418_s26, %s14232_s16  ;;  %p14238_p5 = scmp.lt.s32.totalorder %s14232_s16, %s14232_s16 }
  0x82   :  { %p14239_p6 = por %p14238_p5, %p14237_p4 }
  0x84   :  { %p14240_p7 = pnand %p14239_p6, %p14233_p3 }
  0x86   :  { %14243 = shalt.err (!%p14240_p7)
}
  0x87   :  { %s14270_s7 = smov 768   ;;  %s14271_s6 = smov 48  }
  0x88   :  { %116 = dma.hbm_to_vmem [thread:$0]  %s14674_s8, 1536, %s14418_s26, [#allocation14], %s14270_s7, %s14270_s7, %s14271_s6  }
  0x89   :  { %14244 = dma.done.wait [#allocation3], 4096  }
  0x8a   :  { %14245 = vsyncadd [#allocation3], 4294963200 }
  0x8b   :  { %14246 = dma.done.wait [#allocation5], 73728  }
  0x8c   :  { %14247 = vsyncadd [#allocation5], 4294893568 }
  0x8d   :  { %14248 = dma.done.wait [#allocation8], 18432  }
  0x8e   :  { %14249 = vsyncadd [#allocation8], 4294948864 }
  0x8f   :  { %14250 = dma.done.wait [#allocation11], 69632  }
  0x90   :  { %14251 = vsyncadd [#allocation11], 4294897664 }
  0x91   :  { %14252 = dma.done.wait [#allocation14], 1536  }
  0x92   :  { %14253 = vsyncadd [#allocation14], 4294965760  ;;  %v14272_v0 = vmov 0   ;;  %v11964_v1 = vld [vmem:[#allocation2 + $0x4] ss:$16 sps:$4 sm:$0xff]  }
  0x93   :  { %390 = vmatprep.mubr.bf16.mxu0 %v14272_v0  ;;  %431 = vmatprep.mubr.bf16.mxu1 %v14272_v0  ;;  %v11966_v2 = vld [vmem:[#allocation2] ss:$16 sps:$4 sm:$0xff]   ;;  %v11967_v3 = vld [vmem:[#allocation2 + $0x24] ss:$16 sps:$4 sm:$0xff]   ;;  %v11988_v10 = vld [vmem:[#allocation2 + $0xc] ss:$16 sps:$4 sm:$0xff]  }
  0x94   :  { %358 = vmatprep.subr.bf16.mxu0 %v11964_v1  ;;  %v11969_v4 = vld [vmem:[#allocation2 + $0x20] ss:$16 sps:$4 sm:$0xff]   ;;  %v11970_v5 = vld [vmem:[#allocation2 + $0x44] ss:$16 sps:$4 sm:$0xff]   ;;  %v11990_v11 = vld [vmem:[#allocation2 + $0x8] ss:$16 sps:$4 sm:$0xff]   ;;  %399 = vmatprep.subr.bf16.mxu1 %v11988_v10 }
  0x95   :  { %359 = vmatpush1.bf16.msra.mxu0 %v11966_v2  ;;  %v11972_v6 = vld [vmem:[#allocation2 + $0x40] ss:$16 sps:$4 sm:$0xff]   ;;  %v11973_v7 = vld [vmem:[#allocation2 + $0x64] ss:$16 sps:$4 sm:$0xff]   ;;  %v11991_v12 = vld [vmem:[#allocation2 + $0x2c] ss:$16 sps:$4 sm:$0xff]   ;;  %400 = vmatpush1.bf16.msra.mxu1 %v11990_v11 }
  0x96   :  { %360 = vmatprep.subr.bf16.mxu0 %v11967_v3  ;;  %v11975_v8 = vld [vmem:[#allocation2 + $0x60] ss:$16 sps:$4 sm:$0xff]   ;;  %v11976_v9 = vld [vmem:[#allocation2 + $0x84] ss:$16 sps:$4 sm:$0xff]   ;;  %v11993_v14 = vld [vmem:[#allocation2 + $0x28] ss:$16 sps:$4 sm:$0xff]   ;;  %401 = vmatprep.subr.bf16.mxu1 %v11991_v12 }
  0x97   :  { %v11978_v13 = vld [vmem:[#allocation2 + $0x80] ss:$16 sps:$4 sm:$0xff]   ;;  %v11994_v15 = vld [vmem:[#allocation2 + $0x4c] ss:$16 sps:$4 sm:$0xff]   ;;  %v11979_v16 = vld [vmem:[#allocation2 + $0xa4] ss:$16 sps:$4 sm:$0xff]  }
  0x98   :  { %v11981_v17 = vld [vmem:[#allocation2 + $0xa0] ss:$16 sps:$4 sm:$0xff]   ;;  %v11996_v18 = vld [vmem:[#allocation2 + $0x48] ss:$16 sps:$4 sm:$0xff]   ;;  %v11997_v19 = vld [vmem:[#allocation2 + $0x6c] ss:$16 sps:$4 sm:$0xff]  }
  0x99   :  { %361 = vmatpush1.bf16.msra.mxu0 %v11969_v4  ;;  %402 = vmatpush1.bf16.msra.mxu1 %v11993_v14  ;;  %v11982_v20 = vld [vmem:[#allocation2 + $0xc4] ss:$16 sps:$4 sm:$0xff]   ;;  %v11984_v21 = vld [vmem:[#allocation2 + $0xc0] ss:$16 sps:$4 sm:$0xff]   ;;  %v11999_v22 = vld [vmem:[#allocation2 + $0x68] ss:$16 sps:$4 sm:$0xff]  }
  0x9a   :  { %362 = vmatprep.subr.bf16.mxu0 %v11970_v5  ;;  %403 = vmatprep.subr.bf16.mxu1 %v11994_v15  ;;  %v12000_v23 = vld [vmem:[#allocation2 + $0x8c] ss:$16 sps:$4 sm:$0xff]   ;;  %v11985_v24 = vld [vmem:[#allocation2 + $0xe4] ss:$16 sps:$4 sm:$0xff]   ;;  %v11987_v25 = vld [vmem:[#allocation2 + $0xe0] ss:$16 sps:$4 sm:$0xff]  }
  0x9b   :  { %v142_v26 = vld [vmem:[%s14666_s0] sm:$0xff]  ;;  %v12002_v27 = vld [vmem:[#allocation2 + $0x88] ss:$16 sps:$4 sm:$0xff]   ;;  %v12003_v28 = vld [vmem:[#allocation2 + $0xac] ss:$16 sps:$4 sm:$0xff]  }
  0x9c   :  { %v12014_v29 = vld [vmem:[#allocation4 + $0x4] ss:$16 sps:$4 sm:$0xff]   ;;  %v175_v30 = vpack.c.bf16 %v142_v26, %v142_v26  ;;  %v12005_v31 = vld [vmem:[#allocation2 + $0xa8] ss:$16 sps:$4 sm:$0xff]   ;;  %v12006_v32 = vld [vmem:[#allocation2 + $0xcc] ss:$16 sps:$4 sm:$0xff]  }
  0x9d   :  { %363 = vmatpush1.bf16.msra.mxu0 %v11972_v6  ;;  %404 = vmatpush1.bf16.msra.mxu1 %v11996_v18  ;;  %v12012_v33 = vld [vmem:[#allocation4] ss:$16 sps:$4 sm:$0xff]   ;;  %v12020_v34 = vld [vmem:[#allocation4 + $0x24] ss:$16 sps:$4 sm:$0xff]   ;;  %v12008_v35 = vld [vmem:[#allocation2 + $0xc8] ss:$16 sps:$4 sm:$0xff]  }
  0x9e   :  { %364 = vmatprep.subr.bf16.mxu0 %v11973_v7  ;;  %405 = vmatprep.subr.bf16.mxu1 %v11997_v19  ;;  %v12009_v36 = vld [vmem:[#allocation2 + $0xec] ss:$16 sps:$4 sm:$0xff]   ;;  %v12018_v37 = vld [vmem:[#allocation4 + $0x20] ss:$16 sps:$4 sm:$0xff]   ;;  %v12026_v38 = vld [vmem:[#allocation4 + $0x44] ss:$16 sps:$4 sm:$0xff]  }
  0x9f   :  { %v12011_v39 = vld [vmem:[#allocation2 + $0xe8] ss:$16 sps:$4 sm:$0xff]   ;;  %v12017_v40 = vld [vmem:[#allocation4 + $0xc] ss:$16 sps:$4 sm:$0xff]   ;;  %v12024_v41 = vld [vmem:[#allocation4 + $0x40] ss:$16 sps:$4 sm:$0xff]  }
  0xa0   :  { %v12032_v42 = vld [vmem:[#allocation4 + $0x64] ss:$16 sps:$4 sm:$0xff]   ;;  %v12015_v43 = vld [vmem:[#allocation4 + $0x8] ss:$16 sps:$4 sm:$0xff]   ;;  %v12023_v44 = vld [vmem:[#allocation4 + $0x2c] ss:$16 sps:$4 sm:$0xff]  }
  0xa1   :  { %365 = vmatpush1.bf16.msra.mxu0 %v11975_v8  ;;  %406 = vmatpush1.bf16.msra.mxu1 %v11999_v22  ;;  %v12030_v45 = vld [vmem:[#allocation4 + $0x60] ss:$16 sps:$4 sm:$0xff]   ;;  %v12038_v46 = vld [vmem:[#allocation4 + $0x84] ss:$16 sps:$4 sm:$0xff]   ;;  %v12021_v47 = vld [vmem:[#allocation4 + $0x28] ss:$16 sps:$4 sm:$0xff]  }
  0xa2   :  { %366 = vmatprep.subr.bf16.mxu0 %v11976_v9  ;;  %407 = vmatprep.subr.bf16.mxu1 %v12000_v23  ;;  %v12029_v48 = vld [vmem:[#allocation4 + $0x4c] ss:$16 sps:$4 sm:$0xff]   ;;  %v12036_v49 = vld [vmem:[#allocation4 + $0x80] ss:$16 sps:$4 sm:$0xff]   ;;  %v12044_v50 = vld [vmem:[#allocation4 + $0xa4] ss:$16 sps:$4 sm:$0xff]  }
  0xa3   :  { %v12027_v51 = vld [vmem:[#allocation4 + $0x48] ss:$16 sps:$4 sm:$0xff]   ;;  %v12035_v52 = vld [vmem:[#allocation4 + $0x6c] ss:$16 sps:$4 sm:$0xff]   ;;  %v12042_v53 = vld [vmem:[#allocation4 + $0xa0] ss:$16 sps:$4 sm:$0xff]  }
  0xa4   :  { %v12050_v54 = vld [vmem:[#allocation4 + $0xc4] ss:$16 sps:$4 sm:$0xff]   ;;  %v12033_v55 = vld [vmem:[#allocation4 + $0x68] ss:$16 sps:$4 sm:$0xff]   ;;  %v12041_v56 = vld [vmem:[#allocation4 + $0x8c] ss:$16 sps:$4 sm:$0xff]  }
  0xa5   :  { %367 = vmatpush1.bf16.msra.mxu0 %v11978_v13  ;;  %408 = vmatpush1.bf16.msra.mxu1 %v12002_v27  ;;  %v12048_v57 = vld [vmem:[#allocation4 + $0xc0] ss:$16 sps:$4 sm:$0xff]   ;;  %v12056_v58 = vld [vmem:[#allocation4 + $0xe4] ss:$16 sps:$4 sm:$0xff]   ;;  %v12039_v59 = vld [vmem:[#allocation4 + $0x88] ss:$16 sps:$4 sm:$0xff]  }
  0xa6   :  { %368 = vmatprep.subr.bf16.mxu0 %v11979_v16  ;;  %409 = vmatprep.subr.bf16.mxu1 %v12003_v28  ;;  %v12047_v60 = vld [vmem:[#allocation4 + $0xac] ss:$16 sps:$4 sm:$0xff]   ;;  %v12054_v61 = vld [vmem:[#allocation4 + $0xe0] ss:$16 sps:$4 sm:$0xff]   ;;  %v12045_v62 = vld [vmem:[#allocation4 + $0xa8] ss:$16 sps:$4 sm:$0xff]  }
  0xa7   :  { %v12053_v63 = vld [vmem:[#allocation4 + $0xcc] ss:$16 sps:$4 sm:$0xff]   ;;  %v12051_v0 = vld [vmem:[#allocation4 + $0xc8] ss:$16 sps:$4 sm:$0xff]   ;;  %v12062_v3 = vld [vmem:[#allocation4 + $0x104] ss:$16 sps:$4 sm:$0xff]  }
  0xa8   :  { %v12059_v1 = vld [vmem:[#allocation4 + $0xec] ss:$16 sps:$4 sm:$0xff]   ;;  %v12057_v2 = vld [vmem:[#allocation4 + $0xe8] ss:$16 sps:$4 sm:$0xff]   ;;  %v12060_v5 = vld [vmem:[#allocation4 + $0x100] ss:$16 sps:$4 sm:$0xff]  }
  0xa9   :  { %369 = vmatpush1.bf16.msra.mxu0 %v11981_v17  ;;  %410 = vmatpush1.bf16.msra.mxu1 %v12005_v31  ;;  %v12065_v4 = vld [vmem:[#allocation4 + $0x10c] ss:$16 sps:$4 sm:$0xff]   ;;  %v12063_v6 = vld [vmem:[#allocation4 + $0x108] ss:$16 sps:$4 sm:$0xff]   ;;  %v12068_v7 = vld [vmem:[#allocation4 + $0x124] ss:$16 sps:$4 sm:$0xff]  }
  0xaa   :  { %370 = vmatprep.subr.bf16.mxu0 %v11982_v20  ;;  %411 = vmatprep.subr.bf16.mxu1 %v12006_v32  ;;  %v12071_v8 = vld [vmem:[#allocation4 + $0x12c] ss:$16 sps:$4 sm:$0xff]   ;;  %v12066_v9 = vld [vmem:[#allocation4 + $0x120] ss:$16 sps:$4 sm:$0xff]   ;;  %v12069_v10 = vld [vmem:[#allocation4 + $0x128] ss:$16 sps:$4 sm:$0xff]  }
  0xab   :  { %v12074_v11 = vld [vmem:[#allocation4 + $0x144] ss:$16 sps:$4 sm:$0xff]   ;;  %v12077_v12 = vld [vmem:[#allocation4 + $0x14c] ss:$16 sps:$4 sm:$0xff]   ;;  %v12072_v13 = vld [vmem:[#allocation4 + $0x140] ss:$16 sps:$4 sm:$0xff]  }
  0xac   :  { %v12075_v14 = vld [vmem:[#allocation4 + $0x148] ss:$16 sps:$4 sm:$0xff]   ;;  %v12080_v15 = vld [vmem:[#allocation4 + $0x164] ss:$16 sps:$4 sm:$0xff]   ;;  %v12083_v16 = vld [vmem:[#allocation4 + $0x16c] ss:$16 sps:$4 sm:$0xff]  }
  0xad   :  { %371 = vmatpush1.bf16.msra.mxu0 %v11984_v21  ;;  %412 = vmatpush1.bf16.msra.mxu1 %v12008_v35  ;;  %v12078_v17 = vld [vmem:[#allocation4 + $0x160] ss:$16 sps:$4 sm:$0xff]   ;;  %v12081_v18 = vld [vmem:[#allocation4 + $0x168] ss:$16 sps:$4 sm:$0xff]   ;;  %v12086_v19 = vld [vmem:[#allocation4 + $0x184] ss:$16 sps:$4 sm:$0xff]  }
  0xae   :  { %372 = vmatprep.subr.bf16.mxu0 %v11985_v24  ;;  %413 = vmatprep.subr.bf16.mxu1 %v12009_v36  ;;  %v12089_v20 = vld [vmem:[#allocation4 + $0x18c] ss:$16 sps:$4 sm:$0xff]   ;;  %v12084_v21 = vld [vmem:[#allocation4 + $0x180] ss:$16 sps:$4 sm:$0xff]   ;;  %v12087_v22 = vld [vmem:[#allocation4 + $0x188] ss:$16 sps:$4 sm:$0xff]  }
  0xaf   :  { %v12092_v23 = vld [vmem:[#allocation4 + $0x1a4] ss:$16 sps:$4 sm:$0xff]   ;;  %v12095_v24 = vld [vmem:[#allocation4 + $0x1ac] ss:$16 sps:$4 sm:$0xff]   ;;  %v12093_v26 = vld [vmem:[#allocation4 + $0x1a8] ss:$16 sps:$4 sm:$0xff]  }
  0xb0   :  { %v12098_v27 = vld [vmem:[#allocation4 + $0x1c4] ss:$16 sps:$4 sm:$0xff]   ;;  %v12101_v28 = vld [vmem:[#allocation4 + $0x1cc] ss:$16 sps:$4 sm:$0xff]  }
  0xb1   :  { %373 = vmatpush1.bf16.msra.mxu0 %v11987_v25  ;;  %414 = vmatpush1.bf16.msra.mxu1 %v12011_v39  ;;  %v12090_v25 = vld [vmem:[#allocation4 + $0x1a0] ss:$16 sps:$4 sm:$0xff]   ;;  %v12104_v31 = vld [vmem:[#allocation4 + $0x1e4] ss:$16 sps:$4 sm:$0xff]   ;;  %v12107_v32 = vld [vmem:[#allocation4 + $0x1ec] ss:$16 sps:$4 sm:$0xff]  }
  0xb2   :  { %1263 = vmatprep.subr.bf16.mxu0 %v12014_v29  ;;  %1345 = vmatprep.subr.bf16.mxu1 %v12017_v40  ;;  %v12096_v29 = vld [vmem:[#allocation4 + $0x1c0] ss:$16 sps:$4 sm:$0xff]   ;;  %v12110_v35 = vld [vmem:[#allocation4 + $0x204] ss:$16 sps:$4 sm:$0xff]   ;;  %v12113_v36 = vld [vmem:[#allocation4 + $0x20c] ss:$16 sps:$4 sm:$0xff]  }
  0xb3   :  { %v14454_v39 = vld [vmem:[#allocation13] ss:$8 sm:$0xf] }
  0xb4   :  { %391 = vmatmul.mubr.bf16.vlgmr.msra.gmra.mrb[0].mxu0 %v175_v30  ;;  %432 = vmatmul.mubr.bf16.vlgmr.msra.gmra.mrb[0].mxu1 %v175_v30  ;;  %v12099_v30 = vld [vmem:[#allocation4 + $0x1c8] ss:$16 sps:$4 sm:$0xff]  }
  0xb5   :  { %1264 = vmatpush1.bf16.msra.mxu0 %v12012_v33  ;;  %1346 = vmatpush1.bf16.msra.mxu1 %v12015_v43  ;;  %v12102_v33 = vld [vmem:[#allocation4 + $0x1e0] ss:$16 sps:$4 sm:$0xff]  }
  0xb6   :  { %1265 = vmatprep.subr.bf16.mxu0 %v12020_v34  ;;  %1347 = vmatprep.subr.bf16.mxu1 %v12023_v44  ;;  %v12105_v34 = vld [vmem:[#allocation4 + $0x1e8] ss:$16 sps:$4 sm:$0xff]  }
  0xb9   :  { %1266 = vmatpush1.bf16.msra.mxu0 %v12018_v37  ;;  %1348 = vmatpush1.bf16.msra.mxu1 %v12021_v47  ;;  %v178_v37 = vlaneseq }
  0xba   :  { %1267 = vmatprep.subr.bf16.mxu0 %v12026_v38  ;;  %1349 = vmatprep.subr.bf16.mxu1 %v12029_v48 }
  0xbb   :  { %v14452_v38 = vshrl.u32 %v178_v37, 7  ;;  %v12144_v37 = vld [vmem:[#allocation4 + $0x2c0] ss:$16 sps:$4 sm:$0xff]  }
  0xbd   :  { %1268 = vmatpush1.bf16.msra.mxu0 %v12024_v41  ;;  %1350 = vmatpush1.bf16.msra.mxu1 %v12027_v51  ;;  %v14457_v40 = vsub.s32 0, %v14452_v38  ;;  %v14460_v41 = vsub.s32 1, %v14452_v38 }
  0xbe   :  { %1269 = vmatprep.subr.bf16.mxu0 %v12032_v42  ;;  %1351 = vmatprep.subr.bf16.mxu1 %v12035_v52  ;;  %v14467_v52 = vsub.s32 3, %v14452_v38 }
  0xbf   :  { %v181_v42 = vrot.slane %v14454_v39, %v14457_v40  ;;  %v185_v43 = vrot.slane %v14454_v39, %v14460_v41 }
  0xc1   :  { %1270 = vmatpush1.bf16.msra.mxu0 %v12030_v45  ;;  %1352 = vmatpush1.bf16.msra.mxu1 %v12033_v55 }
  0xc2   :  { %1271 = vmatprep.subr.bf16.mxu0 %v12038_v46  ;;  %1353 = vmatprep.subr.bf16.mxu1 %v12041_v56 }
  0xc5   :  { %1272 = vmatpush1.bf16.msra.mxu0 %v12036_v49  ;;  %1354 = vmatpush1.bf16.msra.mxu1 %v12039_v59 }
  0xc6   :  { %1273 = vmatprep.subr.bf16.mxu0 %v12044_v50  ;;  %1355 = vmatprep.subr.bf16.mxu1 %v12047_v60 }
  0xc9   :  { %1274 = vmatpush1.bf16.msra.mxu0 %v12042_v53  ;;  %1356 = vmatpush1.bf16.msra.mxu1 %v12045_v62  ;;  %v193_v53 = vrot.slane %v14454_v39, %v14467_v52 }
  0xca   :  { %1275 = vmatprep.subr.bf16.mxu0 %v12050_v54  ;;  %1357 = vmatprep.subr.bf16.mxu1 %v12053_v63 }
  0xcd   :  { %1276 = vmatpush1.bf16.msra.mxu0 %v12048_v57  ;;  %1358 = vmatpush1.bf16.msra.mxu1 %v12051_v0 }
  0xce   :  { %1277 = vmatprep.subr.bf16.mxu0 %v12056_v58  ;;  %1359 = vmatprep.subr.bf16.mxu1 %v12059_v1 }
  0xd1   :  { %1278 = vmatpush1.bf16.msra.mxu0 %v12054_v61  ;;  %1360 = vmatpush1.bf16.msra.mxu1 %v12057_v2 }
  0xd2   :  { %1279 = vmatprep.subr.bf16.mxu0 %v12062_v3  ;;  %1361 = vmatprep.subr.bf16.mxu1 %v12065_v4 }
  0xd5   :  { %1280 = vmatpush1.bf16.msra.mxu0 %v12060_v5  ;;  %1362 = vmatpush1.bf16.msra.mxu1 %v12063_v6  ;;  %v12108_v6 = vld [vmem:[#allocation4 + $0x200] ss:$16 sps:$4 sm:$0xff]  }
  0xd6   :  { %1281 = vmatprep.subr.bf16.mxu0 %v12068_v7  ;;  %1363 = vmatprep.subr.bf16.mxu1 %v12071_v8  ;;  %v12111_v7 = vld [vmem:[#allocation4 + $0x208] ss:$16 sps:$4 sm:$0xff]   ;;  %v12116_v8 = vld [vmem:[#allocation4 + $0x224] ss:$16 sps:$4 sm:$0xff]  }
  0xd9   :  { %1282 = vmatpush1.bf16.msra.mxu0 %v12066_v9  ;;  %1364 = vmatpush1.bf16.msra.mxu1 %v12069_v10  ;;  %v12119_v9 = vld [vmem:[#allocation4 + $0x22c] ss:$16 sps:$4 sm:$0xff]  }
  0xda   :  { %1283 = vmatprep.subr.bf16.mxu0 %v12074_v11  ;;  %1365 = vmatprep.subr.bf16.mxu1 %v12077_v12  ;;  %v12114_v12 = vld [vmem:[#allocation4 + $0x220] ss:$16 sps:$4 sm:$0xff]  }
  0xdd   :  { %1284 = vmatpush1.bf16.msra.mxu0 %v12072_v13  ;;  %1366 = vmatpush1.bf16.msra.mxu1 %v12075_v14  ;;  %v12117_v13 = vld [vmem:[#allocation4 + $0x228] ss:$16 sps:$4 sm:$0xff]   ;;  %v12122_v14 = vld [vmem:[#allocation4 + $0x244] ss:$16 sps:$4 sm:$0xff]  }
  0xde   :  { %1285 = vmatprep.subr.bf16.mxu0 %v12080_v15  ;;  %1367 = vmatprep.subr.bf16.mxu1 %v12083_v16  ;;  %v12125_v15 = vld [vmem:[#allocation4 + $0x24c] ss:$16 sps:$4 sm:$0xff]   ;;  %v12120_v16 = vld [vmem:[#allocation4 + $0x240] ss:$16 sps:$4 sm:$0xff]  }
  0xe1   :  { %1286 = vmatpush1.bf16.msra.mxu0 %v12078_v17  ;;  %1368 = vmatpush1.bf16.msra.mxu1 %v12081_v18  ;;  %v12123_v17 = vld [vmem:[#allocation4 + $0x248] ss:$16 sps:$4 sm:$0xff]   ;;  %v12128_v18 = vld [vmem:[#allocation4 + $0x264] ss:$16 sps:$4 sm:$0xff]  }
  0xe2   :  { %1287 = vmatprep.subr.bf16.mxu0 %v12086_v19  ;;  %1369 = vmatprep.subr.bf16.mxu1 %v12089_v20  ;;  %v12131_v19 = vld [vmem:[#allocation4 + $0x26c] ss:$16 sps:$4 sm:$0xff]  }
  0xe5   :  { %1288 = vmatpush1.bf16.msra.mxu0 %v12084_v21  ;;  %1370 = vmatpush1.bf16.msra.mxu1 %v12087_v22  ;;  %v12126_v22 = vld [vmem:[#allocation4 + $0x260] ss:$16 sps:$4 sm:$0xff]  }
  0xe6   :  { %1289 = vmatprep.subr.bf16.mxu0 %v12092_v23  ;;  %1371 = vmatprep.subr.bf16.mxu1 %v12095_v24  ;;  %v12129_v23 = vld [vmem:[#allocation4 + $0x268] ss:$16 sps:$4 sm:$0xff]  }
  0xe9   :  { %1290 = vmatpush1.bf16.msra.mxu0 %v12090_v25  ;;  %1372 = vmatpush1.bf16.msra.mxu1 %v12093_v26  ;;  %v12134_v25 = vld [vmem:[#allocation4 + $0x284] ss:$16 sps:$4 sm:$0xff]   ;;  %v12137_v26 = vld [vmem:[#allocation4 + $0x28c] ss:$16 sps:$4 sm:$0xff]  }
  0xea   :  { %1291 = vmatprep.subr.bf16.mxu0 %v12098_v27  ;;  %1373 = vmatprep.subr.bf16.mxu1 %v12101_v28  ;;  %v12132_v27 = vld [vmem:[#allocation4 + $0x280] ss:$16 sps:$4 sm:$0xff]   ;;  %v12135_v28 = vld [vmem:[#allocation4 + $0x288] ss:$16 sps:$4 sm:$0xff]  }
  0xed   :  { %1292 = vmatpush1.bf16.msra.mxu0 %v12096_v29  ;;  %1374 = vmatpush1.bf16.msra.mxu1 %v12099_v30  ;;  %v14474_v29 = vsub.s32 2, %v14452_v38  ;;  %v12140_v30 = vld [vmem:[#allocation4 + $0x2a4] ss:$16 sps:$4 sm:$0xff]  }
  0xee   :  { %1293 = vmatprep.subr.bf16.mxu0 %v12104_v31  ;;  %1375 = vmatprep.subr.bf16.mxu1 %v12107_v32  ;;  %v12143_v31 = vld [vmem:[#allocation4 + $0x2ac] ss:$16 sps:$4 sm:$0xff]   ;;  %v12138_v32 = vld [vmem:[#allocation4 + $0x2a0] ss:$16 sps:$4 sm:$0xff]  }
  0xf1   :  { %1294 = vmatpush1.bf16.msra.mxu0 %v12102_v33  ;;  %1376 = vmatpush1.bf16.msra.mxu1 %v12105_v34  ;;  %v12141_v33 = vld [vmem:[#allocation4 + $0x2a8] ss:$16 sps:$4 sm:$0xff]   ;;  %v189_v34 = vrot.slane %v14454_v39, %v14474_v29 }
  0xf2   :  { %1304 = vmatprep.subr.bf16.mxu0 %v12110_v35  ;;  %1386 = vmatprep.subr.bf16.mxu1 %v12113_v36  ;;  %v12146_v35 = vld [vmem:[#allocation4 + $0x2c4] ss:$16 sps:$4 sm:$0xff]   ;;  %v12149_v36 = vld [vmem:[#allocation4 + $0x2cc] ss:$16 sps:$4 sm:$0xff]  }
 0x187   :  { %v392_v44 = vpop.f32.mrb[0].mxu0  ;;  %v14471_v54 = vpop.f32.mrb[0].mxu1 }
 0x188   :  { %v393_v45 = vadd.f32 %v392_v44, %v181_v42  ;;  %v394_v46 = vpop.f32.mrb[1].mxu0  ;;  %v435_v55 = vpop.f32.mrb[1].mxu1  ;;  %v12147_v42 = vld [vmem:[#allocation4 + $0x2c8] ss:$16 sps:$4 sm:$0xff]   ;;  %v12152_v44 = vld [vmem:[#allocation4 + $0x2e4] ss:$16 sps:$4 sm:$0xff]  }
 0x189   :  { %v395_v47 = vadd.f32 %v394_v46, %v185_v43  ;;  %v396_v48 = vpop.f32.mrb[2].mxu0  ;;  %v436_v56 = vadd.f32 %v435_v55, %v193_v53  ;;  %v437_v57 = vpop.f32.mrb[2].mxu1  ;;  %v14479_v43 = vadd.f32 %v14471_v54, %v189_v34  ;;  %v12150_v46 = vld [vmem:[#allocation4 + $0x2e0] ss:$16 sps:$4 sm:$0xff]   ;;  %v12164_v53 = vld [vmem:[#allocation4 + $0x324] ss:$16 sps:$4 sm:$0xff]  }
 0x18a   :  { %v10467_v49 = vmul.f32 -1.442695, %v393_v45  ;;  %v397_v50 = vpop.f32.mrb[3].mxu0  ;;  %v438_v58 = vpop.f32.mrb[3].mxu1  ;;  %v12158_v48 = vld [vmem:[#allocation4 + $0x304] ss:$16 sps:$4 sm:$0xff]  }
 0x18b   :  { %v10468_v51 = vmul.f32 -1.442695, %v395_v47  ;;  %v10470_v60 = vmul.f32 -1.442695, %v436_v56  ;;  %v10469_v39 = vmul.f32 -1.442695, %v14479_v43 }
 0x18c   :  { %13884 = vpow2.f32 %v10467_v49  ;;  %v12161_v49 = vld [vmem:[#allocation4 + $0x30c] ss:$16 sps:$4 sm:$0xff]   ;;  %v12156_v50 = vld [vmem:[#allocation4 + $0x300] ss:$16 sps:$4 sm:$0xff]   ;;  %v12170_v57 = vld [vmem:[#allocation4 + $0x344] ss:$16 sps:$4 sm:$0xff]  }
 0x18d   :  { %13886 = vpow2.f32 %v10468_v51  ;;  %v12159_v51 = vld [vmem:[#allocation4 + $0x308] ss:$16 sps:$4 sm:$0xff]   ;;  %v12167_v54 = vld [vmem:[#allocation4 + $0x32c] ss:$16 sps:$4 sm:$0xff]   ;;  %v12162_v55 = vld [vmem:[#allocation4 + $0x320] ss:$16 sps:$4 sm:$0xff]  }
 0x18e   :  { %13888 = vpow2.f32 %v10470_v60  ;;  %v12173_v58 = vld [vmem:[#allocation4 + $0x34c] ss:$16 sps:$4 sm:$0xff]   ;;  %v12171_v60 = vld [vmem:[#allocation4 + $0x348] ss:$16 sps:$4 sm:$0xff]  }
 0x18f   :  { %v12219_v34 = vld [vmem:[#allocation4 + $0x448] ss:$16 sps:$4 sm:$0xff]  }
 0x196   :  { %v13885_v59 = vpop.eup %13884 }
 0x197   :  { %v13887_v61 = vpop.eup %13886  ;;  %v452_v62 = vadd.f32 1.0, %v13885_v59  ;;  %v12168_v59 = vld [vmem:[#allocation4 + $0x340] ss:$16 sps:$4 sm:$0xff]  }
 0x198   :  { %v453_v63 = vadd.f32 1.0, %v13887_v61  ;;  %v13889_v0 = vpop.eup %13888  ;;  %v12176_v61 = vld [vmem:[#allocation4 + $0x364] ss:$16 sps:$4 sm:$0xff]  }
 0x199   :  { %13890 = vrcp.f32 %v452_v62  ;;  %v455_v2 = vadd.f32 1.0, %v13889_v0  ;;  %v12179_v62 = vld [vmem:[#allocation4 + $0x36c] ss:$16 sps:$4 sm:$0xff]   ;;  %v12174_v0 = vld [vmem:[#allocation4 + $0x360] ss:$16 sps:$4 sm:$0xff]  }
 0x19a   :  { %13892 = vrcp.f32 %v453_v63 }
 0x19b   :  { %13894 = vrcp.f32 %v455_v2  ;;  %v12182_v2 = vld [vmem:[#allocation4 + $0x384] ss:$16 sps:$4 sm:$0xff]  }
 0x19c   :  { %13896 = vpow2.f32 %v10469_v39  ;;  %v12239_v39 = vld [vmem:[#allocation4 + $0x4ac] ss:$16 sps:$4 sm:$0xff]  }
 0x1a3   :  { %v13891_v1 = vpop.eup %13890 }
 0x1a4   :  { %v13893_v3 = vpop.eup %13892  ;;  %v464_v4 = vmul.f32 %v13891_v1, %v393_v45  ;;  %v12155_v45 = vld [vmem:[#allocation4 + $0x2ec] ss:$16 sps:$4 sm:$0xff]   ;;  %v12177_v1 = vld [vmem:[#allocation4 + $0x368] ss:$16 sps:$4 sm:$0xff]  }
 0x1a5   :  { %v465_v5 = vmul.f32 %v13893_v3, %v395_v47  ;;  %v13895_v20 = vpop.eup %13894  ;;  %v12153_v47 = vld [vmem:[#allocation4 + $0x2e8] ss:$16 sps:$4 sm:$0xff]   ;;  %v12185_v3 = vld [vmem:[#allocation4 + $0x38c] ss:$16 sps:$4 sm:$0xff]  }
 0x1a6   :  { %v596_v11 = vpack.c.bf16 %v464_v4, %v464_v4  ;;  %v467_v21 = vmul.f32 %v13895_v20, %v436_v56  ;;  %v12165_v56 = vld [vmem:[#allocation4 + $0x328] ss:$16 sps:$4 sm:$0xff]   ;;  %v13897_v63 = vpop.eup %13896  ;;  %v12206_v20 = vld [vmem:[#allocation4 + $0x404] ss:$16 sps:$4 sm:$0xff]  }
 0x1a7   :  { %v597_v10 = vpack.c.bf16 %v465_v5, %v465_v5  ;;  %v454_v4 = vadd.f32 1.0, %v13897_v63  ;;  %v12180_v5 = vld [vmem:[#allocation4 + $0x380] ss:$16 sps:$4 sm:$0xff]   ;;  %v12260_v63 = vld [vmem:[#allocation4 + $0x524] ss:$16 sps:$4 sm:$0xff]  }
 0x1a8   :  { %v599_v24 = vpack.c.bf16 %v467_v21, %v467_v21  ;;  %v12209_v21 = vld [vmem:[#allocation4 + $0x40c] ss:$16 sps:$4 sm:$0xff]  }
 0x1a9   :  { %1295 = vmatprep.mubr.bf16.mxu0 %v597_v10  ;;  %1377 = vmatprep.mubr.bf16.mxu1 %v597_v10  ;;  %13898 = vrcp.f32 %v454_v4  ;;  %v12189_v10 = vld [vmem:[#allocation4 + $0x3a8] ss:$16 sps:$4 sm:$0xff]   ;;  %v12269_v4 = vld [vmem:[#allocation4 + $0x54c] ss:$16 sps:$4 sm:$0xff]  }
 0x1aa   :  { %1296 = vmatmul.mubr.bf16.vlgmr.msra.gmra.mrb[4].mxu0 %v596_v11  ;;  %1378 = vmatmul.mubr.bf16.vlgmr.msra.gmra.mrb[4].mxu1 %v596_v11  ;;  %v12194_v11 = vld [vmem:[#allocation4 + $0x3c4] ss:$16 sps:$4 sm:$0xff]  }
 0x1ab   :  { %1305 = vmatpush1.bf16.msra.mxu0 %v12108_v6  ;;  %1387 = vmatpush1.bf16.msra.mxu1 %v12111_v7  ;;  %v12183_v6 = vld [vmem:[#allocation4 + $0x388] ss:$16 sps:$4 sm:$0xff]   ;;  %v12188_v7 = vld [vmem:[#allocation4 + $0x3a4] ss:$16 sps:$4 sm:$0xff]  }
 0x1ac   :  { %1306 = vmatprep.subr.bf16.mxu0 %v12116_v8  ;;  %1388 = vmatprep.subr.bf16.mxu1 %v12119_v9  ;;  %v12191_v8 = vld [vmem:[#allocation4 + $0x3ac] ss:$16 sps:$4 sm:$0xff]   ;;  %v12186_v9 = vld [vmem:[#allocation4 + $0x3a0] ss:$16 sps:$4 sm:$0xff]  }
 0x1ad   :  { %1336 = vmatprep.mubr.bf16.mxu0 %v599_v24  ;;  %1418 = vmatprep.mubr.bf16.mxu1 %v599_v24  ;;  %v12207_v24 = vld [vmem:[#allocation4 + $0x408] ss:$16 sps:$4 sm:$0xff]  }
 0x1af   :  { %1307 = vmatpush1.bf16.msra.mxu0 %v12114_v12  ;;  %1389 = vmatpush1.bf16.msra.mxu1 %v12117_v13  ;;  %v12197_v12 = vld [vmem:[#allocation4 + $0x3cc] ss:$16 sps:$4 sm:$0xff]   ;;  %v12192_v13 = vld [vmem:[#allocation4 + $0x3c0] ss:$16 sps:$4 sm:$0xff]  }
 0x1b0   :  { %1308 = vmatprep.subr.bf16.mxu0 %v12122_v14  ;;  %1390 = vmatprep.subr.bf16.mxu1 %v12125_v15  ;;  %v12195_v14 = vld [vmem:[#allocation4 + $0x3c8] ss:$16 sps:$4 sm:$0xff]   ;;  %v12200_v15 = vld [vmem:[#allocation4 + $0x3e4] ss:$16 sps:$4 sm:$0xff]  }
 0x1b3   :  { %1309 = vmatpush1.bf16.msra.mxu0 %v12120_v16  ;;  %1391 = vmatpush1.bf16.msra.mxu1 %v12123_v17  ;;  %v12203_v16 = vld [vmem:[#allocation4 + $0x3ec] ss:$16 sps:$4 sm:$0xff]   ;;  %v13899_v17 = vpop.eup %13898 }
 0x1b4   :  { %1310 = vmatprep.subr.bf16.mxu0 %v12128_v18  ;;  %1392 = vmatprep.subr.bf16.mxu1 %v12131_v19  ;;  %v12198_v18 = vld [vmem:[#allocation4 + $0x3e0] ss:$16 sps:$4 sm:$0xff]   ;;  %v12201_v19 = vld [vmem:[#allocation4 + $0x3e8] ss:$16 sps:$4 sm:$0xff]  }
 0x1b7   :  { %1311 = vmatpush1.bf16.msra.mxu0 %v12126_v22  ;;  %1393 = vmatpush1.bf16.msra.mxu1 %v12129_v23  ;;  %v466_v22 = vmul.f32 %v13899_v17, %v14479_v43  ;;  %v12204_v23 = vld [vmem:[#allocation4 + $0x400] ss:$16 sps:$4 sm:$0xff]   ;;  %v12230_v43 = vld [vmem:[#allocation4 + $0x484] ss:$16 sps:$4 sm:$0xff]  }
 0x1b8   :  { %1312 = vmatprep.subr.bf16.mxu0 %v12134_v25  ;;  %1394 = vmatprep.subr.bf16.mxu1 %v12137_v26  ;;  %v12212_v25 = vld [vmem:[#allocation4 + $0x424] ss:$16 sps:$4 sm:$0xff]   ;;  %v12215_v26 = vld [vmem:[#allocation4 + $0x42c] ss:$16 sps:$4 sm:$0xff]   ;;  %v12282_v17 = vld [vmem:[#allocation4 + $0x5a0] ss:$16 sps:$4 sm:$0xff]  }
 0x1bb   :  { %1313 = vmatpush1.bf16.msra.mxu0 %v12132_v27  ;;  %1395 = vmatpush1.bf16.msra.mxu1 %v12135_v28  ;;  %v598_v27 = vpack.c.bf16 %v466_v22, %v466_v22  ;;  %v12210_v28 = vld [vmem:[#allocation4 + $0x420] ss:$16 sps:$4 sm:$0xff]   ;;  %v12291_v22 = vld [vmem:[#allocation4 + $0x5c8] ss:$16 sps:$4 sm:$0xff]  }
 0x1bc   :  { %1314 = vmatprep.subr.bf16.mxu0 %v12140_v30  ;;  %1396 = vmatprep.subr.bf16.mxu1 %v12143_v31  ;;  %v12213_v30 = vld [vmem:[#allocation4 + $0x428] ss:$16 sps:$4 sm:$0xff]   ;;  %v12218_v31 = vld [vmem:[#allocation4 + $0x444] ss:$16 sps:$4 sm:$0xff]  }
 0x1bf   :  { %1315 = vmatpush1.bf16.msra.mxu0 %v12138_v32  ;;  %1397 = vmatpush1.bf16.msra.mxu1 %v12141_v33  ;;  %v12221_v32 = vld [vmem:[#allocation4 + $0x44c] ss:$16 sps:$4 sm:$0xff]   ;;  %v12216_v33 = vld [vmem:[#allocation4 + $0x440] ss:$16 sps:$4 sm:$0xff]  }
 0x1c0   :  { %1316 = vmatprep.subr.bf16.mxu0 %v12146_v35  ;;  %1398 = vmatprep.subr.bf16.mxu1 %v12149_v36  ;;  %v12224_v35 = vld [vmem:[#allocation4 + $0x464] ss:$16 sps:$4 sm:$0xff]   ;;  %v12227_v36 = vld [vmem:[#allocation4 + $0x46c] ss:$16 sps:$4 sm:$0xff]  }
 0x1c3   :  { %1317 = vmatpush1.bf16.msra.mxu0 %v12144_v37  ;;  %1399 = vmatpush1.bf16.msra.mxu1 %v12147_v42  ;;  %v12222_v37 = vld [vmem:[#allocation4 + $0x460] ss:$16 sps:$4 sm:$0xff]   ;;  %v12225_v42 = vld [vmem:[#allocation4 + $0x468] ss:$16 sps:$4 sm:$0xff]  }
 0x1c4   :  { %1318 = vmatprep.subr.bf16.mxu0 %v12152_v44  ;;  %1400 = vmatprep.subr.bf16.mxu1 %v12155_v45  ;;  %v12233_v44 = vld [vmem:[#allocation4 + $0x48c] ss:$16 sps:$4 sm:$0xff]   ;;  %v12228_v45 = vld [vmem:[#allocation4 + $0x480] ss:$16 sps:$4 sm:$0xff]  }
 0x1c7   :  { %1319 = vmatpush1.bf16.msra.mxu0 %v12150_v46  ;;  %1401 = vmatpush1.bf16.msra.mxu1 %v12153_v47  ;;  %v12231_v46 = vld [vmem:[#allocation4 + $0x488] ss:$16 sps:$4 sm:$0xff]   ;;  %v12236_v47 = vld [vmem:[#allocation4 + $0x4a4] ss:$16 sps:$4 sm:$0xff]  }
 0x1c8   :  { %1320 = vmatprep.subr.bf16.mxu0 %v12158_v48  ;;  %1402 = vmatprep.subr.bf16.mxu1 %v12161_v49  ;;  %v12234_v48 = vld [vmem:[#allocation4 + $0x4a0] ss:$16 sps:$4 sm:$0xff]   ;;  %v12237_v49 = vld [vmem:[#allocation4 + $0x4a8] ss:$16 sps:$4 sm:$0xff]  }
 0x1cb   :  { %1321 = vmatpush1.bf16.msra.mxu0 %v12156_v50  ;;  %1403 = vmatpush1.bf16.msra.mxu1 %v12159_v51  ;;  %v12242_v50 = vld [vmem:[#allocation4 + $0x4c4] ss:$16 sps:$4 sm:$0xff]   ;;  %v12245_v51 = vld [vmem:[#allocation4 + $0x4cc] ss:$16 sps:$4 sm:$0xff]  }
 0x1cc   :  { %1322 = vmatprep.subr.bf16.mxu0 %v12164_v53  ;;  %1404 = vmatprep.subr.bf16.mxu1 %v12167_v54  ;;  %v12240_v53 = vld [vmem:[#allocation4 + $0x4c0] ss:$16 sps:$4 sm:$0xff]   ;;  %v12243_v54 = vld [vmem:[#allocation4 + $0x4c8] ss:$16 sps:$4 sm:$0xff]  }
 0x1cf   :  { %1323 = vmatpush1.bf16.msra.mxu0 %v12162_v55  ;;  %1405 = vmatpush1.bf16.msra.mxu1 %v12165_v56  ;;  %v12248_v55 = vld [vmem:[#allocation4 + $0x4e4] ss:$16 sps:$4 sm:$0xff]   ;;  %v12251_v56 = vld [vmem:[#allocation4 + $0x4ec] ss:$16 sps:$4 sm:$0xff]  }
 0x1d0   :  { %1324 = vmatprep.subr.bf16.mxu0 %v12170_v57  ;;  %1406 = vmatprep.subr.bf16.mxu1 %v12173_v58  ;;  %v12246_v57 = vld [vmem:[#allocation4 + $0x4e0] ss:$16 sps:$4 sm:$0xff]   ;;  %v12249_v58 = vld [vmem:[#allocation4 + $0x4e8] ss:$16 sps:$4 sm:$0xff]  }
 0x1d3   :  { %1325 = vmatpush1.bf16.msra.mxu0 %v12168_v59  ;;  %1407 = vmatpush1.bf16.msra.mxu1 %v12171_v60  ;;  %v12254_v59 = vld [vmem:[#allocation4 + $0x504] ss:$16 sps:$4 sm:$0xff]   ;;  %v12257_v60 = vld [vmem:[#allocation4 + $0x50c] ss:$16 sps:$4 sm:$0xff]  }
 0x1d4   :  { %1326 = vmatprep.subr.bf16.mxu0 %v12176_v61  ;;  %1408 = vmatprep.subr.bf16.mxu1 %v12179_v62  ;;  %v12252_v61 = vld [vmem:[#allocation4 + $0x500] ss:$16 sps:$4 sm:$0xff]   ;;  %v12255_v62 = vld [vmem:[#allocation4 + $0x508] ss:$16 sps:$4 sm:$0xff]  }
 0x1d7   :  { %1327 = vmatpush1.bf16.msra.mxu0 %v12174_v0  ;;  %1409 = vmatpush1.bf16.msra.mxu1 %v12177_v1  ;;  %v12263_v0 = vld [vmem:[#allocation4 + $0x52c] ss:$16 sps:$4 sm:$0xff]   ;;  %v12258_v1 = vld [vmem:[#allocation4 + $0x520] ss:$16 sps:$4 sm:$0xff]  }
 0x1d8   :  { %1328 = vmatprep.subr.bf16.mxu0 %v12182_v2  ;;  %1410 = vmatprep.subr.bf16.mxu1 %v12185_v3  ;;  %v12261_v2 = vld [vmem:[#allocation4 + $0x528] ss:$16 sps:$4 sm:$0xff]   ;;  %v12266_v3 = vld [vmem:[#allocation4 + $0x544] ss:$16 sps:$4 sm:$0xff]  }
 0x1db   :  { %1329 = vmatpush1.bf16.msra.mxu0 %v12180_v5  ;;  %1411 = vmatpush1.bf16.msra.mxu1 %v12183_v6  ;;  %v12264_v5 = vld [vmem:[#allocation4 + $0x540] ss:$16 sps:$4 sm:$0xff]   ;;  %v12267_v6 = vld [vmem:[#allocation4 + $0x548] ss:$16 sps:$4 sm:$0xff]  }
 0x1dc   :  { %1330 = vmatprep.subr.bf16.mxu0 %v12188_v7  ;;  %1412 = vmatprep.subr.bf16.mxu1 %v12191_v8  ;;  %v12272_v7 = vld [vmem:[#allocation4 + $0x564] ss:$16 sps:$4 sm:$0xff]   ;;  %v12275_v8 = vld [vmem:[#allocation4 + $0x56c] ss:$16 sps:$4 sm:$0xff]  }
 0x1df   :  { %1331 = vmatpush1.bf16.msra.mxu0 %v12186_v9  ;;  %1413 = vmatpush1.bf16.msra.mxu1 %v12189_v10  ;;  %v12270_v9 = vld [vmem:[#allocation4 + $0x560] ss:$16 sps:$4 sm:$0xff]   ;;  %v12273_v10 = vld [vmem:[#allocation4 + $0x568] ss:$16 sps:$4 sm:$0xff]  }
 0x1e0   :  { %1332 = vmatprep.subr.bf16.mxu0 %v12194_v11  ;;  %1414 = vmatprep.subr.bf16.mxu1 %v12197_v12  ;;  %v12278_v11 = vld [vmem:[#allocation4 + $0x584] ss:$16 sps:$4 sm:$0xff]   ;;  %v12281_v12 = vld [vmem:[#allocation4 + $0x58c] ss:$16 sps:$4 sm:$0xff]  }
 0x1e3   :  { %1333 = vmatpush1.bf16.msra.mxu0 %v12192_v13  ;;  %1415 = vmatpush1.bf16.msra.mxu1 %v12195_v14  ;;  %v12276_v13 = vld [vmem:[#allocation4 + $0x580] ss:$16 sps:$4 sm:$0xff]   ;;  %v12279_v14 = vld [vmem:[#allocation4 + $0x588] ss:$16 sps:$4 sm:$0xff]  }
 0x1e4   :  { %1334 = vmatprep.subr.bf16.mxu0 %v12200_v15  ;;  %1416 = vmatprep.subr.bf16.mxu1 %v12203_v16  ;;  %v12284_v15 = vld [vmem:[#allocation4 + $0x5a4] ss:$16 sps:$4 sm:$0xff]   ;;  %v12287_v16 = vld [vmem:[#allocation4 + $0x5ac] ss:$16 sps:$4 sm:$0xff]  }
 0x1e7   :  { %1335 = vmatpush1.bf16.msra.mxu0 %v12198_v18  ;;  %1417 = vmatpush1.bf16.msra.mxu1 %v12201_v19  ;;  %v12285_v18 = vld [vmem:[#allocation4 + $0x5a8] ss:$16 sps:$4 sm:$0xff]   ;;  %v12290_v19 = vld [vmem:[#allocation4 + $0x5c4] ss:$16 sps:$4 sm:$0xff]  }
 0x1e8   :  { %2251 = vmatprep.subr.bf16.mxu0 %v12206_v20  ;;  %2333 = vmatprep.subr.bf16.mxu1 %v12209_v21  ;;  %v12293_v20 = vld [vmem:[#allocation4 + $0x5cc] ss:$16 sps:$4 sm:$0xff]   ;;  %v12288_v21 = vld [vmem:[#allocation4 + $0x5c0] ss:$16 sps:$4 sm:$0xff]  }
 0x1ea   :  { %1337 = vmatmul.mubr.bf16.vlgmr.msra.gmra.mrb[4].mxu0 %v598_v27  ;;  %1419 = vmatmul.mubr.bf16.vlgmr.msra.gmra.mrb[4].mxu1 %v598_v27  ;;  %v12302_v27 = vld [vmem:[#allocation4 + $0x604] ss:$16 sps:$4 sm:$0xff]  }
 0x1eb   :  { %2252 = vmatpush1.bf16.msra.mxu0 %v12204_v23  ;;  %2334 = vmatpush1.bf16.msra.mxu1 %v12207_v24  ;;  %v12296_v23 = vld [vmem:[#allocation4 + $0x5e4] ss:$16 sps:$4 sm:$0xff]   ;;  %v12299_v24 = vld [vmem:[#allocation4 + $0x5ec] ss:$16 sps:$4 sm:$0xff]  }
 0x1ec   :  { %2253 = vmatprep.subr.bf16.mxu0 %v12212_v25  ;;  %2335 = vmatprep.subr.bf16.mxu1 %v12215_v26  ;;  %v12294_v25 = vld [vmem:[#allocation4 + $0x5e0] ss:$16 sps:$4 sm:$0xff]   ;;  %v12297_v26 = vld [vmem:[#allocation4 + $0x5e8] ss:$16 sps:$4 sm:$0xff]  }
 0x1ef   :  { %2254 = vmatpush1.bf16.msra.mxu0 %v12210_v28  ;;  %2336 = vmatpush1.bf16.msra.mxu1 %v12213_v30  ;;  %v12305_v28 = vld [vmem:[#allocation4 + $0x60c] ss:$16 sps:$4 sm:$0xff]   ;;  %v14483_v30 = vld [vmem:[#allocation13 + $0x1] ss:$8 sm:$0xf] }
 0x1f0   :  { %2255 = vmatprep.subr.bf16.mxu0 %v12218_v31  ;;  %2337 = vmatprep.subr.bf16.mxu1 %v12221_v32  ;;  %v606_v31 = vrot.slane %v14483_v30, %v14457_v40  ;;  %v610_v32 = vrot.slane %v14483_v30, %v14460_v41 }
 0x1f3   :  { %2256 = vmatpush1.bf16.msra.mxu0 %v12216_v33  ;;  %2338 = vmatpush1.bf16.msra.mxu1 %v12219_v34  ;;  %v618_v33 = vrot.slane %v14483_v30, %v14467_v52 }
 0x1f4   :  { %2257 = vmatprep.subr.bf16.mxu0 %v12224_v35  ;;  %2339 = vmatprep.subr.bf16.mxu1 %v12227_v36 }
 0x1f7   :  { %2258 = vmatpush1.bf16.msra.mxu0 %v12222_v37  ;;  %2340 = vmatpush1.bf16.msra.mxu1 %v12225_v42 }
 0x1f8   :  { %2259 = vmatprep.subr.bf16.mxu0 %v12230_v43  ;;  %2341 = vmatprep.subr.bf16.mxu1 %v12233_v44 }
 0x1fb   :  { %2260 = vmatpush1.bf16.msra.mxu0 %v12228_v45  ;;  %2342 = vmatpush1.bf16.msra.mxu1 %v12231_v46 }
 0x1fc   :  { %2261 = vmatprep.subr.bf16.mxu0 %v12236_v47  ;;  %2343 = vmatprep.subr.bf16.mxu1 %v12239_v39 }
 0x1ff   :  { %2262 = vmatpush1.bf16.msra.mxu0 %v12234_v48  ;;  %2344 = vmatpush1.bf16.msra.mxu1 %v12237_v49 }
 0x200   :  { %2263 = vmatprep.subr.bf16.mxu0 %v12242_v50  ;;  %2345 = vmatprep.subr.bf16.mxu1 %v12245_v51 }
 0x203   :  { %2264 = vmatpush1.bf16.msra.mxu0 %v12240_v53  ;;  %2346 = vmatpush1.bf16.msra.mxu1 %v12243_v54 }
 0x204   :  { %2265 = vmatprep.subr.bf16.mxu0 %v12248_v55  ;;  %2347 = vmatprep.subr.bf16.mxu1 %v12251_v56 }
 0x207   :  { %2266 = vmatpush1.bf16.msra.mxu0 %v12246_v57  ;;  %2348 = vmatpush1.bf16.msra.mxu1 %v12249_v58 }
 0x208   :  { %2267 = vmatprep.subr.bf16.mxu0 %v12254_v59  ;;  %2349 = vmatprep.subr.bf16.mxu1 %v12257_v60 }
 0x20b   :  { %2268 = vmatpush1.bf16.msra.mxu0 %v12252_v61  ;;  %2350 = vmatpush1.bf16.msra.mxu1 %v12255_v62 }
 0x20c   :  { %2269 = vmatprep.subr.bf16.mxu0 %v12260_v63  ;;  %2351 = vmatprep.subr.bf16.mxu1 %v12263_v0 }
 0x20f   :  { %2270 = vmatpush1.bf16.msra.mxu0 %v12258_v1  ;;  %2352 = vmatpush1.bf16.msra.mxu1 %v12261_v2  ;;  %v12300_v1 = vld [vmem:[#allocation4 + $0x600] ss:$16 sps:$4 sm:$0xff]   ;;  %v12303_v2 = vld [vmem:[#allocation4 + $0x608] ss:$16 sps:$4 sm:$0xff]  }
 0x210   :  { %2271 = vmatprep.subr.bf16.mxu0 %v12266_v3  ;;  %2353 = vmatprep.subr.bf16.mxu1 %v12269_v4  ;;  %v12308_v4 = vld [vmem:[#allocation4 + $0x624] ss:$16 sps:$4 sm:$0xff]  }
 0x213   :  { %2272 = vmatpush1.bf16.msra.mxu0 %v12264_v5  ;;  %2354 = vmatpush1.bf16.msra.mxu1 %v12267_v6  ;;  %v12311_v5 = vld [vmem:[#allocation4 + $0x62c] ss:$16 sps:$4 sm:$0xff]  }
 0x214   :  { %2273 = vmatprep.subr.bf16.mxu0 %v12272_v7  ;;  %2355 = vmatprep.subr.bf16.mxu1 %v12275_v8  ;;  %v12306_v7 = vld [vmem:[#allocation4 + $0x620] ss:$16 sps:$4 sm:$0xff]   ;;  %v12309_v8 = vld [vmem:[#allocation4 + $0x628] ss:$16 sps:$4 sm:$0xff]  }
 0x217   :  { %2274 = vmatpush1.bf16.msra.mxu0 %v12270_v9  ;;  %2356 = vmatpush1.bf16.msra.mxu1 %v12273_v10  ;;  %v12314_v9 = vld [vmem:[#allocation4 + $0x644] ss:$16 sps:$4 sm:$0xff]   ;;  %v12317_v10 = vld [vmem:[#allocation4 + $0x64c] ss:$16 sps:$4 sm:$0xff]  }
 0x218   :  { %2275 = vmatprep.subr.bf16.mxu0 %v12278_v11  ;;  %2357 = vmatprep.subr.bf16.mxu1 %v12281_v12  ;;  %v12312_v11 = vld [vmem:[#allocation4 + $0x640] ss:$16 sps:$4 sm:$0xff]   ;;  %v12315_v12 = vld [vmem:[#allocation4 + $0x648] ss:$16 sps:$4 sm:$0xff]  }
 0x21b   :  { %2276 = vmatpush1.bf16.msra.mxu0 %v12276_v13  ;;  %2358 = vmatpush1.bf16.msra.mxu1 %v12279_v14  ;;  %v12320_v13 = vld [vmem:[#allocation4 + $0x664] ss:$16 sps:$4 sm:$0xff]   ;;  %v12323_v14 = vld [vmem:[#allocation4 + $0x66c] ss:$16 sps:$4 sm:$0xff]  }
 0x21c   :  { %2277 = vmatprep.subr.bf16.mxu0 %v12284_v15  ;;  %2359 = vmatprep.subr.bf16.mxu1 %v12287_v16  ;;  %v12318_v15 = vld [vmem:[#allocation4 + $0x660] ss:$16 sps:$4 sm:$0xff]   ;;  %v12321_v16 = vld [vmem:[#allocation4 + $0x668] ss:$16 sps:$4 sm:$0xff]  }
 0x21f   :  { %2278 = vmatpush1.bf16.msra.mxu0 %v12282_v17  ;;  %2360 = vmatpush1.bf16.msra.mxu1 %v12285_v18  ;;  %v12326_v17 = vld [vmem:[#allocation4 + $0x684] ss:$16 sps:$4 sm:$0xff]   ;;  %v12329_v18 = vld [vmem:[#allocation4 + $0x68c] ss:$16 sps:$4 sm:$0xff]  }
 0x220   :  { %2279 = vmatprep.subr.bf16.mxu0 %v12290_v19  ;;  %2361 = vmatprep.subr.bf16.mxu1 %v12293_v20  ;;  %v12324_v19 = vld [vmem:[#allocation4 + $0x680] ss:$16 sps:$4 sm:$0xff]   ;;  %v12327_v20 = vld [vmem:[#allocation4 + $0x688] ss:$16 sps:$4 sm:$0xff]  }
 0x223   :  { %2280 = vmatpush1.bf16.msra.mxu0 %v12288_v21  ;;  %2362 = vmatpush1.bf16.msra.mxu1 %v12291_v22  ;;  %v12332_v21 = vld [vmem:[#allocation4 + $0x6a4] ss:$16 sps:$4 sm:$0xff]   ;;  %v12335_v22 = vld [vmem:[#allocation4 + $0x6ac] ss:$16 sps:$4 sm:$0xff]  }
 0x224   :  { %2281 = vmatprep.subr.bf16.mxu0 %v12296_v23  ;;  %2363 = vmatprep.subr.bf16.mxu1 %v12299_v24  ;;  %v614_v23 = vrot.slane %v14483_v30, %v14474_v29  ;;  %v12330_v24 = vld [vmem:[#allocation4 + $0x6a0] ss:$16 sps:$4 sm:$0xff]  }
 0x227   :  { %2282 = vmatpush1.bf16.msra.mxu0 %v12294_v25  ;;  %2364 = vmatpush1.bf16.msra.mxu1 %v12297_v26  ;;  %v12333_v25 = vld [vmem:[#allocation4 + $0x6a8] ss:$16 sps:$4 sm:$0xff]   ;;  %v12338_v26 = vld [vmem:[#allocation4 + $0x6c4] ss:$16 sps:$4 sm:$0xff]  }
 0x228   :  { %2292 = vmatprep.subr.bf16.mxu0 %v12302_v27  ;;  %2374 = vmatprep.subr.bf16.mxu1 %v12305_v28  ;;  %v12341_v27 = vld [vmem:[#allocation4 + $0x6cc] ss:$16 sps:$4 sm:$0xff]  }
 0x2bd   :  { %v1338_v34 = vpop.f32.mrb[4].mxu0  ;;  %v14491_v35 = vpop.f32.mrb[4].mxu1 }
 0x2be   :  { %v11843_v36 = vadd.f32 %v1338_v34, %v606_v31  ;;  %v1340_v37 = vpop.f32.mrb[5].mxu0  ;;  %v1422_v42 = vpop.f32.mrb[5].mxu1  ;;  %v14496_v28 = vadd.f32 %v14491_v35, %v614_v23  ;;  %v12336_v31 = vld [vmem:[#allocation4 + $0x6c0] ss:$16 sps:$4 sm:$0xff]   ;;  %v12347_v34 = vld [vmem:[#allocation4 + $0x6ec] ss:$16 sps:$4 sm:$0xff]  }
 0x2bf   :  { %v11844_v43 = vadd.f32 %v1340_v37, %v610_v32  ;;  %v11846_v44 = vadd.f32 %v1422_v42, %v618_v33  ;;  %v1342_v45 = vpop.f32.mrb[6].mxu0  ;;  %v1424_v46 = vpop.f32.mrb[6].mxu1  ;;  %v12339_v32 = vld [vmem:[#allocation4 + $0x6c8] ss:$16 sps:$4 sm:$0xff]   ;;  %v12344_v33 = vld [vmem:[#allocation4 + $0x6e4] ss:$16 sps:$4 sm:$0xff]  }
 0x2c0   :  { %v10599_v47 = vmul.f32 -1.442695, %v11843_v36  ;;  %v1343_v39 = vpop.f32.mrb[7].mxu0  ;;  %v1425_v48 = vpop.f32.mrb[7].mxu1  ;;  %v10601_v30 = vmul.f32 -1.442695, %v14496_v28 }
 0x2c1   :  { %v10600_v49 = vmul.f32 -1.442695, %v11844_v43  ;;  %v10602_v50 = vmul.f32 -1.442695, %v11846_v44  ;;  %v12345_v37 = vld [vmem:[#allocation4 + $0x6e8] ss:$16 sps:$4 sm:$0xff]  }
 0x2c2   :  { %13900 = vpow2.f32 %v10599_v47  ;;  %v12350_v42 = vld [vmem:[#allocation4 + $0x704] ss:$16 sps:$4 sm:$0xff]   ;;  %v12348_v35 = vld [vmem:[#allocation4 + $0x700] ss:$16 sps:$4 sm:$0xff]   ;;  %v12359_v46 = vld [vmem:[#allocation4 + $0x72c] ss:$16 sps:$4 sm:$0xff]  }
 0x2c3   :  { %13902 = vpow2.f32 %v10600_v49  ;;  %v12356_v45 = vld [vmem:[#allocation4 + $0x724] ss:$16 sps:$4 sm:$0xff]   ;;  %v12354_v47 = vld [vmem:[#allocation4 + $0x720] ss:$16 sps:$4 sm:$0xff]   ;;  %v12357_v39 = vld [vmem:[#allocation4 + $0x728] ss:$16 sps:$4 sm:$0xff]  }
 0x2c4   :  { %13904 = vpow2.f32 %v10602_v50  ;;  %v12362_v48 = vld [vmem:[#allocation4 + $0x744] ss:$16 sps:$4 sm:$0xff]   ;;  %v12365_v49 = vld [vmem:[#allocation4 + $0x74c] ss:$16 sps:$4 sm:$0xff]   ;;  %v12360_v50 = vld [vmem:[#allocation4 + $0x740] ss:$16 sps:$4 sm:$0xff]  }
 0x2c5   :  { %v12413_v23 = vld [vmem:[#allocation4 + $0x84c] ss:$16 sps:$4 sm:$0xff]  }
 0x2cc   :  { %v13901_v51 = vpop.eup %13900 }
 0x2cd   :  { %v1439_v53 = vadd.f32 1.0, %v13901_v51  ;;  %v13903_v54 = vpop.eup %13902  ;;  %v12363_v51 = vld [vmem:[#allocation4 + $0x748] ss:$16 sps:$4 sm:$0xff]  }
 0x2ce   :  { %v13905_v55 = vpop.eup %13904  ;;  %v1440_v56 = vadd.f32 1.0, %v13903_v54  ;;  %v12368_v54 = vld [vmem:[#allocation4 + $0x764] ss:$16 sps:$4 sm:$0xff]  }
 0x2cf   :  { %13906 = vrcp.f32 %v1439_v53  ;;  %v1442_v57 = vadd.f32 1.0, %v13905_v55  ;;  %v12371_v55 = vld [vmem:[#allocation4 + $0x76c] ss:$16 sps:$4 sm:$0xff]  }
 0x2d0   :  { %13908 = vrcp.f32 %v1440_v56 }
 0x2d1   :  { %13910 = vrcp.f32 %v1442_v57  ;;  %v12366_v57 = vld [vmem:[#allocation4 + $0x760] ss:$16 sps:$4 sm:$0xff]  }
 0x2d2   :  { %13912 = vpow2.f32 %v10601_v30  ;;  %v12423_v30 = vld [vmem:[#allocation4 + $0x888] ss:$16 sps:$4 sm:$0xff]  }
 0x2d9   :  { %v13907_v58 = vpop.eup %13906 }
 0x2da   :  { %v13909_v59 = vpop.eup %13908  ;;  %v1451_v60 = vmul.f32 %v13907_v58, %v11843_v36  ;;  %v12342_v36 = vld [vmem:[#allocation4 + $0x6e0] ss:$16 sps:$4 sm:$0xff]   ;;  %v12369_v58 = vld [vmem:[#allocation4 + $0x768] ss:$16 sps:$4 sm:$0xff]  }
 0x2db   :  { %v13911_v61 = vpop.eup %13910  ;;  %v1452_v62 = vmul.f32 %v13909_v59, %v11844_v43  ;;  %v12353_v43 = vld [vmem:[#allocation4 + $0x70c] ss:$16 sps:$4 sm:$0xff]   ;;  %v12374_v59 = vld [vmem:[#allocation4 + $0x784] ss:$16 sps:$4 sm:$0xff]  }
 0x2dc   :  { %v1454_v63 = vmul.f32 %v13911_v61, %v11846_v44  ;;  %v1584_v3 = vpack.c.bf16 %v1451_v60, %v1451_v60  ;;  %v12351_v44 = vld [vmem:[#allocation4 + $0x708] ss:$16 sps:$4 sm:$0xff]   ;;  %v13913_v53 = vpop.eup %13912  ;;  %v12377_v60 = vld [vmem:[#allocation4 + $0x78c] ss:$16 sps:$4 sm:$0xff]   ;;  %v12372_v61 = vld [vmem:[#allocation4 + $0x780] ss:$16 sps:$4 sm:$0xff]  }
 0x2dd   :  { %v1585_v0 = vpack.c.bf16 %v1452_v62, %v1452_v62  ;;  %v1441_v56 = vadd.f32 1.0, %v13913_v53  ;;  %v12375_v62 = vld [vmem:[#allocation4 + $0x788] ss:$16 sps:$4 sm:$0xff]   ;;  %v12444_v53 = vld [vmem:[#allocation4 + $0x900] ss:$16 sps:$4 sm:$0xff]  }
 0x2de   :  { %v1587_v6 = vpack.c.bf16 %v1454_v63, %v1454_v63  ;;  %v12380_v63 = vld [vmem:[#allocation4 + $0x7a4] ss:$16 sps:$4 sm:$0xff]  }
 0x2df   :  { %2283 = vmatprep.mubr.bf16.mxu0 %v1585_v0  ;;  %2365 = vmatprep.mubr.bf16.mxu1 %v1585_v0  ;;  %13914 = vrcp.f32 %v1441_v56  ;;  %v12383_v0 = vld [vmem:[#allocation4 + $0x7ac] ss:$16 sps:$4 sm:$0xff]  }
 0x2e0   :  { %2284 = vmatmul.mubr.bf16.vlgmr.msra.gmra.mrb[8].mxu0 %v1584_v3  ;;  %2366 = vmatmul.mubr.bf16.vlgmr.msra.gmra.mrb[8].mxu1 %v1584_v3  ;;  %v12386_v3 = vld [vmem:[#allocation4 + $0x7c4] ss:$16 sps:$4 sm:$0xff]   ;;  %v12455_v56 = vld [vmem:[#allocation4 + $0x92c] ss:$16 sps:$4 sm:$0xff]  }
 0x2e1   :  { %2293 = vmatpush1.bf16.msra.mxu0 %v12300_v1  ;;  %2375 = vmatpush1.bf16.msra.mxu1 %v12303_v2  ;;  %v12378_v1 = vld [vmem:[#allocation4 + $0x7a0] ss:$16 sps:$4 sm:$0xff]   ;;  %v12381_v2 = vld [vmem:[#allocation4 + $0x7a8] ss:$16 sps:$4 sm:$0xff]  }
 0x2e2   :  { %2324 = vmatprep.mubr.bf16.mxu0 %v1587_v6  ;;  %2406 = vmatprep.mubr.bf16.mxu1 %v1587_v6  ;;  %v12387_v6 = vld [vmem:[#allocation4 + $0x7c8] ss:$16 sps:$4 sm:$0xff]  }
 0x2e3   :  { %2294 = vmatprep.subr.bf16.mxu0 %v12308_v4  ;;  %2376 = vmatprep.subr.bf16.mxu1 %v12311_v5  ;;  %v12389_v4 = vld [vmem:[#allocation4 + $0x7cc] ss:$16 sps:$4 sm:$0xff]   ;;  %v12384_v5 = vld [vmem:[#allocation4 + $0x7c0] ss:$16 sps:$4 sm:$0xff]  }
 0x2e5   :  { %2295 = vmatpush1.bf16.msra.mxu0 %v12306_v7  ;;  %2377 = vmatpush1.bf16.msra.mxu1 %v12309_v8  ;;  %v12392_v7 = vld [vmem:[#allocation4 + $0x7e4] ss:$16 sps:$4 sm:$0xff]   ;;  %v12395_v8 = vld [vmem:[#allocation4 + $0x7ec] ss:$16 sps:$4 sm:$0xff]  }
 0x2e6   :  { %2296 = vmatprep.subr.bf16.mxu0 %v12314_v9  ;;  %2378 = vmatprep.subr.bf16.mxu1 %v12317_v10  ;;  %v12390_v10 = vld [vmem:[#allocation4 + $0x7e0] ss:$16 sps:$4 sm:$0xff]  }
 0x2e9   :  { %2297 = vmatpush1.bf16.msra.mxu0 %v12312_v11  ;;  %2379 = vmatpush1.bf16.msra.mxu1 %v12315_v12  ;;  %v13915_v9 = vpop.eup %13914  ;;  %v12393_v11 = vld [vmem:[#allocation4 + $0x7e8] ss:$16 sps:$4 sm:$0xff]  }
 0x2ea   :  { %2298 = vmatprep.subr.bf16.mxu0 %v12320_v13  ;;  %2380 = vmatprep.subr.bf16.mxu1 %v12323_v14  ;;  %v1453_v12 = vmul.f32 %v13915_v9, %v14496_v28  ;;  %v12398_v13 = vld [vmem:[#allocation4 + $0x804] ss:$16 sps:$4 sm:$0xff]   ;;  %v12401_v14 = vld [vmem:[#allocation4 + $0x80c] ss:$16 sps:$4 sm:$0xff]   ;;  %v12414_v28 = vld [vmem:[#allocation4 + $0x860] ss:$16 sps:$4 sm:$0xff]  }
 0x2eb   :  { %v12474_v9 = vld [vmem:[#allocation4 + $0x9a0] ss:$16 sps:$4 sm:$0xff]  }
 0x2ed   :  { %2299 = vmatpush1.bf16.msra.mxu0 %v12318_v15  ;;  %2381 = vmatpush1.bf16.msra.mxu1 %v12321_v16  ;;  %v12396_v15 = vld [vmem:[#allocation4 + $0x800] ss:$16 sps:$4 sm:$0xff]   ;;  %v12399_v16 = vld [vmem:[#allocation4 + $0x808] ss:$16 sps:$4 sm:$0xff]  }
 0x2ee   :  { %2300 = vmatprep.subr.bf16.mxu0 %v12326_v17  ;;  %2382 = vmatprep.subr.bf16.mxu1 %v12329_v18  ;;  %v1586_v17 = vpack.c.bf16 %v1453_v12, %v1453_v12  ;;  %v12404_v18 = vld [vmem:[#allocation4 + $0x824] ss:$16 sps:$4 sm:$0xff]   ;;  %v12485_v12 = vld [vmem:[#allocation4 + $0x9cc] ss:$16 sps:$4 sm:$0xff]  }
 0x2f1   :  { %2301 = vmatpush1.bf16.msra.mxu0 %v12324_v19  ;;  %2383 = vmatpush1.bf16.msra.mxu1 %v12327_v20  ;;  %v12407_v19 = vld [vmem:[#allocation4 + $0x82c] ss:$16 sps:$4 sm:$0xff]   ;;  %v12402_v20 = vld [vmem:[#allocation4 + $0x820] ss:$16 sps:$4 sm:$0xff]  }
 0x2f2   :  { %2302 = vmatprep.subr.bf16.mxu0 %v12332_v21  ;;  %2384 = vmatprep.subr.bf16.mxu1 %v12335_v22  ;;  %v12405_v21 = vld [vmem:[#allocation4 + $0x828] ss:$16 sps:$4 sm:$0xff]   ;;  %v12410_v22 = vld [vmem:[#allocation4 + $0x844] ss:$16 sps:$4 sm:$0xff]  }
 0x2f5   :  { %2303 = vmatpush1.bf16.msra.mxu0 %v12330_v24  ;;  %2385 = vmatpush1.bf16.msra.mxu1 %v12333_v25  ;;  %v12408_v24 = vld [vmem:[#allocation4 + $0x840] ss:$16 sps:$4 sm:$0xff]   ;;  %v12411_v25 = vld [vmem:[#allocation4 + $0x848] ss:$16 sps:$4 sm:$0xff]  }
 0x2f6   :  { %2304 = vmatprep.subr.bf16.mxu0 %v12338_v26  ;;  %2386 = vmatprep.subr.bf16.mxu1 %v12341_v27  ;;  %v12416_v26 = vld [vmem:[#allocation4 + $0x864] ss:$16 sps:$4 sm:$0xff]   ;;  %v12419_v27 = vld [vmem:[#allocation4 + $0x86c] ss:$16 sps:$4 sm:$0xff]  }
 0x2f9   :  { %2305 = vmatpush1.bf16.msra.mxu0 %v12336_v31  ;;  %2387 = vmatpush1.bf16.msra.mxu1 %v12339_v32  ;;  %v12417_v31 = vld [vmem:[#allocation4 + $0x868] ss:$16 sps:$4 sm:$0xff]   ;;  %v12422_v32 = vld [vmem:[#allocation4 + $0x884] ss:$16 sps:$4 sm:$0xff]  }
 0x2fa   :  { %2306 = vmatprep.subr.bf16.mxu0 %v12344_v33  ;;  %2388 = vmatprep.subr.bf16.mxu1 %v12347_v34  ;;  %v12425_v33 = vld [vmem:[#allocation4 + $0x88c] ss:$16 sps:$4 sm:$0xff]   ;;  %v12420_v34 = vld [vmem:[#allocation4 + $0x880] ss:$16 sps:$4 sm:$0xff]  }
 0x2fd   :  { %2307 = vmatpush1.bf16.msra.mxu0 %v12342_v36  ;;  %2389 = vmatpush1.bf16.msra.mxu1 %v12345_v37  ;;  %v12428_v36 = vld [vmem:[#allocation4 + $0x8a4] ss:$16 sps:$4 sm:$0xff]   ;;  %v12431_v37 = vld [vmem:[#allocation4 + $0x8ac] ss:$16 sps:$4 sm:$0xff]  }
 0x2fe   :  { %2308 = vmatprep.subr.bf16.mxu0 %v12350_v42  ;;  %2390 = vmatprep.subr.bf16.mxu1 %v12353_v43  ;;  %v12426_v42 = vld [vmem:[#allocation4 + $0x8a0] ss:$16 sps:$4 sm:$0xff]   ;;  %v12429_v43 = vld [vmem:[#allocation4 + $0x8a8] ss:$16 sps:$4 sm:$0xff]  }
 0x301   :  { %2309 = vmatpush1.bf16.msra.mxu0 %v12348_v35  ;;  %2391 = vmatpush1.bf16.msra.mxu1 %v12351_v44  ;;  %v12434_v35 = vld [vmem:[#allocation4 + $0x8c4] ss:$16 sps:$4 sm:$0xff]   ;;  %v12437_v44 = vld [vmem:[#allocation4 + $0x8cc] ss:$16 sps:$4 sm:$0xff]  }
 0x302   :  { %2310 = vmatprep.subr.bf16.mxu0 %v12356_v45  ;;  %2392 = vmatprep.subr.bf16.mxu1 %v12359_v46  ;;  %v12432_v45 = vld [vmem:[#allocation4 + $0x8c0] ss:$16 sps:$4 sm:$0xff]   ;;  %v12435_v46 = vld [vmem:[#allocation4 + $0x8c8] ss:$16 sps:$4 sm:$0xff]  }
 0x305   :  { %2311 = vmatpush1.bf16.msra.mxu0 %v12354_v47  ;;  %2393 = vmatpush1.bf16.msra.mxu1 %v12357_v39  ;;  %v12440_v47 = vld [vmem:[#allocation4 + $0x8e4] ss:$16 sps:$4 sm:$0xff]   ;;  %v12443_v39 = vld [vmem:[#allocation4 + $0x8ec] ss:$16 sps:$4 sm:$0xff]  }
 0x306   :  { %2312 = vmatprep.subr.bf16.mxu0 %v12362_v48  ;;  %2394 = vmatprep.subr.bf16.mxu1 %v12365_v49  ;;  %v12438_v48 = vld [vmem:[#allocation4 + $0x8e0] ss:$16 sps:$4 sm:$0xff]   ;;  %v12441_v49 = vld [vmem:[#allocation4 + $0x8e8] ss:$16 sps:$4 sm:$0xff]  }
 0x309   :  { %2313 = vmatpush1.bf16.msra.mxu0 %v12360_v50  ;;  %2395 = vmatpush1.bf16.msra.mxu1 %v12363_v51  ;;  %v12446_v50 = vld [vmem:[#allocation4 + $0x904] ss:$16 sps:$4 sm:$0xff]   ;;  %v12449_v51 = vld [vmem:[#allocation4 + $0x90c] ss:$16 sps:$4 sm:$0xff]  }
 0x30a   :  { %2314 = vmatprep.subr.bf16.mxu0 %v12368_v54  ;;  %2396 = vmatprep.subr.bf16.mxu1 %v12371_v55  ;;  %v12447_v54 = vld [vmem:[#allocation4 + $0x908] ss:$16 sps:$4 sm:$0xff]   ;;  %v12452_v55 = vld [vmem:[#allocation4 + $0x924] ss:$16 sps:$4 sm:$0xff]  }
 0x30d   :  { %2315 = vmatpush1.bf16.msra.mxu0 %v12366_v57  ;;  %2397 = vmatpush1.bf16.msra.mxu1 %v12369_v58  ;;  %v12450_v57 = vld [vmem:[#allocation4 + $0x920] ss:$16 sps:$4 sm:$0xff]   ;;  %v12453_v58 = vld [vmem:[#allocation4 + $0x928] ss:$16 sps:$4 sm:$0xff]  }
 0x30e   :  { %2316 = vmatprep.subr.bf16.mxu0 %v12374_v59  ;;  %2398 = vmatprep.subr.bf16.mxu1 %v12377_v60  ;;  %v12458_v59 = vld [vmem:[#allocation4 + $0x944] ss:$16 sps:$4 sm:$0xff]   ;;  %v12461_v60 = vld [vmem:[#allocation4 + $0x94c] ss:$16 sps:$4 sm:$0xff]  }
 0x311   :  { %2317 = vmatpush1.bf16.msra.mxu0 %v12372_v61  ;;  %2399 = vmatpush1.bf16.msra.mxu1 %v12375_v62  ;;  %v12456_v61 = vld [vmem:[#allocation4 + $0x940] ss:$16 sps:$4 sm:$0xff]   ;;  %v12459_v62 = vld [vmem:[#allocation4 + $0x948] ss:$16 sps:$4 sm:$0xff]  }
 0x312   :  { %2318 = vmatprep.subr.bf16.mxu0 %v12380_v63  ;;  %2400 = vmatprep.subr.bf16.mxu1 %v12383_v0  ;;  %v12464_v63 = vld [vmem:[#allocation4 + $0x964] ss:$16 sps:$4 sm:$0xff]   ;;  %v12467_v0 = vld [vmem:[#allocation4 + $0x96c] ss:$16 sps:$4 sm:$0xff]  }
 0x315   :  { %2319 = vmatpush1.bf16.msra.mxu0 %v12378_v1  ;;  %2401 = vmatpush1.bf16.msra.mxu1 %v12381_v2  ;;  %v12462_v1 = vld [vmem:[#allocation4 + $0x960] ss:$16 sps:$4 sm:$0xff]   ;;  %v12465_v2 = vld [vmem:[#allocation4 + $0x968] ss:$16 sps:$4 sm:$0xff]  }
 0x316   :  { %2320 = vmatprep.subr.bf16.mxu0 %v12386_v3  ;;  %2402 = vmatprep.subr.bf16.mxu1 %v12389_v4  ;;  %v12470_v3 = vld [vmem:[#allocation4 + $0x984] ss:$16 sps:$4 sm:$0xff]   ;;  %v12473_v4 = vld [vmem:[#allocation4 + $0x98c] ss:$16 sps:$4 sm:$0xff]  }
 0x319   :  { %2321 = vmatpush1.bf16.msra.mxu0 %v12384_v5  ;;  %2403 = vmatpush1.bf16.msra.mxu1 %v12387_v6  ;;  %v12468_v5 = vld [vmem:[#allocation4 + $0x980] ss:$16 sps:$4 sm:$0xff]   ;;  %v12471_v6 = vld [vmem:[#allocation4 + $0x988] ss:$16 sps:$4 sm:$0xff]  }
 0x31a   :  { %2322 = vmatprep.subr.bf16.mxu0 %v12392_v7  ;;  %2404 = vmatprep.subr.bf16.mxu1 %v12395_v8  ;;  %v12476_v7 = vld [vmem:[#allocation4 + $0x9a4] ss:$16 sps:$4 sm:$0xff]   ;;  %v12479_v8 = vld [vmem:[#allocation4 + $0x9ac] ss:$16 sps:$4 sm:$0xff]  }
 0x31d   :  { %2323 = vmatpush1.bf16.msra.mxu0 %v12390_v10  ;;  %2405 = vmatpush1.bf16.msra.mxu1 %v12393_v11  ;;  %v12477_v10 = vld [vmem:[#allocation4 + $0x9a8] ss:$16 sps:$4 sm:$0xff]   ;;  %v12482_v11 = vld [vmem:[#allocation4 + $0x9c4] ss:$16 sps:$4 sm:$0xff]  }
 0x31e   :  { %3239 = vmatprep.subr.bf16.mxu0 %v12398_v13  ;;  %3321 = vmatprep.subr.bf16.mxu1 %v12401_v14  ;;  %v12480_v13 = vld [vmem:[#allocation4 + $0x9c0] ss:$16 sps:$4 sm:$0xff]   ;;  %v12483_v14 = vld [vmem:[#allocation4 + $0x9c8] ss:$16 sps:$4 sm:$0xff]  }
 0x320   :  { %2325 = vmatmul.mubr.bf16.vlgmr.msra.gmra.mrb[8].mxu0 %v1586_v17  ;;  %2407 = vmatmul.mubr.bf16.vlgmr.msra.gmra.mrb[8].mxu1 %v1586_v17  ;;  %v12486_v17 = vld [vmem:[#allocation4 + $0x9e0] ss:$16 sps:$4 sm:$0xff]  }
 0x321   :  { %3240 = vmatpush1.bf16.msra.mxu0 %v12396_v15  ;;  %3322 = vmatpush1.bf16.msra.mxu1 %v12399_v16  ;;  %v12488_v15 = vld [vmem:[#allocation4 + $0x9e4] ss:$16 sps:$4 sm:$0xff]   ;;  %v12491_v16 = vld [vmem:[#allocation4 + $0x9ec] ss:$16 sps:$4 sm:$0xff]  }
 0x322   :  { %3241 = vmatprep.subr.bf16.mxu0 %v12404_v18  ;;  %3323 = vmatprep.subr.bf16.mxu1 %v12407_v19  ;;  %v12489_v18 = vld [vmem:[#allocation4 + $0x9e8] ss:$16 sps:$4 sm:$0xff]   ;;  %v12494_v19 = vld [vmem:[#allocation4 + $0xa04] ss:$16 sps:$4 sm:$0xff]  }
 0x325   :  { %3242 = vmatpush1.bf16.msra.mxu0 %v12402_v20  ;;  %3324 = vmatpush1.bf16.msra.mxu1 %v12405_v21  ;;  %v12497_v20 = vld [vmem:[#allocation4 + $0xa0c] ss:$16 sps:$4 sm:$0xff]   ;;  %v14500_v21 = vld [vmem:[#allocation13 + $0x2] ss:$8 sm:$0xf] }
 0x326   :  { %3243 = vmatprep.subr.bf16.mxu0 %v12410_v22  ;;  %3325 = vmatprep.subr.bf16.mxu1 %v12413_v23  ;;  %v1594_v22 = vrot.slane %v14500_v21, %v14457_v40  ;;  %v1598_v23 = vrot.slane %v14500_v21, %v14460_v41 }
 0x329   :  { %3244 = vmatpush1.bf16.msra.mxu0 %v12408_v24  ;;  %3326 = vmatpush1.bf16.msra.mxu1 %v12411_v25  ;;  %v1606_v24 = vrot.slane %v14500_v21, %v14467_v52 }
 0x32a   :  { %3245 = vmatprep.subr.bf16.mxu0 %v12416_v26  ;;  %3327 = vmatprep.subr.bf16.mxu1 %v12419_v27 }
 0x32d   :  { %3246 = vmatpush1.bf16.msra.mxu0 %v12414_v28  ;;  %3328 = vmatpush1.bf16.msra.mxu1 %v12417_v31 }
 0x32e   :  { %3247 = vmatprep.subr.bf16.mxu0 %v12422_v32  ;;  %3329 = vmatprep.subr.bf16.mxu1 %v12425_v33 }
 0x331   :  { %3248 = vmatpush1.bf16.msra.mxu0 %v12420_v34  ;;  %3330 = vmatpush1.bf16.msra.mxu1 %v12423_v30 }
 0x332   :  { %3249 = vmatprep.subr.bf16.mxu0 %v12428_v36  ;;  %3331 = vmatprep.subr.bf16.mxu1 %v12431_v37 }
 0x335   :  { %3250 = vmatpush1.bf16.msra.mxu0 %v12426_v42  ;;  %3332 = vmatpush1.bf16.msra.mxu1 %v12429_v43 }
 0x336   :  { %3251 = vmatprep.subr.bf16.mxu0 %v12434_v35  ;;  %3333 = vmatprep.subr.bf16.mxu1 %v12437_v44 }
 0x339   :  { %3252 = vmatpush1.bf16.msra.mxu0 %v12432_v45  ;;  %3334 = vmatpush1.bf16.msra.mxu1 %v12435_v46 }
 0x33a   :  { %3253 = vmatprep.subr.bf16.mxu0 %v12440_v47  ;;  %3335 = vmatprep.subr.bf16.mxu1 %v12443_v39 }
 0x33d   :  { %3254 = vmatpush1.bf16.msra.mxu0 %v12438_v48  ;;  %3336 = vmatpush1.bf16.msra.mxu1 %v12441_v49 }
 0x33e   :  { %3255 = vmatprep.subr.bf16.mxu0 %v12446_v50  ;;  %3337 = vmatprep.subr.bf16.mxu1 %v12449_v51 }
 0x341   :  { %3256 = vmatpush1.bf16.msra.mxu0 %v12444_v53  ;;  %3338 = vmatpush1.bf16.msra.mxu1 %v12447_v54 }
 0x342   :  { %3257 = vmatprep.subr.bf16.mxu0 %v12452_v55  ;;  %3339 = vmatprep.subr.bf16.mxu1 %v12455_v56 }
 0x345   :  { %3258 = vmatpush1.bf16.msra.mxu0 %v12450_v57  ;;  %3340 = vmatpush1.bf16.msra.mxu1 %v12453_v58  ;;  %v12492_v57 = vld [vmem:[#allocation4 + $0xa00] ss:$16 sps:$4 sm:$0xff]   ;;  %v12495_v58 = vld [vmem:[#allocation4 + $0xa08] ss:$16 sps:$4 sm:$0xff]  }
 0x346   :  { %3259 = vmatprep.subr.bf16.mxu0 %v12458_v59  ;;  %3341 = vmatprep.subr.bf16.mxu1 %v12461_v60  ;;  %v12500_v60 = vld [vmem:[#allocation4 + $0xa24] ss:$16 sps:$4 sm:$0xff]  }
 0x349   :  { %3260 = vmatpush1.bf16.msra.mxu0 %v12456_v61  ;;  %3342 = vmatpush1.bf16.msra.mxu1 %v12459_v62  ;;  %v12503_v61 = vld [vmem:[#allocation4 + $0xa2c] ss:$16 sps:$4 sm:$0xff]  }
 0x34a   :  { %3261 = vmatprep.subr.bf16.mxu0 %v12464_v63  ;;  %3343 = vmatprep.subr.bf16.mxu1 %v12467_v0  ;;  %v12498_v63 = vld [vmem:[#allocation4 + $0xa20] ss:$16 sps:$4 sm:$0xff]   ;;  %v12501_v0 = vld [vmem:[#allocation4 + $0xa28] ss:$16 sps:$4 sm:$0xff]  }
 0x34d   :  { %3262 = vmatpush1.bf16.msra.mxu0 %v12462_v1  ;;  %3344 = vmatpush1.bf16.msra.mxu1 %v12465_v2  ;;  %v12506_v1 = vld [vmem:[#allocation4 + $0xa44] ss:$16 sps:$4 sm:$0xff]   ;;  %v12509_v2 = vld [vmem:[#allocation4 + $0xa4c] ss:$16 sps:$4 sm:$0xff]  }
 0x34e   :  { %3263 = vmatprep.subr.bf16.mxu0 %v12470_v3  ;;  %3345 = vmatprep.subr.bf16.mxu1 %v12473_v4  ;;  %v12504_v3 = vld [vmem:[#allocation4 + $0xa40] ss:$16 sps:$4 sm:$0xff]   ;;  %v12507_v4 = vld [vmem:[#allocation4 + $0xa48] ss:$16 sps:$4 sm:$0xff]  }
 0x351   :  { %3264 = vmatpush1.bf16.msra.mxu0 %v12468_v5  ;;  %3346 = vmatpush1.bf16.msra.mxu1 %v12471_v6  ;;  %v12512_v5 = vld [vmem:[#allocation4 + $0xa64] ss:$16 sps:$4 sm:$0xff]   ;;  %v12515_v6 = vld [vmem:[#allocation4 + $0xa6c] ss:$16 sps:$4 sm:$0xff]  }
 0x352   :  { %3265 = vmatprep.subr.bf16.mxu0 %v12476_v7  ;;  %3347 = vmatprep.subr.bf16.mxu1 %v12479_v8  ;;  %v12510_v7 = vld [vmem:[#allocation4 + $0xa60] ss:$16 sps:$4 sm:$0xff]   ;;  %v12513_v8 = vld [vmem:[#allocation4 + $0xa68] ss:$16 sps:$4 sm:$0xff]  }
 0x355   :  { %3266 = vmatpush1.bf16.msra.mxu0 %v12474_v9  ;;  %3348 = vmatpush1.bf16.msra.mxu1 %v12477_v10  ;;  %v12518_v9 = vld [vmem:[#allocation4 + $0xa84] ss:$16 sps:$4 sm:$0xff]   ;;  %v12521_v10 = vld [vmem:[#allocation4 + $0xa8c] ss:$16 sps:$4 sm:$0xff]  }
 0x356   :  { %3267 = vmatprep.subr.bf16.mxu0 %v12482_v11  ;;  %3349 = vmatprep.subr.bf16.mxu1 %v12485_v12  ;;  %v12516_v11 = vld [vmem:[#allocation4 + $0xa80] ss:$16 sps:$4 sm:$0xff]   ;;  %v12519_v12 = vld [vmem:[#allocation4 + $0xa88] ss:$16 sps:$4 sm:$0xff]  }
 0x359   :  { %3268 = vmatpush1.bf16.msra.mxu0 %v12480_v13  ;;  %3350 = vmatpush1.bf16.msra.mxu1 %v12483_v14  ;;  %v12524_v13 = vld [vmem:[#allocation4 + $0xaa4] ss:$16 sps:$4 sm:$0xff]   ;;  %v12527_v14 = vld [vmem:[#allocation4 + $0xaac] ss:$16 sps:$4 sm:$0xff]  }
 0x35a   :  { %3269 = vmatprep.subr.bf16.mxu0 %v12488_v15  ;;  %3351 = vmatprep.subr.bf16.mxu1 %v12491_v16  ;;  %v1602_v15 = vrot.slane %v14500_v21, %v14474_v29  ;;  %v12522_v16 = vld [vmem:[#allocation4 + $0xaa0] ss:$16 sps:$4 sm:$0xff]  }
 0x35d   :  { %3270 = vmatpush1.bf16.msra.mxu0 %v12486_v17  ;;  %3352 = vmatpush1.bf16.msra.mxu1 %v12489_v18  ;;  %v12525_v17 = vld [vmem:[#allocation4 + $0xaa8] ss:$16 sps:$4 sm:$0xff]   ;;  %v12530_v18 = vld [vmem:[#allocation4 + $0xac4] ss:$16 sps:$4 sm:$0xff]  }
 0x35e   :  { %3280 = vmatprep.subr.bf16.mxu0 %v12494_v19  ;;  %3362 = vmatprep.subr.bf16.mxu1 %v12497_v20  ;;  %v12533_v19 = vld [vmem:[#allocation4 + $0xacc] ss:$16 sps:$4 sm:$0xff]  }
 0x3f3   :  { %v2326_v25 = vpop.f32.mrb[8].mxu0  ;;  %v14508_v26 = vpop.f32.mrb[8].mxu1 }
 0x3f4   :  { %v11847_v27 = vadd.f32 %v2326_v25, %v1594_v22  ;;  %v2328_v28 = vpop.f32.mrb[9].mxu0  ;;  %v2410_v31 = vpop.f32.mrb[9].mxu1  ;;  %v14513_v20 = vadd.f32 %v14508_v26, %v1602_v15  ;;  %v12528_v22 = vld [vmem:[#allocation4 + $0xac0] ss:$16 sps:$4 sm:$0xff]   ;;  %v12539_v25 = vld [vmem:[#allocation4 + $0xaec] ss:$16 sps:$4 sm:$0xff]  }
 0x3f5   :  { %v11848_v32 = vadd.f32 %v2328_v28, %v1598_v23  ;;  %v11850_v33 = vadd.f32 %v2410_v31, %v1606_v24  ;;  %v2330_v34 = vpop.f32.mrb[10].mxu0  ;;  %v2412_v30 = vpop.f32.mrb[10].mxu1  ;;  %v12531_v23 = vld [vmem:[#allocation4 + $0xac8] ss:$16 sps:$4 sm:$0xff]   ;;  %v12536_v24 = vld [vmem:[#allocation4 + $0xae4] ss:$16 sps:$4 sm:$0xff]  }
 0x3f6   :  { %v10731_v36 = vmul.f32 -1.442695, %v11847_v27  ;;  %v2331_v37 = vpop.f32.mrb[11].mxu0  ;;  %v2413_v42 = vpop.f32.mrb[11].mxu1  ;;  %v10733_v21 = vmul.f32 -1.442695, %v14513_v20 }
 0x3f7   :  { %v10732_v43 = vmul.f32 -1.442695, %v11848_v32  ;;  %v10734_v35 = vmul.f32 -1.442695, %v11850_v33  ;;  %v12537_v28 = vld [vmem:[#allocation4 + $0xae8] ss:$16 sps:$4 sm:$0xff]  }
 0x3f8   :  { %13916 = vpow2.f32 %v10731_v36  ;;  %v12542_v31 = vld [vmem:[#allocation4 + $0xb04] ss:$16 sps:$4 sm:$0xff]   ;;  %v12540_v26 = vld [vmem:[#allocation4 + $0xb00] ss:$16 sps:$4 sm:$0xff]   ;;  %v12551_v30 = vld [vmem:[#allocation4 + $0xb2c] ss:$16 sps:$4 sm:$0xff]  }
 0x3f9   :  { %13918 = vpow2.f32 %v10732_v43  ;;  %v12548_v34 = vld [vmem:[#allocation4 + $0xb24] ss:$16 sps:$4 sm:$0xff]   ;;  %v12546_v36 = vld [vmem:[#allocation4 + $0xb20] ss:$16 sps:$4 sm:$0xff]   ;;  %v12549_v37 = vld [vmem:[#allocation4 + $0xb28] ss:$16 sps:$4 sm:$0xff]  }
 0x3fa   :  { %13920 = vpow2.f32 %v10734_v35  ;;  %v12554_v42 = vld [vmem:[#allocation4 + $0xb44] ss:$16 sps:$4 sm:$0xff]   ;;  %v12557_v43 = vld [vmem:[#allocation4 + $0xb4c] ss:$16 sps:$4 sm:$0xff]   ;;  %v12552_v35 = vld [vmem:[#allocation4 + $0xb40] ss:$16 sps:$4 sm:$0xff]  }
 0x3fb   :  { %v12605_v15 = vld [vmem:[#allocation6 + $0x6c] ss:$24 sps:$4 sm:$0xff]  }
 0x402   :  { %v13917_v44 = vpop.eup %13916 }
 0x403   :  { %v2427_v45 = vadd.f32 1.0, %v13917_v44  ;;  %v13919_v46 = vpop.eup %13918  ;;  %v12555_v44 = vld [vmem:[#allocation4 + $0xb48] ss:$16 sps:$4 sm:$0xff]  }
 0x404   :  { %v13921_v47 = vpop.eup %13920  ;;  %v2428_v39 = vadd.f32 1.0, %v13919_v46  ;;  %v12560_v46 = vld [vmem:[#allocation4 + $0xb64] ss:$16 sps:$4 sm:$0xff]  }
 0x405   :  { %13922 = vrcp.f32 %v2427_v45  ;;  %v2430_v48 = vadd.f32 1.0, %v13921_v47  ;;  %v12563_v47 = vld [vmem:[#allocation4 + $0xb6c] ss:$16 sps:$4 sm:$0xff]  }
 0x406   :  { %13924 = vrcp.f32 %v2428_v39 }
 0x407   :  { %13926 = vrcp.f32 %v2430_v48  ;;  %v12558_v48 = vld [vmem:[#allocation4 + $0xb60] ss:$16 sps:$4 sm:$0xff]  }
 0x408   :  { %13928 = vpow2.f32 %v10733_v21  ;;  %v12615_v21 = vld [vmem:[#allocation6 + $0xc8] ss:$24 sps:$4 sm:$0xff]  }
 0x40f   :  { %v13923_v49 = vpop.eup %13922 }
 0x410   :  { %v13925_v50 = vpop.eup %13924  ;;  %v2439_v51 = vmul.f32 %v13923_v49, %v11847_v27  ;;  %v12534_v27 = vld [vmem:[#allocation4 + $0xae0] ss:$16 sps:$4 sm:$0xff]   ;;  %v12561_v49 = vld [vmem:[#allocation4 + $0xb68] ss:$16 sps:$4 sm:$0xff]  }
 0x411   :  { %v13927_v53 = vpop.eup %13926  ;;  %v2440_v54 = vmul.f32 %v13925_v50, %v11848_v32  ;;  %v12545_v32 = vld [vmem:[#allocation4 + $0xb0c] ss:$16 sps:$4 sm:$0xff]   ;;  %v12566_v50 = vld [vmem:[#allocation4 + $0xb84] ss:$16 sps:$4 sm:$0xff]  }
 0x412   :  { %v2442_v55 = vmul.f32 %v13927_v53, %v11850_v33  ;;  %v2572_v59 = vpack.c.bf16 %v2439_v51, %v2439_v51  ;;  %v12543_v33 = vld [vmem:[#allocation4 + $0xb08] ss:$16 sps:$4 sm:$0xff]   ;;  %v13929_v45 = vpop.eup %13928  ;;  %v12569_v51 = vld [vmem:[#allocation4 + $0xb8c] ss:$16 sps:$4 sm:$0xff]   ;;  %v12564_v53 = vld [vmem:[#allocation4 + $0xb80] ss:$16 sps:$4 sm:$0xff]  }
 0x413   :  { %v2573_v56 = vpack.c.bf16 %v2440_v54, %v2440_v54  ;;  %v2429_v39 = vadd.f32 1.0, %v13929_v45  ;;  %v12567_v54 = vld [vmem:[#allocation4 + $0xb88] ss:$16 sps:$4 sm:$0xff]  }
 0x414   :  { %v2575_v62 = vpack.c.bf16 %v2442_v55, %v2442_v55  ;;  %v12572_v55 = vld [vmem:[#allocation4 + $0xba4] ss:$16 sps:$4 sm:$0xff]   ;;  %v12636_v45 = vld [vmem:[#allocation6 + $0x180] ss:$24 sps:$4 sm:$0xff]  }
 0x415   :  { %3271 = vmatprep.mubr.bf16.mxu0 %v2573_v56  ;;  %3353 = vmatprep.mubr.bf16.mxu1 %v2573_v56  ;;  %13930 = vrcp.f32 %v2429_v39  ;;  %v12575_v56 = vld [vmem:[#allocation4 + $0xbac] ss:$16 sps:$4 sm:$0xff]  }
 0x416   :  { %3272 = vmatmul.mubr.bf16.vlgmr.msra.gmra.mrb[12].mxu0 %v2572_v59  ;;  %3354 = vmatmul.mubr.bf16.vlgmr.msra.gmra.mrb[12].mxu1 %v2572_v59  ;;  %v12578_v59 = vld [vmem:[#allocation4 + $0xbc4] ss:$16 sps:$4 sm:$0xff]  }
 0x417   :  { %3281 = vmatpush1.bf16.msra.mxu0 %v12492_v57  ;;  %3363 = vmatpush1.bf16.msra.mxu1 %v12495_v58  ;;  %v12570_v57 = vld [vmem:[#allocation4 + $0xba0] ss:$16 sps:$4 sm:$0xff]   ;;  %v12573_v58 = vld [vmem:[#allocation4 + $0xba8] ss:$16 sps:$4 sm:$0xff]   ;;  %v12647_v39 = vld [vmem:[#allocation6 + $0x1bc] ss:$24 sps:$4 sm:$0xff]  }
 0x418   :  { %3312 = vmatprep.mubr.bf16.mxu0 %v2575_v62  ;;  %3394 = vmatprep.mubr.bf16.mxu1 %v2575_v62  ;;  %v12579_v62 = vld [vmem:[#allocation4 + $0xbc8] ss:$16 sps:$4 sm:$0xff]  }
 0x419   :  { %3282 = vmatprep.subr.bf16.mxu0 %v12500_v60  ;;  %3364 = vmatprep.subr.bf16.mxu1 %v12503_v61  ;;  %v12581_v60 = vld [vmem:[#allocation4 + $0xbcc] ss:$16 sps:$4 sm:$0xff]   ;;  %v12576_v61 = vld [vmem:[#allocation4 + $0xbc0] ss:$16 sps:$4 sm:$0xff]  }
 0x41b   :  { %3283 = vmatpush1.bf16.msra.mxu0 %v12498_v63  ;;  %3365 = vmatpush1.bf16.msra.mxu1 %v12501_v0  ;;  %v12584_v63 = vld [vmem:[#allocation4 + $0xbe4] ss:$16 sps:$4 sm:$0xff]   ;;  %v12587_v0 = vld [vmem:[#allocation4 + $0xbec] ss:$16 sps:$4 sm:$0xff]  }
 0x41c   :  { %3284 = vmatprep.subr.bf16.mxu0 %v12506_v1  ;;  %3366 = vmatprep.subr.bf16.mxu1 %v12509_v2  ;;  %v12582_v2 = vld [vmem:[#allocation4 + $0xbe0] ss:$16 sps:$4 sm:$0xff]  }
 0x41f   :  { %3285 = vmatpush1.bf16.msra.mxu0 %v12504_v3  ;;  %3367 = vmatpush1.bf16.msra.mxu1 %v12507_v4  ;;  %v13931_v1 = vpop.eup %13930  ;;  %v12585_v3 = vld [vmem:[#allocation4 + $0xbe8] ss:$16 sps:$4 sm:$0xff]  }
 0x420   :  { %3286 = vmatprep.subr.bf16.mxu0 %v12512_v5  ;;  %3368 = vmatprep.subr.bf16.mxu1 %v12515_v6  ;;  %v2441_v4 = vmul.f32 %v13931_v1, %v14513_v20  ;;  %v12590_v5 = vld [vmem:[#allocation6 + $0x4] ss:$24 sps:$4 sm:$0xff]   ;;  %v12606_v20 = vld [vmem:[#allocation6 + $0x90] ss:$24 sps:$4 sm:$0xff]  }
 0x421   :  { %v12593_v6 = vld [vmem:[#allocation6 + $0xc] ss:$24 sps:$4 sm:$0xff]   ;;  %v12666_v1 = vld [vmem:[#allocation6 + $0x270] ss:$24 sps:$4 sm:$0xff]  }
 0x423   :  { %3287 = vmatpush1.bf16.msra.mxu0 %v12510_v7  ;;  %3369 = vmatpush1.bf16.msra.mxu1 %v12513_v8  ;;  %v12588_v7 = vld [vmem:[#allocation6] ss:$24 sps:$4 sm:$0xff]  }
 0x424   :  { %3288 = vmatprep.subr.bf16.mxu0 %v12518_v9  ;;  %3370 = vmatprep.subr.bf16.mxu1 %v12521_v10  ;;  %v12591_v8 = vld [vmem:[#allocation6 + $0x8] ss:$24 sps:$4 sm:$0xff]   ;;  %v2574_v9 = vpack.c.bf16 %v2441_v4, %v2441_v4  ;;  %v12596_v10 = vld [vmem:[#allocation6 + $0x34] ss:$24 sps:$4 sm:$0xff]  }
 0x425   :  { %v12677_v4 = vld [vmem:[#allocation6 + $0x2ac] ss:$24 sps:$4 sm:$0xff]  }
 0x427   :  { %3289 = vmatpush1.bf16.msra.mxu0 %v12516_v11  ;;  %3371 = vmatpush1.bf16.msra.mxu1 %v12519_v12  ;;  %v12599_v11 = vld [vmem:[#allocation6 + $0x3c] ss:$24 sps:$4 sm:$0xff]   ;;  %v12594_v12 = vld [vmem:[#allocation6 + $0x30] ss:$24 sps:$4 sm:$0xff]  }
 0x428   :  { %3290 = vmatprep.subr.bf16.mxu0 %v12524_v13  ;;  %3372 = vmatprep.subr.bf16.mxu1 %v12527_v14  ;;  %v12597_v13 = vld [vmem:[#allocation6 + $0x38] ss:$24 sps:$4 sm:$0xff]   ;;  %v12602_v14 = vld [vmem:[#allocation6 + $0x64] ss:$24 sps:$4 sm:$0xff]  }
 0x42b   :  { %3291 = vmatpush1.bf16.msra.mxu0 %v12522_v16  ;;  %3373 = vmatpush1.bf16.msra.mxu1 %v12525_v17  ;;  %v12600_v16 = vld [vmem:[#allocation6 + $0x60] ss:$24 sps:$4 sm:$0xff]  }
 0x42c   :  { %3292 = vmatprep.subr.bf16.mxu0 %v12530_v18  ;;  %3374 = vmatprep.subr.bf16.mxu1 %v12533_v19  ;;  %v12603_v17 = vld [vmem:[#allocation6 + $0x68] ss:$24 sps:$4 sm:$0xff]   ;;  %v12608_v18 = vld [vmem:[#allocation6 + $0x94] ss:$24 sps:$4 sm:$0xff]  }
 0x42d   :  { %v12611_v19 = vld [vmem:[#allocation6 + $0x9c] ss:$24 sps:$4 sm:$0xff]  }
 0x42f   :  { %3293 = vmatpush1.bf16.msra.mxu0 %v12528_v22  ;;  %3375 = vmatpush1.bf16.msra.mxu1 %v12531_v23  ;;  %v12609_v22 = vld [vmem:[#allocation6 + $0x98] ss:$24 sps:$4 sm:$0xff]   ;;  %v12614_v23 = vld [vmem:[#allocation6 + $0xc4] ss:$24 sps:$4 sm:$0xff]  }
 0x430   :  { %3294 = vmatprep.subr.bf16.mxu0 %v12536_v24  ;;  %3376 = vmatprep.subr.bf16.mxu1 %v12539_v25  ;;  %v12617_v24 = vld [vmem:[#allocation6 + $0xcc] ss:$24 sps:$4 sm:$0xff]   ;;  %v12612_v25 = vld [vmem:[#allocation6 + $0xc0] ss:$24 sps:$4 sm:$0xff]  }
 0x433   :  { %3295 = vmatpush1.bf16.msra.mxu0 %v12534_v27  ;;  %3377 = vmatpush1.bf16.msra.mxu1 %v12537_v28  ;;  %v12620_v27 = vld [vmem:[#allocation6 + $0xf4] ss:$24 sps:$4 sm:$0xff]  }
 0x434   :  { %3296 = vmatprep.subr.bf16.mxu0 %v12542_v31  ;;  %3378 = vmatprep.subr.bf16.mxu1 %v12545_v32  ;;  %v12623_v28 = vld [vmem:[#allocation6 + $0xfc] ss:$24 sps:$4 sm:$0xff]   ;;  %v12618_v31 = vld [vmem:[#allocation6 + $0xf0] ss:$24 sps:$4 sm:$0xff]  }
 0x435   :  { %v12621_v32 = vld [vmem:[#allocation6 + $0xf8] ss:$24 sps:$4 sm:$0xff]  }
 0x437   :  { %3297 = vmatpush1.bf16.msra.mxu0 %v12540_v26  ;;  %3379 = vmatpush1.bf16.msra.mxu1 %v12543_v33  ;;  %v12626_v26 = vld [vmem:[#allocation6 + $0x124] ss:$24 sps:$4 sm:$0xff]  }
 0x438   :  { %3298 = vmatprep.subr.bf16.mxu0 %v12548_v34  ;;  %3380 = vmatprep.subr.bf16.mxu1 %v12551_v30  ;;  %v12629_v33 = vld [vmem:[#allocation6 + $0x12c] ss:$24 sps:$4 sm:$0xff]   ;;  %v12624_v34 = vld [vmem:[#allocation6 + $0x120] ss:$24 sps:$4 sm:$0xff]  }
 0x439   :  { %v12627_v30 = vld [vmem:[#allocation6 + $0x128] ss:$24 sps:$4 sm:$0xff]  }
 0x43b   :  { %3299 = vmatpush1.bf16.msra.mxu0 %v12546_v36  ;;  %3381 = vmatpush1.bf16.msra.mxu1 %v12549_v37  ;;  %v12632_v36 = vld [vmem:[#allocation6 + $0x154] ss:$24 sps:$4 sm:$0xff]  }
 0x43c   :  { %3300 = vmatprep.subr.bf16.mxu0 %v12554_v42  ;;  %3382 = vmatprep.subr.bf16.mxu1 %v12557_v43  ;;  %v12635_v37 = vld [vmem:[#allocation6 + $0x15c] ss:$24 sps:$4 sm:$0xff]   ;;  %v12630_v42 = vld [vmem:[#allocation6 + $0x150] ss:$24 sps:$4 sm:$0xff]  }
 0x43d   :  { %v12633_v43 = vld [vmem:[#allocation6 + $0x158] ss:$24 sps:$4 sm:$0xff]  }
 0x43f   :  { %3301 = vmatpush1.bf16.msra.mxu0 %v12552_v35  ;;  %3383 = vmatpush1.bf16.msra.mxu1 %v12555_v44  ;;  %v12638_v35 = vld [vmem:[#allocation6 + $0x184] ss:$24 sps:$4 sm:$0xff]  }
 0x440   :  { %3302 = vmatprep.subr.bf16.mxu0 %v12560_v46  ;;  %3384 = vmatprep.subr.bf16.mxu1 %v12563_v47  ;;  %v12641_v44 = vld [vmem:[#allocation6 + $0x18c] ss:$24 sps:$4 sm:$0xff]   ;;  %v12639_v46 = vld [vmem:[#allocation6 + $0x188] ss:$24 sps:$4 sm:$0xff]  }
 0x441   :  { %v12644_v47 = vld [vmem:[#allocation6 + $0x1b4] ss:$24 sps:$4 sm:$0xff]  }
 0x443   :  { %3303 = vmatpush1.bf16.msra.mxu0 %v12558_v48  ;;  %3385 = vmatpush1.bf16.msra.mxu1 %v12561_v49  ;;  %v12642_v48 = vld [vmem:[#allocation6 + $0x1b0] ss:$24 sps:$4 sm:$0xff]  }
 0x444   :  { %3304 = vmatprep.subr.bf16.mxu0 %v12566_v50  ;;  %3386 = vmatprep.subr.bf16.mxu1 %v12569_v51  ;;  %v12645_v49 = vld [vmem:[#allocation6 + $0x1b8] ss:$24 sps:$4 sm:$0xff]   ;;  %v12650_v50 = vld [vmem:[#allocation6 + $0x1e4] ss:$24 sps:$4 sm:$0xff]  }
 0x445   :  { %v12653_v51 = vld [vmem:[#allocation6 + $0x1ec] ss:$24 sps:$4 sm:$0xff]  }
 0x447   :  { %3305 = vmatpush1.bf16.msra.mxu0 %v12564_v53  ;;  %3387 = vmatpush1.bf16.msra.mxu1 %v12567_v54  ;;  %v12648_v53 = vld [vmem:[#allocation6 + $0x1e0] ss:$24 sps:$4 sm:$0xff]  }
 0x448   :  { %3306 = vmatprep.subr.bf16.mxu0 %v12572_v55  ;;  %3388 = vmatprep.subr.bf16.mxu1 %v12575_v56  ;;  %v12651_v54 = vld [vmem:[#allocation6 + $0x1e8] ss:$24 sps:$4 sm:$0xff]   ;;  %v12656_v55 = vld [vmem:[#allocation6 + $0x214] ss:$24 sps:$4 sm:$0xff]  }
 0x449   :  { %v12659_v56 = vld [vmem:[#allocation6 + $0x21c] ss:$24 sps:$4 sm:$0xff]  }
 0x44b   :  { %3307 = vmatpush1.bf16.msra.mxu0 %v12570_v57  ;;  %3389 = vmatpush1.bf16.msra.mxu1 %v12573_v58  ;;  %v12654_v57 = vld [vmem:[#allocation6 + $0x210] ss:$24 sps:$4 sm:$0xff]  }
 0x44c   :  { %3308 = vmatprep.subr.bf16.mxu0 %v12578_v59  ;;  %3390 = vmatprep.subr.bf16.mxu1 %v12581_v60  ;;  %v12657_v58 = vld [vmem:[#allocation6 + $0x218] ss:$24 sps:$4 sm:$0xff]   ;;  %v12662_v59 = vld [vmem:[#allocation6 + $0x244] ss:$24 sps:$4 sm:$0xff]  }
 0x44d   :  { %v12665_v60 = vld [vmem:[#allocation6 + $0x24c] ss:$24 sps:$4 sm:$0xff]  }
 0x44f   :  { %3309 = vmatpush1.bf16.msra.mxu0 %v12576_v61  ;;  %3391 = vmatpush1.bf16.msra.mxu1 %v12579_v62  ;;  %v12660_v61 = vld [vmem:[#allocation6 + $0x240] ss:$24 sps:$4 sm:$0xff]  }
 0x450   :  { %3310 = vmatprep.subr.bf16.mxu0 %v12584_v63  ;;  %3392 = vmatprep.subr.bf16.mxu1 %v12587_v0  ;;  %v12663_v62 = vld [vmem:[#allocation6 + $0x248] ss:$24 sps:$4 sm:$0xff]   ;;  %v12668_v63 = vld [vmem:[#allocation6 + $0x274] ss:$24 sps:$4 sm:$0xff]  }
 0x451   :  { %v12671_v0 = vld [vmem:[#allocation6 + $0x27c] ss:$24 sps:$4 sm:$0xff]  }
 0x453   :  { %3311 = vmatpush1.bf16.msra.mxu0 %v12582_v2  ;;  %3393 = vmatpush1.bf16.msra.mxu1 %v12585_v3  ;;  %v12669_v2 = vld [vmem:[#allocation6 + $0x278] ss:$24 sps:$4 sm:$0xff]   ;;  %v12674_v3 = vld [vmem:[#allocation6 + $0x2a4] ss:$24 sps:$4 sm:$0xff]  }
 0x454   :  { %4622 = vmatprep.subr.bf16.mxu0 %v12590_v5  ;;  %4704 = vmatprep.subr.bf16.mxu1 %v12593_v6  ;;  %v12672_v5 = vld [vmem:[#allocation6 + $0x2a0] ss:$24 sps:$4 sm:$0xff]  }
 0x455   :  { %v12675_v6 = vld [vmem:[#allocation6 + $0x2a8] ss:$24 sps:$4 sm:$0xff]  }
 0x456   :  { %3313 = vmatmul.mubr.bf16.vlgmr.msra.gmra.mrb[12].mxu0 %v2574_v9  ;;  %3395 = vmatmul.mubr.bf16.vlgmr.msra.gmra.mrb[12].mxu1 %v2574_v9  ;;  %v12678_v9 = vld [vmem:[#allocation6 + $0x2d0] ss:$24 sps:$4 sm:$0xff]  }
 0x457   :  { %4623 = vmatpush1.bf16.msra.mxu0 %v12588_v7  ;;  %4705 = vmatpush1.bf16.msra.mxu1 %v12591_v8  ;;  %v12680_v7 = vld [vmem:[#allocation6 + $0x2d4] ss:$24 sps:$4 sm:$0xff]  }
 0x458   :  { %4624 = vmatprep.subr.bf16.mxu0 %v12596_v10  ;;  %4706 = vmatprep.subr.bf16.mxu1 %v12599_v11  ;;  %v12683_v8 = vld [vmem:[#allocation6 + $0x2dc] ss:$24 sps:$4 sm:$0xff]   ;;  %v12681_v10 = vld [vmem:[#allocation6 + $0x2d8] ss:$24 sps:$4 sm:$0xff]  }
 0x459   :  { %v12686_v11 = vld [vmem:[#allocation6 + $0x304] ss:$24 sps:$4 sm:$0xff]  }
 0x45b   :  { %4625 = vmatpush1.bf16.msra.mxu0 %v12594_v12  ;;  %4707 = vmatpush1.bf16.msra.mxu1 %v12597_v13  ;;  %v12689_v12 = vld [vmem:[#allocation6 + $0x30c] ss:$24 sps:$4 sm:$0xff]   ;;  %v14517_v13 = vld [vmem:[#allocation13 + $0x3] ss:$8 sm:$0xf] }
 0x45c   :  { %4626 = vmatprep.subr.bf16.mxu0 %v12602_v14  ;;  %4708 = vmatprep.subr.bf16.mxu1 %v12605_v15  ;;  %v2582_v14 = vrot.slane %v14517_v13, %v14457_v40  ;;  %v2586_v15 = vrot.slane %v14517_v13, %v14460_v41 }
 0x45f   :  { %4627 = vmatpush1.bf16.msra.mxu0 %v12600_v16  ;;  %4709 = vmatpush1.bf16.msra.mxu1 %v12603_v17  ;;  %v2594_v16 = vrot.slane %v14517_v13, %v14467_v52 }
 0x460   :  { %4628 = vmatprep.subr.bf16.mxu0 %v12608_v18  ;;  %4710 = vmatprep.subr.bf16.mxu1 %v12611_v19 }
 0x463   :  { %4629 = vmatpush1.bf16.msra.mxu0 %v12606_v20  ;;  %4711 = vmatpush1.bf16.msra.mxu1 %v12609_v22 }
 0x464   :  { %4630 = vmatprep.subr.bf16.mxu0 %v12614_v23  ;;  %4712 = vmatprep.subr.bf16.mxu1 %v12617_v24 }
 0x467   :  { %4631 = vmatpush1.bf16.msra.mxu0 %v12612_v25  ;;  %4713 = vmatpush1.bf16.msra.mxu1 %v12615_v21 }
 0x468   :  { %4632 = vmatprep.subr.bf16.mxu0 %v12620_v27  ;;  %4714 = vmatprep.subr.bf16.mxu1 %v12623_v28 }
 0x46b   :  { %4633 = vmatpush1.bf16.msra.mxu0 %v12618_v31  ;;  %4715 = vmatpush1.bf16.msra.mxu1 %v12621_v32 }
 0x46c   :  { %4634 = vmatprep.subr.bf16.mxu0 %v12626_v26  ;;  %4716 = vmatprep.subr.bf16.mxu1 %v12629_v33 }
 0x46f   :  { %4635 = vmatpush1.bf16.msra.mxu0 %v12624_v34  ;;  %4717 = vmatpush1.bf16.msra.mxu1 %v12627_v30 }
 0x470   :  { %4636 = vmatprep.subr.bf16.mxu0 %v12632_v36  ;;  %4718 = vmatprep.subr.bf16.mxu1 %v12635_v37 }
 0x473   :  { %4637 = vmatpush1.bf16.msra.mxu0 %v12630_v42  ;;  %4719 = vmatpush1.bf16.msra.mxu1 %v12633_v43 }
 0x474   :  { %4638 = vmatprep.subr.bf16.mxu0 %v12638_v35  ;;  %4720 = vmatprep.subr.bf16.mxu1 %v12641_v44 }
 0x477   :  { %4639 = vmatpush1.bf16.msra.mxu0 %v12636_v45  ;;  %4721 = vmatpush1.bf16.msra.mxu1 %v12639_v46 }
 0x478   :  { %4640 = vmatprep.subr.bf16.mxu0 %v12644_v47  ;;  %4722 = vmatprep.subr.bf16.mxu1 %v12647_v39 }
 0x47b   :  { %4641 = vmatpush1.bf16.msra.mxu0 %v12642_v48  ;;  %4723 = vmatpush1.bf16.msra.mxu1 %v12645_v49  ;;  %v12684_v48 = vld [vmem:[#allocation6 + $0x300] ss:$24 sps:$4 sm:$0xff]  }
 0x47c   :  { %4642 = vmatprep.subr.bf16.mxu0 %v12650_v50  ;;  %4724 = vmatprep.subr.bf16.mxu1 %v12653_v51  ;;  %v12687_v49 = vld [vmem:[#allocation6 + $0x308] ss:$24 sps:$4 sm:$0xff]   ;;  %v12692_v51 = vld [vmem:[#allocation6 + $0x334] ss:$24 sps:$4 sm:$0xff]  }
 0x47f   :  { %4643 = vmatpush1.bf16.msra.mxu0 %v12648_v53  ;;  %4725 = vmatpush1.bf16.msra.mxu1 %v12651_v54  ;;  %v12695_v53 = vld [vmem:[#allocation6 + $0x33c] ss:$24 sps:$4 sm:$0xff]  }
 0x480   :  { %4644 = vmatprep.subr.bf16.mxu0 %v12656_v55  ;;  %4726 = vmatprep.subr.bf16.mxu1 %v12659_v56  ;;  %v12690_v55 = vld [vmem:[#allocation6 + $0x330] ss:$24 sps:$4 sm:$0xff]  }
 0x481   :  { %v12693_v56 = vld [vmem:[#allocation6 + $0x338] ss:$24 sps:$4 sm:$0xff]  }
 0x483   :  { %4645 = vmatpush1.bf16.msra.mxu0 %v12654_v57  ;;  %4727 = vmatpush1.bf16.msra.mxu1 %v12657_v58  ;;  %v12698_v57 = vld [vmem:[#allocation6 + $0x364] ss:$24 sps:$4 sm:$0xff]  }
 0x484   :  { %4646 = vmatprep.subr.bf16.mxu0 %v12662_v59  ;;  %4728 = vmatprep.subr.bf16.mxu1 %v12665_v60  ;;  %v12701_v58 = vld [vmem:[#allocation6 + $0x36c] ss:$24 sps:$4 sm:$0xff]   ;;  %v12696_v59 = vld [vmem:[#allocation6 + $0x360] ss:$24 sps:$4 sm:$0xff]  }
 0x485   :  { %v12699_v60 = vld [vmem:[#allocation6 + $0x368] ss:$24 sps:$4 sm:$0xff]  }
 0x487   :  { %4647 = vmatpush1.bf16.msra.mxu0 %v12660_v61  ;;  %4729 = vmatpush1.bf16.msra.mxu1 %v12663_v62  ;;  %v12704_v61 = vld [vmem:[#allocation6 + $0x394] ss:$24 sps:$4 sm:$0xff]  }
 0x488   :  { %4648 = vmatprep.subr.bf16.mxu0 %v12668_v63  ;;  %4730 = vmatprep.subr.bf16.mxu1 %v12671_v0  ;;  %v12707_v62 = vld [vmem:[#allocation6 + $0x39c] ss:$24 sps:$4 sm:$0xff]   ;;  %v12702_v63 = vld [vmem:[#allocation6 + $0x390] ss:$24 sps:$4 sm:$0xff]  }
 0x489   :  { %v12705_v0 = vld [vmem:[#allocation6 + $0x398] ss:$24 sps:$4 sm:$0xff]  }
 0x48b   :  { %4649 = vmatpush1.bf16.msra.mxu0 %v12666_v1  ;;  %4731 = vmatpush1.bf16.msra.mxu1 %v12669_v2  ;;  %v12710_v1 = vld [vmem:[#allocation6 + $0x3c4] ss:$24 sps:$4 sm:$0xff]  }
 0x48c   :  { %4650 = vmatprep.subr.bf16.mxu0 %v12674_v3  ;;  %4732 = vmatprep.subr.bf16.mxu1 %v12677_v4  ;;  %v12713_v2 = vld [vmem:[#allocation6 + $0x3cc] ss:$24 sps:$4 sm:$0xff]   ;;  %v12708_v3 = vld [vmem:[#allocation6 + $0x3c0] ss:$24 sps:$4 sm:$0xff]  }
 0x48d   :  { %v12711_v4 = vld [vmem:[#allocation6 + $0x3c8] ss:$24 sps:$4 sm:$0xff]  }
 0x48f   :  { %4651 = vmatpush1.bf16.msra.mxu0 %v12672_v5  ;;  %4733 = vmatpush1.bf16.msra.mxu1 %v12675_v6  ;;  %v12716_v5 = vld [vmem:[#allocation6 + $0x3f4] ss:$24 sps:$4 sm:$0xff]  }
 0x490   :  { %4652 = vmatprep.subr.bf16.mxu0 %v12680_v7  ;;  %4734 = vmatprep.subr.bf16.mxu1 %v12683_v8  ;;  %v12719_v6 = vld [vmem:[#allocation6 + $0x3fc] ss:$24 sps:$4 sm:$0xff]   ;;  %v2590_v7 = vrot.slane %v14517_v13, %v14474_v29  ;;  %v12714_v8 = vld [vmem:[#allocation6 + $0x3f0] ss:$24 sps:$4 sm:$0xff]  }
 0x493   :  { %4653 = vmatpush1.bf16.msra.mxu0 %v12678_v9  ;;  %4735 = vmatpush1.bf16.msra.mxu1 %v12681_v10  ;;  %v12717_v9 = vld [vmem:[#allocation6 + $0x3f8] ss:$24 sps:$4 sm:$0xff]   ;;  %v12722_v10 = vld [vmem:[#allocation6 + $0x424] ss:$24 sps:$4 sm:$0xff]  }
 0x494   :  { %4663 = vmatprep.subr.bf16.mxu0 %v12686_v11  ;;  %4745 = vmatprep.subr.bf16.mxu1 %v12689_v12  ;;  %v12725_v11 = vld [vmem:[#allocation6 + $0x42c] ss:$24 sps:$4 sm:$0xff]  }
 0x529   :  { %v3314_v17 = vpop.f32.mrb[12].mxu0  ;;  %v14525_v18 = vpop.f32.mrb[12].mxu1 }
 0x52a   :  { %v11851_v19 = vadd.f32 %v3314_v17, %v2582_v14  ;;  %v3316_v20 = vpop.f32.mrb[13].mxu0  ;;  %v3398_v22 = vpop.f32.mrb[13].mxu1  ;;  %v14542_v12 = vadd.f32 %v14525_v18, %v2590_v7  ;;  %v12720_v14 = vld [vmem:[#allocation6 + $0x420] ss:$24 sps:$4 sm:$0xff]   ;;  %v12731_v17 = vld [vmem:[#allocation6 + $0x45c] ss:$24 sps:$4 sm:$0xff]  }
 0x52b   :  { %v11852_v23 = vadd.f32 %v3316_v20, %v2586_v15  ;;  %v11854_v24 = vadd.f32 %v3398_v22, %v2594_v16  ;;  %v3318_v25 = vpop.f32.mrb[14].mxu0  ;;  %v3400_v21 = vpop.f32.mrb[14].mxu1  ;;  %v12723_v15 = vld [vmem:[#allocation6 + $0x428] ss:$24 sps:$4 sm:$0xff]   ;;  %v12728_v16 = vld [vmem:[#allocation6 + $0x454] ss:$24 sps:$4 sm:$0xff]  }
 0x52c   :  { %v10863_v27 = vmul.f32 -1.442695, %v11851_v19  ;;  %v3319_v28 = vpop.f32.mrb[15].mxu0  ;;  %v3401_v31 = vpop.f32.mrb[15].mxu1  ;;  %v10865_v13 = vmul.f32 -1.442695, %v14542_v12 }
 0x52d   :  { %v10864_v32 = vmul.f32 -1.442695, %v11852_v23  ;;  %v10866_v26 = vmul.f32 -1.442695, %v11854_v24  ;;  %v12729_v20 = vld [vmem:[#allocation6 + $0x458] ss:$24 sps:$4 sm:$0xff]  }
 0x52e   :  { %13932 = vpow2.f32 %v10863_v27  ;;  %v12734_v22 = vld [vmem:[#allocation6 + $0x484] ss:$24 sps:$4 sm:$0xff]   ;;  %v12732_v18 = vld [vmem:[#allocation6 + $0x480] ss:$24 sps:$4 sm:$0xff]   ;;  %v12740_v25 = vld [vmem:[#allocation6 + $0x4b4] ss:$24 sps:$4 sm:$0xff]  }
 0x52f   :  { %13934 = vpow2.f32 %v10864_v32  ;;  %v12743_v21 = vld [vmem:[#allocation6 + $0x4bc] ss:$24 sps:$4 sm:$0xff]   ;;  %v12738_v27 = vld [vmem:[#allocation6 + $0x4b0] ss:$24 sps:$4 sm:$0xff]   ;;  %v12749_v32 = vld [vmem:[#allocation6 + $0x4ec] ss:$24 sps:$4 sm:$0xff]  }
 0x530   :  { %13936 = vpow2.f32 %v10866_v26  ;;  %v12741_v28 = vld [vmem:[#allocation6 + $0x4b8] ss:$24 sps:$4 sm:$0xff]   ;;  %v12746_v31 = vld [vmem:[#allocation6 + $0x4e4] ss:$24 sps:$4 sm:$0xff]  }
 0x531   :  { %v12744_v26 = vld [vmem:[#allocation6 + $0x4e0] ss:$24 sps:$4 sm:$0xff]   ;;  %v12881_v7 = vld [vmem:[#allocation7 + $0x14] ss:$8 sps:$4 sm:$0xff]  }
 0x538   :  { %v13933_v33 = vpop.eup %13932 }
 0x539   :  { %v3415_v34 = vadd.f32 1.0, %v13933_v33  ;;  %v13935_v30 = vpop.eup %13934  ;;  %v12747_v33 = vld [vmem:[#allocation6 + $0x4e8] ss:$24 sps:$4 sm:$0xff]  }
 0x53a   :  { %v13937_v36 = vpop.eup %13936  ;;  %v3416_v37 = vadd.f32 1.0, %v13935_v30  ;;  %v12752_v30 = vld [vmem:[#allocation6 + $0x514] ss:$24 sps:$4 sm:$0xff]  }
 0x53b   :  { %13938 = vrcp.f32 %v3415_v34  ;;  %v3418_v42 = vadd.f32 1.0, %v13937_v36  ;;  %v12755_v36 = vld [vmem:[#allocation6 + $0x51c] ss:$24 sps:$4 sm:$0xff]  }
 0x53c   :  { %13940 = vrcp.f32 %v3416_v37 }
 0x53d   :  { %13942 = vrcp.f32 %v3418_v42  ;;  %v12750_v42 = vld [vmem:[#allocation6 + $0x510] ss:$24 sps:$4 sm:$0xff]  }
 0x53e   :  { %13944 = vpow2.f32 %v10865_v13  ;;  %v12890_v13 = vld [vmem:[#allocation7 + $0x44] ss:$8 sps:$4 sm:$0xff]  }
 0x545   :  { %v13939_v43 = vpop.eup %13938 }
 0x546   :  { %v13941_v35 = vpop.eup %13940  ;;  %v3427_v44 = vmul.f32 %v13939_v43, %v11851_v19  ;;  %v12726_v19 = vld [vmem:[#allocation6 + $0x450] ss:$24 sps:$4 sm:$0xff]  }
 0x547   :  { %v13943_v45 = vpop.eup %13942  ;;  %v3428_v46 = vmul.f32 %v13941_v35, %v11852_v23  ;;  %v12737_v23 = vld [vmem:[#allocation6 + $0x48c] ss:$24 sps:$4 sm:$0xff]   ;;  %v12753_v43 = vld [vmem:[#allocation6 + $0x518] ss:$24 sps:$4 sm:$0xff]  }
 0x548   :  { %v3430_v47 = vmul.f32 %v13943_v45, %v11854_v24  ;;  %v14529_v50 = vpack.c.bf16 %v3427_v44, %v3427_v44  ;;  %v12735_v24 = vld [vmem:[#allocation6 + $0x488] ss:$24 sps:$4 sm:$0xff]   ;;  %v13945_v34 = vpop.eup %13944  ;;  %v12758_v35 = vld [vmem:[#allocation6 + $0x544] ss:$24 sps:$4 sm:$0xff]  }
 0x549   :  { %v14527_v39 = vpack.c.bf16 %v3428_v46, %v3428_v46  ;;  %v3417_v37 = vadd.f32 1.0, %v13945_v34  ;;  %v12761_v44 = vld [vmem:[#allocation6 + $0x54c] ss:$24 sps:$4 sm:$0xff]   ;;  %v12756_v45 = vld [vmem:[#allocation6 + $0x540] ss:$24 sps:$4 sm:$0xff]  }
 0x54a   :  { %v14533_v54 = vpack.c.bf16 %v3430_v47, %v3430_v47  ;;  %v12759_v46 = vld [vmem:[#allocation6 + $0x548] ss:$24 sps:$4 sm:$0xff]   ;;  %v12764_v47 = vld [vmem:[#allocation6 + $0x574] ss:$24 sps:$4 sm:$0xff]   ;;  %v12897_v34 = vld [vmem:[#allocation7 + $0x70] ss:$8 sps:$4 sm:$0xff]  }
 0x54b   :  { %4654 = vmatprep.mubr.bf16.mxu0 %v14527_v39  ;;  %4736 = vmatprep.mubr.bf16.mxu1 %v14527_v39  ;;  %13946 = vrcp.f32 %v3417_v37  ;;  %v12807_v37 = vld [vmem:[#allocation6 + $0x1c0] ss:$24 sps:$4 sm:$0xff]  }
 0x54c   :  { %4655 = vmatmul.mubr.bf16.vlgmr.msra.gmra.mrb[16].mxu0 %v14529_v50  ;;  %4737 = vmatmul.mubr.bf16.vlgmr.msra.gmra.mrb[16].mxu1 %v14529_v50 }
 0x54d   :  { %4664 = vmatpush1.bf16.msra.mxu0 %v12684_v48  ;;  %4746 = vmatpush1.bf16.msra.mxu1 %v12687_v49  ;;  %v12767_v48 = vld [vmem:[#allocation6 + $0x57c] ss:$24 sps:$4 sm:$0xff]   ;;  %v12762_v49 = vld [vmem:[#allocation6 + $0x570] ss:$24 sps:$4 sm:$0xff]  }
 0x54e   :  { %4695 = vmatprep.mubr.bf16.mxu0 %v14533_v54  ;;  %4777 = vmatprep.mubr.bf16.mxu1 %v14533_v54 }
 0x54f   :  { %4665 = vmatprep.subr.bf16.mxu0 %v12692_v51  ;;  %4747 = vmatprep.subr.bf16.mxu1 %v12695_v53  ;;  %v12765_v51 = vld [vmem:[#allocation6 + $0x578] ss:$24 sps:$4 sm:$0xff]   ;;  %v12770_v53 = vld [vmem:[#allocation6 + $0x5a4] ss:$24 sps:$4 sm:$0xff]  }
 0x551   :  { %4666 = vmatpush1.bf16.msra.mxu0 %v12690_v55  ;;  %4748 = vmatpush1.bf16.msra.mxu1 %v12693_v56  ;;  %v12773_v55 = vld [vmem:[#allocation6 + $0x5ac] ss:$24 sps:$4 sm:$0xff]   ;;  %v12768_v56 = vld [vmem:[#allocation6 + $0x5a0] ss:$24 sps:$4 sm:$0xff]  }
 0x552   :  { %4667 = vmatprep.subr.bf16.mxu0 %v12698_v57  ;;  %4749 = vmatprep.subr.bf16.mxu1 %v12701_v58  ;;  %v12771_v57 = vld [vmem:[#allocation6 + $0x5a8] ss:$24 sps:$4 sm:$0xff]   ;;  %v12776_v58 = vld [vmem:[#allocation6 + $0x5d4] ss:$24 sps:$4 sm:$0xff]  }
 0x555   :  { %4668 = vmatpush1.bf16.msra.mxu0 %v12696_v59  ;;  %4750 = vmatpush1.bf16.msra.mxu1 %v12699_v60  ;;  %v12779_v59 = vld [vmem:[#allocation6 + $0x5dc] ss:$24 sps:$4 sm:$0xff]   ;;  %v13947_v60 = vpop.eup %13946 }
 0x556   :  { %4669 = vmatprep.subr.bf16.mxu0 %v12704_v61  ;;  %4751 = vmatprep.subr.bf16.mxu1 %v12707_v62  ;;  %v12774_v61 = vld [vmem:[#allocation6 + $0x5d0] ss:$24 sps:$4 sm:$0xff]  }
 0x557   :  { %v12777_v62 = vld [vmem:[#allocation6 + $0x5d8] ss:$24 sps:$4 sm:$0xff]  }
 0x559   :  { %4670 = vmatpush1.bf16.msra.mxu0 %v12702_v63  ;;  %4752 = vmatpush1.bf16.msra.mxu1 %v12705_v0  ;;  %v3429_v63 = vmul.f32 %v13947_v60, %v14542_v12  ;;  %v12782_v0 = vld [vmem:[#allocation6 + $0x14] ss:$24 sps:$4 sm:$0xff]   ;;  %v12791_v12 = vld [vmem:[#allocation6 + $0xa4] ss:$24 sps:$4 sm:$0xff]  }
 0x55a   :  { %4671 = vmatprep.subr.bf16.mxu0 %v12710_v1  ;;  %4753 = vmatprep.subr.bf16.mxu1 %v12713_v2  ;;  %v12780_v1 = vld [vmem:[#allocation6 + $0x10] ss:$24 sps:$4 sm:$0xff]   ;;  %v12836_v60 = vld [vmem:[#allocation6 + $0x374] ss:$24 sps:$4 sm:$0xff]  }
 0x55b   :  { %v14546_v2 = vpack.c.bf16 %v3429_v63, %v3429_v63  ;;  %v12837_v63 = vld [vmem:[#allocation6 + $0x3a0] ss:$24 sps:$4 sm:$0xff]  }
 0x55d   :  { %4672 = vmatpush1.bf16.msra.mxu0 %v12708_v3  ;;  %4754 = vmatpush1.bf16.msra.mxu1 %v12711_v4  ;;  %v12785_v3 = vld [vmem:[#allocation6 + $0x44] ss:$24 sps:$4 sm:$0xff]   ;;  %v12876_v4 = vld [vmem:[#allocation7] ss:$8 sps:$4 sm:$0xff]  }
 0x55e   :  { %4673 = vmatprep.subr.bf16.mxu0 %v12716_v5  ;;  %4755 = vmatprep.subr.bf16.mxu1 %v12719_v6  ;;  %v12878_v5 = vld [vmem:[#allocation7 + $0x4] ss:$8 sps:$4 sm:$0xff]   ;;  %v12783_v6 = vld [vmem:[#allocation6 + $0x40] ss:$24 sps:$4 sm:$0xff]  }
 0x561   :  { %4674 = vmatpush1.bf16.msra.mxu0 %v12714_v8  ;;  %4756 = vmatpush1.bf16.msra.mxu1 %v12717_v9  ;;  %v12788_v8 = vld [vmem:[#allocation6 + $0x74] ss:$24 sps:$4 sm:$0xff]   ;;  %v12879_v9 = vld [vmem:[#allocation7 + $0x10] ss:$8 sps:$4 sm:$0xff]  }
 0x562   :  { %4675 = vmatprep.subr.bf16.mxu0 %v12722_v10  ;;  %4757 = vmatprep.subr.bf16.mxu1 %v12725_v11  ;;  %v12884_v10 = vld [vmem:[#allocation7 + $0x24] ss:$8 sps:$4 sm:$0xff]   ;;  %v12786_v11 = vld [vmem:[#allocation6 + $0x70] ss:$24 sps:$4 sm:$0xff]  }
 0x565   :  { %4676 = vmatpush1.bf16.msra.mxu0 %v12720_v14  ;;  %4758 = vmatpush1.bf16.msra.mxu1 %v12723_v15  ;;  %v12882_v14 = vld [vmem:[#allocation7 + $0x20] ss:$8 sps:$4 sm:$0xff]   ;;  %v12887_v15 = vld [vmem:[#allocation7 + $0x34] ss:$8 sps:$4 sm:$0xff]  }
 0x566   :  { %4677 = vmatprep.subr.bf16.mxu0 %v12728_v16  ;;  %4759 = vmatprep.subr.bf16.mxu1 %v12731_v17  ;;  %v12789_v16 = vld [vmem:[#allocation6 + $0xa0] ss:$24 sps:$4 sm:$0xff]  }
 0x567   :  { %v12885_v17 = vld [vmem:[#allocation7 + $0x30] ss:$8 sps:$4 sm:$0xff]  }
 0x569   :  { %4678 = vmatpush1.bf16.msra.mxu0 %v12726_v19  ;;  %4760 = vmatpush1.bf16.msra.mxu1 %v12729_v20  ;;  %v12792_v19 = vld [vmem:[#allocation6 + $0xd0] ss:$24 sps:$4 sm:$0xff]   ;;  %v12797_v20 = vld [vmem:[#allocation6 + $0x104] ss:$24 sps:$4 sm:$0xff]  }
 0x56a   :  { %4679 = vmatprep.subr.bf16.mxu0 %v12734_v22  ;;  %4761 = vmatprep.subr.bf16.mxu1 %v12737_v23  ;;  %v12888_v22 = vld [vmem:[#allocation7 + $0x40] ss:$8 sps:$4 sm:$0xff]   ;;  %v12893_v23 = vld [vmem:[#allocation7 + $0x54] ss:$8 sps:$4 sm:$0xff]  }
 0x56d   :  { %4680 = vmatpush1.bf16.msra.mxu0 %v12732_v18  ;;  %4762 = vmatpush1.bf16.msra.mxu1 %v12735_v24  ;;  %v12795_v18 = vld [vmem:[#allocation6 + $0x100] ss:$24 sps:$4 sm:$0xff]   ;;  %v12800_v24 = vld [vmem:[#allocation6 + $0x134] ss:$24 sps:$4 sm:$0xff]  }
 0x56e   :  { %4681 = vmatprep.subr.bf16.mxu0 %v12740_v25  ;;  %4763 = vmatprep.subr.bf16.mxu1 %v12743_v21  ;;  %v12891_v25 = vld [vmem:[#allocation7 + $0x50] ss:$8 sps:$4 sm:$0xff]   ;;  %v12896_v21 = vld [vmem:[#allocation7 + $0x64] ss:$8 sps:$4 sm:$0xff]  }
 0x571   :  { %4682 = vmatpush1.bf16.msra.mxu0 %v12738_v27  ;;  %4764 = vmatpush1.bf16.msra.mxu1 %v12741_v28  ;;  %v12798_v27 = vld [vmem:[#allocation6 + $0x130] ss:$24 sps:$4 sm:$0xff]   ;;  %v12803_v28 = vld [vmem:[#allocation6 + $0x164] ss:$24 sps:$4 sm:$0xff]  }
 0x572   :  { %4683 = vmatprep.subr.bf16.mxu0 %v12746_v31  ;;  %4765 = vmatprep.subr.bf16.mxu1 %v12749_v32  ;;  %v12894_v31 = vld [vmem:[#allocation7 + $0x60] ss:$8 sps:$4 sm:$0xff]   ;;  %v12899_v32 = vld [vmem:[#allocation7 + $0x74] ss:$8 sps:$4 sm:$0xff]  }
 0x575   :  { %4684 = vmatpush1.bf16.msra.mxu0 %v12744_v26  ;;  %4766 = vmatpush1.bf16.msra.mxu1 %v12747_v33  ;;  %v12801_v26 = vld [vmem:[#allocation6 + $0x160] ss:$24 sps:$4 sm:$0xff]   ;;  %v12806_v33 = vld [vmem:[#allocation6 + $0x194] ss:$24 sps:$4 sm:$0xff]  }
 0x576   :  { %4685 = vmatprep.subr.bf16.mxu0 %v12752_v30  ;;  %4767 = vmatprep.subr.bf16.mxu1 %v12755_v36  ;;  %v12804_v30 = vld [vmem:[#allocation6 + $0x190] ss:$24 sps:$4 sm:$0xff]   ;;  %v12809_v36 = vld [vmem:[#allocation6 + $0x1c4] ss:$24 sps:$4 sm:$0xff]  }
 0x579   :  { %4686 = vmatpush1.bf16.msra.mxu0 %v12750_v42  ;;  %4768 = vmatpush1.bf16.msra.mxu1 %v12753_v43  ;;  %v12812_v42 = vld [vmem:[#allocation6 + $0x1f4] ss:$24 sps:$4 sm:$0xff]   ;;  %v12810_v43 = vld [vmem:[#allocation6 + $0x1f0] ss:$24 sps:$4 sm:$0xff]  }
 0x57a   :  { %4687 = vmatprep.subr.bf16.mxu0 %v12758_v35  ;;  %4769 = vmatprep.subr.bf16.mxu1 %v12761_v44  ;;  %v12815_v35 = vld [vmem:[#allocation6 + $0x224] ss:$24 sps:$4 sm:$0xff]   ;;  %v12813_v44 = vld [vmem:[#allocation6 + $0x220] ss:$24 sps:$4 sm:$0xff]  }
 0x57d   :  { %4688 = vmatpush1.bf16.msra.mxu0 %v12756_v45  ;;  %4770 = vmatpush1.bf16.msra.mxu1 %v12759_v46  ;;  %v12818_v45 = vld [vmem:[#allocation6 + $0x254] ss:$24 sps:$4 sm:$0xff]   ;;  %v12816_v46 = vld [vmem:[#allocation6 + $0x250] ss:$24 sps:$4 sm:$0xff]  }
 0x57e   :  { %4689 = vmatprep.subr.bf16.mxu0 %v12764_v47  ;;  %4771 = vmatprep.subr.bf16.mxu1 %v12767_v48  ;;  %v12821_v47 = vld [vmem:[#allocation6 + $0x284] ss:$24 sps:$4 sm:$0xff]   ;;  %v12819_v48 = vld [vmem:[#allocation6 + $0x280] ss:$24 sps:$4 sm:$0xff]  }
 0x581   :  { %4690 = vmatpush1.bf16.msra.mxu0 %v12762_v49  ;;  %4772 = vmatpush1.bf16.msra.mxu1 %v12765_v51  ;;  %v12824_v49 = vld [vmem:[#allocation6 + $0x2b4] ss:$24 sps:$4 sm:$0xff]   ;;  %v12822_v51 = vld [vmem:[#allocation6 + $0x2b0] ss:$24 sps:$4 sm:$0xff]  }
 0x582   :  { %4691 = vmatprep.subr.bf16.mxu0 %v12770_v53  ;;  %4773 = vmatprep.subr.bf16.mxu1 %v12773_v55  ;;  %v12827_v53 = vld [vmem:[#allocation6 + $0x2e4] ss:$24 sps:$4 sm:$0xff]   ;;  %v12825_v55 = vld [vmem:[#allocation6 + $0x2e0] ss:$24 sps:$4 sm:$0xff]  }
 0x585   :  { %4692 = vmatpush1.bf16.msra.mxu0 %v12768_v56  ;;  %4774 = vmatpush1.bf16.msra.mxu1 %v12771_v57  ;;  %v12830_v56 = vld [vmem:[#allocation6 + $0x314] ss:$24 sps:$4 sm:$0xff]   ;;  %v12828_v57 = vld [vmem:[#allocation6 + $0x310] ss:$24 sps:$4 sm:$0xff]  }
 0x586   :  { %4693 = vmatprep.subr.bf16.mxu0 %v12776_v58  ;;  %4775 = vmatprep.subr.bf16.mxu1 %v12779_v59  ;;  %v12833_v58 = vld [vmem:[#allocation6 + $0x344] ss:$24 sps:$4 sm:$0xff]   ;;  %v12831_v59 = vld [vmem:[#allocation6 + $0x340] ss:$24 sps:$4 sm:$0xff]  }
 0x589   :  { %4694 = vmatpush1.bf16.msra.mxu0 %v12774_v61  ;;  %4776 = vmatpush1.bf16.msra.mxu1 %v12777_v62  ;;  %v12834_v61 = vld [vmem:[#allocation6 + $0x370] ss:$24 sps:$4 sm:$0xff]   ;;  %v12839_v62 = vld [vmem:[#allocation6 + $0x3a4] ss:$24 sps:$4 sm:$0xff]  }
 0x58a   :  { %4786 = vmatprep.subr.bf16.mxu0 %v12782_v0  ;;  %5117 = vmatprep.subr.bf16.mxu1 %v12878_v5  ;;  %v12842_v0 = vld [vmem:[#allocation6 + $0x3d4] ss:$24 sps:$4 sm:$0xff]   ;;  %v12851_v5 = vld [vmem:[#allocation6 + $0x464] ss:$24 sps:$4 sm:$0xff]  }
 0x58c   :  { %4696 = vmatmul.mubr.bf16.vlgmr.msra.gmra.mrb[16].mxu0 %v14546_v2  ;;  %4778 = vmatmul.mubr.bf16.vlgmr.msra.gmra.mrb[16].mxu1 %v14546_v2 }
 0x58d   :  { %4787 = vmatpush1.bf16.msra.mxu0 %v12780_v1  ;;  %4818 = vmatprep.mubr.bf16.mxu0 %v14527_v39  ;;  %v12794_v39 = vld [vmem:[#allocation6 + $0xd4] ss:$24 sps:$4 sm:$0xff]   ;;  %v12840_v1 = vld [vmem:[#allocation6 + $0x3d0] ss:$24 sps:$4 sm:$0xff]  }
 0x58e   :  { %4788 = vmatprep.subr.bf16.mxu0 %v12785_v3  ;;  %5118 = vmatpush1.bf16.msra.mxu1 %v12876_v4  ;;  %v12845_v3 = vld [vmem:[#allocation6 + $0x404] ss:$24 sps:$4 sm:$0xff]   ;;  %v12848_v4 = vld [vmem:[#allocation6 + $0x434] ss:$24 sps:$4 sm:$0xff]  }
 0x58f   :  { %5119 = vmatprep.subr.bf16.mxu1 %v12881_v7  ;;  %v12900_v7 = vld [vmem:[#allocation7 + $0x80] ss:$8 sps:$4 sm:$0xff]  }
 0x591   :  { %4789 = vmatpush1.bf16.msra.mxu0 %v12783_v6  ;;  %v12902_v6 = vld [vmem:[#allocation7 + $0x84] ss:$8 sps:$4 sm:$0xff]  }
 0x592   :  { %4790 = vmatprep.subr.bf16.mxu0 %v12788_v8  ;;  %5120 = vmatpush1.bf16.msra.mxu1 %v12879_v9  ;;  %v12849_v8 = vld [vmem:[#allocation6 + $0x460] ss:$24 sps:$4 sm:$0xff]   ;;  %v12854_v9 = vld [vmem:[#allocation6 + $0x494] ss:$24 sps:$4 sm:$0xff]  }
 0x593   :  { %5121 = vmatprep.subr.bf16.mxu1 %v12884_v10  ;;  %v12905_v10 = vld [vmem:[#allocation7 + $0x94] ss:$8 sps:$4 sm:$0xff]  }
 0x595   :  { %4791 = vmatpush1.bf16.msra.mxu0 %v12786_v11  ;;  %v12903_v11 = vld [vmem:[#allocation7 + $0x90] ss:$8 sps:$4 sm:$0xff]  }
 0x596   :  { %4792 = vmatprep.subr.bf16.mxu0 %v12791_v12  ;;  %5122 = vmatpush1.bf16.msra.mxu1 %v12882_v14  ;;  %v12852_v12 = vld [vmem:[#allocation6 + $0x490] ss:$24 sps:$4 sm:$0xff]   ;;  %v12857_v14 = vld [vmem:[#allocation6 + $0x4c4] ss:$24 sps:$4 sm:$0xff]  }
 0x597   :  { %5123 = vmatprep.subr.bf16.mxu1 %v12887_v15  ;;  %v12908_v15 = vld [vmem:[#allocation7 + $0xa4] ss:$8 sps:$4 sm:$0xff]  }
 0x599   :  { %4793 = vmatpush1.bf16.msra.mxu0 %v12789_v16  ;;  %v12906_v16 = vld [vmem:[#allocation7 + $0xa0] ss:$8 sps:$4 sm:$0xff]  }
 0x59a   :  { %4794 = vmatprep.subr.bf16.mxu0 %v12794_v39  ;;  %5124 = vmatpush1.bf16.msra.mxu1 %v12885_v17  ;;  %v12855_v39 = vld [vmem:[#allocation6 + $0x4c0] ss:$24 sps:$4 sm:$0xff]   ;;  %v12860_v17 = vld [vmem:[#allocation6 + $0x4f4] ss:$24 sps:$4 sm:$0xff]  }
 0x59b   :  { %5125 = vmatprep.subr.bf16.mxu1 %v12890_v13  ;;  %v12911_v13 = vld [vmem:[#allocation7 + $0xb4] ss:$8 sps:$4 sm:$0xff]  }
 0x59d   :  { %4795 = vmatpush1.bf16.msra.mxu0 %v12792_v19  ;;  %v12909_v19 = vld [vmem:[#allocation7 + $0xb0] ss:$8 sps:$4 sm:$0xff]  }
 0x59e   :  { %4796 = vmatprep.subr.bf16.mxu0 %v12797_v20  ;;  %5126 = vmatpush1.bf16.msra.mxu1 %v12888_v22  ;;  %v12858_v20 = vld [vmem:[#allocation6 + $0x4f0] ss:$24 sps:$4 sm:$0xff]   ;;  %v12863_v22 = vld [vmem:[#allocation6 + $0x524] ss:$24 sps:$4 sm:$0xff]  }
 0x59f   :  { %5127 = vmatprep.subr.bf16.mxu1 %v12893_v23  ;;  %v12914_v23 = vld [vmem:[#allocation7 + $0xc4] ss:$8 sps:$4 sm:$0xff]  }
 0x5a1   :  { %4797 = vmatpush1.bf16.msra.mxu0 %v12795_v18  ;;  %v12912_v18 = vld [vmem:[#allocation7 + $0xc0] ss:$8 sps:$4 sm:$0xff]  }
 0x5a2   :  { %4798 = vmatprep.subr.bf16.mxu0 %v12800_v24  ;;  %5128 = vmatpush1.bf16.msra.mxu1 %v12891_v25  ;;  %v12861_v24 = vld [vmem:[#allocation6 + $0x520] ss:$24 sps:$4 sm:$0xff]   ;;  %v12866_v25 = vld [vmem:[#allocation6 + $0x554] ss:$24 sps:$4 sm:$0xff]  }
 0x5a3   :  { %5129 = vmatprep.subr.bf16.mxu1 %v12896_v21  ;;  %v12917_v21 = vld [vmem:[#allocation7 + $0xd4] ss:$8 sps:$4 sm:$0xff]  }
 0x5a5   :  { %4799 = vmatpush1.bf16.msra.mxu0 %v12798_v27  ;;  %v12915_v27 = vld [vmem:[#allocation7 + $0xd0] ss:$8 sps:$4 sm:$0xff]  }
 0x5a6   :  { %4800 = vmatprep.subr.bf16.mxu0 %v12803_v28  ;;  %5130 = vmatpush1.bf16.msra.mxu1 %v12894_v31  ;;  %v12864_v28 = vld [vmem:[#allocation6 + $0x550] ss:$24 sps:$4 sm:$0xff]   ;;  %v12869_v31 = vld [vmem:[#allocation6 + $0x584] ss:$24 sps:$4 sm:$0xff]  }
 0x5a7   :  { %5131 = vmatprep.subr.bf16.mxu1 %v12899_v32  ;;  %v12920_v32 = vld [vmem:[#allocation7 + $0xe4] ss:$8 sps:$4 sm:$0xff]  }
 0x5a9   :  { %4801 = vmatpush1.bf16.msra.mxu0 %v12801_v26  ;;  %v12918_v26 = vld [vmem:[#allocation7 + $0xe0] ss:$8 sps:$4 sm:$0xff]  }
 0x5aa   :  { %4802 = vmatprep.subr.bf16.mxu0 %v12806_v33  ;;  %5132 = vmatpush1.bf16.msra.mxu1 %v12897_v34  ;;  %v12867_v33 = vld [vmem:[#allocation6 + $0x580] ss:$24 sps:$4 sm:$0xff]   ;;  %v12872_v34 = vld [vmem:[#allocation6 + $0x5b4] ss:$24 sps:$4 sm:$0xff]  }
 0x5ab   :  { %5133 = vmatprep.subr.bf16.mxu1 %v12902_v6 }
 0x5ad   :  { %4803 = vmatpush1.bf16.msra.mxu0 %v12804_v30  ;;  %v12923_v30 = vld [vmem:[#allocation7 + $0xf4] ss:$8 sps:$4 sm:$0xff]  }
 0x5ae   :  { %4804 = vmatprep.subr.bf16.mxu0 %v12809_v36  ;;  %5134 = vmatpush1.bf16.msra.mxu1 %v12900_v7  ;;  %v12921_v36 = vld [vmem:[#allocation7 + $0xf0] ss:$8 sps:$4 sm:$0xff]   ;;  %v12924_v7 = vld [vmem:[#allocation7 + $0x100] ss:$8 sps:$4 sm:$0xff]  }
 0x5af   :  { %5135 = vmatprep.subr.bf16.mxu1 %v12905_v10  ;;  %v12927_v10 = vld [vmem:[#allocation7 + $0x110] ss:$8 sps:$4 sm:$0xff]  }
 0x5b1   :  { %4805 = vmatpush1.bf16.msra.mxu0 %v12807_v37  ;;  %v12870_v37 = vld [vmem:[#allocation6 + $0x5b0] ss:$24 sps:$4 sm:$0xff]  }
 0x5b2   :  { %4806 = vmatprep.subr.bf16.mxu0 %v12812_v42  ;;  %5136 = vmatpush1.bf16.msra.mxu1 %v12903_v11  ;;  %v12875_v42 = vld [vmem:[#allocation6 + $0x5e4] ss:$24 sps:$4 sm:$0xff]  }
 0x5b3   :  { %5137 = vmatprep.subr.bf16.mxu1 %v12908_v15  ;;  %v12932_v11 = vld [vmem:[#allocation7 + $0x124] ss:$8 sps:$4 sm:$0xff]   ;;  %v12933_v15 = vld [vmem:[#allocation7 + $0x130] ss:$8 sps:$4 sm:$0xff]  }
 0x5b5   :  { %4807 = vmatpush1.bf16.msra.mxu0 %v12810_v43  ;;  %v12873_v43 = vld [vmem:[#allocation6 + $0x5e0] ss:$24 sps:$4 sm:$0xff]  }
 0x5b6   :  { %4808 = vmatprep.subr.bf16.mxu0 %v12815_v35  ;;  %5138 = vmatpush1.bf16.msra.mxu1 %v12906_v16  ;;  %v3628_v35 = vld [vmem:[#allocation13 + $0x4] ss:$8 sm:$0xf] }
 0x5b7   :  { %5139 = vmatprep.subr.bf16.mxu1 %v12911_v13  ;;  %v12938_v16 = vld [vmem:[#allocation7 + $0x144] ss:$8 sps:$4 sm:$0xff]   ;;  %v12939_v13 = vld [vmem:[#allocation7 + $0x150] ss:$8 sps:$4 sm:$0xff]  }
 0x5b9   :  { %4809 = vmatpush1.bf16.msra.mxu0 %v12813_v44  ;;  %v3629_v44 = vld [vmem:[#allocation13 + $0x4] ss:$8 sm:$0x30] }
 0x5ba   :  { %4810 = vmatprep.subr.bf16.mxu0 %v12818_v45  ;;  %5140 = vmatpush1.bf16.msra.mxu1 %v12909_v19  ;;  %v14554_v45 = vor.u32 %v3629_v44, %v3628_v35  ;;  %v12944_v19 = vld [vmem:[#allocation7 + $0x164] ss:$8 sps:$4 sm:$0xff]   ;;  %v12966_v44 = vld [vmem:[#allocation7 + $0x1e0] ss:$8 sps:$4 sm:$0xff]  }
 0x5bb   :  { %5141 = vmatprep.subr.bf16.mxu1 %v12914_v23  ;;  %v12945_v23 = vld [vmem:[#allocation7 + $0x170] ss:$8 sps:$4 sm:$0xff]   ;;  %v12968_v35 = vld [vmem:[#allocation7 + $0x1e4] ss:$8 sps:$4 sm:$0xff]  }
 0x5bd   :  { %4811 = vmatpush1.bf16.msra.mxu0 %v12816_v46  ;;  %v3635_v46 = vrot.slane %v14554_v45, %v14457_v40 }
 0x5be   :  { %4812 = vmatprep.subr.bf16.mxu0 %v12821_v47  ;;  %5142 = vmatpush1.bf16.msra.mxu1 %v12912_v18  ;;  %v3639_v47 = vrot.slane %v14554_v45, %v14460_v41  ;;  %v12950_v18 = vld [vmem:[#allocation7 + $0x184] ss:$8 sps:$4 sm:$0xff]  }
 0x5bf   :  { %5143 = vmatprep.subr.bf16.mxu1 %v12917_v21  ;;  %v12951_v21 = vld [vmem:[#allocation7 + $0x190] ss:$8 sps:$4 sm:$0xff]  }
 0x5c1   :  { %4813 = vmatpush1.bf16.msra.mxu0 %v12819_v48 }
 0x5c2   :  { %4814 = vmatprep.subr.bf16.mxu0 %v12824_v49  ;;  %5144 = vmatpush1.bf16.msra.mxu1 %v12915_v27 }
 0x5c3   :  { %5145 = vmatprep.subr.bf16.mxu1 %v12920_v32 }
 0x5c5   :  { %4815 = vmatpush1.bf16.msra.mxu0 %v12822_v51 }
 0x5c6   :  { %4816 = vmatprep.subr.bf16.mxu0 %v12827_v53  ;;  %5146 = vmatpush1.bf16.msra.mxu1 %v12918_v26  ;;  %v12954_v26 = vld [vmem:[#allocation7 + $0x1a0] ss:$8 sps:$4 sm:$0xff]  }
 0x5c7   :  { %5147 = vmatprep.subr.bf16.mxu1 %v12923_v30  ;;  %v12957_v30 = vld [vmem:[#allocation7 + $0x1b0] ss:$8 sps:$4 sm:$0xff]  }
 0x5c9   :  { %4817 = vmatpush1.bf16.msra.mxu0 %v12825_v55 }
 0x5ca   :  { %4827 = vmatprep.subr.bf16.mxu0 %v12830_v56  ;;  %5148 = vmatpush1.bf16.msra.mxu1 %v12921_v36  ;;  %v12962_v36 = vld [vmem:[#allocation7 + $0x1c4] ss:$8 sps:$4 sm:$0xff]  }
 0x5cc   :  { %4819 = vmatmul.mubr.bf16.vlgmr.msra.gmra.mrb[20].mxu0 %v14529_v50  ;;  %v12843_v50 = vld [vmem:[#allocation6 + $0x400] ss:$24 sps:$4 sm:$0xff]  }
 0x5cd   :  { %4828 = vmatpush1.bf16.msra.mxu0 %v12828_v57  ;;  %4859 = vmatprep.mubr.bf16.mxu0 %v14533_v54  ;;  %v12846_v54 = vld [vmem:[#allocation6 + $0x430] ss:$24 sps:$4 sm:$0xff]  }
 0x5ce   :  { %4829 = vmatprep.subr.bf16.mxu0 %v12833_v58 }
 0x5d1   :  { %4830 = vmatpush1.bf16.msra.mxu0 %v12831_v59 }
 0x5d2   :  { %4831 = vmatprep.subr.bf16.mxu0 %v12836_v60 }
 0x5d5   :  { %4832 = vmatpush1.bf16.msra.mxu0 %v12834_v61 }
 0x5d6   :  { %4833 = vmatprep.subr.bf16.mxu0 %v12839_v62 }
 0x5d9   :  { %4834 = vmatpush1.bf16.msra.mxu0 %v12837_v63 }
 0x5da   :  { %4835 = vmatprep.subr.bf16.mxu0 %v12842_v0 }
 0x5dd   :  { %4836 = vmatpush1.bf16.msra.mxu0 %v12840_v1 }
 0x5de   :  { %4837 = vmatprep.subr.bf16.mxu0 %v12845_v3 }
 0x5e1   :  { %4838 = vmatpush1.bf16.msra.mxu0 %v12843_v50 }
 0x5e2   :  { %4839 = vmatprep.subr.bf16.mxu0 %v12848_v4 }
 0x5e5   :  { %4840 = vmatpush1.bf16.msra.mxu0 %v12846_v54 }
 0x5e6   :  { %4841 = vmatprep.subr.bf16.mxu0 %v12851_v5  ;;  %v12926_v5 = vld [vmem:[#allocation7 + $0x104] ss:$8 sps:$4 sm:$0xff]  }
 0x5e7   :  { %5380 = vmatprep.subr.bf16.mxu1 %v12926_v5 }
 0x5e9   :  { %4842 = vmatpush1.bf16.msra.mxu0 %v12849_v8 }
 0x5ea   :  { %4843 = vmatprep.subr.bf16.mxu0 %v12854_v9  ;;  %v12929_v9 = vld [vmem:[#allocation7 + $0x114] ss:$8 sps:$4 sm:$0xff]  }
 0x5ed   :  { %4844 = vmatpush1.bf16.msra.mxu0 %v12852_v12  ;;  %v12930_v12 = vld [vmem:[#allocation7 + $0x120] ss:$8 sps:$4 sm:$0xff]  }
 0x5ee   :  { %4845 = vmatprep.subr.bf16.mxu0 %v12857_v14  ;;  %v12935_v14 = vld [vmem:[#allocation7 + $0x134] ss:$8 sps:$4 sm:$0xff]  }
 0x5f1   :  { %4846 = vmatpush1.bf16.msra.mxu0 %v12855_v39  ;;  %v12936_v39 = vld [vmem:[#allocation7 + $0x140] ss:$8 sps:$4 sm:$0xff]  }
 0x5f2   :  { %4847 = vmatprep.subr.bf16.mxu0 %v12860_v17  ;;  %v12941_v17 = vld [vmem:[#allocation7 + $0x154] ss:$8 sps:$4 sm:$0xff]  }
 0x5f5   :  { %4848 = vmatpush1.bf16.msra.mxu0 %v12858_v20  ;;  %v12942_v20 = vld [vmem:[#allocation7 + $0x160] ss:$8 sps:$4 sm:$0xff]  }
 0x5f6   :  { %4849 = vmatprep.subr.bf16.mxu0 %v12863_v22  ;;  %v12947_v22 = vld [vmem:[#allocation7 + $0x174] ss:$8 sps:$4 sm:$0xff]  }
 0x5f9   :  { %4850 = vmatpush1.bf16.msra.mxu0 %v12861_v24  ;;  %v12948_v24 = vld [vmem:[#allocation7 + $0x180] ss:$8 sps:$4 sm:$0xff]  }
 0x5fa   :  { %4851 = vmatprep.subr.bf16.mxu0 %v12866_v25  ;;  %v12953_v25 = vld [vmem:[#allocation7 + $0x194] ss:$8 sps:$4 sm:$0xff]  }
 0x5fd   :  { %4852 = vmatpush1.bf16.msra.mxu0 %v12864_v28 }
 0x5fe   :  { %4853 = vmatprep.subr.bf16.mxu0 %v12869_v31  ;;  %v12956_v31 = vld [vmem:[#allocation7 + $0x1a4] ss:$8 sps:$4 sm:$0xff]  }
 0x601   :  { %4854 = vmatpush1.bf16.msra.mxu0 %v12867_v33 }
 0x602   :  { %4855 = vmatprep.subr.bf16.mxu0 %v12872_v34  ;;  %v12959_v34 = vld [vmem:[#allocation7 + $0x1b4] ss:$8 sps:$4 sm:$0xff]  }
 0x605   :  { %4856 = vmatpush1.bf16.msra.mxu0 %v12870_v37  ;;  %v12960_v37 = vld [vmem:[#allocation7 + $0x1c0] ss:$8 sps:$4 sm:$0xff]  }
 0x606   :  { %4857 = vmatprep.subr.bf16.mxu0 %v12875_v42  ;;  %v12965_v42 = vld [vmem:[#allocation7 + $0x1d4] ss:$8 sps:$4 sm:$0xff]  }
 0x609   :  { %4858 = vmatpush1.bf16.msra.mxu0 %v12873_v43  ;;  %v12963_v43 = vld [vmem:[#allocation7 + $0x1d0] ss:$8 sps:$4 sm:$0xff]  }
 0x60c   :  { %4860 = vmatmul.mubr.bf16.vlgmr.msra.gmra.mrb[20].mxu0 %v14546_v2 }
 0x65f   :  { %v4697_v48 = vpop.f32.mrb[16].mxu0  ;;  %v14560_v49 = vpop.f32.mrb[16].mxu1 }
 0x660   :  { %v11855_v51 = vadd.f32 %v4697_v48, %v3635_v46  ;;  %v4699_v53 = vpop.f32.mrb[17].mxu0  ;;  %v14562_v55 = vpop.f32.mrb[17].mxu1  ;;  %v12971_v46 = vld [vmem:[#allocation7 + $0x1f4] ss:$8 sps:$4 sm:$0xff]   ;;  %v12972_v48 = vld [vmem:[#allocation7 + $0x200] ss:$8 sps:$4 sm:$0xff]  }
 0x661   :  { %v11856_v56 = vadd.f32 %v4699_v53, %v3639_v47  ;;  %v4701_v57 = vpop.f32.mrb[18].mxu0  ;;  %v4783_v2 = vpop.f32.mrb[18].mxu1  ;;  %v12969_v47 = vld [vmem:[#allocation7 + $0x1f0] ss:$8 sps:$4 sm:$0xff]   ;;  %v12977_v53 = vld [vmem:[#allocation7 + $0x214] ss:$8 sps:$4 sm:$0xff]  }
 0x662   :  { %v11059_v58 = vmul.f32 -1.442695, %v11855_v51  ;;  %v4702_v59 = vpop.f32.mrb[19].mxu0  ;;  %v4784_v60 = vpop.f32.mrb[19].mxu1  ;;  %v12980_v57 = vld [vmem:[#allocation7 + $0x224] ss:$8 sps:$4 sm:$0xff]  }
 0x663   :  { %v11060_v61 = vmul.f32 -1.442695, %v11856_v56  ;;  %v12978_v2 = vld [vmem:[#allocation7 + $0x220] ss:$8 sps:$4 sm:$0xff]   ;;  %v12981_v59 = vld [vmem:[#allocation7 + $0x230] ss:$8 sps:$4 sm:$0xff]  }
 0x664   :  { %13948 = vpow2.f32 %v11059_v58  ;;  %v12983_v58 = vld [vmem:[#allocation7 + $0x234] ss:$8 sps:$4 sm:$0xff]   ;;  %v12986_v60 = vld [vmem:[#allocation7 + $0x244] ss:$8 sps:$4 sm:$0xff]  }
 0x665   :  { %13950 = vpow2.f32 %v11060_v61  ;;  %v12984_v61 = vld [vmem:[#allocation7 + $0x240] ss:$8 sps:$4 sm:$0xff]  }
 0x66e   :  { %v13949_v62 = vpop.eup %13948 }
 0x66f   :  { %v4886_v63 = vadd.f32 1.0, %v13949_v62  ;;  %v13951_v0 = vpop.eup %13950  ;;  %v12989_v62 = vld [vmem:[#allocation7 + $0x254] ss:$8 sps:$4 sm:$0xff]  }
 0x670   :  { %v4887_v1 = vadd.f32 1.0, %v13951_v0  ;;  %v12992_v0 = vld [vmem:[#allocation7 + $0x264] ss:$8 sps:$4 sm:$0xff]  }
 0x671   :  { %13952 = vrcp.f32 %v4886_v63  ;;  %v12987_v63 = vld [vmem:[#allocation7 + $0x250] ss:$8 sps:$4 sm:$0xff]  }
 0x672   :  { %13954 = vrcp.f32 %v4887_v1  ;;  %v12990_v1 = vld [vmem:[#allocation7 + $0x260] ss:$8 sps:$4 sm:$0xff]  }
 0x67b   :  { %v13953_v3 = vpop.eup %13952 }
 0x67c   :  { %v13955_v50 = vpop.eup %13954  ;;  %v4904_v4 = vmul.f32 %v13953_v3, %v11855_v51  ;;  %v12974_v51 = vld [vmem:[#allocation7 + $0x204] ss:$8 sps:$4 sm:$0xff]   ;;  %v12995_v3 = vld [vmem:[#allocation7 + $0x274] ss:$8 sps:$4 sm:$0xff]  }
 0x67d   :  { %v4905_v54 = vmul.f32 %v13955_v50, %v11856_v56  ;;  %5643 = vmatprep.subr.bf16.mxu0 %v12974_v51  ;;  %v12975_v56 = vld [vmem:[#allocation7 + $0x210] ss:$8 sps:$4 sm:$0xff]   ;;  %v13025_v51 = vld [vmem:[#allocation7 + $0x314] ss:$8 sps:$4 sm:$0xff]  }
 0x67e   :  { %v4942_v8 = vpack.c.bf16 %v4904_v4, %v4904_v4  ;;  %5644 = vmatpush1.bf16.msra.mxu0 %v12972_v48  ;;  %v12993_v50 = vld [vmem:[#allocation7 + $0x270] ss:$8 sps:$4 sm:$0xff]   ;;  %v4945_v4 = vld [vmem:[#allocation13 + $0x5] ss:$8 sm:$0x3] }
 0x67f   :  { %v4943_v6 = vpack.c.bf16 %v4905_v54, %v4905_v54  ;;  %5645 = vmatprep.subr.bf16.mxu0 %v12977_v53  ;;  %v4950_v54 = vrot.slane %v4945_v4, %v14457_v40  ;;  %v4954_v5 = vrot.slane %v4945_v4, %v14460_v41  ;;  %v13022_v48 = vld [vmem:[#allocation7 + $0x304] ss:$8 sps:$4 sm:$0xff]   ;;  %v13023_v53 = vld [vmem:[#allocation7 + $0x310] ss:$8 sps:$4 sm:$0xff]  }
 0x681   :  { %5149 = vmatprep.mubr.bf16.mxu1 %v4943_v6 }
 0x682   :  { %5150 = vmatmul.mubr.bf16.vlgmr.msra.gmra.mrb[20].mxu1 %v4942_v8  ;;  %5646 = vmatpush1.bf16.msra.mxu0 %v12975_v56  ;;  %v13028_v56 = vld [vmem:[#allocation7 + $0x324] ss:$8 sps:$4 sm:$0xff]  }
 0x683   :  { %5381 = vmatpush1.bf16.msra.mxu1 %v12924_v7  ;;  %5647 = vmatprep.subr.bf16.mxu0 %v12980_v57  ;;  %v13026_v57 = vld [vmem:[#allocation7 + $0x320] ss:$8 sps:$4 sm:$0xff]  }
 0x684   :  { %5382 = vmatprep.subr.bf16.mxu1 %v12929_v9 }
 0x686   :  { %5648 = vmatpush1.bf16.msra.mxu0 %v12978_v2  ;;  %v13031_v2 = vld [vmem:[#allocation7 + $0x334] ss:$8 sps:$4 sm:$0xff]  }
 0x687   :  { %5383 = vmatpush1.bf16.msra.mxu1 %v12927_v10  ;;  %5649 = vmatprep.subr.bf16.mxu0 %v12983_v58  ;;  %v13029_v58 = vld [vmem:[#allocation7 + $0x330] ss:$8 sps:$4 sm:$0xff]  }
 0x688   :  { %5384 = vmatprep.subr.bf16.mxu1 %v12932_v11 }
 0x68a   :  { %5650 = vmatpush1.bf16.msra.mxu0 %v12981_v59  ;;  %v13034_v59 = vld [vmem:[#allocation7 + $0x344] ss:$8 sps:$4 sm:$0xff]  }
 0x68b   :  { %5385 = vmatpush1.bf16.msra.mxu1 %v12930_v12  ;;  %5651 = vmatprep.subr.bf16.mxu0 %v12986_v60  ;;  %v13032_v60 = vld [vmem:[#allocation7 + $0x340] ss:$8 sps:$4 sm:$0xff]  }
 0x68c   :  { %5386 = vmatprep.subr.bf16.mxu1 %v12935_v14 }
 0x68e   :  { %5652 = vmatpush1.bf16.msra.mxu0 %v12984_v61  ;;  %v13037_v61 = vld [vmem:[#allocation7 + $0x354] ss:$8 sps:$4 sm:$0xff]  }
 0x68f   :  { %5387 = vmatpush1.bf16.msra.mxu1 %v12933_v15  ;;  %5653 = vmatprep.subr.bf16.mxu0 %v12989_v62  ;;  %v13035_v62 = vld [vmem:[#allocation7 + $0x350] ss:$8 sps:$4 sm:$0xff]  }
 0x690   :  { %5388 = vmatprep.subr.bf16.mxu1 %v12938_v16 }
 0x692   :  { %5654 = vmatpush1.bf16.msra.mxu0 %v12987_v63  ;;  %v13040_v63 = vld [vmem:[#allocation7 + $0x364] ss:$8 sps:$4 sm:$0xff]  }
 0x693   :  { %5389 = vmatpush1.bf16.msra.mxu1 %v12936_v39  ;;  %5655 = vmatprep.subr.bf16.mxu0 %v12992_v0  ;;  %v13038_v0 = vld [vmem:[#allocation7 + $0x360] ss:$8 sps:$4 sm:$0xff]  }
 0x694   :  { %5390 = vmatprep.subr.bf16.mxu1 %v12941_v17 }
 0x696   :  { %5656 = vmatpush1.bf16.msra.mxu0 %v12990_v1  ;;  %v13043_v1 = vld [vmem:[#allocation7 + $0x374] ss:$8 sps:$4 sm:$0xff]  }
 0x697   :  { %5391 = vmatpush1.bf16.msra.mxu1 %v12939_v13  ;;  %5657 = vmatprep.subr.bf16.mxu0 %v12995_v3  ;;  %v13041_v3 = vld [vmem:[#allocation7 + $0x370] ss:$8 sps:$4 sm:$0xff]  }
 0x698   :  { %5392 = vmatprep.subr.bf16.mxu1 %v12944_v19 }
 0x69a   :  { %5658 = vmatpush1.bf16.msra.mxu0 %v12993_v50  ;;  %v5208_v50 = vld [vmem:[#allocation13 + $0x6] ss:$8 sm:$0x3] }
 0x69b   :  { %5393 = vmatpush1.bf16.msra.mxu1 %v12942_v20  ;;  %v5213_v4 = vrot.slane %v5208_v50, %v14457_v40 }
 0x69c   :  { %5394 = vmatprep.subr.bf16.mxu1 %v12947_v22 }
 0x69f   :  { %5395 = vmatpush1.bf16.msra.mxu1 %v12945_v23 }
 0x6a0   :  { %5396 = vmatprep.subr.bf16.mxu1 %v12950_v18 }
 0x6a3   :  { %5397 = vmatpush1.bf16.msra.mxu1 %v12948_v24  ;;  %v12998_v24 = vld [vmem:[#allocation7 + $0x284] ss:$8 sps:$4 sm:$0xff]  }
 0x6a4   :  { %5398 = vmatprep.subr.bf16.mxu1 %v12953_v25  ;;  %v12996_v25 = vld [vmem:[#allocation7 + $0x280] ss:$8 sps:$4 sm:$0xff]   ;;  %5659 = vmatprep.subr.bf16.mxu0 %v12998_v24 }
 0x6a5   :  { %5660 = vmatpush1.bf16.msra.mxu0 %v12996_v25  ;;  %v13044_v24 = vld [vmem:[#allocation7 + $0x380] ss:$8 sps:$4 sm:$0xff]   ;;  %v13049_v25 = vld [vmem:[#allocation7 + $0x394] ss:$8 sps:$4 sm:$0xff]  }
 0x6a7   :  { %5399 = vmatpush1.bf16.msra.mxu1 %v12951_v21  ;;  %v13001_v21 = vld [vmem:[#allocation7 + $0x294] ss:$8 sps:$4 sm:$0xff]  }
 0x6a8   :  { %5400 = vmatprep.subr.bf16.mxu1 %v12956_v31  ;;  %v12999_v31 = vld [vmem:[#allocation7 + $0x290] ss:$8 sps:$4 sm:$0xff]   ;;  %5661 = vmatprep.subr.bf16.mxu0 %v13001_v21 }
 0x6a9   :  { %5662 = vmatpush1.bf16.msra.mxu0 %v12999_v31  ;;  %v13047_v21 = vld [vmem:[#allocation7 + $0x390] ss:$8 sps:$4 sm:$0xff]   ;;  %v13052_v31 = vld [vmem:[#allocation7 + $0x3a4] ss:$8 sps:$4 sm:$0xff]  }
 0x6ab   :  { %5401 = vmatpush1.bf16.msra.mxu1 %v12954_v26  ;;  %v13002_v26 = vld [vmem:[#allocation7 + $0x2a0] ss:$8 sps:$4 sm:$0xff]  }
 0x6ac   :  { %5402 = vmatprep.subr.bf16.mxu1 %v12959_v34  ;;  %v13005_v34 = vld [vmem:[#allocation7 + $0x2b0] ss:$8 sps:$4 sm:$0xff]  }
 0x6af   :  { %5403 = vmatpush1.bf16.msra.mxu1 %v12957_v30  ;;  %v13010_v30 = vld [vmem:[#allocation7 + $0x2c4] ss:$8 sps:$4 sm:$0xff]  }
 0x6b0   :  { %5404 = vmatprep.subr.bf16.mxu1 %v12962_v36  ;;  %v13008_v36 = vld [vmem:[#allocation7 + $0x2c0] ss:$8 sps:$4 sm:$0xff]  }
 0x6b3   :  { %5405 = vmatpush1.bf16.msra.mxu1 %v12960_v37  ;;  %v13013_v37 = vld [vmem:[#allocation7 + $0x2d4] ss:$8 sps:$4 sm:$0xff]  }
 0x6b4   :  { %5406 = vmatprep.subr.bf16.mxu1 %v12965_v42  ;;  %v13011_v42 = vld [vmem:[#allocation7 + $0x2d0] ss:$8 sps:$4 sm:$0xff]  }
 0x6b7   :  { %5407 = vmatpush1.bf16.msra.mxu1 %v12963_v43  ;;  %v13016_v43 = vld [vmem:[#allocation7 + $0x2e4] ss:$8 sps:$4 sm:$0xff]  }
 0x6b8   :  { %5408 = vmatprep.subr.bf16.mxu1 %v12968_v35  ;;  %v13014_v35 = vld [vmem:[#allocation7 + $0x2e0] ss:$8 sps:$4 sm:$0xff]  }
 0x6bb   :  { %5409 = vmatpush1.bf16.msra.mxu1 %v12966_v44  ;;  %v13019_v44 = vld [vmem:[#allocation7 + $0x2f4] ss:$8 sps:$4 sm:$0xff]  }
 0x6bc   :  { %5410 = vmatprep.subr.bf16.mxu1 %v12971_v46  ;;  %v13017_v46 = vld [vmem:[#allocation7 + $0x2f0] ss:$8 sps:$4 sm:$0xff]  }
 0x6bf   :  { %5411 = vmatpush1.bf16.msra.mxu1 %v12969_v47  ;;  %v13020_v47 = vld [vmem:[#allocation7 + $0x300] ss:$8 sps:$4 sm:$0xff]  }
 0x6c0   :  { %5906 = vmatprep.subr.bf16.mxu1 %v13022_v48 }
 0x6df   :  { %v14564_v27 = vpop.f32.mrb[20].mxu0 }
 0x6e0   :  { %v14566_v28 = vpop.f32.mrb[21].mxu0 }
 0x6e1   :  { %v4865_v32 = vpop.f32.mrb[22].mxu0 }
 0x6e2   :  { %v4866_v33 = vpop.f32.mrb[23].mxu0  ;;  %v13004_v32 = vld [vmem:[#allocation7 + $0x2a4] ss:$8 sps:$4 sm:$0xff]  }
 0x6e3   :  { %5663 = vmatprep.subr.bf16.mxu0 %v13004_v32  ;;  %v13007_v33 = vld [vmem:[#allocation7 + $0x2b4] ss:$8 sps:$4 sm:$0xff]   ;;  %v13050_v32 = vld [vmem:[#allocation7 + $0x3a0] ss:$8 sps:$4 sm:$0xff]  }
 0x6e4   :  { %5664 = vmatpush1.bf16.msra.mxu0 %v13002_v26  ;;  %v13055_v26 = vld [vmem:[#allocation7 + $0x3b4] ss:$8 sps:$4 sm:$0xff]  }
 0x6e5   :  { %5665 = vmatprep.subr.bf16.mxu0 %v13007_v33  ;;  %v13053_v33 = vld [vmem:[#allocation7 + $0x3b0] ss:$8 sps:$4 sm:$0xff]  }
 0x6e8   :  { %5666 = vmatpush1.bf16.msra.mxu0 %v13005_v34  ;;  %v13058_v34 = vld [vmem:[#allocation7 + $0x3c4] ss:$8 sps:$4 sm:$0xff]  }
 0x6e9   :  { %5667 = vmatprep.subr.bf16.mxu0 %v13010_v30  ;;  %v13056_v30 = vld [vmem:[#allocation7 + $0x3c0] ss:$8 sps:$4 sm:$0xff]  }
 0x6ec   :  { %5668 = vmatpush1.bf16.msra.mxu0 %v13008_v36  ;;  %v13061_v36 = vld [vmem:[#allocation7 + $0x3d4] ss:$8 sps:$4 sm:$0xff]  }
 0x6ed   :  { %5669 = vmatprep.subr.bf16.mxu0 %v13013_v37  ;;  %v13059_v37 = vld [vmem:[#allocation7 + $0x3d0] ss:$8 sps:$4 sm:$0xff]  }
 0x6f0   :  { %5670 = vmatpush1.bf16.msra.mxu0 %v13011_v42  ;;  %v13064_v42 = vld [vmem:[#allocation7 + $0x3e4] ss:$8 sps:$4 sm:$0xff]  }
 0x6f1   :  { %5671 = vmatprep.subr.bf16.mxu0 %v13016_v43  ;;  %v13062_v43 = vld [vmem:[#allocation7 + $0x3e0] ss:$8 sps:$4 sm:$0xff]  }
 0x6f4   :  { %5672 = vmatpush1.bf16.msra.mxu0 %v13014_v35  ;;  %v13067_v35 = vld [vmem:[#allocation7 + $0x3f4] ss:$8 sps:$4 sm:$0xff]  }
 0x6f5   :  { %5673 = vmatprep.subr.bf16.mxu0 %v13019_v44  ;;  %v13065_v44 = vld [vmem:[#allocation7 + $0x3f0] ss:$8 sps:$4 sm:$0xff]  }
 0x6f8   :  { %5674 = vmatpush1.bf16.msra.mxu0 %v13017_v46  ;;  %v13070_v46 = vld [vmem:[#allocation10 + $0x4] ss:$16 sps:$4 sm:$0xff]  }
 0x755   :  { %v5151_v6 = vpop.f32.mrb[20].mxu1 }
 0x756   :  { %v5152_v7 = vadd.f32 %v5151_v6, %v4950_v54  ;;  %v5153_v8 = vpop.f32.mrb[21].mxu1  ;;  %v5217_v54 = vrot.slane %v5208_v50, %v14460_v41 }
 0x757   :  { %v5154_v9 = vadd.f32 %v5153_v8, %v4954_v5  ;;  %v5155_v10 = vpop.f32.mrb[22].mxu1 }
 0x758   :  { %v11097_v11 = vmul.f32 -1.442695, %v5152_v7  ;;  %v5156_v12 = vpop.f32.mrb[23].mxu1 }
 0x759   :  { %v11098_v14 = vmul.f32 -1.442695, %v5154_v9 }
 0x75a   :  { %13956 = vpow2.f32 %v11097_v11 }
 0x75b   :  { %13958 = vpow2.f32 %v11098_v14 }
 0x764   :  { %v13957_v15 = vpop.eup %13956 }
 0x765   :  { %v13959_v16 = vpop.eup %13958  ;;  %v5164_v39 = vadd.f32 1.0, %v13957_v15 }
 0x766   :  { %v5165_v17 = vadd.f32 1.0, %v13959_v16 }
 0x767   :  { %13960 = vrcp.f32 %v5164_v39 }
 0x768   :  { %13962 = vrcp.f32 %v5165_v17 }
 0x771   :  { %v13961_v13 = vpop.eup %13960 }
 0x772   :  { %v13963_v19 = vpop.eup %13962  ;;  %v5170_v20 = vmul.f32 %v13961_v13, %v5152_v7 }
 0x773   :  { %v5171_v22 = vmul.f32 %v13963_v19, %v5154_v9 }
 0x774   :  { %v5205_v18 = vpack.c.bf16 %v5170_v20, %v5170_v20 }
 0x775   :  { %v5206_v23 = vpack.c.bf16 %v5171_v22, %v5171_v22 }
 0x777   :  { %5412 = vmatprep.mubr.bf16.mxu1 %v5206_v23 }
 0x778   :  { %5413 = vmatmul.mubr.bf16.vlgmr.msra.gmra.mrb[24].mxu1 %v5205_v18  ;;  %v13046_v18 = vld [vmem:[#allocation7 + $0x384] ss:$8 sps:$4 sm:$0xff]  }
 0x779   :  { %5907 = vmatpush1.bf16.msra.mxu1 %v13020_v47  ;;  %v3647_v47 = vrot.slane %v14554_v45, %v14467_v52 }
 0x77a   :  { %5908 = vmatprep.subr.bf16.mxu1 %v13025_v51  ;;  %v5471_v51 = vld [vmem:[#allocation13 + $0x7] ss:$8 sm:$0x3] }
 0x77b   :  { %v11858_v48 = vadd.f32 %v14562_v55, %v3647_v47 }
 0x77d   :  { %5909 = vmatpush1.bf16.msra.mxu1 %v13023_v53  ;;  %v11062_v53 = vmul.f32 -1.442695, %v11858_v48 }
 0x77e   :  { %5910 = vmatprep.subr.bf16.mxu1 %v13028_v56  ;;  %v5476_v56 = vrot.slane %v5471_v51, %v14457_v40 }
 0x781   :  { %5911 = vmatpush1.bf16.msra.mxu1 %v13026_v57  ;;  %v5480_v57 = vrot.slane %v5471_v51, %v14460_v41 }
 0x782   :  { %5912 = vmatprep.subr.bf16.mxu1 %v13031_v2 }
 0x785   :  { %5913 = vmatpush1.bf16.msra.mxu1 %v13029_v58 }
 0x786   :  { %5914 = vmatprep.subr.bf16.mxu1 %v13034_v59 }
 0x789   :  { %5915 = vmatpush1.bf16.msra.mxu1 %v13032_v60 }
 0x78a   :  { %5916 = vmatprep.subr.bf16.mxu1 %v13037_v61 }
 0x78d   :  { %5917 = vmatpush1.bf16.msra.mxu1 %v13035_v62 }
 0x78e   :  { %5918 = vmatprep.subr.bf16.mxu1 %v13040_v63 }
 0x791   :  { %5919 = vmatpush1.bf16.msra.mxu1 %v13038_v0 }
 0x792   :  { %5920 = vmatprep.subr.bf16.mxu1 %v13043_v1 }
 0x795   :  { %5921 = vmatpush1.bf16.msra.mxu1 %v13041_v3 }
 0x796   :  { %5922 = vmatprep.subr.bf16.mxu1 %v13046_v18  ;;  %v13080_v18 = vld [vmem:[#allocation10 + $0x80] ss:$16 sps:$4 sm:$0xff]  }
 0x799   :  { %5923 = vmatpush1.bf16.msra.mxu1 %v13044_v24  ;;  %v13085_v24 = vld [vmem:[#allocation10 + $0xa4] ss:$16 sps:$4 sm:$0xff]  }
 0x79a   :  { %5924 = vmatprep.subr.bf16.mxu1 %v13049_v25  ;;  %v3643_v25 = vrot.slane %v14554_v45, %v14474_v29 }
 0x79d   :  { %5925 = vmatpush1.bf16.msra.mxu1 %v13047_v21 }
 0x79e   :  { %5926 = vmatprep.subr.bf16.mxu1 %v13052_v31  ;;  %v13083_v31 = vld [vmem:[#allocation10 + $0xa0] ss:$16 sps:$4 sm:$0xff]  }
 0x7a1   :  { %5927 = vmatpush1.bf16.msra.mxu1 %v13050_v32  ;;  %v13088_v32 = vld [vmem:[#allocation10 + $0xc4] ss:$16 sps:$4 sm:$0xff]  }
 0x7a2   :  { %5928 = vmatprep.subr.bf16.mxu1 %v13055_v26  ;;  %v11857_v26 = vadd.f32 %v14560_v49, %v3643_v25  ;;  %v13095_v49 = vld [vmem:[#allocation10 + $0x120] ss:$16 sps:$4 sm:$0xff]   ;;  %v13139_v25 = vld [vmem:[#allocation10 + $0x2e4] ss:$16 sps:$4 sm:$0xff]  }
 0x7a5   :  { %5929 = vmatpush1.bf16.msra.mxu1 %v13053_v33 }
 0x7a6   :  { %5930 = vmatprep.subr.bf16.mxu1 %v13058_v34  ;;  %v13086_v34 = vld [vmem:[#allocation10 + $0xc0] ss:$16 sps:$4 sm:$0xff]  }
 0x7a9   :  { %5931 = vmatpush1.bf16.msra.mxu1 %v13056_v30  ;;  %v13091_v30 = vld [vmem:[#allocation10 + $0xe4] ss:$16 sps:$4 sm:$0xff]  }
 0x7aa   :  { %5932 = vmatprep.subr.bf16.mxu1 %v13061_v36  ;;  %v11061_v36 = vmul.f32 -1.442695, %v11857_v26 }
 0x7ad   :  { %5933 = vmatpush1.bf16.msra.mxu1 %v13059_v37 }
 0x7ae   :  { %5934 = vmatprep.subr.bf16.mxu1 %v13064_v42  ;;  %v13089_v42 = vld [vmem:[#allocation10 + $0xe0] ss:$16 sps:$4 sm:$0xff]  }
 0x7b1   :  { %5935 = vmatpush1.bf16.msra.mxu1 %v13062_v43  ;;  %v13094_v43 = vld [vmem:[#allocation10 + $0x104] ss:$16 sps:$4 sm:$0xff]  }
 0x7b2   :  { %5936 = vmatprep.subr.bf16.mxu1 %v13067_v35  ;;  %v13092_v35 = vld [vmem:[#allocation10 + $0x100] ss:$16 sps:$4 sm:$0xff]  }
 0x7b5   :  { %5937 = vmatpush1.bf16.msra.mxu1 %v13065_v44  ;;  %v13097_v44 = vld [vmem:[#allocation10 + $0x124] ss:$16 sps:$4 sm:$0xff]  }
 0x7b6   :  { %6927 = vmatprep.subr.bf16.mxu1 %v13070_v46  ;;  %v13098_v46 = vld [vmem:[#allocation10 + $0x140] ss:$16 sps:$4 sm:$0xff]  }
 0x84b   :  { %v5414_v5 = vpop.f32.mrb[24].mxu1 }
 0x84c   :  { %v5415_v6 = vadd.f32 %v5414_v5, %v5213_v4  ;;  %v5416_v7 = vpop.f32.mrb[25].mxu1 }
 0x84d   :  { %v5417_v8 = vadd.f32 %v5416_v7, %v5217_v54  ;;  %v5418_v9 = vpop.f32.mrb[26].mxu1 }
 0x84e   :  { %v11131_v10 = vmul.f32 -1.442695, %v5415_v6  ;;  %v5419_v11 = vpop.f32.mrb[27].mxu1 }
 0x84f   :  { %v11132_v12 = vmul.f32 -1.442695, %v5417_v8 }
 0x850   :  { %13964 = vpow2.f32 %v11131_v10 }
 0x851   :  { %13966 = vpow2.f32 %v11132_v12  ;;  %v13068_v12 = vld [vmem:[#allocation10] ss:$16 sps:$4 sm:$0xff]  }
 0x85a   :  { %v13965_v14 = vpop.eup %13964 }
 0x85b   :  { %v13967_v15 = vpop.eup %13966  ;;  %v5427_v16 = vadd.f32 1.0, %v13965_v14 }
 0x85c   :  { %v5428_v39 = vadd.f32 1.0, %v13967_v15  ;;  %v13073_v15 = vld [vmem:[#allocation10 + $0x24] ss:$16 sps:$4 sm:$0xff]  }
 0x85d   :  { %13968 = vrcp.f32 %v5427_v16 }
 0x85e   :  { %13970 = vrcp.f32 %v5428_v39  ;;  %v13071_v39 = vld [vmem:[#allocation10 + $0x20] ss:$16 sps:$4 sm:$0xff]  }
 0x85f   :  { %13972 = vpow2.f32 %v11062_v53 }
 0x867   :  { %v13969_v17 = vpop.eup %13968 }
 0x868   :  { %v13971_v13 = vpop.eup %13970  ;;  %v5433_v19 = vmul.f32 %v13969_v17, %v5415_v6  ;;  %v13076_v17 = vld [vmem:[#allocation10 + $0x44] ss:$16 sps:$4 sm:$0xff]  }
 0x869   :  { %v5434_v20 = vmul.f32 %v13971_v13, %v5417_v8  ;;  %v13973_v1 = vpop.eup %13972  ;;  %v13074_v13 = vld [vmem:[#allocation10 + $0x40] ss:$16 sps:$4 sm:$0xff]  }
 0x86a   :  { %v5468_v23 = vpack.c.bf16 %v5433_v19, %v5433_v19  ;;  %v4889_v3 = vadd.f32 1.0, %v13973_v1  ;;  %v13079_v19 = vld [vmem:[#allocation10 + $0x64] ss:$16 sps:$4 sm:$0xff]  }
 0x86b   :  { %v5469_v22 = vpack.c.bf16 %v5434_v20, %v5434_v20  ;;  %v13077_v20 = vld [vmem:[#allocation10 + $0x60] ss:$16 sps:$4 sm:$0xff]  }
 0x86d   :  { %5675 = vmatprep.mubr.bf16.mxu0 %v5469_v22  ;;  %v13082_v22 = vld [vmem:[#allocation10 + $0x84] ss:$16 sps:$4 sm:$0xff]  }
 0x86e   :  { %5676 = vmatmul.mubr.bf16.vlgmr.msra.gmra.mrb[24].mxu0 %v5468_v23  ;;  %v3654_v23 = vsub.s32 5, %v14452_v38 }
 0x870   :  { %v3655_v21 = vrot.slane %v14554_v45, %v3654_v23  ;;  %v13164_v23 = vld [vmem:[#allocation9 + $0x40] sm:$0xff]  }
 0x871   :  { %11777 = vmatprep.subr.bf16.mxu0 %v13164_v23 }
 0x872   :  { %v11860_v33 = vadd.f32 %v14566_v28, %v3655_v21  ;;  %v13100_v28 = vld [vmem:[#allocation10 + $0x144] ss:$16 sps:$4 sm:$0xff]   ;;  %v13166_v21 = vld [vmem:[#allocation9 + $0x48] sm:$0xff]  }
 0x874   :  { %v11064_v37 = vmul.f32 -1.442695, %v11860_v33 }
 0x941   :  { %v5677_v2 = vpop.f32.mrb[24].mxu0 }
 0x942   :  { %v5678_v58 = vadd.f32 %v5677_v2, %v5476_v56  ;;  %v5679_v59 = vpop.f32.mrb[25].mxu0  ;;  %v13101_v56 = vld [vmem:[#allocation10 + $0x160] ss:$16 sps:$4 sm:$0xff]   ;;  %v13106_v2 = vld [vmem:[#allocation10 + $0x184] ss:$16 sps:$4 sm:$0xff]  }
 0x943   :  { %v5680_v60 = vadd.f32 %v5679_v59, %v5480_v57  ;;  %v5681_v61 = vpop.f32.mrb[26].mxu0  ;;  %v13109_v59 = vld [vmem:[#allocation10 + $0x1a4] ss:$16 sps:$4 sm:$0xff]  }
 0x944   :  { %v11165_v62 = vmul.f32 -1.442695, %v5678_v58  ;;  %v5682_v63 = vpop.f32.mrb[27].mxu0  ;;  %v13112_v61 = vld [vmem:[#allocation10 + $0x1c4] ss:$16 sps:$4 sm:$0xff]  }
 0x945   :  { %v11166_v0 = vmul.f32 -1.442695, %v5680_v60  ;;  %v13115_v63 = vld [vmem:[#allocation10 + $0x1e4] ss:$16 sps:$4 sm:$0xff]  }
 0x946   :  { %13974 = vpow2.f32 %v11165_v62  ;;  %v13110_v62 = vld [vmem:[#allocation10 + $0x1c0] ss:$16 sps:$4 sm:$0xff]  }
 0x947   :  { %13976 = vpow2.f32 %v11166_v0 }
 0x948   :  { %13978 = vrcp.f32 %v4889_v3  ;;  %v13113_v3 = vld [vmem:[#allocation10 + $0x1e0] ss:$16 sps:$4 sm:$0xff]  }
 0x950   :  { %v13975_v55 = vpop.eup %13974 }
 0x951   :  { %v13977_v50 = vpop.eup %13976  ;;  %v5690_v4 = vadd.f32 1.0, %v13975_v55 }
 0x952   :  { %v5691_v54 = vadd.f32 1.0, %v13977_v50  ;;  %v13979_v5 = vpop.eup %13978  ;;  %v13118_v50 = vld [vmem:[#allocation10 + $0x204] ss:$16 sps:$4 sm:$0xff]  }
 0x953   :  { %13980 = vrcp.f32 %v5690_v4  ;;  %v4907_v9 = vmul.f32 %v13979_v5, %v11858_v48  ;;  %v13103_v48 = vld [vmem:[#allocation10 + $0x164] ss:$16 sps:$4 sm:$0xff]  }
 0x954   :  { %13982 = vrcp.f32 %v5691_v54  ;;  %v13116_v54 = vld [vmem:[#allocation10 + $0x200] ss:$16 sps:$4 sm:$0xff]  }
 0x955   :  { %v14577_v16 = vpack.c.bf16 %v4907_v9, %v4907_v9  ;;  %13984 = vpow2.f32 %v11061_v36  ;;  %v13124_v9 = vld [vmem:[#allocation10 + $0x244] ss:$16 sps:$4 sm:$0xff]   ;;  %v13143_v36 = vld [vmem:[#allocation10 + $0x320] ss:$16 sps:$4 sm:$0xff]  }
 0x956   :  { %13986 = vpow2.f32 %v11064_v37  ;;  %v13171_v37 = vld [vmem:[#allocation9 + $0x18] sm:$0xff]  }
 0x95d   :  { %v13981_v6 = vpop.eup %13980 }
 0x95e   :  { %v13983_v7 = vpop.eup %13982  ;;  %v5696_v8 = vmul.f32 %v13981_v6, %v5678_v58  ;;  %v13104_v58 = vld [vmem:[#allocation10 + $0x180] ss:$16 sps:$4 sm:$0xff]   ;;  %v13121_v6 = vld [vmem:[#allocation10 + $0x224] ss:$16 sps:$4 sm:$0xff]  }
 0x95f   :  { %v5697_v10 = vmul.f32 %v13983_v7, %v5680_v60  ;;  %v13985_v47 = vpop.eup %13984  ;;  %v13107_v60 = vld [vmem:[#allocation10 + $0x1a0] ss:$16 sps:$4 sm:$0xff]  }
 0x960   :  { %v5731_v14 = vpack.c.bf16 %v5696_v8, %v5696_v8  ;;  %v13987_v51 = vpop.eup %13986  ;;  %v4888_v53 = vadd.f32 1.0, %v13985_v47  ;;  %v13119_v8 = vld [vmem:[#allocation10 + $0x220] ss:$16 sps:$4 sm:$0xff]  }
 0x961   :  { %v5732_v11 = vpack.c.bf16 %v5697_v10, %v5697_v10  ;;  %v4891_v57 = vadd.f32 1.0, %v13987_v51  ;;  %v13122_v10 = vld [vmem:[#allocation10 + $0x240] ss:$16 sps:$4 sm:$0xff]   ;;  %v13175_v51 = vld [vmem:[#allocation9 + $0x28] sm:$0xff]  }
 0x962   :  { %13988 = vrcp.f32 %v4888_v53  ;;  %v13154_v53 = vld [vmem:[#allocation10 + $0x384] ss:$16 sps:$4 sm:$0xff]  }
 0x963   :  { %5938 = vmatprep.mubr.bf16.mxu1 %v5732_v11  ;;  %13990 = vrcp.f32 %v4891_v57  ;;  %v13127_v11 = vld [vmem:[#allocation10 + $0x264] ss:$16 sps:$4 sm:$0xff]   ;;  %v13152_v57 = vld [vmem:[#allocation10 + $0x380] ss:$16 sps:$4 sm:$0xff]  }
 0x964   :  { %5939 = vmatmul.mubr.bf16.vlgmr.msra.gmra.mrb[28].mxu1 %v5731_v14  ;;  %v13130_v14 = vld [vmem:[#allocation10 + $0x284] ss:$16 sps:$4 sm:$0xff]  }
 0x965   :  { %6928 = vmatpush1.bf16.msra.mxu1 %v13068_v12  ;;  %6959 = vmatprep.mubr.bf16.mxu1 %v14577_v16  ;;  %v13125_v12 = vld [vmem:[#allocation10 + $0x260] ss:$16 sps:$4 sm:$0xff]  }
 0x966   :  { %6929 = vmatprep.subr.bf16.mxu1 %v13073_v15  ;;  %v3650_v15 = vsub.s32 4, %v14452_v38 }
 0x969   :  { %6930 = vmatpush1.bf16.msra.mxu1 %v13071_v39  ;;  %v13128_v39 = vld [vmem:[#allocation10 + $0x280] ss:$16 sps:$4 sm:$0xff]  }
 0x96a   :  { %6931 = vmatprep.subr.bf16.mxu1 %v13076_v17  ;;  %v13133_v17 = vld [vmem:[#allocation10 + $0x2a4] ss:$16 sps:$4 sm:$0xff]  }
 0x96c   :  { %v13989_v0 = vpop.eup %13988 }
 0x96d   :  { %6932 = vmatpush1.bf16.msra.mxu1 %v13074_v13  ;;  %v13991_v1 = vpop.eup %13990  ;;  %v4906_v55 = vmul.f32 %v13989_v0, %v11857_v26  ;;  %v3651_v13 = vrot.slane %v14554_v45, %v3650_v15  ;;  %v13137_v45 = vld [vmem:[#allocation10 + $0x2e0] ss:$16 sps:$4 sm:$0xff]  }
 0x96e   :  { %6933 = vmatprep.subr.bf16.mxu1 %v13079_v19  ;;  %v4909_v4 = vmul.f32 %v13991_v1, %v11860_v33  ;;  %v13131_v19 = vld [vmem:[#allocation10 + $0x2a0] ss:$16 sps:$4 sm:$0xff]   ;;  %v13163_v1 = vld [vmem:[#allocation10 + $0x3e4] ss:$16 sps:$4 sm:$0xff]  }
 0x96f   :  { %v14586_v5 = vpack.c.bf16 %v4906_v55, %v4906_v55  ;;  %v13140_v26 = vld [vmem:[#allocation10 + $0x300] ss:$16 sps:$4 sm:$0xff]  }
 0x970   :  { %v14588_v7 = vpack.c.bf16 %v4909_v4, %v4909_v4  ;;  %v13169_v33 = vld [vmem:[#allocation9 + $0x10] sm:$0xff]  }
 0x971   :  { %6934 = vmatpush1.bf16.msra.mxu1 %v13077_v20  ;;  %v13136_v20 = vld [vmem:[#allocation10 + $0x2c4] ss:$16 sps:$4 sm:$0xff]   ;;  %v13158_v0 = vld [vmem:[#allocation10 + $0x3c0] ss:$16 sps:$4 sm:$0xff]  }
 0x972   :  { %6935 = vmatprep.subr.bf16.mxu1 %v13082_v22  ;;  %v14595_v22 = vadd.f32 %v14564_v27, %v3651_v13  ;;  %v13168_v27 = vld [vmem:[#allocation9 + $0x50] sm:$0xff]  }
 0x973   :  { %v13161_v55 = vld [vmem:[#allocation10 + $0x3e0] ss:$16 sps:$4 sm:$0xff]   ;;  %v13263_v13 = vld [vmem:[#allocation10 + $0x4a4] ss:$16 sps:$4 sm:$0xff]  }
 0x974   :  { %v11063_v38 = vmul.f32 -1.442695, %v14595_v22  ;;  %v13255_v15 = vld [vmem:[#allocation10 + $0x480] ss:$16 sps:$4 sm:$0xff]  }
 0x975   :  { %6936 = vmatpush1.bf16.msra.mxu1 %v13080_v18  ;;  %v13134_v18 = vld [vmem:[#allocation10 + $0x2c0] ss:$16 sps:$4 sm:$0xff]  }
 0x976   :  { %6937 = vmatprep.subr.bf16.mxu1 %v13085_v24  ;;  %v13165_v24 = vld [vmem:[#allocation9] sm:$0xff]   ;;  %13992 = vpow2.f32 %v11063_v38 }
 0x977   :  { %11778 = vmatpush3.bf16.msra.mxu0 %v13165_v24  ;;  %v13275_v24 = vld [vmem:[#allocation10 + $0x4e4] ss:$16 sps:$4 sm:$0xff]  }
 0x978   :  { %11779 = vmatprep.subr.bf16.mxu0 %v13166_v21 }
 0x979   :  { %6938 = vmatpush1.bf16.msra.mxu1 %v13083_v31  ;;  %v13167_v31 = vld [vmem:[#allocation9 + $0x8] sm:$0xff]  }
 0x97a   :  { %6939 = vmatprep.subr.bf16.mxu1 %v13088_v32  ;;  %v13142_v32 = vld [vmem:[#allocation10 + $0x304] ss:$16 sps:$4 sm:$0xff]  }
 0x97b   :  { %11780 = vmatpush3.bf16.msra.mxu0 %v13167_v31  ;;  %v13281_v31 = vld [vmem:[#allocation10 + $0x504] ss:$16 sps:$4 sm:$0xff]  }
 0x97c   :  { %11781 = vmatprep.subr.bf16.mxu0 %v13168_v27 }
 0x97d   :  { %6940 = vmatpush1.bf16.msra.mxu1 %v13086_v34  ;;  %v13145_v34 = vld [vmem:[#allocation10 + $0x324] ss:$16 sps:$4 sm:$0xff]  }
 0x97e   :  { %6941 = vmatprep.subr.bf16.mxu1 %v13091_v30  ;;  %v13170_v30 = vld [vmem:[#allocation9 + $0x58] sm:$0xff]  }
 0x97f   :  { %11782 = vmatpush3.bf16.msra.mxu0 %v13169_v33 }
 0x980   :  { %11783 = vmatprep.subr.bf16.mxu0 %v13170_v30 }
 0x981   :  { %6942 = vmatpush1.bf16.msra.mxu1 %v13089_v42  ;;  %v13148_v42 = vld [vmem:[#allocation10 + $0x344] ss:$16 sps:$4 sm:$0xff]  }
 0x982   :  { %6943 = vmatprep.subr.bf16.mxu1 %v13094_v43  ;;  %v13172_v43 = vld [vmem:[#allocation9 + $0x60] sm:$0xff]  }
 0x983   :  { %11784 = vmatpush3.bf16.msra.mxu0 %v13171_v37  ;;  %v13285_v37 = vld [vmem:[#allocation10 + $0x520] ss:$16 sps:$4 sm:$0xff]  }
 0x984   :  { %11785 = vmatprep.subr.bf16.mxu0 %v13172_v43  ;;  %v13291_v43 = vld [vmem:[#allocation10 + $0x540] ss:$16 sps:$4 sm:$0xff]  }
 0x985   :  { %6944 = vmatpush1.bf16.msra.mxu1 %v13092_v35  ;;  %v13146_v35 = vld [vmem:[#allocation10 + $0x340] ss:$16 sps:$4 sm:$0xff]  }
 0x986   :  { %6945 = vmatprep.subr.bf16.mxu1 %v13097_v44  ;;  %v13173_v44 = vld [vmem:[#allocation9 + $0x20] sm:$0xff]  }
 0x987   :  { %11786 = vmatpush3.bf16.msra.mxu0 %v13173_v44  ;;  %v13297_v44 = vld [vmem:[#allocation10 + $0x560] ss:$16 sps:$4 sm:$0xff]  }
 0x989   :  { %6946 = vmatpush1.bf16.msra.mxu1 %v13095_v49  ;;  %v13993_v49 = vpop.eup %13992 }
 0x98a   :  { %6947 = vmatprep.subr.bf16.mxu1 %v13100_v28  ;;  %v13151_v28 = vld [vmem:[#allocation10 + $0x364] ss:$16 sps:$4 sm:$0xff]   ;;  %v4890_v47 = vadd.f32 1.0, %v13993_v49 }
 0x98c   :  { %13994 = vrcp.f32 %v4890_v47 }
 0x98d   :  { %6948 = vmatpush1.bf16.msra.mxu1 %v13098_v46  ;;  %v13174_v46 = vld [vmem:[#allocation9 + $0x68] sm:$0xff]  }
 0x98e   :  { %6949 = vmatprep.subr.bf16.mxu1 %v13103_v48  ;;  %v13149_v48 = vld [vmem:[#allocation10 + $0x360] ss:$16 sps:$4 sm:$0xff]   ;;  %11787 = vmatprep.subr.bf16.mxu0 %v13174_v46 }
 0x98f   :  { %11788 = vmatpush3.bf16.msra.mxu0 %v13175_v51  ;;  %v13303_v51 = vld [vmem:[#allocation10 + $0x580] ss:$16 sps:$4 sm:$0xff]  }
 0x991   :  { %6950 = vmatpush1.bf16.msra.mxu1 %v13101_v56  ;;  %v13176_v56 = vld [vmem:[#allocation9 + $0x70] sm:$0xff]  }
 0x992   :  { %6951 = vmatprep.subr.bf16.mxu1 %v13106_v2  ;;  %v13177_v2 = vld [vmem:[#allocation9 + $0x30] sm:$0xff]   ;;  %11789 = vmatprep.subr.bf16.mxu0 %v13176_v56 }
 0x993   :  { %11790 = vmatpush3.bf16.msra.mxu0 %v13177_v2  ;;  %v13309_v56 = vld [vmem:[#allocation10 + $0x5a0] ss:$16 sps:$4 sm:$0xff]  }
 0x994   :  { %v13315_v2 = vld [vmem:[#allocation10 + $0x5c0] ss:$16 sps:$4 sm:$0xff]  }
 0x995   :  { %6952 = vmatpush1.bf16.msra.mxu1 %v13104_v58  ;;  %v13157_v58 = vld [vmem:[#allocation10 + $0x3a4] ss:$16 sps:$4 sm:$0xff]  }
 0x996   :  { %6953 = vmatprep.subr.bf16.mxu1 %v13109_v59  ;;  %v13178_v59 = vld [vmem:[#allocation9 + $0x78] sm:$0xff]  }
 0x997   :  { %11791 = vmatprep.subr.bf16.mxu0 %v13178_v59 }
 0x999   :  { %6954 = vmatpush1.bf16.msra.mxu1 %v13107_v60  ;;  %v13155_v60 = vld [vmem:[#allocation10 + $0x3a0] ss:$16 sps:$4 sm:$0xff]  }
 0x99a   :  { %6955 = vmatprep.subr.bf16.mxu1 %v13112_v61  ;;  %v13179_v61 = vld [vmem:[#allocation9 + $0x38] sm:$0xff]  }
 0x99b   :  { %11792 = vmatpush3.bf16.msra.mxu0 %v13179_v61  ;;  %v13323_v61 = vld [vmem:[#allocation10 + $0x5e4] ss:$16 sps:$4 sm:$0xff]  }
 0x99d   :  { %6956 = vmatpush1.bf16.msra.mxu1 %v13110_v62  ;;  %v13160_v62 = vld [vmem:[#allocation10 + $0x3c4] ss:$16 sps:$4 sm:$0xff]  }
 0x99e   :  { %6957 = vmatprep.subr.bf16.mxu1 %v13115_v63  ;;  %v13182_v63 = vld [vmem:[#allocation10 + $0xc] ss:$16 sps:$4 sm:$0xff]  }
 0x99f   :  { %7009 = vmatprep.subr.bf16.mxu0 %v13182_v63  ;;  %v13321_v63 = vld [vmem:[#allocation10 + $0x5e0] ss:$16 sps:$4 sm:$0xff]  }
 0x9a1   :  { %6958 = vmatpush1.bf16.msra.mxu1 %v13113_v3  ;;  %v13995_v3 = vpop.eup %13994 }
 0x9a2   :  { %6968 = vmatprep.subr.bf16.mxu1 %v13118_v50  ;;  %v4908_v50 = vmul.f32 %v13995_v3, %v14595_v22  ;;  %v5734_v22 = vld [vmem:[#allocation13 + $0x30] ss:$8 sm:$0x3] }
 0x9a3   :  { %v5739_v23 = vrot.slane %v5734_v22, %v14457_v40 }
 0x9a4   :  { %6960 = vmatmul.mubr.bf16.vlgmr.msra.gmra.mrb[32].mxu1 %v14586_v5  ;;  %v14599_v4 = vpack.c.bf16 %v4908_v50, %v4908_v50  ;;  %v13183_v50 = vld [vmem:[#allocation10 + $0x28] ss:$16 sps:$4 sm:$0xff]  }
 0x9a5   :  { %6969 = vmatpush1.bf16.msra.mxu1 %v13116_v54  ;;  %7000 = vmatprep.mubr.bf16.mxu1 %v14588_v7  ;;  %v13233_v54 = vld [vmem:[#allocation10 + $0x404] ss:$16 sps:$4 sm:$0xff]  }
 0x9a6   :  { %6970 = vmatprep.subr.bf16.mxu1 %v13121_v6  ;;  %v13231_v6 = vld [vmem:[#allocation10 + $0x400] ss:$16 sps:$4 sm:$0xff]  }
 0x9a9   :  { %6971 = vmatpush1.bf16.msra.mxu1 %v13119_v8  ;;  %v13237_v8 = vld [vmem:[#allocation10 + $0x420] ss:$16 sps:$4 sm:$0xff]  }
 0x9aa   :  { %6972 = vmatprep.subr.bf16.mxu1 %v13124_v9  ;;  %v13239_v9 = vld [vmem:[#allocation10 + $0x424] ss:$16 sps:$4 sm:$0xff]  }
 0x9ad   :  { %6973 = vmatpush1.bf16.msra.mxu1 %v13122_v10  ;;  %v13243_v10 = vld [vmem:[#allocation10 + $0x440] ss:$16 sps:$4 sm:$0xff]  }
 0x9ae   :  { %6974 = vmatprep.subr.bf16.mxu1 %v13127_v11  ;;  %v13245_v11 = vld [vmem:[#allocation10 + $0x444] ss:$16 sps:$4 sm:$0xff]  }
 0x9b1   :  { %6975 = vmatpush1.bf16.msra.mxu1 %v13125_v12  ;;  %v13249_v12 = vld [vmem:[#allocation10 + $0x460] ss:$16 sps:$4 sm:$0xff]  }
 0x9b2   :  { %6976 = vmatprep.subr.bf16.mxu1 %v13130_v14  ;;  %v13251_v14 = vld [vmem:[#allocation10 + $0x464] ss:$16 sps:$4 sm:$0xff]  }
 0x9b5   :  { %6977 = vmatpush1.bf16.msra.mxu1 %v13128_v39  ;;  %v13257_v39 = vld [vmem:[#allocation10 + $0x484] ss:$16 sps:$4 sm:$0xff]  }
 0x9b6   :  { %6978 = vmatprep.subr.bf16.mxu1 %v13133_v17  ;;  %v13261_v17 = vld [vmem:[#allocation10 + $0x4a0] ss:$16 sps:$4 sm:$0xff]  }
 0x9b9   :  { %6979 = vmatpush1.bf16.msra.mxu1 %v13131_v19  ;;  %v13267_v19 = vld [vmem:[#allocation10 + $0x4c0] ss:$16 sps:$4 sm:$0xff]  }
 0x9ba   :  { %6980 = vmatprep.subr.bf16.mxu1 %v13136_v20  ;;  %v13269_v20 = vld [vmem:[#allocation10 + $0x4c4] ss:$16 sps:$4 sm:$0xff]  }
 0x9bd   :  { %6981 = vmatpush1.bf16.msra.mxu1 %v13134_v18  ;;  %v13273_v18 = vld [vmem:[#allocation10 + $0x4e0] ss:$16 sps:$4 sm:$0xff]  }
 0x9be   :  { %6982 = vmatprep.subr.bf16.mxu1 %v13139_v25  ;;  %v5743_v25 = vrot.slane %v5734_v22, %v14460_v41  ;;  %v13207_v22 = vld [vmem:[#allocation10 + $0x128] ss:$16 sps:$4 sm:$0xff]  }
 0x9c1   :  { %6983 = vmatpush1.bf16.msra.mxu1 %v13137_v45 }
 0x9c2   :  { %6984 = vmatprep.subr.bf16.mxu1 %v13142_v32 }
 0x9c5   :  { %6985 = vmatpush1.bf16.msra.mxu1 %v13140_v26  ;;  %v13279_v26 = vld [vmem:[#allocation10 + $0x500] ss:$16 sps:$4 sm:$0xff]  }
 0x9c6   :  { %6986 = vmatprep.subr.bf16.mxu1 %v13145_v34 }
 0x9c9   :  { %6987 = vmatpush1.bf16.msra.mxu1 %v13143_v36  ;;  %v13287_v36 = vld [vmem:[#allocation10 + $0x524] ss:$16 sps:$4 sm:$0xff]  }
 0x9ca   :  { %6988 = vmatprep.subr.bf16.mxu1 %v13148_v42  ;;  %v13293_v42 = vld [vmem:[#allocation10 + $0x544] ss:$16 sps:$4 sm:$0xff]  }
 0x9cd   :  { %6989 = vmatpush1.bf16.msra.mxu1 %v13146_v35  ;;  %v13299_v35 = vld [vmem:[#allocation10 + $0x564] ss:$16 sps:$4 sm:$0xff]  }
 0x9ce   :  { %6990 = vmatprep.subr.bf16.mxu1 %v13151_v28 }
 0x9d1   :  { %6991 = vmatpush1.bf16.msra.mxu1 %v13149_v48  ;;  %v13305_v48 = vld [vmem:[#allocation10 + $0x584] ss:$16 sps:$4 sm:$0xff]  }
 0x9d2   :  { %6992 = vmatprep.subr.bf16.mxu1 %v13154_v53  ;;  %v13311_v53 = vld [vmem:[#allocation10 + $0x5a4] ss:$16 sps:$4 sm:$0xff]  }
 0x9d5   :  { %6993 = vmatpush1.bf16.msra.mxu1 %v13152_v57  ;;  %v13317_v57 = vld [vmem:[#allocation10 + $0x5c4] ss:$16 sps:$4 sm:$0xff]  }
 0x9d6   :  { %6994 = vmatprep.subr.bf16.mxu1 %v13157_v58 }
 0x9d9   :  { %6995 = vmatpush1.bf16.msra.mxu1 %v13155_v60 }
 0x9da   :  { %6996 = vmatprep.subr.bf16.mxu1 %v13160_v62 }
 0x9dd   :  { %6997 = vmatpush1.bf16.msra.mxu1 %v13158_v0 }
 0x9de   :  { %6998 = vmatprep.subr.bf16.mxu1 %v13163_v1  ;;  %v13180_v1 = vld [vmem:[#allocation10 + $0x8] ss:$16 sps:$4 sm:$0xff]  }
 0x9e1   :  { %6999 = vmatpush1.bf16.msra.mxu1 %v13161_v55  ;;  %v13185_v55 = vld [vmem:[#allocation10 + $0x2c] ss:$16 sps:$4 sm:$0xff]  }
 0x9e2   :  { %7915 = vmatprep.subr.bf16.mxu1 %v13233_v54  ;;  %v13188_v54 = vld [vmem:[#allocation10 + $0x4c] ss:$16 sps:$4 sm:$0xff]  }
 0x9e4   :  { %7001 = vmatmul.mubr.bf16.vlgmr.msra.gmra.mrb[32].mxu1 %v14599_v4 }
 0x9e5   :  { %7916 = vmatpush1.bf16.msra.mxu1 %v13231_v6  ;;  %v13186_v6 = vld [vmem:[#allocation10 + $0x48] ss:$16 sps:$4 sm:$0xff]  }
 0x9e6   :  { %7917 = vmatprep.subr.bf16.mxu1 %v13239_v9  ;;  %v13189_v9 = vld [vmem:[#allocation10 + $0x68] ss:$16 sps:$4 sm:$0xff]  }
 0x9e9   :  { %7918 = vmatpush1.bf16.msra.mxu1 %v13237_v8  ;;  %v13191_v8 = vld [vmem:[#allocation10 + $0x6c] ss:$16 sps:$4 sm:$0xff]  }
 0x9ea   :  { %7919 = vmatprep.subr.bf16.mxu1 %v13245_v11  ;;  %v13192_v11 = vld [vmem:[#allocation10 + $0x88] ss:$16 sps:$4 sm:$0xff]  }
 0x9ed   :  { %7920 = vmatpush1.bf16.msra.mxu1 %v13243_v10  ;;  %v13194_v10 = vld [vmem:[#allocation10 + $0x8c] ss:$16 sps:$4 sm:$0xff]  }
 0x9ee   :  { %7921 = vmatprep.subr.bf16.mxu1 %v13251_v14  ;;  %v13195_v14 = vld [vmem:[#allocation10 + $0xa8] ss:$16 sps:$4 sm:$0xff]  }
 0x9f1   :  { %7922 = vmatpush1.bf16.msra.mxu1 %v13249_v12  ;;  %v13197_v12 = vld [vmem:[#allocation10 + $0xac] ss:$16 sps:$4 sm:$0xff]  }
 0x9f2   :  { %7923 = vmatprep.subr.bf16.mxu1 %v13257_v39  ;;  %v13203_v39 = vld [vmem:[#allocation10 + $0xec] ss:$16 sps:$4 sm:$0xff]  }
 0x9f5   :  { %7924 = vmatpush1.bf16.msra.mxu1 %v13255_v15  ;;  %v13200_v15 = vld [vmem:[#allocation10 + $0xcc] ss:$16 sps:$4 sm:$0xff]  }
 0x9f6   :  { %7925 = vmatprep.subr.bf16.mxu1 %v13263_v13  ;;  %v13206_v13 = vld [vmem:[#allocation10 + $0x10c] ss:$16 sps:$4 sm:$0xff]  }
 0x9f9   :  { %7926 = vmatpush1.bf16.msra.mxu1 %v13261_v17  ;;  %v13201_v17 = vld [vmem:[#allocation10 + $0xe8] ss:$16 sps:$4 sm:$0xff]  }
 0x9fa   :  { %7927 = vmatprep.subr.bf16.mxu1 %v13269_v20  ;;  %v13209_v20 = vld [vmem:[#allocation10 + $0x12c] ss:$16 sps:$4 sm:$0xff]  }
 0x9fd   :  { %7928 = vmatpush1.bf16.msra.mxu1 %v13267_v19  ;;  %v13204_v19 = vld [vmem:[#allocation10 + $0x108] ss:$16 sps:$4 sm:$0xff]  }
 0x9fe   :  { %7929 = vmatprep.subr.bf16.mxu1 %v13275_v24  ;;  %v13215_v24 = vld [vmem:[#allocation10 + $0x16c] ss:$16 sps:$4 sm:$0xff]  }
 0xa01   :  { %7930 = vmatpush1.bf16.msra.mxu1 %v13273_v18  ;;  %v13210_v18 = vld [vmem:[#allocation10 + $0x148] ss:$16 sps:$4 sm:$0xff]  }
 0xa02   :  { %7931 = vmatprep.subr.bf16.mxu1 %v13281_v31  ;;  %v13219_v31 = vld [vmem:[#allocation10 + $0x1a8] ss:$16 sps:$4 sm:$0xff]  }
 0xa05   :  { %7932 = vmatpush1.bf16.msra.mxu1 %v13279_v26  ;;  %v13227_v26 = vld [vmem:[#allocation10 + $0x1ec] ss:$16 sps:$4 sm:$0xff]  }
 0xa06   :  { %7933 = vmatprep.subr.bf16.mxu1 %v13287_v36  ;;  %v13236_v36 = vld [vmem:[#allocation10 + $0x22c] ss:$16 sps:$4 sm:$0xff]  }
 0xa09   :  { %7934 = vmatpush1.bf16.msra.mxu1 %v13285_v37  ;;  %v13234_v37 = vld [vmem:[#allocation10 + $0x228] ss:$16 sps:$4 sm:$0xff]  }
 0xa0a   :  { %7935 = vmatprep.subr.bf16.mxu1 %v13293_v42  ;;  %v13242_v42 = vld [vmem:[#allocation10 + $0x24c] ss:$16 sps:$4 sm:$0xff]  }
 0xa0d   :  { %7936 = vmatpush1.bf16.msra.mxu1 %v13291_v43  ;;  %v13240_v43 = vld [vmem:[#allocation10 + $0x248] ss:$16 sps:$4 sm:$0xff]  }
 0xa0e   :  { %7937 = vmatprep.subr.bf16.mxu1 %v13299_v35  ;;  %v13248_v35 = vld [vmem:[#allocation10 + $0x26c] ss:$16 sps:$4 sm:$0xff]  }
 0xa11   :  { %7938 = vmatpush1.bf16.msra.mxu1 %v13297_v44  ;;  %v13246_v44 = vld [vmem:[#allocation10 + $0x268] ss:$16 sps:$4 sm:$0xff]  }
 0xa12   :  { %7939 = vmatprep.subr.bf16.mxu1 %v13305_v48  ;;  %v13272_v48 = vld [vmem:[#allocation10 + $0x2ec] ss:$16 sps:$4 sm:$0xff]  }
 0xa15   :  { %7940 = vmatpush1.bf16.msra.mxu1 %v13303_v51  ;;  %v14607_v51 = vld [vmem:[#allocation13 + $0x32] ss:$8 sm:$0xf] }
 0xa16   :  { %7941 = vmatprep.subr.bf16.mxu1 %v13311_v53  ;;  %v13270_v53 = vld [vmem:[#allocation10 + $0x2e8] ss:$16 sps:$4 sm:$0xff]  }
 0xa19   :  { %7942 = vmatpush1.bf16.msra.mxu1 %v13309_v56  ;;  %v13374_v56 = vld [vmem:[#allocation10 + $0x604] ss:$16 sps:$4 sm:$0xff]  }
 0xa1a   :  { %7943 = vmatprep.subr.bf16.mxu1 %v13317_v57  ;;  %v6270_v57 = vrot.slane %v14607_v51, %v14457_v40 }
 0xa1d   :  { %7944 = vmatpush1.bf16.msra.mxu1 %v13315_v2  ;;  %v13278_v2 = vld [vmem:[#allocation10 + $0x30c] ss:$16 sps:$4 sm:$0xff]  }
 0xa1e   :  { %7945 = vmatprep.subr.bf16.mxu1 %v13323_v61 }
 0xa21   :  { %7946 = vmatpush1.bf16.msra.mxu1 %v13321_v63  ;;  %v13284_v63 = vld [vmem:[#allocation10 + $0x32c] ss:$16 sps:$4 sm:$0xff]  }
 0xa22   :  { %7956 = vmatprep.subr.bf16.mxu1 %v13374_v56  ;;  %v13344_v56 = vld [vmem:[#allocation10 + $0x4cc] ss:$16 sps:$4 sm:$0xff]  }
 0xa37   :  { %v5940_v38 = vpop.f32.mrb[28].mxu1 }
 0xa38   :  { %v5941_v21 = vadd.f32 %v5940_v38, %v5739_v23  ;;  %v5942_v45 = vpop.f32.mrb[29].mxu1  ;;  %v13212_v23 = vld [vmem:[#allocation10 + $0x14c] ss:$16 sps:$4 sm:$0xff]  }
 0xa39   :  { %v5943_v32 = vadd.f32 %v5942_v45, %v5743_v25  ;;  %v5944_v27 = vpop.f32.mrb[30].mxu1  ;;  %v13213_v25 = vld [vmem:[#allocation10 + $0x168] ss:$16 sps:$4 sm:$0xff]   ;;  %v13218_v38 = vld [vmem:[#allocation10 + $0x18c] ss:$16 sps:$4 sm:$0xff]  }
 0xa3a   :  { %v11199_v33 = vmul.f32 -1.442695, %v5941_v21  ;;  %v5945_v34 = vpop.f32.mrb[31].mxu1  ;;  %v13221_v45 = vld [vmem:[#allocation10 + $0x1ac] ss:$16 sps:$4 sm:$0xff]  }
 0xa3b   :  { %v11200_v30 = vmul.f32 -1.442695, %v5943_v32  ;;  %v13222_v27 = vld [vmem:[#allocation10 + $0x1c8] ss:$16 sps:$4 sm:$0xff]   ;;  %v13230_v34 = vld [vmem:[#allocation10 + $0x20c] ss:$16 sps:$4 sm:$0xff]  }
 0xa3c   :  { %13996 = vpow2.f32 %v11199_v33  ;;  %v13225_v33 = vld [vmem:[#allocation10 + $0x1e8] ss:$16 sps:$4 sm:$0xff]  }
 0xa3d   :  { %13998 = vpow2.f32 %v11200_v30  ;;  %v13228_v30 = vld [vmem:[#allocation10 + $0x208] ss:$16 sps:$4 sm:$0xff]  }
 0xa46   :  { %v13997_v49 = vpop.eup %13996 }
 0xa47   :  { %v13999_v28 = vpop.eup %13998  ;;  %v5953_v46 = vadd.f32 1.0, %v13997_v49  ;;  %v13254_v49 = vld [vmem:[#allocation10 + $0x28c] ss:$16 sps:$4 sm:$0xff]  }
 0xa48   :  { %v5954_v47 = vadd.f32 1.0, %v13999_v28  ;;  %v13252_v28 = vld [vmem:[#allocation10 + $0x288] ss:$16 sps:$4 sm:$0xff]  }
 0xa49   :  { %14000 = vrcp.f32 %v5953_v46  ;;  %v13260_v46 = vld [vmem:[#allocation10 + $0x2ac] ss:$16 sps:$4 sm:$0xff]  }
 0xa4a   :  { %14002 = vrcp.f32 %v5954_v47  ;;  %v13266_v47 = vld [vmem:[#allocation10 + $0x2cc] ss:$16 sps:$4 sm:$0xff]  }
 0xa53   :  { %v14001_v58 = vpop.eup %14000 }
 0xa54   :  { %v14003_v59 = vpop.eup %14002  ;;  %v5959_v60 = vmul.f32 %v14001_v58, %v5941_v21  ;;  %v13216_v21 = vld [vmem:[#allocation10 + $0x188] ss:$16 sps:$4 sm:$0xff]   ;;  %v6274_v58 = vrot.slane %v14607_v51, %v14460_v41 }
 0xa55   :  { %v5960_v62 = vmul.f32 %v14003_v59, %v5943_v32  ;;  %v13224_v32 = vld [vmem:[#allocation10 + $0x1cc] ss:$16 sps:$4 sm:$0xff]  }
 0xa56   :  { %v5993_v3 = vpack.c.bf16 %v5959_v60, %v5959_v60  ;;  %v13276_v60 = vld [vmem:[#allocation10 + $0x308] ss:$16 sps:$4 sm:$0xff]  }
 0xa57   :  { %v5994_v0 = vpack.c.bf16 %v5960_v62, %v5960_v62 }
 0xa59   :  { %6124 = vmatprep.mubr.bf16.mxu0 %v5994_v0 }
 0xa5a   :  { %6125 = vmatmul.mubr.bf16.vlgmr.msra.gmra.mrb[28].mxu0 %v5993_v3 }
 0xa5b   :  { %7010 = vmatpush1.bf16.msra.mxu0 %v13180_v1  ;;  %7041 = vmatprep.mubr.bf16.mxu0 %v14577_v16  ;;  %v13198_v16 = vld [vmem:[#allocation10 + $0xc8] ss:$16 sps:$4 sm:$0xff]  }
 0xa5c   :  { %7011 = vmatprep.subr.bf16.mxu0 %v13185_v55 }
 0xa5f   :  { %7012 = vmatpush1.bf16.msra.mxu0 %v13183_v50 }
 0xa60   :  { %7013 = vmatprep.subr.bf16.mxu0 %v13188_v54  ;;  %v13282_v54 = vld [vmem:[#allocation10 + $0x328] ss:$16 sps:$4 sm:$0xff]  }
 0xa63   :  { %7014 = vmatpush1.bf16.msra.mxu0 %v13186_v6  ;;  %v13290_v6 = vld [vmem:[#allocation10 + $0x34c] ss:$16 sps:$4 sm:$0xff]  }
 0xa64   :  { %7015 = vmatprep.subr.bf16.mxu0 %v13191_v8  ;;  %v13288_v8 = vld [vmem:[#allocation10 + $0x348] ss:$16 sps:$4 sm:$0xff]  }
 0xa67   :  { %7016 = vmatpush1.bf16.msra.mxu0 %v13189_v9  ;;  %v13296_v9 = vld [vmem:[#allocation10 + $0x36c] ss:$16 sps:$4 sm:$0xff]  }
 0xa68   :  { %7017 = vmatprep.subr.bf16.mxu0 %v13194_v10  ;;  %v13294_v10 = vld [vmem:[#allocation10 + $0x368] ss:$16 sps:$4 sm:$0xff]  }
 0xa6b   :  { %7018 = vmatpush1.bf16.msra.mxu0 %v13192_v11  ;;  %v13302_v11 = vld [vmem:[#allocation10 + $0x38c] ss:$16 sps:$4 sm:$0xff]  }
 0xa6c   :  { %7019 = vmatprep.subr.bf16.mxu0 %v13197_v12 }
 0xa6f   :  { %7020 = vmatpush1.bf16.msra.mxu0 %v13195_v14 }
 0xa70   :  { %7021 = vmatprep.subr.bf16.mxu0 %v13200_v15 }
 0xa73   :  { %7022 = vmatpush1.bf16.msra.mxu0 %v13198_v16  ;;  %v13300_v16 = vld [vmem:[#allocation10 + $0x388] ss:$16 sps:$4 sm:$0xff]  }
 0xa74   :  { %7023 = vmatprep.subr.bf16.mxu0 %v13203_v39 }
 0xa77   :  { %7024 = vmatpush1.bf16.msra.mxu0 %v13201_v17  ;;  %v13308_v17 = vld [vmem:[#allocation10 + $0x3ac] ss:$16 sps:$4 sm:$0xff]  }
 0xa78   :  { %7025 = vmatprep.subr.bf16.mxu0 %v13206_v13  ;;  %v13306_v13 = vld [vmem:[#allocation10 + $0x3a8] ss:$16 sps:$4 sm:$0xff]  }
 0xa7b   :  { %7026 = vmatpush1.bf16.msra.mxu0 %v13204_v19  ;;  %v13314_v19 = vld [vmem:[#allocation10 + $0x3cc] ss:$16 sps:$4 sm:$0xff]  }
 0xa7c   :  { %7027 = vmatprep.subr.bf16.mxu0 %v13209_v20  ;;  %v13312_v20 = vld [vmem:[#allocation10 + $0x3c8] ss:$16 sps:$4 sm:$0xff]  }
 0xa7f   :  { %7028 = vmatpush1.bf16.msra.mxu0 %v13207_v22  ;;  %v13320_v22 = vld [vmem:[#allocation10 + $0x3ec] ss:$16 sps:$4 sm:$0xff]  }
 0xa80   :  { %7029 = vmatprep.subr.bf16.mxu0 %v13212_v23 }
 0xa83   :  { %7030 = vmatpush1.bf16.msra.mxu0 %v13210_v18  ;;  %v13318_v18 = vld [vmem:[#allocation10 + $0x3e8] ss:$16 sps:$4 sm:$0xff]  }
 0xa84   :  { %7031 = vmatprep.subr.bf16.mxu0 %v13215_v24 }
 0xa87   :  { %7032 = vmatpush1.bf16.msra.mxu0 %v13213_v25 }
 0xa88   :  { %7033 = vmatprep.subr.bf16.mxu0 %v13218_v38  ;;  %v13326_v38 = vld [vmem:[#allocation10 + $0x40c] ss:$16 sps:$4 sm:$0xff]  }
 0xa8b   :  { %7034 = vmatpush1.bf16.msra.mxu0 %v13216_v21 }
 0xa8c   :  { %7035 = vmatprep.subr.bf16.mxu0 %v13221_v45 }
 0xa8f   :  { %7036 = vmatpush1.bf16.msra.mxu0 %v13219_v31  ;;  %v13324_v31 = vld [vmem:[#allocation10 + $0x408] ss:$16 sps:$4 sm:$0xff]  }
 0xa90   :  { %7037 = vmatprep.subr.bf16.mxu0 %v13224_v32 }
 0xa93   :  { %7038 = vmatpush1.bf16.msra.mxu0 %v13222_v27  ;;  %v13329_v27 = vld [vmem:[#allocation10 + $0x42c] ss:$16 sps:$4 sm:$0xff]  }
 0xa94   :  { %7039 = vmatprep.subr.bf16.mxu0 %v13227_v26  ;;  %v13372_v26 = vld [vmem:[#allocation10 + $0x600] ss:$16 sps:$4 sm:$0xff]  }
 0xa97   :  { %7040 = vmatpush1.bf16.msra.mxu0 %v13225_v33  ;;  %v13380_v33 = vld [vmem:[#allocation10 + $0x624] ss:$16 sps:$4 sm:$0xff]  }
 0xa98   :  { %7050 = vmatprep.subr.bf16.mxu0 %v13230_v34  ;;  %v13327_v34 = vld [vmem:[#allocation10 + $0x428] ss:$16 sps:$4 sm:$0xff]  }
 0xa9a   :  { %7042 = vmatmul.mubr.bf16.vlgmr.msra.gmra.mrb[32].mxu0 %v14586_v5  ;;  %v13258_v5 = vld [vmem:[#allocation10 + $0x2a8] ss:$16 sps:$4 sm:$0xff]  }
 0xa9b   :  { %7051 = vmatpush1.bf16.msra.mxu0 %v13228_v30  ;;  %7082 = vmatprep.mubr.bf16.mxu0 %v14588_v7  ;;  %v13264_v7 = vld [vmem:[#allocation10 + $0x2c8] ss:$16 sps:$4 sm:$0xff]   ;;  %v13332_v30 = vld [vmem:[#allocation10 + $0x44c] ss:$16 sps:$4 sm:$0xff]  }
 0xa9c   :  { %7052 = vmatprep.subr.bf16.mxu0 %v13236_v36  ;;  %v13378_v36 = vld [vmem:[#allocation10 + $0x620] ss:$16 sps:$4 sm:$0xff]  }
 0xa9f   :  { %7053 = vmatpush1.bf16.msra.mxu0 %v13234_v37  ;;  %v13386_v37 = vld [vmem:[#allocation10 + $0x644] ss:$16 sps:$4 sm:$0xff]  }
 0xaa0   :  { %7054 = vmatprep.subr.bf16.mxu0 %v13242_v42  ;;  %v13330_v42 = vld [vmem:[#allocation10 + $0x448] ss:$16 sps:$4 sm:$0xff]  }
 0xaa3   :  { %7055 = vmatpush1.bf16.msra.mxu0 %v13240_v43  ;;  %v13335_v43 = vld [vmem:[#allocation10 + $0x46c] ss:$16 sps:$4 sm:$0xff]  }
 0xaa4   :  { %7056 = vmatprep.subr.bf16.mxu0 %v13248_v35  ;;  %v13384_v35 = vld [vmem:[#allocation10 + $0x640] ss:$16 sps:$4 sm:$0xff]  }
 0xaa7   :  { %7057 = vmatpush1.bf16.msra.mxu0 %v13246_v44  ;;  %v13392_v44 = vld [vmem:[#allocation10 + $0x664] ss:$16 sps:$4 sm:$0xff]  }
 0xaa8   :  { %7058 = vmatprep.subr.bf16.mxu0 %v13254_v49  ;;  %v13338_v49 = vld [vmem:[#allocation10 + $0x48c] ss:$16 sps:$4 sm:$0xff]  }
 0xaab   :  { %7059 = vmatpush1.bf16.msra.mxu0 %v13252_v28  ;;  %v13390_v28 = vld [vmem:[#allocation10 + $0x660] ss:$16 sps:$4 sm:$0xff]  }
 0xaac   :  { %7060 = vmatprep.subr.bf16.mxu0 %v13260_v46  ;;  %v13398_v46 = vld [vmem:[#allocation10 + $0x684] ss:$16 sps:$4 sm:$0xff]  }
 0xaaf   :  { %7061 = vmatpush1.bf16.msra.mxu0 %v13258_v5  ;;  %v13336_v5 = vld [vmem:[#allocation10 + $0x488] ss:$16 sps:$4 sm:$0xff]  }
 0xab0   :  { %7062 = vmatprep.subr.bf16.mxu0 %v13266_v47  ;;  %v13341_v47 = vld [vmem:[#allocation10 + $0x4ac] ss:$16 sps:$4 sm:$0xff]  }
 0xab3   :  { %7063 = vmatpush1.bf16.msra.mxu0 %v13264_v7  ;;  %v13396_v7 = vld [vmem:[#allocation10 + $0x680] ss:$16 sps:$4 sm:$0xff]  }
 0xab4   :  { %7064 = vmatprep.subr.bf16.mxu0 %v13272_v48  ;;  %v13404_v48 = vld [vmem:[#allocation10 + $0x6a4] ss:$16 sps:$4 sm:$0xff]  }
 0xab7   :  { %v7002_v59 = vpop.f32.mrb[32].mxu1  ;;  %7065 = vmatpush1.bf16.msra.mxu0 %v13270_v53  ;;  %v13339_v53 = vld [vmem:[#allocation10 + $0x4a8] ss:$16 sps:$4 sm:$0xff]  }
 0xab8   :  { %v11861_v61 = vadd.f32 %v7002_v59, %v6270_v57  ;;  %v7004_v62 = vpop.f32.mrb[33].mxu1  ;;  %7066 = vmatprep.subr.bf16.mxu0 %v13278_v2  ;;  %v13402_v57 = vld [vmem:[#allocation10 + $0x6a0] ss:$16 sps:$4 sm:$0xff]   ;;  %v13410_v2 = vld [vmem:[#allocation10 + $0x6c4] ss:$16 sps:$4 sm:$0xff]  }
 0xab9   :  { %v11862_v0 = vadd.f32 %v7004_v62, %v6274_v58  ;;  %v7006_v1 = vpop.f32.mrb[34].mxu1  ;;  %v13342_v58 = vld [vmem:[#allocation10 + $0x4c8] ss:$16 sps:$4 sm:$0xff]   ;;  %v13347_v59 = vld [vmem:[#allocation10 + $0x4ec] ss:$16 sps:$4 sm:$0xff]  }
 0xaba   :  { %v11345_v3 = vmul.f32 -1.442695, %v11861_v61  ;;  %v7007_v55 = vpop.f32.mrb[35].mxu1  ;;  %v13345_v62 = vld [vmem:[#allocation10 + $0x4e8] ss:$16 sps:$4 sm:$0xff]  }
 0xabb   :  { %v11346_v50 = vmul.f32 -1.442695, %v11862_v0  ;;  %7067 = vmatpush1.bf16.msra.mxu0 %v13276_v60  ;;  %v13408_v60 = vld [vmem:[#allocation10 + $0x6c0] ss:$16 sps:$4 sm:$0xff]   ;;  %v13348_v1 = vld [vmem:[#allocation10 + $0x508] ss:$16 sps:$4 sm:$0xff]  }
 0xabc   :  { %14004 = vpow2.f32 %v11345_v3  ;;  %7068 = vmatprep.subr.bf16.mxu0 %v13284_v63  ;;  %v13350_v63 = vld [vmem:[#allocation10 + $0x50c] ss:$16 sps:$4 sm:$0xff]   ;;  %v13351_v55 = vld [vmem:[#allocation10 + $0x528] ss:$16 sps:$4 sm:$0xff]  }
 0xabd   :  { %14006 = vpow2.f32 %v11346_v50  ;;  %v13353_v3 = vld [vmem:[#allocation10 + $0x52c] ss:$16 sps:$4 sm:$0xff]  }
 0xabe   :  { %v13356_v50 = vld [vmem:[#allocation10 + $0x54c] ss:$16 sps:$4 sm:$0xff]  }
 0xabf   :  { %7069 = vmatpush1.bf16.msra.mxu0 %v13282_v54  ;;  %v13354_v54 = vld [vmem:[#allocation10 + $0x548] ss:$16 sps:$4 sm:$0xff]  }
 0xac0   :  { %7070 = vmatprep.subr.bf16.mxu0 %v13290_v6  ;;  %v13359_v6 = vld [vmem:[#allocation10 + $0x56c] ss:$16 sps:$4 sm:$0xff]  }
 0xac3   :  { %7071 = vmatpush1.bf16.msra.mxu0 %v13288_v8  ;;  %v13357_v8 = vld [vmem:[#allocation10 + $0x568] ss:$16 sps:$4 sm:$0xff]  }
 0xac4   :  { %7072 = vmatprep.subr.bf16.mxu0 %v13296_v9  ;;  %v13362_v9 = vld [vmem:[#allocation10 + $0x58c] ss:$16 sps:$4 sm:$0xff]  }
 0xac6   :  { %v14005_v12 = vpop.eup %14004 }
 0xac7   :  { %v14007_v14 = vpop.eup %14006  ;;  %v7103_v15 = vadd.f32 1.0, %v14005_v12  ;;  %7073 = vmatpush1.bf16.msra.mxu0 %v13294_v10  ;;  %v13360_v10 = vld [vmem:[#allocation10 + $0x588] ss:$16 sps:$4 sm:$0xff]  }
 0xac8   :  { %v7104_v39 = vadd.f32 1.0, %v14007_v14  ;;  %7074 = vmatprep.subr.bf16.mxu0 %v13302_v11  ;;  %v13365_v11 = vld [vmem:[#allocation10 + $0x5ac] ss:$16 sps:$4 sm:$0xff]   ;;  %v13363_v12 = vld [vmem:[#allocation10 + $0x5a8] ss:$16 sps:$4 sm:$0xff]  }
 0xac9   :  { %14008 = vrcp.f32 %v7103_v15  ;;  %v13368_v14 = vld [vmem:[#allocation10 + $0x5cc] ss:$16 sps:$4 sm:$0xff]   ;;  %v13366_v15 = vld [vmem:[#allocation10 + $0x5c8] ss:$16 sps:$4 sm:$0xff]  }
 0xaca   :  { %14010 = vrcp.f32 %v7104_v39  ;;  %v13369_v39 = vld [vmem:[#allocation10 + $0x5e8] ss:$16 sps:$4 sm:$0xff]  }
 0xacb   :  { %7075 = vmatpush1.bf16.msra.mxu0 %v13300_v16  ;;  %v13371_v16 = vld [vmem:[#allocation10 + $0x5ec] ss:$16 sps:$4 sm:$0xff]  }
 0xacc   :  { %7076 = vmatprep.subr.bf16.mxu0 %v13308_v17  ;;  %v13377_v17 = vld [vmem:[#allocation10 + $0x60c] ss:$16 sps:$4 sm:$0xff]  }
 0xacf   :  { %7077 = vmatpush1.bf16.msra.mxu0 %v13306_v13  ;;  %v13375_v13 = vld [vmem:[#allocation10 + $0x608] ss:$16 sps:$4 sm:$0xff]  }
 0xad0   :  { %7078 = vmatprep.subr.bf16.mxu0 %v13314_v19  ;;  %v13383_v19 = vld [vmem:[#allocation10 + $0x62c] ss:$16 sps:$4 sm:$0xff]  }
 0xad3   :  { %v14009_v23 = vpop.eup %14008  ;;  %7079 = vmatpush1.bf16.msra.mxu0 %v13312_v20  ;;  %v13381_v20 = vld [vmem:[#allocation10 + $0x628] ss:$16 sps:$4 sm:$0xff]  }
 0xad4   :  { %v14011_v24 = vpop.eup %14010  ;;  %v7115_v25 = vmul.f32 %v14009_v23, %v11861_v61  ;;  %7080 = vmatprep.subr.bf16.mxu0 %v13320_v22  ;;  %v13416_v61 = vld [vmem:[#allocation10 + $0x6e4] ss:$16 sps:$4 sm:$0xff]   ;;  %v13389_v22 = vld [vmem:[#allocation10 + $0x64c] ss:$16 sps:$4 sm:$0xff]   ;;  %v13387_v23 = vld [vmem:[#allocation10 + $0x648] ss:$16 sps:$4 sm:$0xff]  }
 0xad5   :  { %v7116_v21 = vmul.f32 %v14011_v24, %v11862_v0  ;;  %v13414_v0 = vld [vmem:[#allocation10 + $0x6e0] ss:$16 sps:$4 sm:$0xff]   ;;  %v13393_v24 = vld [vmem:[#allocation10 + $0x668] ss:$16 sps:$4 sm:$0xff]  }
 0xad6   :  { %v14613_v32 = vpack.c.bf16 %v7115_v25, %v7115_v25  ;;  %v13401_v25 = vld [vmem:[#allocation10 + $0x68c] ss:$16 sps:$4 sm:$0xff]  }
 0xad7   :  { %v7249_v45 = vpack.c.bf16 %v7116_v21, %v7116_v21  ;;  %7081 = vmatpush1.bf16.msra.mxu0 %v13318_v18  ;;  %v13395_v18 = vld [vmem:[#allocation10 + $0x66c] ss:$16 sps:$4 sm:$0xff]  }
 0xad8   :  { %7997 = vmatprep.subr.bf16.mxu0 %v13326_v38  ;;  %v13399_v38 = vld [vmem:[#allocation10 + $0x688] ss:$16 sps:$4 sm:$0xff]   ;;  %v13407_v21 = vld [vmem:[#allocation10 + $0x6ac] ss:$16 sps:$4 sm:$0xff]  }
 0xad9   :  { %7947 = vmatprep.mubr.bf16.mxu1 %v7249_v45 }
 0xada   :  { %7083 = vmatmul.mubr.bf16.vlgmr.msra.gmra.mrb[32].mxu0 %v14599_v4  ;;  %7948 = vmatmul.mubr.bf16.vlgmr.msra.gmra.mrb[36].mxu1 %v14613_v32  ;;  %v13333_v4 = vld [vmem:[#allocation10 + $0x468] ss:$16 sps:$4 sm:$0xff]  }
 0xadb   :  { %7998 = vmatpush1.bf16.msra.mxu0 %v13324_v31  ;;  %8029 = vmatprep.mubr.bf16.mxu0 %v7249_v45  ;;  %v13405_v45 = vld [vmem:[#allocation10 + $0x6a8] ss:$16 sps:$4 sm:$0xff]   ;;  %v13413_v31 = vld [vmem:[#allocation10 + $0x6cc] ss:$16 sps:$4 sm:$0xff]  }
 0xadc   :  { %7999 = vmatprep.subr.bf16.mxu0 %v13329_v27  ;;  %7957 = vmatpush1.bf16.msra.mxu1 %v13372_v26  ;;  %v5995_v27 = vld [vmem:[#allocation13 + $0x31] ss:$0 sm:$0xff] }
 0xadd   :  { %7958 = vmatprep.subr.bf16.mxu1 %v13380_v33  ;;  %v13422_v33 = vld [vmem:[#allocation10 + $0x704] ss:$16 sps:$4 sm:$0xff]  }
 0xadf   :  { %8000 = vmatpush1.bf16.msra.mxu0 %v13327_v34 }
 0xae0   :  { %8001 = vmatprep.subr.bf16.mxu0 %v13332_v30  ;;  %7959 = vmatpush1.bf16.msra.mxu1 %v13378_v36  ;;  %v13411_v36 = vld [vmem:[#allocation10 + $0x6c8] ss:$16 sps:$4 sm:$0xff]  }
 0xae1   :  { %7960 = vmatprep.subr.bf16.mxu1 %v13386_v37  ;;  %v13420_v37 = vld [vmem:[#allocation10 + $0x700] ss:$16 sps:$4 sm:$0xff]  }
 0xae3   :  { %8002 = vmatpush1.bf16.msra.mxu0 %v13330_v42 }
 0xae4   :  { %8003 = vmatprep.subr.bf16.mxu0 %v13335_v43  ;;  %7961 = vmatpush1.bf16.msra.mxu1 %v13384_v35  ;;  %v13419_v43 = vld [vmem:[#allocation10 + $0x6ec] ss:$16 sps:$4 sm:$0xff]  }
 0xae5   :  { %7962 = vmatprep.subr.bf16.mxu1 %v13392_v44  ;;  %v13428_v44 = vld [vmem:[#allocation10 + $0x724] ss:$16 sps:$4 sm:$0xff]  }
 0xae7   :  { %8004 = vmatpush1.bf16.msra.mxu0 %v13333_v4  ;;  %v13417_v4 = vld [vmem:[#allocation10 + $0x6e8] ss:$16 sps:$4 sm:$0xff]  }
 0xae8   :  { %8005 = vmatprep.subr.bf16.mxu0 %v13338_v49  ;;  %7963 = vmatpush1.bf16.msra.mxu1 %v13390_v28  ;;  %v13426_v49 = vld [vmem:[#allocation10 + $0x720] ss:$16 sps:$4 sm:$0xff]   ;;  %v13425_v28 = vld [vmem:[#allocation10 + $0x70c] ss:$16 sps:$4 sm:$0xff]  }
 0xae9   :  { %7964 = vmatprep.subr.bf16.mxu1 %v13398_v46  ;;  %v13434_v46 = vld [vmem:[#allocation10 + $0x744] ss:$16 sps:$4 sm:$0xff]  }
 0xaeb   :  { %8006 = vmatpush1.bf16.msra.mxu0 %v13336_v5  ;;  %v13423_v5 = vld [vmem:[#allocation10 + $0x708] ss:$16 sps:$4 sm:$0xff]  }
 0xaec   :  { %8007 = vmatprep.subr.bf16.mxu0 %v13341_v47  ;;  %7965 = vmatpush1.bf16.msra.mxu1 %v13396_v7  ;;  %v13432_v47 = vld [vmem:[#allocation10 + $0x740] ss:$16 sps:$4 sm:$0xff]   ;;  %v13431_v7 = vld [vmem:[#allocation10 + $0x72c] ss:$16 sps:$4 sm:$0xff]  }
 0xaed   :  { %7966 = vmatprep.subr.bf16.mxu1 %v13404_v48  ;;  %v13440_v48 = vld [vmem:[#allocation10 + $0x764] ss:$16 sps:$4 sm:$0xff]  }
 0xaef   :  { %8008 = vmatpush1.bf16.msra.mxu0 %v13339_v53  ;;  %v13429_v53 = vld [vmem:[#allocation10 + $0x728] ss:$16 sps:$4 sm:$0xff]  }
 0xaf0   :  { %8009 = vmatprep.subr.bf16.mxu0 %v13344_v56  ;;  %7967 = vmatpush1.bf16.msra.mxu1 %v13402_v57  ;;  %v13438_v56 = vld [vmem:[#allocation10 + $0x760] ss:$16 sps:$4 sm:$0xff]   ;;  %v13437_v57 = vld [vmem:[#allocation10 + $0x74c] ss:$16 sps:$4 sm:$0xff]  }
 0xaf1   :  { %7968 = vmatprep.subr.bf16.mxu1 %v13410_v2  ;;  %v13446_v2 = vld [vmem:[#allocation10 + $0x784] ss:$16 sps:$4 sm:$0xff]  }
 0xaf3   :  { %8010 = vmatpush1.bf16.msra.mxu0 %v13342_v58  ;;  %v13435_v58 = vld [vmem:[#allocation10 + $0x748] ss:$16 sps:$4 sm:$0xff]  }
 0xaf4   :  { %8011 = vmatprep.subr.bf16.mxu0 %v13347_v59  ;;  %7969 = vmatpush1.bf16.msra.mxu1 %v13408_v60  ;;  %v13444_v59 = vld [vmem:[#allocation10 + $0x780] ss:$16 sps:$4 sm:$0xff]   ;;  %v13443_v60 = vld [vmem:[#allocation10 + $0x76c] ss:$16 sps:$4 sm:$0xff]  }
 0xaf5   :  { %7970 = vmatprep.subr.bf16.mxu1 %v13416_v61  ;;  %v13452_v61 = vld [vmem:[#allocation10 + $0x7a4] ss:$16 sps:$4 sm:$0xff]  }
 0xaf7   :  { %8012 = vmatpush1.bf16.msra.mxu0 %v13345_v62  ;;  %v13441_v62 = vld [vmem:[#allocation10 + $0x768] ss:$16 sps:$4 sm:$0xff]  }
 0xaf8   :  { %8013 = vmatprep.subr.bf16.mxu0 %v13350_v63  ;;  %7971 = vmatpush1.bf16.msra.mxu1 %v13414_v0  ;;  %v13450_v63 = vld [vmem:[#allocation10 + $0x7a0] ss:$16 sps:$4 sm:$0xff]   ;;  %v13449_v0 = vld [vmem:[#allocation10 + $0x78c] ss:$16 sps:$4 sm:$0xff]  }
 0xaf9   :  { %7972 = vmatprep.subr.bf16.mxu1 %v13422_v33  ;;  %v13468_v33 = vld [vmem:[#allocation10 + $0x800] ss:$16 sps:$4 sm:$0xff]  }
 0xafb   :  { %8014 = vmatpush1.bf16.msra.mxu0 %v13348_v1  ;;  %v13458_v1 = vld [vmem:[#allocation10 + $0x7c4] ss:$16 sps:$4 sm:$0xff]  }
 0xafc   :  { %8015 = vmatprep.subr.bf16.mxu0 %v13353_v3  ;;  %7973 = vmatpush1.bf16.msra.mxu1 %v13420_v37  ;;  %v13447_v3 = vld [vmem:[#allocation10 + $0x788] ss:$16 sps:$4 sm:$0xff]   ;;  %v13479_v37 = vld [vmem:[#allocation10 + $0x82c] ss:$16 sps:$4 sm:$0xff]  }
 0xafd   :  { %7974 = vmatprep.subr.bf16.mxu1 %v13428_v44  ;;  %v13485_v44 = vld [vmem:[#allocation10 + $0x84c] ss:$16 sps:$4 sm:$0xff]  }
 0xaff   :  { %8016 = vmatpush1.bf16.msra.mxu0 %v13351_v55  ;;  %v13456_v55 = vld [vmem:[#allocation10 + $0x7c0] ss:$16 sps:$4 sm:$0xff]  }
 0xb00   :  { %8017 = vmatprep.subr.bf16.mxu0 %v13356_v50  ;;  %7975 = vmatpush1.bf16.msra.mxu1 %v13426_v49  ;;  %v13455_v50 = vld [vmem:[#allocation10 + $0x7ac] ss:$16 sps:$4 sm:$0xff]   ;;  %v13483_v49 = vld [vmem:[#allocation10 + $0x848] ss:$16 sps:$4 sm:$0xff]  }
 0xb01   :  { %7976 = vmatprep.subr.bf16.mxu1 %v13434_v46  ;;  %v13491_v46 = vld [vmem:[#allocation10 + $0x86c] ss:$16 sps:$4 sm:$0xff]  }
 0xb03   :  { %8018 = vmatpush1.bf16.msra.mxu0 %v13354_v54  ;;  %v13464_v54 = vld [vmem:[#allocation10 + $0x7e4] ss:$16 sps:$4 sm:$0xff]  }
 0xb04   :  { %8019 = vmatprep.subr.bf16.mxu0 %v13359_v6  ;;  %7977 = vmatpush1.bf16.msra.mxu1 %v13432_v47  ;;  %v13453_v6 = vld [vmem:[#allocation10 + $0x7a8] ss:$16 sps:$4 sm:$0xff]  }
 0xb05   :  { %7978 = vmatprep.subr.bf16.mxu1 %v13440_v48  ;;  %v13489_v47 = vld [vmem:[#allocation10 + $0x868] ss:$16 sps:$4 sm:$0xff]   ;;  %v13497_v48 = vld [vmem:[#allocation10 + $0x88c] ss:$16 sps:$4 sm:$0xff]  }
 0xb07   :  { %8020 = vmatpush1.bf16.msra.mxu0 %v13357_v8  ;;  %v13462_v8 = vld [vmem:[#allocation10 + $0x7e0] ss:$16 sps:$4 sm:$0xff]  }
 0xb08   :  { %8021 = vmatprep.subr.bf16.mxu0 %v13362_v9  ;;  %7979 = vmatpush1.bf16.msra.mxu1 %v13438_v56  ;;  %v13461_v9 = vld [vmem:[#allocation10 + $0x7cc] ss:$16 sps:$4 sm:$0xff]   ;;  %v13495_v56 = vld [vmem:[#allocation10 + $0x888] ss:$16 sps:$4 sm:$0xff]  }
 0xb09   :  { %7980 = vmatprep.subr.bf16.mxu1 %v13446_v2  ;;  %v13503_v2 = vld [vmem:[#allocation10 + $0x8ac] ss:$16 sps:$4 sm:$0xff]  }
 0xb0b   :  { %8022 = vmatpush1.bf16.msra.mxu0 %v13360_v10  ;;  %v13459_v10 = vld [vmem:[#allocation10 + $0x7c8] ss:$16 sps:$4 sm:$0xff]  }
 0xb0c   :  { %8023 = vmatprep.subr.bf16.mxu0 %v13365_v11  ;;  %7981 = vmatpush1.bf16.msra.mxu1 %v13444_v59  ;;  %v13467_v11 = vld [vmem:[#allocation10 + $0x7ec] ss:$16 sps:$4 sm:$0xff]   ;;  %v13501_v59 = vld [vmem:[#allocation10 + $0x8a8] ss:$16 sps:$4 sm:$0xff]  }
 0xb0d   :  { %7982 = vmatprep.subr.bf16.mxu1 %v13452_v61  ;;  %v13509_v61 = vld [vmem:[#allocation10 + $0x8cc] ss:$16 sps:$4 sm:$0xff]  }
 0xb0f   :  { %8024 = vmatpush1.bf16.msra.mxu0 %v13363_v12  ;;  %v13470_v12 = vld [vmem:[#allocation10 + $0x804] ss:$16 sps:$4 sm:$0xff]  }
 0xb10   :  { %8025 = vmatprep.subr.bf16.mxu0 %v13368_v14  ;;  %7983 = vmatpush1.bf16.msra.mxu1 %v13450_v63  ;;  %v13465_v14 = vld [vmem:[#allocation10 + $0x7e8] ss:$16 sps:$4 sm:$0xff]  }
 0xb11   :  { %7984 = vmatprep.subr.bf16.mxu1 %v13458_v1  ;;  %v13507_v63 = vld [vmem:[#allocation10 + $0x8c8] ss:$16 sps:$4 sm:$0xff]   ;;  %v13515_v1 = vld [vmem:[#allocation10 + $0x8ec] ss:$16 sps:$4 sm:$0xff]  }
 0xb13   :  { %8026 = vmatpush1.bf16.msra.mxu0 %v13366_v15  ;;  %v13473_v15 = vld [vmem:[#allocation10 + $0x80c] ss:$16 sps:$4 sm:$0xff]  }
 0xb14   :  { %8027 = vmatprep.subr.bf16.mxu0 %v13371_v16  ;;  %7985 = vmatpush1.bf16.msra.mxu1 %v13456_v55  ;;  %v6278_v16 = vrot.slane %v14607_v51, %v14474_v29  ;;  %v13513_v55 = vld [vmem:[#allocation10 + $0x8e8] ss:$16 sps:$4 sm:$0xff]  }
 0xb15   :  { %7986 = vmatprep.subr.bf16.mxu1 %v13464_v54  ;;  %v13521_v54 = vld [vmem:[#allocation10 + $0x90c] ss:$16 sps:$4 sm:$0xff]  }
 0xb17   :  { %8028 = vmatpush1.bf16.msra.mxu0 %v13369_v39  ;;  %v6282_v39 = vrot.slane %v14607_v51, %v14467_v52 }
 0xb18   :  { %8038 = vmatprep.subr.bf16.mxu0 %v13377_v17  ;;  %7987 = vmatpush1.bf16.msra.mxu1 %v13462_v8  ;;  %v13519_v8 = vld [vmem:[#allocation10 + $0x908] ss:$16 sps:$4 sm:$0xff]  }
 0xb19   :  { %8903 = vmatprep.subr.bf16.mxu1 %v13470_v12  ;;  %v13525_v12 = vld [vmem:[#allocation10 + $0x928] ss:$16 sps:$4 sm:$0xff]  }
 0xb1a   :  { %8030 = vmatmul.mubr.bf16.vlgmr.msra.gmra.mrb[36].mxu0 %v14613_v32 }
 0xb1b   :  { %8039 = vmatpush1.bf16.msra.mxu0 %v13375_v13 }
 0xb1c   :  { %8040 = vmatprep.subr.bf16.mxu0 %v13383_v19 }
 0xb1f   :  { %8041 = vmatpush1.bf16.msra.mxu0 %v13381_v20 }
 0xb20   :  { %8042 = vmatprep.subr.bf16.mxu0 %v13389_v22 }
 0xb23   :  { %8043 = vmatpush1.bf16.msra.mxu0 %v13387_v23 }
 0xb24   :  { %8044 = vmatprep.subr.bf16.mxu0 %v13395_v18 }
 0xb27   :  { %8045 = vmatpush1.bf16.msra.mxu0 %v13393_v24 }
 0xb28   :  { %8046 = vmatprep.subr.bf16.mxu0 %v13401_v25 }
 0xb2b   :  { %8047 = vmatpush1.bf16.msra.mxu0 %v13399_v38 }
 0xb2c   :  { %8048 = vmatprep.subr.bf16.mxu0 %v13407_v21 }
 0xb2d   :  { %v11793_v32 = vpop.f32.mrb[28].mxu0 }
 0xb2e   :  { %v11794_v26 = vpop.f32.mrb[29].mxu0 }
 0xb2f   :  { %v11795_v34 = vadd.f32 %v11794_v26, %v11793_v32  ;;  %v11796_v30 = vpop.f32.mrb[30].mxu0  ;;  %8049 = vmatpush1.bf16.msra.mxu0 %v13405_v45 }
 0xb30   :  { %v11797_v42 = vpop.f32.mrb[31].mxu0  ;;  %8050 = vmatprep.subr.bf16.mxu0 %v13413_v31 }
 0xb31   :  { %v6127_v35 = vadd.f32 %v11795_v34, %v5995_v27  ;;  %v13471_v34 = vld [vmem:[#allocation10 + $0x808] ss:$16 sps:$4 sm:$0xff]   ;;  %v13474_v42 = vld [vmem:[#allocation10 + $0x820] ss:$16 sps:$4 sm:$0xff]  }
 0xb33   :  { %10424 = vst [vmem:[%s14675_s9] sm:$0xff] %v6127_v35  ;;  %8051 = vmatpush1.bf16.msra.mxu0 %v13411_v36  ;;  %v13476_v36 = vld [vmem:[#allocation10 + $0x824] ss:$16 sps:$4 sm:$0xff]  }
 0xb34   :  { %8052 = vmatprep.subr.bf16.mxu0 %v13419_v43  ;;  %v13477_v43 = vld [vmem:[#allocation10 + $0x828] ss:$16 sps:$4 sm:$0xff]   ;;  %v13482_v35 = vld [vmem:[#allocation10 + $0x844] ss:$16 sps:$4 sm:$0xff]  }
 0xb37   :  { %8053 = vmatpush1.bf16.msra.mxu0 %v13417_v4  ;;  %v13480_v4 = vld [vmem:[#allocation10 + $0x840] ss:$16 sps:$4 sm:$0xff]  }
 0xb38   :  { %8054 = vmatprep.subr.bf16.mxu0 %v13425_v28  ;;  %v13488_v28 = vld [vmem:[#allocation10 + $0x864] ss:$16 sps:$4 sm:$0xff]  }
 0xb3b   :  { %8055 = vmatpush1.bf16.msra.mxu0 %v13423_v5  ;;  %v13486_v5 = vld [vmem:[#allocation10 + $0x860] ss:$16 sps:$4 sm:$0xff]  }
 0xb3c   :  { %8056 = vmatprep.subr.bf16.mxu0 %v13431_v7  ;;  %v13494_v7 = vld [vmem:[#allocation10 + $0x884] ss:$16 sps:$4 sm:$0xff]  }
 0xb3f   :  { %8057 = vmatpush1.bf16.msra.mxu0 %v13429_v53  ;;  %v13492_v53 = vld [vmem:[#allocation10 + $0x880] ss:$16 sps:$4 sm:$0xff]  }
 0xb40   :  { %8058 = vmatprep.subr.bf16.mxu0 %v13437_v57  ;;  %v13500_v57 = vld [vmem:[#allocation10 + $0x8a4] ss:$16 sps:$4 sm:$0xff]  }
 0xb43   :  { %8059 = vmatpush1.bf16.msra.mxu0 %v13435_v58  ;;  %v13498_v58 = vld [vmem:[#allocation10 + $0x8a0] ss:$16 sps:$4 sm:$0xff]  }
 0xb44   :  { %8060 = vmatprep.subr.bf16.mxu0 %v13443_v60  ;;  %v13506_v60 = vld [vmem:[#allocation10 + $0x8c4] ss:$16 sps:$4 sm:$0xff]  }
 0xb47   :  { %8061 = vmatpush1.bf16.msra.mxu0 %v13441_v62  ;;  %v13504_v62 = vld [vmem:[#allocation10 + $0x8c0] ss:$16 sps:$4 sm:$0xff]  }
 0xb48   :  { %8062 = vmatprep.subr.bf16.mxu0 %v13449_v0  ;;  %v13512_v0 = vld [vmem:[#allocation10 + $0x8e4] ss:$16 sps:$4 sm:$0xff]  }
 0xb4b   :  { %8063 = vmatpush1.bf16.msra.mxu0 %v13447_v3  ;;  %v13510_v3 = vld [vmem:[#allocation10 + $0x8e0] ss:$16 sps:$4 sm:$0xff]  }
 0xb4c   :  { %8064 = vmatprep.subr.bf16.mxu0 %v13455_v50  ;;  %v13518_v50 = vld [vmem:[#allocation10 + $0x904] ss:$16 sps:$4 sm:$0xff]  }
 0xb4f   :  { %8065 = vmatpush1.bf16.msra.mxu0 %v13453_v6  ;;  %v13516_v6 = vld [vmem:[#allocation10 + $0x900] ss:$16 sps:$4 sm:$0xff]  }
 0xb50   :  { %8066 = vmatprep.subr.bf16.mxu0 %v13461_v9  ;;  %v13524_v9 = vld [vmem:[#allocation10 + $0x924] ss:$16 sps:$4 sm:$0xff]  }
 0xb53   :  { %8067 = vmatpush1.bf16.msra.mxu0 %v13459_v10  ;;  %v13527_v10 = vld [vmem:[#allocation10 + $0x92c] ss:$16 sps:$4 sm:$0xff]  }
 0xb54   :  { %8068 = vmatprep.subr.bf16.mxu0 %v13467_v11  ;;  %v13522_v11 = vld [vmem:[#allocation10 + $0x920] ss:$16 sps:$4 sm:$0xff]  }
 0xb57   :  { %8069 = vmatpush1.bf16.msra.mxu0 %v13465_v14  ;;  %v13530_v14 = vld [vmem:[#allocation10 + $0x944] ss:$16 sps:$4 sm:$0xff]  }
 0xb58   :  { %8985 = vmatprep.subr.bf16.mxu0 %v13473_v15  ;;  %v13533_v15 = vld [vmem:[#allocation10 + $0x94c] ss:$16 sps:$4 sm:$0xff]  }
 0xbad   :  { %v7084_v17 = vpop.f32.mrb[32].mxu0 }
 0xbae   :  { %v11863_v13 = vadd.f32 %v7084_v17, %v6278_v16  ;;  %v7086_v19 = vpop.f32.mrb[33].mxu0  ;;  %v13528_v16 = vld [vmem:[#allocation10 + $0x940] ss:$16 sps:$4 sm:$0xff]   ;;  %v13536_v17 = vld [vmem:[#allocation10 + $0x964] ss:$16 sps:$4 sm:$0xff]  }
 0xbaf   :  { %v11864_v20 = vadd.f32 %v7086_v19, %v6282_v39  ;;  %v7088_v22 = vpop.f32.mrb[34].mxu0  ;;  %v13531_v39 = vld [vmem:[#allocation10 + $0x948] ss:$16 sps:$4 sm:$0xff]   ;;  %v13534_v19 = vld [vmem:[#allocation10 + $0x960] ss:$16 sps:$4 sm:$0xff]  }
 0xbb0   :  { %v11347_v23 = vmul.f32 -1.442695, %v11863_v13  ;;  %v7089_v18 = vpop.f32.mrb[35].mxu0  ;;  %v13542_v22 = vld [vmem:[#allocation10 + $0x984] ss:$16 sps:$4 sm:$0xff]  }
 0xbb1   :  { %v11348_v24 = vmul.f32 -1.442695, %v11864_v20  ;;  %v13540_v18 = vld [vmem:[#allocation10 + $0x980] ss:$16 sps:$4 sm:$0xff]  }
 0xbb2   :  { %14012 = vpow2.f32 %v11347_v23  ;;  %v13545_v23 = vld [vmem:[#allocation10 + $0x98c] ss:$16 sps:$4 sm:$0xff]  }
 0xbb3   :  { %14014 = vpow2.f32 %v11348_v24  ;;  %v13543_v24 = vld [vmem:[#allocation10 + $0x988] ss:$16 sps:$4 sm:$0xff]  }
 0xbbc   :  { %v14013_v25 = vpop.eup %14012 }
 0xbbd   :  { %v14015_v38 = vpop.eup %14014  ;;  %v7105_v21 = vadd.f32 1.0, %v14013_v25  ;;  %v13548_v25 = vld [vmem:[#allocation10 + $0x9a4] ss:$16 sps:$4 sm:$0xff]  }
 0xbbe   :  { %v7106_v45 = vadd.f32 1.0, %v14015_v38  ;;  %v13551_v38 = vld [vmem:[#allocation10 + $0x9ac] ss:$16 sps:$4 sm:$0xff]  }
 0xbbf   :  { %14016 = vrcp.f32 %v7105_v21  ;;  %v13546_v21 = vld [vmem:[#allocation10 + $0x9a0] ss:$16 sps:$4 sm:$0xff]  }
 0xbc0   :  { %14018 = vrcp.f32 %v7106_v45  ;;  %v13549_v45 = vld [vmem:[#allocation10 + $0x9a8] ss:$16 sps:$4 sm:$0xff]  }
 0xbc9   :  { %v14017_v31 = vpop.eup %14016 }
 0xbca   :  { %v14019_v32 = vpop.eup %14018  ;;  %v7117_v27 = vmul.f32 %v14017_v31, %v11863_v13  ;;  %v13539_v13 = vld [vmem:[#allocation10 + $0x96c] ss:$16 sps:$4 sm:$0xff]   ;;  %v13554_v31 = vld [vmem:[#allocation10 + $0x9c4] ss:$16 sps:$4 sm:$0xff]  }
 0xbcb   :  { %v7118_v51 = vmul.f32 %v14019_v32, %v11864_v20  ;;  %v13537_v20 = vld [vmem:[#allocation10 + $0x968] ss:$16 sps:$4 sm:$0xff]   ;;  %v13557_v32 = vld [vmem:[#allocation10 + $0x9cc] ss:$16 sps:$4 sm:$0xff]  }
 0xbcc   :  { %v7250_v30 = vpack.c.bf16 %v7117_v27, %v7117_v27  ;;  %v13552_v27 = vld [vmem:[#allocation10 + $0x9c0] ss:$16 sps:$4 sm:$0xff]  }
 0xbcd   :  { %v7251_v26 = vpack.c.bf16 %v7118_v51, %v7118_v51  ;;  %v13555_v51 = vld [vmem:[#allocation10 + $0x9c8] ss:$16 sps:$4 sm:$0xff]  }
 0xbcf   :  { %7988 = vmatprep.mubr.bf16.mxu1 %v7251_v26  ;;  %8070 = vmatprep.mubr.bf16.mxu0 %v7251_v26  ;;  %v13560_v26 = vld [vmem:[#allocation10 + $0x9e4] ss:$16 sps:$4 sm:$0xff]  }
 0xbd0   :  { %7989 = vmatmul.mubr.bf16.vlgmr.msra.gmra.mrb[36].mxu1 %v7250_v30  ;;  %8071 = vmatmul.mubr.bf16.vlgmr.msra.gmra.mrb[36].mxu0 %v7250_v30  ;;  %v13561_v30 = vld [vmem:[#allocation10 + $0x9e8] ss:$16 sps:$4 sm:$0xff]  }
 0xbd1   :  { %8904 = vmatpush1.bf16.msra.mxu1 %v13468_v33  ;;  %8986 = vmatpush1.bf16.msra.mxu0 %v13471_v34  ;;  %v13563_v33 = vld [vmem:[#allocation10 + $0x9ec] ss:$16 sps:$4 sm:$0xff]   ;;  %v13558_v34 = vld [vmem:[#allocation10 + $0x9e0] ss:$16 sps:$4 sm:$0xff]  }
 0xbd2   :  { %8905 = vmatprep.subr.bf16.mxu1 %v13476_v36  ;;  %8987 = vmatprep.subr.bf16.mxu0 %v13479_v37  ;;  %v13566_v36 = vld [vmem:[#allocation10 + $0xa04] ss:$16 sps:$4 sm:$0xff]   ;;  %v13569_v37 = vld [vmem:[#allocation10 + $0xa0c] ss:$16 sps:$4 sm:$0xff]  }
 0xbd5   :  { %8906 = vmatpush1.bf16.msra.mxu1 %v13474_v42  ;;  %8988 = vmatpush1.bf16.msra.mxu0 %v13477_v43  ;;  %v14625_v42 = vld [vmem:[#allocation13 + $0x33] ss:$8 sm:$0xf] }
 0xbd6   :  { %8907 = vmatprep.subr.bf16.mxu1 %v13482_v35  ;;  %8989 = vmatprep.subr.bf16.mxu0 %v13485_v44  ;;  %v7258_v43 = vrot.slane %v14625_v42, %v14457_v40  ;;  %v7262_v35 = vrot.slane %v14625_v42, %v14460_v41  ;;  %v7270_v44 = vrot.slane %v14625_v42, %v14467_v52 }
 0xbd9   :  { %8908 = vmatpush1.bf16.msra.mxu1 %v13480_v4  ;;  %8990 = vmatpush1.bf16.msra.mxu0 %v13483_v49 }
 0xbda   :  { %8909 = vmatprep.subr.bf16.mxu1 %v13488_v28  ;;  %8991 = vmatprep.subr.bf16.mxu0 %v13491_v46 }
 0xbdd   :  { %8910 = vmatpush1.bf16.msra.mxu1 %v13486_v5  ;;  %8992 = vmatpush1.bf16.msra.mxu0 %v13489_v47 }
 0xbde   :  { %8911 = vmatprep.subr.bf16.mxu1 %v13494_v7  ;;  %8993 = vmatprep.subr.bf16.mxu0 %v13497_v48 }
 0xbe1   :  { %8912 = vmatpush1.bf16.msra.mxu1 %v13492_v53  ;;  %8994 = vmatpush1.bf16.msra.mxu0 %v13495_v56 }
 0xbe2   :  { %8913 = vmatprep.subr.bf16.mxu1 %v13500_v57  ;;  %8995 = vmatprep.subr.bf16.mxu0 %v13503_v2 }
 0xbe5   :  { %8914 = vmatpush1.bf16.msra.mxu1 %v13498_v58  ;;  %8996 = vmatpush1.bf16.msra.mxu0 %v13501_v59 }
 0xbe6   :  { %8915 = vmatprep.subr.bf16.mxu1 %v13506_v60  ;;  %8997 = vmatprep.subr.bf16.mxu0 %v13509_v61 }
 0xbe9   :  { %8916 = vmatpush1.bf16.msra.mxu1 %v13504_v62  ;;  %8998 = vmatpush1.bf16.msra.mxu0 %v13507_v63 }
 0xbea   :  { %8917 = vmatprep.subr.bf16.mxu1 %v13512_v0  ;;  %8999 = vmatprep.subr.bf16.mxu0 %v13515_v1 }
 0xbed   :  { %8918 = vmatpush1.bf16.msra.mxu1 %v13510_v3  ;;  %9000 = vmatpush1.bf16.msra.mxu0 %v13513_v55 }
 0xbee   :  { %8919 = vmatprep.subr.bf16.mxu1 %v13518_v50  ;;  %9001 = vmatprep.subr.bf16.mxu0 %v13521_v54 }
 0xbf1   :  { %8920 = vmatpush1.bf16.msra.mxu1 %v13516_v6  ;;  %9002 = vmatpush1.bf16.msra.mxu0 %v13519_v8 }
 0xbf2   :  { %8921 = vmatprep.subr.bf16.mxu1 %v13524_v9  ;;  %9003 = vmatprep.subr.bf16.mxu0 %v13527_v10  ;;  %v13564_v10 = vld [vmem:[#allocation10 + $0xa00] ss:$16 sps:$4 sm:$0xff]  }
 0xbf5   :  { %8922 = vmatpush1.bf16.msra.mxu1 %v13522_v11  ;;  %9004 = vmatpush1.bf16.msra.mxu0 %v13525_v12  ;;  %v13567_v11 = vld [vmem:[#allocation10 + $0xa08] ss:$16 sps:$4 sm:$0xff]  }
 0xbf6   :  { %8923 = vmatprep.subr.bf16.mxu1 %v13530_v14  ;;  %9005 = vmatprep.subr.bf16.mxu0 %v13533_v15  ;;  %v13572_v14 = vld [vmem:[#allocation10 + $0xa24] ss:$16 sps:$4 sm:$0xff]   ;;  %v13575_v15 = vld [vmem:[#allocation10 + $0xa2c] ss:$16 sps:$4 sm:$0xff]  }
 0xbf9   :  { %8924 = vmatpush1.bf16.msra.mxu1 %v13528_v16  ;;  %9006 = vmatpush1.bf16.msra.mxu0 %v13531_v39  ;;  %v13570_v39 = vld [vmem:[#allocation10 + $0xa20] ss:$16 sps:$4 sm:$0xff]  }
 0xbfa   :  { %8925 = vmatprep.subr.bf16.mxu1 %v13536_v17  ;;  %9007 = vmatprep.subr.bf16.mxu0 %v13539_v13  ;;  %v13573_v17 = vld [vmem:[#allocation10 + $0xa28] ss:$16 sps:$4 sm:$0xff]   ;;  %v13578_v13 = vld [vmem:[#allocation10 + $0xa44] ss:$16 sps:$4 sm:$0xff]  }
 0xbfd   :  { %8926 = vmatpush1.bf16.msra.mxu1 %v13534_v19  ;;  %9008 = vmatpush1.bf16.msra.mxu0 %v13537_v20  ;;  %v13581_v19 = vld [vmem:[#allocation10 + $0xa4c] ss:$16 sps:$4 sm:$0xff]   ;;  %v13576_v20 = vld [vmem:[#allocation10 + $0xa40] ss:$16 sps:$4 sm:$0xff]  }
 0xbfe   :  { %8927 = vmatprep.subr.bf16.mxu1 %v13542_v22  ;;  %9009 = vmatprep.subr.bf16.mxu0 %v13545_v23  ;;  %v13579_v22 = vld [vmem:[#allocation10 + $0xa48] ss:$16 sps:$4 sm:$0xff]   ;;  %v13584_v23 = vld [vmem:[#allocation10 + $0xa64] ss:$16 sps:$4 sm:$0xff]  }
 0xc01   :  { %8928 = vmatpush1.bf16.msra.mxu1 %v13540_v18  ;;  %9010 = vmatpush1.bf16.msra.mxu0 %v13543_v24  ;;  %v13587_v18 = vld [vmem:[#allocation10 + $0xa6c] ss:$16 sps:$4 sm:$0xff]   ;;  %v13582_v24 = vld [vmem:[#allocation10 + $0xa60] ss:$16 sps:$4 sm:$0xff]  }
 0xc02   :  { %8929 = vmatprep.subr.bf16.mxu1 %v13548_v25  ;;  %9011 = vmatprep.subr.bf16.mxu0 %v13551_v38  ;;  %v13585_v25 = vld [vmem:[#allocation10 + $0xa68] ss:$16 sps:$4 sm:$0xff]   ;;  %v13590_v38 = vld [vmem:[#allocation10 + $0xa84] ss:$16 sps:$4 sm:$0xff]  }
 0xc05   :  { %8930 = vmatpush1.bf16.msra.mxu1 %v13546_v21  ;;  %9012 = vmatpush1.bf16.msra.mxu0 %v13549_v45  ;;  %v13593_v21 = vld [vmem:[#allocation10 + $0xa8c] ss:$16 sps:$4 sm:$0xff]   ;;  %v13588_v45 = vld [vmem:[#allocation10 + $0xa80] ss:$16 sps:$4 sm:$0xff]  }
 0xc06   :  { %8931 = vmatprep.subr.bf16.mxu1 %v13554_v31  ;;  %9013 = vmatprep.subr.bf16.mxu0 %v13557_v32  ;;  %v13591_v31 = vld [vmem:[#allocation10 + $0xa88] ss:$16 sps:$4 sm:$0xff]   ;;  %v13596_v32 = vld [vmem:[#allocation10 + $0xaa4] ss:$16 sps:$4 sm:$0xff]  }
 0xc09   :  { %8932 = vmatpush1.bf16.msra.mxu1 %v13552_v27  ;;  %9014 = vmatpush1.bf16.msra.mxu0 %v13555_v51  ;;  %v13599_v27 = vld [vmem:[#allocation10 + $0xaac] ss:$16 sps:$4 sm:$0xff]   ;;  %v7266_v51 = vrot.slane %v14625_v42, %v14474_v29 }
 0xc0a   :  { %8933 = vmatprep.subr.bf16.mxu1 %v13560_v26  ;;  %9015 = vmatprep.subr.bf16.mxu0 %v13563_v33  ;;  %v13594_v26 = vld [vmem:[#allocation10 + $0xaa0] ss:$16 sps:$4 sm:$0xff]   ;;  %v13597_v33 = vld [vmem:[#allocation10 + $0xaa8] ss:$16 sps:$4 sm:$0xff]  }
 0xc0d   :  { %8934 = vmatpush1.bf16.msra.mxu1 %v13558_v34  ;;  %9016 = vmatpush1.bf16.msra.mxu0 %v13561_v30  ;;  %v13602_v34 = vld [vmem:[#allocation10 + $0xac4] ss:$16 sps:$4 sm:$0xff]   ;;  %v13605_v30 = vld [vmem:[#allocation10 + $0xacc] ss:$16 sps:$4 sm:$0xff]  }
 0xc0e   :  { %8944 = vmatprep.subr.bf16.mxu1 %v13566_v36  ;;  %9026 = vmatprep.subr.bf16.mxu0 %v13569_v37  ;;  %v13600_v37 = vld [vmem:[#allocation10 + $0xac0] ss:$16 sps:$4 sm:$0xff]  }
 0xca3   :  { %v7990_v4 = vpop.f32.mrb[36].mxu1  ;;  %v14633_v49 = vpop.f32.mrb[36].mxu0 }
 0xca4   :  { %v11865_v28 = vadd.f32 %v7990_v4, %v7258_v43  ;;  %v7992_v46 = vpop.f32.mrb[37].mxu1  ;;  %v8074_v5 = vpop.f32.mrb[37].mxu0  ;;  %v14638_v36 = vadd.f32 %v14633_v49, %v7266_v51  ;;  %v13603_v43 = vld [vmem:[#allocation10 + $0xac8] ss:$16 sps:$4 sm:$0xff]   ;;  %v13606_v4 = vld [vmem:[#allocation10 + $0xae0] ss:$16 sps:$4 sm:$0xff]  }
 0xca5   :  { %v11866_v47 = vadd.f32 %v7992_v46, %v7262_v35  ;;  %v11868_v7 = vadd.f32 %v8074_v5, %v7270_v44  ;;  %v7994_v48 = vpop.f32.mrb[38].mxu1  ;;  %v8076_v53 = vpop.f32.mrb[38].mxu0  ;;  %v13608_v35 = vld [vmem:[#allocation10 + $0xae4] ss:$16 sps:$4 sm:$0xff]   ;;  %v13611_v44 = vld [vmem:[#allocation10 + $0xaec] ss:$16 sps:$4 sm:$0xff]  }
 0xca6   :  { %v11477_v56 = vmul.f32 -1.442695, %v11865_v28  ;;  %v7995_v57 = vpop.f32.mrb[39].mxu1  ;;  %v8077_v2 = vpop.f32.mrb[39].mxu0  ;;  %v11479_v42 = vmul.f32 -1.442695, %v14638_v36 }
 0xca7   :  { %v11478_v58 = vmul.f32 -1.442695, %v11866_v47  ;;  %v11480_v59 = vmul.f32 -1.442695, %v11868_v7  ;;  %v13614_v46 = vld [vmem:[#allocation10 + $0xb04] ss:$16 sps:$4 sm:$0xff]  }
 0xca8   :  { %14020 = vpow2.f32 %v11477_v56  ;;  %v13617_v5 = vld [vmem:[#allocation10 + $0xb0c] ss:$16 sps:$4 sm:$0xff]   ;;  %v13612_v49 = vld [vmem:[#allocation10 + $0xb00] ss:$16 sps:$4 sm:$0xff]   ;;  %v13621_v56 = vld [vmem:[#allocation10 + $0xb28] ss:$16 sps:$4 sm:$0xff]  }
 0xca9   :  { %14022 = vpow2.f32 %v11478_v58  ;;  %v13623_v48 = vld [vmem:[#allocation10 + $0xb2c] ss:$16 sps:$4 sm:$0xff]   ;;  %v13618_v53 = vld [vmem:[#allocation10 + $0xb20] ss:$16 sps:$4 sm:$0xff]   ;;  %v13626_v57 = vld [vmem:[#allocation10 + $0xb44] ss:$16 sps:$4 sm:$0xff]  }
 0xcaa   :  { %14024 = vpow2.f32 %v11480_v59  ;;  %v13629_v2 = vld [vmem:[#allocation10 + $0xb4c] ss:$16 sps:$4 sm:$0xff]   ;;  %v13624_v58 = vld [vmem:[#allocation10 + $0xb40] ss:$16 sps:$4 sm:$0xff]   ;;  %v13627_v59 = vld [vmem:[#allocation10 + $0xb48] ss:$16 sps:$4 sm:$0xff]  }
 0xcab   :  { %v13672_v51 = vld [vmem:[#allocation10 + $0xc40] ss:$16 sps:$4 sm:$0xff]  }
 0xcb2   :  { %v14021_v60 = vpop.eup %14020 }
 0xcb3   :  { %v8091_v61 = vadd.f32 1.0, %v14021_v60  ;;  %v14023_v62 = vpop.eup %14022 }
 0xcb4   :  { %v14025_v63 = vpop.eup %14024  ;;  %v8092_v0 = vadd.f32 1.0, %v14023_v62  ;;  %v13635_v62 = vld [vmem:[#allocation10 + $0xb6c] ss:$16 sps:$4 sm:$0xff]  }
 0xcb5   :  { %14026 = vrcp.f32 %v8091_v61  ;;  %v8094_v1 = vadd.f32 1.0, %v14025_v63  ;;  %v13632_v61 = vld [vmem:[#allocation10 + $0xb64] ss:$16 sps:$4 sm:$0xff]  }
 0xcb6   :  { %14028 = vrcp.f32 %v8092_v0  ;;  %v13630_v0 = vld [vmem:[#allocation10 + $0xb60] ss:$16 sps:$4 sm:$0xff]  }
 0xcb7   :  { %14030 = vrcp.f32 %v8094_v1  ;;  %v13633_v1 = vld [vmem:[#allocation10 + $0xb68] ss:$16 sps:$4 sm:$0xff]  }
 0xcb8   :  { %14032 = vpow2.f32 %v11479_v42  ;;  %v13692_v42 = vld [vmem:[#allocation10 + $0xca4] ss:$16 sps:$4 sm:$0xff]  }
 0xcbf   :  { %v14027_v3 = vpop.eup %14026 }
 0xcc0   :  { %v14029_v55 = vpop.eup %14028  ;;  %v8103_v50 = vmul.f32 %v14027_v3, %v11865_v28  ;;  %v13609_v28 = vld [vmem:[#allocation10 + $0xae8] ss:$16 sps:$4 sm:$0xff]   ;;  %v13638_v3 = vld [vmem:[#allocation10 + $0xb84] ss:$16 sps:$4 sm:$0xff]  }
 0xcc1   :  { %v14031_v54 = vpop.eup %14030  ;;  %v8104_v6 = vmul.f32 %v14029_v55, %v11866_v47  ;;  %v13615_v47 = vld [vmem:[#allocation10 + $0xb08] ss:$16 sps:$4 sm:$0xff]   ;;  %v13641_v55 = vld [vmem:[#allocation10 + $0xb8c] ss:$16 sps:$4 sm:$0xff]  }
 0xcc2   :  { %v8106_v8 = vmul.f32 %v14031_v54, %v11868_v7  ;;  %v8236_v12 = vpack.c.bf16 %v8103_v50, %v8103_v50  ;;  %v13620_v7 = vld [vmem:[#allocation10 + $0xb24] ss:$16 sps:$4 sm:$0xff]   ;;  %v14033_v60 = vpop.eup %14032  ;;  %v13636_v50 = vld [vmem:[#allocation10 + $0xb80] ss:$16 sps:$4 sm:$0xff]   ;;  %v13639_v54 = vld [vmem:[#allocation10 + $0xb88] ss:$16 sps:$4 sm:$0xff]  }
 0xcc3   :  { %v8237_v9 = vpack.c.bf16 %v8104_v6, %v8104_v6  ;;  %v8093_v63 = vadd.f32 1.0, %v14033_v60  ;;  %v13644_v6 = vld [vmem:[#allocation10 + $0xba4] ss:$16 sps:$4 sm:$0xff]   ;;  %v13711_v60 = vld [vmem:[#allocation10 + $0xd08] ss:$16 sps:$4 sm:$0xff]  }
 0xcc4   :  { %v8239_v16 = vpack.c.bf16 %v8106_v8, %v8106_v8  ;;  %v13647_v8 = vld [vmem:[#allocation10 + $0xbac] ss:$16 sps:$4 sm:$0xff]  }
 0xcc5   :  { %8935 = vmatprep.mubr.bf16.mxu1 %v8237_v9  ;;  %9017 = vmatprep.mubr.bf16.mxu0 %v8237_v9  ;;  %14034 = vrcp.f32 %v8093_v63  ;;  %v13642_v9 = vld [vmem:[#allocation10 + $0xba0] ss:$16 sps:$4 sm:$0xff]  }
 0xcc6   :  { %8936 = vmatmul.mubr.bf16.vlgmr.msra.gmra.mrb[40].mxu1 %v8236_v12  ;;  %9018 = vmatmul.mubr.bf16.vlgmr.msra.gmra.mrb[40].mxu0 %v8236_v12  ;;  %v13653_v12 = vld [vmem:[#allocation10 + $0xbcc] ss:$16 sps:$4 sm:$0xff]   ;;  %v13714_v63 = vld [vmem:[#allocation10 + $0xd20] ss:$16 sps:$4 sm:$0xff]  }
 0xcc7   :  { %8945 = vmatpush1.bf16.msra.mxu1 %v13564_v10  ;;  %9027 = vmatpush1.bf16.msra.mxu0 %v13567_v11  ;;  %v13645_v10 = vld [vmem:[#allocation10 + $0xba8] ss:$16 sps:$4 sm:$0xff]   ;;  %v13650_v11 = vld [vmem:[#allocation10 + $0xbc4] ss:$16 sps:$4 sm:$0xff]  }
 0xcc8   :  { %8976 = vmatprep.mubr.bf16.mxu1 %v8239_v16  ;;  %9058 = vmatprep.mubr.bf16.mxu0 %v8239_v16  ;;  %v13656_v16 = vld [vmem:[#allocation10 + $0xbe4] ss:$16 sps:$4 sm:$0xff]  }
 0xcc9   :  { %8946 = vmatprep.subr.bf16.mxu1 %v13572_v14  ;;  %9028 = vmatprep.subr.bf16.mxu0 %v13575_v15  ;;  %v13648_v14 = vld [vmem:[#allocation10 + $0xbc0] ss:$16 sps:$4 sm:$0xff]   ;;  %v13651_v15 = vld [vmem:[#allocation10 + $0xbc8] ss:$16 sps:$4 sm:$0xff]  }
 0xccb   :  { %8947 = vmatpush1.bf16.msra.mxu1 %v13570_v39  ;;  %9029 = vmatpush1.bf16.msra.mxu0 %v13573_v17  ;;  %v13659_v39 = vld [vmem:[#allocation10 + $0xbec] ss:$16 sps:$4 sm:$0xff]  }
 0xccc   :  { %8948 = vmatprep.subr.bf16.mxu1 %v13578_v13  ;;  %9030 = vmatprep.subr.bf16.mxu0 %v13581_v19  ;;  %v13654_v13 = vld [vmem:[#allocation10 + $0xbe0] ss:$16 sps:$4 sm:$0xff]   ;;  %v13657_v19 = vld [vmem:[#allocation10 + $0xbe8] ss:$16 sps:$4 sm:$0xff]  }
 0xccf   :  { %8949 = vmatpush1.bf16.msra.mxu1 %v13576_v20  ;;  %9031 = vmatpush1.bf16.msra.mxu0 %v13579_v22  ;;  %v14035_v17 = vpop.eup %14034  ;;  %v13662_v22 = vld [vmem:[#allocation10 + $0xc04] ss:$16 sps:$4 sm:$0xff]  }
 0xcd0   :  { %8950 = vmatprep.subr.bf16.mxu1 %v13584_v23  ;;  %9032 = vmatprep.subr.bf16.mxu0 %v13587_v18  ;;  %v8105_v20 = vmul.f32 %v14035_v17, %v14638_v36  ;;  %v13665_v23 = vld [vmem:[#allocation10 + $0xc0c] ss:$16 sps:$4 sm:$0xff]   ;;  %v13660_v18 = vld [vmem:[#allocation10 + $0xc00] ss:$16 sps:$4 sm:$0xff]   ;;  %v13681_v36 = vld [vmem:[#allocation10 + $0xc68] ss:$16 sps:$4 sm:$0xff]  }
 0xcd1   :  { %v13741_v17 = vld [vmem:[#allocation10 + $0xda8] ss:$16 sps:$4 sm:$0xff]  }
 0xcd3   :  { %8951 = vmatpush1.bf16.msra.mxu1 %v13582_v24  ;;  %9033 = vmatpush1.bf16.msra.mxu0 %v13585_v25  ;;  %v13663_v24 = vld [vmem:[#allocation10 + $0xc08] ss:$16 sps:$4 sm:$0xff]   ;;  %v8238_v25 = vpack.c.bf16 %v8105_v20, %v8105_v20  ;;  %v13744_v20 = vld [vmem:[#allocation10 + $0xdc0] ss:$16 sps:$4 sm:$0xff]  }
 0xcd4   :  { %8952 = vmatprep.subr.bf16.mxu1 %v13590_v38  ;;  %9034 = vmatprep.subr.bf16.mxu0 %v13593_v21  ;;  %v13668_v38 = vld [vmem:[#allocation10 + $0xc24] ss:$16 sps:$4 sm:$0xff]   ;;  %v13671_v21 = vld [vmem:[#allocation10 + $0xc2c] ss:$16 sps:$4 sm:$0xff]  }
 0xcd7   :  { %8953 = vmatpush1.bf16.msra.mxu1 %v13588_v45  ;;  %9035 = vmatpush1.bf16.msra.mxu0 %v13591_v31  ;;  %v13666_v45 = vld [vmem:[#allocation10 + $0xc20] ss:$16 sps:$4 sm:$0xff]   ;;  %v13669_v31 = vld [vmem:[#allocation10 + $0xc28] ss:$16 sps:$4 sm:$0xff]  }
 0xcd8   :  { %8954 = vmatprep.subr.bf16.mxu1 %v13596_v32  ;;  %9036 = vmatprep.subr.bf16.mxu0 %v13599_v27  ;;  %v13674_v32 = vld [vmem:[#allocation10 + $0xc44] ss:$16 sps:$4 sm:$0xff]   ;;  %v13677_v27 = vld [vmem:[#allocation10 + $0xc4c] ss:$16 sps:$4 sm:$0xff]  }
 0xcdb   :  { %8955 = vmatpush1.bf16.msra.mxu1 %v13594_v26  ;;  %9037 = vmatpush1.bf16.msra.mxu0 %v13597_v33  ;;  %v13675_v26 = vld [vmem:[#allocation10 + $0xc48] ss:$16 sps:$4 sm:$0xff]   ;;  %v13680_v33 = vld [vmem:[#allocation10 + $0xc64] ss:$16 sps:$4 sm:$0xff]  }
 0xcdc   :  { %8956 = vmatprep.subr.bf16.mxu1 %v13602_v34  ;;  %9038 = vmatprep.subr.bf16.mxu0 %v13605_v30  ;;  %v13683_v34 = vld [vmem:[#allocation10 + $0xc6c] ss:$16 sps:$4 sm:$0xff]   ;;  %v13678_v30 = vld [vmem:[#allocation10 + $0xc60] ss:$16 sps:$4 sm:$0xff]  }
 0xcdf   :  { %8957 = vmatpush1.bf16.msra.mxu1 %v13600_v37  ;;  %9039 = vmatpush1.bf16.msra.mxu0 %v13603_v43  ;;  %v13686_v37 = vld [vmem:[#allocation10 + $0xc84] ss:$16 sps:$4 sm:$0xff]   ;;  %v13689_v43 = vld [vmem:[#allocation10 + $0xc8c] ss:$16 sps:$4 sm:$0xff]  }
 0xce0   :  { %8958 = vmatprep.subr.bf16.mxu1 %v13608_v35  ;;  %9040 = vmatprep.subr.bf16.mxu0 %v13611_v44  ;;  %v13684_v35 = vld [vmem:[#allocation10 + $0xc80] ss:$16 sps:$4 sm:$0xff]   ;;  %v13687_v44 = vld [vmem:[#allocation10 + $0xc88] ss:$16 sps:$4 sm:$0xff]  }
 0xce3   :  { %8959 = vmatpush1.bf16.msra.mxu1 %v13606_v4  ;;  %9041 = vmatpush1.bf16.msra.mxu0 %v13609_v28  ;;  %v13695_v4 = vld [vmem:[#allocation10 + $0xcac] ss:$16 sps:$4 sm:$0xff]   ;;  %v13690_v28 = vld [vmem:[#allocation10 + $0xca0] ss:$16 sps:$4 sm:$0xff]  }
 0xce4   :  { %8960 = vmatprep.subr.bf16.mxu1 %v13614_v46  ;;  %9042 = vmatprep.subr.bf16.mxu0 %v13617_v5  ;;  %v13693_v46 = vld [vmem:[#allocation10 + $0xca8] ss:$16 sps:$4 sm:$0xff]   ;;  %v13698_v5 = vld [vmem:[#allocation10 + $0xcc4] ss:$16 sps:$4 sm:$0xff]  }
 0xce7   :  { %8961 = vmatpush1.bf16.msra.mxu1 %v13612_v49  ;;  %9043 = vmatpush1.bf16.msra.mxu0 %v13615_v47  ;;  %v13701_v49 = vld [vmem:[#allocation10 + $0xccc] ss:$16 sps:$4 sm:$0xff]   ;;  %v13696_v47 = vld [vmem:[#allocation10 + $0xcc0] ss:$16 sps:$4 sm:$0xff]  }
 0xce8   :  { %8962 = vmatprep.subr.bf16.mxu1 %v13620_v7  ;;  %9044 = vmatprep.subr.bf16.mxu0 %v13623_v48  ;;  %v13699_v7 = vld [vmem:[#allocation10 + $0xcc8] ss:$16 sps:$4 sm:$0xff]   ;;  %v13704_v48 = vld [vmem:[#allocation10 + $0xce4] ss:$16 sps:$4 sm:$0xff]  }
 0xceb   :  { %8963 = vmatpush1.bf16.msra.mxu1 %v13618_v53  ;;  %9045 = vmatpush1.bf16.msra.mxu0 %v13621_v56  ;;  %v13707_v53 = vld [vmem:[#allocation10 + $0xcec] ss:$16 sps:$4 sm:$0xff]   ;;  %v13702_v56 = vld [vmem:[#allocation10 + $0xce0] ss:$16 sps:$4 sm:$0xff]  }
 0xcec   :  { %8964 = vmatprep.subr.bf16.mxu1 %v13626_v57  ;;  %9046 = vmatprep.subr.bf16.mxu0 %v13629_v2  ;;  %v13705_v57 = vld [vmem:[#allocation10 + $0xce8] ss:$16 sps:$4 sm:$0xff]   ;;  %v13710_v2 = vld [vmem:[#allocation10 + $0xd04] ss:$16 sps:$4 sm:$0xff]  }
 0xcef   :  { %8965 = vmatpush1.bf16.msra.mxu1 %v13624_v58  ;;  %9047 = vmatpush1.bf16.msra.mxu0 %v13627_v59  ;;  %v13713_v58 = vld [vmem:[#allocation10 + $0xd0c] ss:$16 sps:$4 sm:$0xff]   ;;  %v13708_v59 = vld [vmem:[#allocation10 + $0xd00] ss:$16 sps:$4 sm:$0xff]  }
 0xcf0   :  { %8966 = vmatprep.subr.bf16.mxu1 %v13632_v61  ;;  %9048 = vmatprep.subr.bf16.mxu0 %v13635_v62  ;;  %v13716_v61 = vld [vmem:[#allocation10 + $0xd24] ss:$16 sps:$4 sm:$0xff]   ;;  %v13719_v62 = vld [vmem:[#allocation10 + $0xd2c] ss:$16 sps:$4 sm:$0xff]  }
 0xcf3   :  { %8967 = vmatpush1.bf16.msra.mxu1 %v13630_v0  ;;  %9049 = vmatpush1.bf16.msra.mxu0 %v13633_v1  ;;  %v13717_v0 = vld [vmem:[#allocation10 + $0xd28] ss:$16 sps:$4 sm:$0xff]   ;;  %v13722_v1 = vld [vmem:[#allocation10 + $0xd44] ss:$16 sps:$4 sm:$0xff]  }
 0xcf4   :  { %8968 = vmatprep.subr.bf16.mxu1 %v13638_v3  ;;  %9050 = vmatprep.subr.bf16.mxu0 %v13641_v55  ;;  %v13725_v3 = vld [vmem:[#allocation10 + $0xd4c] ss:$16 sps:$4 sm:$0xff]   ;;  %v13720_v55 = vld [vmem:[#allocation10 + $0xd40] ss:$16 sps:$4 sm:$0xff]  }
 0xcf7   :  { %8969 = vmatpush1.bf16.msra.mxu1 %v13636_v50  ;;  %9051 = vmatpush1.bf16.msra.mxu0 %v13639_v54  ;;  %v13723_v50 = vld [vmem:[#allocation10 + $0xd48] ss:$16 sps:$4 sm:$0xff]   ;;  %v13728_v54 = vld [vmem:[#allocation10 + $0xd64] ss:$16 sps:$4 sm:$0xff]  }
 0xcf8   :  { %8970 = vmatprep.subr.bf16.mxu1 %v13644_v6  ;;  %9052 = vmatprep.subr.bf16.mxu0 %v13647_v8  ;;  %v13731_v6 = vld [vmem:[#allocation10 + $0xd6c] ss:$16 sps:$4 sm:$0xff]   ;;  %v13726_v8 = vld [vmem:[#allocation10 + $0xd60] ss:$16 sps:$4 sm:$0xff]  }
 0xcfb   :  { %8971 = vmatpush1.bf16.msra.mxu1 %v13642_v9  ;;  %9053 = vmatpush1.bf16.msra.mxu0 %v13645_v10  ;;  %v13729_v9 = vld [vmem:[#allocation10 + $0xd68] ss:$16 sps:$4 sm:$0xff]   ;;  %v13734_v10 = vld [vmem:[#allocation10 + $0xd84] ss:$16 sps:$4 sm:$0xff]  }
 0xcfc   :  { %8972 = vmatprep.subr.bf16.mxu1 %v13650_v11  ;;  %9054 = vmatprep.subr.bf16.mxu0 %v13653_v12  ;;  %v13737_v11 = vld [vmem:[#allocation10 + $0xd8c] ss:$16 sps:$4 sm:$0xff]   ;;  %v13732_v12 = vld [vmem:[#allocation10 + $0xd80] ss:$16 sps:$4 sm:$0xff]  }
 0xcff   :  { %8973 = vmatpush1.bf16.msra.mxu1 %v13648_v14  ;;  %9055 = vmatpush1.bf16.msra.mxu0 %v13651_v15  ;;  %v13735_v14 = vld [vmem:[#allocation10 + $0xd88] ss:$16 sps:$4 sm:$0xff]   ;;  %v13740_v15 = vld [vmem:[#allocation10 + $0xda4] ss:$16 sps:$4 sm:$0xff]  }
 0xd00   :  { %8974 = vmatprep.subr.bf16.mxu1 %v13656_v16  ;;  %9056 = vmatprep.subr.bf16.mxu0 %v13659_v39  ;;  %v13743_v16 = vld [vmem:[#allocation10 + $0xdac] ss:$16 sps:$4 sm:$0xff]   ;;  %v13738_v39 = vld [vmem:[#allocation10 + $0xda0] ss:$16 sps:$4 sm:$0xff]  }
 0xd03   :  { %8975 = vmatpush1.bf16.msra.mxu1 %v13654_v13  ;;  %9057 = vmatpush1.bf16.msra.mxu0 %v13657_v19  ;;  %v13746_v13 = vld [vmem:[#allocation10 + $0xdc4] ss:$16 sps:$4 sm:$0xff]   ;;  %v13749_v19 = vld [vmem:[#allocation10 + $0xdcc] ss:$16 sps:$4 sm:$0xff]  }
 0xd04   :  { %9891 = vmatprep.subr.bf16.mxu1 %v13662_v22  ;;  %9973 = vmatprep.subr.bf16.mxu0 %v13665_v23  ;;  %v13747_v22 = vld [vmem:[#allocation10 + $0xdc8] ss:$16 sps:$4 sm:$0xff]   ;;  %v13752_v23 = vld [vmem:[#allocation10 + $0xde4] ss:$16 sps:$4 sm:$0xff]  }
 0xd06   :  { %8977 = vmatmul.mubr.bf16.vlgmr.msra.gmra.mrb[40].mxu1 %v8238_v25  ;;  %9059 = vmatmul.mubr.bf16.vlgmr.msra.gmra.mrb[40].mxu0 %v8238_v25  ;;  %v13753_v25 = vld [vmem:[#allocation10 + $0xde8] ss:$16 sps:$4 sm:$0xff]  }
 0xd07   :  { %9892 = vmatpush1.bf16.msra.mxu1 %v13660_v18  ;;  %9974 = vmatpush1.bf16.msra.mxu0 %v13663_v24  ;;  %v13755_v18 = vld [vmem:[#allocation10 + $0xdec] ss:$16 sps:$4 sm:$0xff]   ;;  %v13750_v24 = vld [vmem:[#allocation10 + $0xde0] ss:$16 sps:$4 sm:$0xff]  }
 0xd08   :  { %9893 = vmatprep.subr.bf16.mxu1 %v13668_v38  ;;  %9975 = vmatprep.subr.bf16.mxu0 %v13671_v21  ;;  %v13758_v38 = vld [vmem:[#allocation10 + $0xe04] ss:$16 sps:$4 sm:$0xff]   ;;  %v13761_v21 = vld [vmem:[#allocation10 + $0xe0c] ss:$16 sps:$4 sm:$0xff]  }
 0xd0b   :  { %9894 = vmatpush1.bf16.msra.mxu1 %v13666_v45  ;;  %9976 = vmatpush1.bf16.msra.mxu0 %v13669_v31  ;;  %v14642_v45 = vld [vmem:[#allocation13 + $0x34] ss:$8 sm:$0xf] }
 0xd0c   :  { %9895 = vmatprep.subr.bf16.mxu1 %v13674_v32  ;;  %9977 = vmatprep.subr.bf16.mxu0 %v13677_v27  ;;  %v8246_v31 = vrot.slane %v14642_v45, %v14457_v40  ;;  %v8250_v32 = vrot.slane %v14642_v45, %v14460_v41  ;;  %v8258_v27 = vrot.slane %v14642_v45, %v14467_v52 }
 0xd0f   :  { %9896 = vmatpush1.bf16.msra.mxu1 %v13672_v51  ;;  %9978 = vmatpush1.bf16.msra.mxu0 %v13675_v26 }
 0xd10   :  { %9897 = vmatprep.subr.bf16.mxu1 %v13680_v33  ;;  %9979 = vmatprep.subr.bf16.mxu0 %v13683_v34 }
 0xd13   :  { %9898 = vmatpush1.bf16.msra.mxu1 %v13678_v30  ;;  %9980 = vmatpush1.bf16.msra.mxu0 %v13681_v36 }
 0xd14   :  { %9899 = vmatprep.subr.bf16.mxu1 %v13686_v37  ;;  %9981 = vmatprep.subr.bf16.mxu0 %v13689_v43 }
 0xd17   :  { %9900 = vmatpush1.bf16.msra.mxu1 %v13684_v35  ;;  %9982 = vmatpush1.bf16.msra.mxu0 %v13687_v44 }
 0xd18   :  { %9901 = vmatprep.subr.bf16.mxu1 %v13692_v42  ;;  %9983 = vmatprep.subr.bf16.mxu0 %v13695_v4 }
 0xd1b   :  { %9902 = vmatpush1.bf16.msra.mxu1 %v13690_v28  ;;  %9984 = vmatpush1.bf16.msra.mxu0 %v13693_v46 }
 0xd1c   :  { %9903 = vmatprep.subr.bf16.mxu1 %v13698_v5  ;;  %9985 = vmatprep.subr.bf16.mxu0 %v13701_v49 }
 0xd1f   :  { %9904 = vmatpush1.bf16.msra.mxu1 %v13696_v47  ;;  %9986 = vmatpush1.bf16.msra.mxu0 %v13699_v7 }
 0xd20   :  { %9905 = vmatprep.subr.bf16.mxu1 %v13704_v48  ;;  %9987 = vmatprep.subr.bf16.mxu0 %v13707_v53 }
 0xd23   :  { %9906 = vmatpush1.bf16.msra.mxu1 %v13702_v56  ;;  %9988 = vmatpush1.bf16.msra.mxu0 %v13705_v57 }
 0xd24   :  { %9907 = vmatprep.subr.bf16.mxu1 %v13710_v2  ;;  %9989 = vmatprep.subr.bf16.mxu0 %v13713_v58 }
 0xd27   :  { %9908 = vmatpush1.bf16.msra.mxu1 %v13708_v59  ;;  %9990 = vmatpush1.bf16.msra.mxu0 %v13711_v60 }
 0xd28   :  { %9909 = vmatprep.subr.bf16.mxu1 %v13716_v61  ;;  %9991 = vmatprep.subr.bf16.mxu0 %v13719_v62  ;;  %v13756_v62 = vld [vmem:[#allocation10 + $0xe00] ss:$16 sps:$4 sm:$0xff]  }
 0xd2b   :  { %9910 = vmatpush1.bf16.msra.mxu1 %v13714_v63  ;;  %9992 = vmatpush1.bf16.msra.mxu0 %v13717_v0  ;;  %v13759_v63 = vld [vmem:[#allocation10 + $0xe08] ss:$16 sps:$4 sm:$0xff]  }
 0xd2c   :  { %9911 = vmatprep.subr.bf16.mxu1 %v13722_v1  ;;  %9993 = vmatprep.subr.bf16.mxu0 %v13725_v3  ;;  %v13764_v1 = vld [vmem:[#allocation10 + $0xe24] ss:$16 sps:$4 sm:$0xff]   ;;  %v13767_v3 = vld [vmem:[#allocation10 + $0xe2c] ss:$16 sps:$4 sm:$0xff]  }
 0xd2f   :  { %9912 = vmatpush1.bf16.msra.mxu1 %v13720_v55  ;;  %9994 = vmatpush1.bf16.msra.mxu0 %v13723_v50  ;;  %v13762_v50 = vld [vmem:[#allocation10 + $0xe20] ss:$16 sps:$4 sm:$0xff]  }
 0xd30   :  { %9913 = vmatprep.subr.bf16.mxu1 %v13728_v54  ;;  %9995 = vmatprep.subr.bf16.mxu0 %v13731_v6  ;;  %v13765_v54 = vld [vmem:[#allocation10 + $0xe28] ss:$16 sps:$4 sm:$0xff]   ;;  %v13770_v6 = vld [vmem:[#allocation10 + $0xe44] ss:$16 sps:$4 sm:$0xff]  }
 0xd33   :  { %9914 = vmatpush1.bf16.msra.mxu1 %v13726_v8  ;;  %9996 = vmatpush1.bf16.msra.mxu0 %v13729_v9  ;;  %v13773_v8 = vld [vmem:[#allocation10 + $0xe4c] ss:$16 sps:$4 sm:$0xff]   ;;  %v13768_v9 = vld [vmem:[#allocation10 + $0xe40] ss:$16 sps:$4 sm:$0xff]  }
 0xd34   :  { %9915 = vmatprep.subr.bf16.mxu1 %v13734_v10  ;;  %9997 = vmatprep.subr.bf16.mxu0 %v13737_v11  ;;  %v13771_v10 = vld [vmem:[#allocation10 + $0xe48] ss:$16 sps:$4 sm:$0xff]   ;;  %v13776_v11 = vld [vmem:[#allocation10 + $0xe64] ss:$16 sps:$4 sm:$0xff]  }
 0xd37   :  { %9916 = vmatpush1.bf16.msra.mxu1 %v13732_v12  ;;  %9998 = vmatpush1.bf16.msra.mxu0 %v13735_v14  ;;  %v13779_v12 = vld [vmem:[#allocation10 + $0xe6c] ss:$16 sps:$4 sm:$0xff]   ;;  %v13774_v14 = vld [vmem:[#allocation10 + $0xe60] ss:$16 sps:$4 sm:$0xff]  }
 0xd38   :  { %9917 = vmatprep.subr.bf16.mxu1 %v13740_v15  ;;  %9999 = vmatprep.subr.bf16.mxu0 %v13743_v16  ;;  %v13777_v15 = vld [vmem:[#allocation10 + $0xe68] ss:$16 sps:$4 sm:$0xff]   ;;  %v13782_v16 = vld [vmem:[#allocation10 + $0xe84] ss:$16 sps:$4 sm:$0xff]  }
 0xd3b   :  { %9918 = vmatpush1.bf16.msra.mxu1 %v13738_v39  ;;  %10000 = vmatpush1.bf16.msra.mxu0 %v13741_v17  ;;  %v13785_v39 = vld [vmem:[#allocation10 + $0xe8c] ss:$16 sps:$4 sm:$0xff]   ;;  %v13780_v17 = vld [vmem:[#allocation10 + $0xe80] ss:$16 sps:$4 sm:$0xff]  }
 0xd3c   :  { %9919 = vmatprep.subr.bf16.mxu1 %v13746_v13  ;;  %10001 = vmatprep.subr.bf16.mxu0 %v13749_v19  ;;  %v13783_v13 = vld [vmem:[#allocation10 + $0xe88] ss:$16 sps:$4 sm:$0xff]   ;;  %v13788_v19 = vld [vmem:[#allocation10 + $0xea4] ss:$16 sps:$4 sm:$0xff]  }
 0xd3f   :  { %9920 = vmatpush1.bf16.msra.mxu1 %v13744_v20  ;;  %10002 = vmatpush1.bf16.msra.mxu0 %v13747_v22  ;;  %v13791_v20 = vld [vmem:[#allocation10 + $0xeac] ss:$16 sps:$4 sm:$0xff]   ;;  %v8254_v22 = vrot.slane %v14642_v45, %v14474_v29 }
 0xd40   :  { %9921 = vmatprep.subr.bf16.mxu1 %v13752_v23  ;;  %10003 = vmatprep.subr.bf16.mxu0 %v13755_v18  ;;  %v13786_v23 = vld [vmem:[#allocation10 + $0xea0] ss:$16 sps:$4 sm:$0xff]   ;;  %v13789_v18 = vld [vmem:[#allocation10 + $0xea8] ss:$16 sps:$4 sm:$0xff]  }
 0xd43   :  { %9922 = vmatpush1.bf16.msra.mxu1 %v13750_v24  ;;  %10004 = vmatpush1.bf16.msra.mxu0 %v13753_v25  ;;  %v13794_v24 = vld [vmem:[#allocation10 + $0xec4] ss:$16 sps:$4 sm:$0xff]   ;;  %v13797_v25 = vld [vmem:[#allocation10 + $0xecc] ss:$16 sps:$4 sm:$0xff]  }
 0xd44   :  { %9932 = vmatprep.subr.bf16.mxu1 %v13758_v38  ;;  %10014 = vmatprep.subr.bf16.mxu0 %v13761_v21  ;;  %v13792_v21 = vld [vmem:[#allocation10 + $0xec0] ss:$16 sps:$4 sm:$0xff]  }
 0xdd9   :  { %v8978_v51 = vpop.f32.mrb[40].mxu1  ;;  %v14650_v26 = vpop.f32.mrb[40].mxu0 }
 0xdda   :  { %v11869_v33 = vadd.f32 %v8978_v51, %v8246_v31  ;;  %v8980_v34 = vpop.f32.mrb[41].mxu1  ;;  %v9062_v30 = vpop.f32.mrb[41].mxu0  ;;  %v14655_v38 = vadd.f32 %v14650_v26, %v8254_v22  ;;  %v13795_v31 = vld [vmem:[#allocation10 + $0xec8] ss:$16 sps:$4 sm:$0xff]   ;;  %v13798_v51 = vld [vmem:[#allocation10 + $0xee0] ss:$16 sps:$4 sm:$0xff]  }
 0xddb   :  { %v11870_v36 = vadd.f32 %v8980_v34, %v8250_v32  ;;  %v11872_v37 = vadd.f32 %v9062_v30, %v8258_v27  ;;  %v8982_v43 = vpop.f32.mrb[42].mxu1  ;;  %v9064_v35 = vpop.f32.mrb[42].mxu0  ;;  %v13800_v32 = vld [vmem:[#allocation10 + $0xee4] ss:$16 sps:$4 sm:$0xff]   ;;  %v13803_v27 = vld [vmem:[#allocation10 + $0xeec] ss:$16 sps:$4 sm:$0xff]  }
 0xddc   :  { %v11609_v44 = vmul.f32 -1.442695, %v11869_v33  ;;  %v8983_v42 = vpop.f32.mrb[43].mxu1  ;;  %v9065_v4 = vpop.f32.mrb[43].mxu0  ;;  %v11611_v45 = vmul.f32 -1.442695, %v14655_v38 }
 0xddd   :  { %v11610_v28 = vmul.f32 -1.442695, %v11870_v36  ;;  %v11612_v46 = vmul.f32 -1.442695, %v11872_v37  ;;  %v13806_v34 = vld [vmem:[#allocation10 + $0xf04] ss:$16 sps:$4 sm:$0xff]  }
 0xdde   :  { %14036 = vpow2.f32 %v11609_v44  ;;  %v13809_v30 = vld [vmem:[#allocation10 + $0xf0c] ss:$16 sps:$4 sm:$0xff]   ;;  %v13804_v26 = vld [vmem:[#allocation10 + $0xf00] ss:$16 sps:$4 sm:$0xff]   ;;  %v13813_v44 = vld [vmem:[#allocation10 + $0xf28] ss:$16 sps:$4 sm:$0xff]  }
 0xddf   :  { %14038 = vpow2.f32 %v11610_v28  ;;  %v13815_v43 = vld [vmem:[#allocation10 + $0xf2c] ss:$16 sps:$4 sm:$0xff]   ;;  %v13810_v35 = vld [vmem:[#allocation10 + $0xf20] ss:$16 sps:$4 sm:$0xff]   ;;  %v13818_v42 = vld [vmem:[#allocation10 + $0xf44] ss:$16 sps:$4 sm:$0xff]  }
 0xde0   :  { %14040 = vpow2.f32 %v11612_v46  ;;  %v13821_v4 = vld [vmem:[#allocation10 + $0xf4c] ss:$16 sps:$4 sm:$0xff]   ;;  %v13816_v28 = vld [vmem:[#allocation10 + $0xf40] ss:$16 sps:$4 sm:$0xff]   ;;  %v13819_v46 = vld [vmem:[#allocation10 + $0xf48] ss:$16 sps:$4 sm:$0xff]  }
 0xde1   :  { %v13862_v22 = vld [vmem:[#allocation12 + $0x10] sm:$0xff]  }
 0xde8   :  { %v14037_v5 = vpop.eup %14036 }
 0xde9   :  { %v9079_v49 = vadd.f32 1.0, %v14037_v5  ;;  %v14039_v47 = vpop.eup %14038 }
 0xdea   :  { %v14041_v7 = vpop.eup %14040  ;;  %v9080_v48 = vadd.f32 1.0, %v14039_v47  ;;  %v13827_v47 = vld [vmem:[#allocation10 + $0xf6c] ss:$16 sps:$4 sm:$0xff]  }
 0xdeb   :  { %14042 = vrcp.f32 %v9079_v49  ;;  %v9082_v53 = vadd.f32 1.0, %v14041_v7  ;;  %v13824_v49 = vld [vmem:[#allocation10 + $0xf64] ss:$16 sps:$4 sm:$0xff]  }
 0xdec   :  { %14044 = vrcp.f32 %v9080_v48  ;;  %v13822_v48 = vld [vmem:[#allocation10 + $0xf60] ss:$16 sps:$4 sm:$0xff]  }
 0xded   :  { %14046 = vrcp.f32 %v9082_v53  ;;  %v13825_v53 = vld [vmem:[#allocation10 + $0xf68] ss:$16 sps:$4 sm:$0xff]  }
 0xdee   :  { %14048 = vpow2.f32 %v11611_v45  ;;  %v13872_v45 = vld [vmem:[#allocation12 + $0x68] sm:$0xff]  }
 0xdf5   :  { %v14043_v56 = vpop.eup %14042 }
 0xdf6   :  { %v14045_v57 = vpop.eup %14044  ;;  %v9091_v2 = vmul.f32 %v14043_v56, %v11869_v33  ;;  %v13801_v33 = vld [vmem:[#allocation10 + $0xee8] ss:$16 sps:$4 sm:$0xff]   ;;  %v13830_v56 = vld [vmem:[#allocation10 + $0xf84] ss:$16 sps:$4 sm:$0xff]  }
 0xdf7   :  { %v14047_v58 = vpop.eup %14046  ;;  %v9092_v59 = vmul.f32 %v14045_v57, %v11870_v36  ;;  %v13807_v36 = vld [vmem:[#allocation10 + $0xf08] ss:$16 sps:$4 sm:$0xff]   ;;  %v13833_v57 = vld [vmem:[#allocation10 + $0xf8c] ss:$16 sps:$4 sm:$0xff]  }
 0xdf8   :  { %v9094_v60 = vmul.f32 %v14047_v58, %v11872_v37  ;;  %v9224_v0 = vpack.c.bf16 %v9091_v2, %v9091_v2  ;;  %v13812_v37 = vld [vmem:[#allocation10 + $0xf24] ss:$16 sps:$4 sm:$0xff]   ;;  %v14049_v5 = vpop.eup %14048  ;;  %v13828_v2 = vld [vmem:[#allocation10 + $0xf80] ss:$16 sps:$4 sm:$0xff]   ;;  %v13831_v58 = vld [vmem:[#allocation10 + $0xf88] ss:$16 sps:$4 sm:$0xff]  }
 0xdf9   :  { %v9225_v61 = vpack.c.bf16 %v9092_v59, %v9092_v59  ;;  %v9081_v7 = vadd.f32 1.0, %v14049_v5  ;;  %v13836_v59 = vld [vmem:[#allocation10 + $0xfa4] ss:$16 sps:$4 sm:$0xff]  }
 0xdfa   :  { %v9227_v55 = vpack.c.bf16 %v9094_v60, %v9094_v60  ;;  %v13839_v60 = vld [vmem:[#allocation10 + $0xfac] ss:$16 sps:$4 sm:$0xff]  }
 0xdfb   :  { %9923 = vmatprep.mubr.bf16.mxu1 %v9225_v61  ;;  %10005 = vmatprep.mubr.bf16.mxu0 %v9225_v61  ;;  %14050 = vrcp.f32 %v9081_v7  ;;  %v13834_v61 = vld [vmem:[#allocation10 + $0xfa0] ss:$16 sps:$4 sm:$0xff]  }
 0xdfc   :  { %9924 = vmatmul.mubr.bf16.vlgmr.msra.gmra.mrb[44].mxu1 %v9224_v0  ;;  %10006 = vmatmul.mubr.bf16.vlgmr.msra.gmra.mrb[44].mxu0 %v9224_v0  ;;  %v13845_v0 = vld [vmem:[#allocation10 + $0xfcc] ss:$16 sps:$4 sm:$0xff]  }
 0xdfd   :  { %9933 = vmatpush1.bf16.msra.mxu1 %v13756_v62  ;;  %10015 = vmatpush1.bf16.msra.mxu0 %v13759_v63  ;;  %v13837_v62 = vld [vmem:[#allocation10 + $0xfa8] ss:$16 sps:$4 sm:$0xff]   ;;  %v13842_v63 = vld [vmem:[#allocation10 + $0xfc4] ss:$16 sps:$4 sm:$0xff]  }
 0xdfe   :  { %9964 = vmatprep.mubr.bf16.mxu1 %v9227_v55  ;;  %10046 = vmatprep.mubr.bf16.mxu0 %v9227_v55  ;;  %v13848_v55 = vld [vmem:[#allocation10 + $0xfe4] ss:$16 sps:$4 sm:$0xff]  }
 0xdff   :  { %9934 = vmatprep.subr.bf16.mxu1 %v13764_v1  ;;  %10016 = vmatprep.subr.bf16.mxu0 %v13767_v3  ;;  %v13840_v1 = vld [vmem:[#allocation10 + $0xfc0] ss:$16 sps:$4 sm:$0xff]   ;;  %v13843_v3 = vld [vmem:[#allocation10 + $0xfc8] ss:$16 sps:$4 sm:$0xff]  }
 0xe01   :  { %9935 = vmatpush1.bf16.msra.mxu1 %v13762_v50  ;;  %10017 = vmatpush1.bf16.msra.mxu0 %v13765_v54  ;;  %v13851_v50 = vld [vmem:[#allocation10 + $0xfec] ss:$16 sps:$4 sm:$0xff]  }
 0xe02   :  { %9936 = vmatprep.subr.bf16.mxu1 %v13770_v6  ;;  %10018 = vmatprep.subr.bf16.mxu0 %v13773_v8  ;;  %v13846_v6 = vld [vmem:[#allocation10 + $0xfe0] ss:$16 sps:$4 sm:$0xff]   ;;  %v13849_v8 = vld [vmem:[#allocation10 + $0xfe8] ss:$16 sps:$4 sm:$0xff]  }
 0xe05   :  { %9937 = vmatpush1.bf16.msra.mxu1 %v13768_v9  ;;  %10019 = vmatpush1.bf16.msra.mxu0 %v13771_v10  ;;  %v14051_v54 = vpop.eup %14050 }
 0xe06   :  { %9938 = vmatprep.subr.bf16.mxu1 %v13776_v11  ;;  %10020 = vmatprep.subr.bf16.mxu0 %v13779_v12  ;;  %v9093_v9 = vmul.f32 %v14051_v54, %v14655_v38  ;;  %v13852_v11 = vld [vmem:[#allocation12 + $0x40] sm:$0xff]   ;;  %v13867_v38 = vld [vmem:[#allocation12 + $0x98] sm:$0xff]  }
 0xe07   :  { %v13853_v12 = vld [vmem:[#allocation12 + $0xc0] sm:$0xff]  }
 0xe08   :  { %v9226_v10 = vpack.c.bf16 %v9093_v9, %v9093_v9 }
 0xe09   :  { %9939 = vmatpush1.bf16.msra.mxu1 %v13774_v14  ;;  %10021 = vmatpush1.bf16.msra.mxu0 %v13777_v15  ;;  %v13854_v14 = vld [vmem:[#allocation12] sm:$0xff]  }
 0xe0a   :  { %9940 = vmatprep.subr.bf16.mxu1 %v13782_v16  ;;  %10022 = vmatprep.subr.bf16.mxu0 %v13785_v39  ;;  %v13855_v15 = vld [vmem:[#allocation12 + $0x80] sm:$0xff]   ;;  %v13856_v16 = vld [vmem:[#allocation12 + $0x48] sm:$0xff]  }
 0xe0b   :  { %v13857_v39 = vld [vmem:[#allocation12 + $0xc8] sm:$0xff]  }
 0xe0d   :  { %9941 = vmatpush1.bf16.msra.mxu1 %v13780_v17  ;;  %10023 = vmatpush1.bf16.msra.mxu0 %v13783_v13  ;;  %v13858_v17 = vld [vmem:[#allocation12 + $0x8] sm:$0xff]  }
 0xe0e   :  { %9942 = vmatprep.subr.bf16.mxu1 %v13788_v19  ;;  %10024 = vmatprep.subr.bf16.mxu0 %v13791_v20  ;;  %v13859_v13 = vld [vmem:[#allocation12 + $0x88] sm:$0xff]   ;;  %v13860_v19 = vld [vmem:[#allocation12 + $0x50] sm:$0xff]  }
 0xe0f   :  { %v13861_v20 = vld [vmem:[#allocation12 + $0xd0] sm:$0xff]  }
 0xe11   :  { %9943 = vmatpush1.bf16.msra.mxu1 %v13786_v23  ;;  %10025 = vmatpush1.bf16.msra.mxu0 %v13789_v18  ;;  %v13863_v23 = vld [vmem:[#allocation12 + $0x90] sm:$0xff]   ;;  %v13864_v18 = vld [vmem:[#allocation12 + $0x58] sm:$0xff]  }
 0xe12   :  { %9944 = vmatprep.subr.bf16.mxu1 %v13794_v24  ;;  %10026 = vmatprep.subr.bf16.mxu0 %v13797_v25  ;;  %v13865_v24 = vld [vmem:[#allocation12 + $0xd8] sm:$0xff]  }
 0xe13   :  { %v13866_v25 = vld [vmem:[#allocation12 + $0x18] sm:$0xff]  }
 0xe15   :  { %9945 = vmatpush1.bf16.msra.mxu1 %v13792_v21  ;;  %10027 = vmatpush1.bf16.msra.mxu0 %v13795_v31  ;;  %v13868_v21 = vld [vmem:[#allocation12 + $0x60] sm:$0xff]  }
 0xe16   :  { %9946 = vmatprep.subr.bf16.mxu1 %v13800_v32  ;;  %10028 = vmatprep.subr.bf16.mxu0 %v13803_v27  ;;  %v13869_v31 = vld [vmem:[#allocation12 + $0xe0] sm:$0xff]  }
 0xe17   :  { %v13870_v32 = vld [vmem:[#allocation12 + $0x20] sm:$0xff]  }
 0xe18   :  { %v13871_v27 = vld [vmem:[#allocation12 + $0xa0] sm:$0xff]  }
 0xe19   :  { %9947 = vmatpush1.bf16.msra.mxu1 %v13798_v51  ;;  %10029 = vmatpush1.bf16.msra.mxu0 %v13801_v33  ;;  %v13873_v51 = vld [vmem:[#allocation12 + $0xe8] sm:$0xff]  }
 0xe1a   :  { %9948 = vmatprep.subr.bf16.mxu1 %v13806_v34  ;;  %10030 = vmatprep.subr.bf16.mxu0 %v13809_v30  ;;  %v13874_v33 = vld [vmem:[#allocation12 + $0x28] sm:$0xff]   ;;  %v13876_v30 = vld [vmem:[#allocation12 + $0x70] sm:$0xff]  }
 0xe1b   :  { %v13875_v34 = vld [vmem:[#allocation12 + $0xa8] sm:$0xff]  }
 0xe1d   :  { %9949 = vmatpush1.bf16.msra.mxu1 %v13804_v26  ;;  %10031 = vmatpush1.bf16.msra.mxu0 %v13807_v36  ;;  %v13877_v26 = vld [vmem:[#allocation12 + $0xf0] sm:$0xff]  }
 0xe1e   :  { %9950 = vmatprep.subr.bf16.mxu1 %v13812_v37  ;;  %10032 = vmatprep.subr.bf16.mxu0 %v13815_v43  ;;  %v13878_v36 = vld [vmem:[#allocation12 + $0x30] sm:$0xff]   ;;  %v13880_v43 = vld [vmem:[#allocation12 + $0x78] sm:$0xff]  }
 0xe1f   :  { %v13879_v37 = vld [vmem:[#allocation12 + $0xb0] sm:$0xff]  }
 0xe21   :  { %9951 = vmatpush1.bf16.msra.mxu1 %v13810_v35  ;;  %10033 = vmatpush1.bf16.msra.mxu0 %v13813_v44  ;;  %v13881_v35 = vld [vmem:[#allocation12 + $0xf8] sm:$0xff]  }
 0xe22   :  { %9952 = vmatprep.subr.bf16.mxu1 %v13818_v42  ;;  %10034 = vmatprep.subr.bf16.mxu0 %v13821_v4  ;;  %v13882_v44 = vld [vmem:[#allocation12 + $0x38] sm:$0xff]  }
 0xe23   :  { %v13883_v42 = vld [vmem:[#allocation12 + $0xb8] sm:$0xff]  }
 0xe24   :  { %v9229_v4 = vld [vmem:[#allocation13 + $0x35] ss:$8 sm:$0xf] }
 0xe25   :  { %9953 = vmatpush1.bf16.msra.mxu1 %v13816_v28  ;;  %10035 = vmatpush1.bf16.msra.mxu0 %v13819_v46  ;;  %v9234_v28 = vrot.slane %v9229_v4, %v14457_v40  ;;  %v9242_v46 = vrot.slane %v9229_v4, %v14474_v29  ;;  %v9238_v5 = vrot.slane %v9229_v4, %v14460_v41 }
 0xe26   :  { %9954 = vmatprep.subr.bf16.mxu1 %v13824_v49  ;;  %10036 = vmatprep.subr.bf16.mxu0 %v13827_v47  ;;  %v9246_v49 = vrot.slane %v9229_v4, %v14467_v52 }
 0xe29   :  { %9955 = vmatpush1.bf16.msra.mxu1 %v13822_v48  ;;  %10037 = vmatpush1.bf16.msra.mxu0 %v13825_v53 }
 0xe2a   :  { %9956 = vmatprep.subr.bf16.mxu1 %v13830_v56  ;;  %10038 = vmatprep.subr.bf16.mxu0 %v13833_v57 }
 0xe2d   :  { %9957 = vmatpush1.bf16.msra.mxu1 %v13828_v2  ;;  %10039 = vmatpush1.bf16.msra.mxu0 %v13831_v58 }
 0xe2e   :  { %9958 = vmatprep.subr.bf16.mxu1 %v13836_v59  ;;  %10040 = vmatprep.subr.bf16.mxu0 %v13839_v60 }
 0xe31   :  { %9959 = vmatpush1.bf16.msra.mxu1 %v13834_v61  ;;  %10041 = vmatpush1.bf16.msra.mxu0 %v13837_v62 }
 0xe32   :  { %9960 = vmatprep.subr.bf16.mxu1 %v13842_v63  ;;  %10042 = vmatprep.subr.bf16.mxu0 %v13845_v0 }
 0xe35   :  { %9961 = vmatpush1.bf16.msra.mxu1 %v13840_v1  ;;  %10043 = vmatpush1.bf16.msra.mxu0 %v13843_v3 }
 0xe36   :  { %9962 = vmatprep.subr.bf16.mxu1 %v13848_v55  ;;  %10044 = vmatprep.subr.bf16.mxu0 %v13851_v50 }
 0xe39   :  { %9963 = vmatpush1.bf16.msra.mxu1 %v13846_v6  ;;  %10045 = vmatpush1.bf16.msra.mxu0 %v13849_v8 }
 0xe3a   :  { %11799 = vmatprep.subr.bf16.mxu1 %v13852_v11  ;;  %11821 = vmatprep.subr.bf16.mxu0 %v13853_v12 }
 0xe3c   :  { %9965 = vmatmul.mubr.bf16.vlgmr.msra.gmra.mrb[44].mxu1 %v9226_v10  ;;  %10047 = vmatmul.mubr.bf16.vlgmr.msra.gmra.mrb[44].mxu0 %v9226_v10 }
 0xe3d   :  { %11800 = vmatpush3.bf16.msra.mxu1 %v13854_v14  ;;  %11822 = vmatpush3.bf16.msra.mxu0 %v13855_v15 }
 0xe3e   :  { %11801 = vmatprep.subr.bf16.mxu1 %v13856_v16  ;;  %11823 = vmatprep.subr.bf16.mxu0 %v13857_v39 }
 0xe41   :  { %11802 = vmatpush3.bf16.msra.mxu1 %v13858_v17  ;;  %11824 = vmatpush3.bf16.msra.mxu0 %v13859_v13 }
 0xe42   :  { %11803 = vmatprep.subr.bf16.mxu1 %v13860_v19  ;;  %11825 = vmatprep.subr.bf16.mxu0 %v13861_v20 }
 0xe45   :  { %11804 = vmatpush3.bf16.msra.mxu1 %v13862_v22  ;;  %11826 = vmatpush3.bf16.msra.mxu0 %v13863_v23  ;;  %v10151_v23 = vld [vmem:[#allocation13 + $0x36] ss:$0 sm:$0xff] }
 0xe46   :  { %11805 = vmatprep.subr.bf16.mxu1 %v13864_v18  ;;  %11827 = vmatprep.subr.bf16.mxu0 %v13865_v24 }
 0xe49   :  { %11806 = vmatpush3.bf16.msra.mxu1 %v13866_v25  ;;  %11828 = vmatpush3.bf16.msra.mxu0 %v13867_v38 }
 0xe4a   :  { %11807 = vmatprep.subr.bf16.mxu1 %v13868_v21  ;;  %11829 = vmatprep.subr.bf16.mxu0 %v13869_v31 }
 0xe4d   :  { %11808 = vmatpush3.bf16.msra.mxu1 %v13870_v32  ;;  %11830 = vmatpush3.bf16.msra.mxu0 %v13871_v27 }
 0xe4e   :  { %11809 = vmatprep.subr.bf16.mxu1 %v13872_v45  ;;  %11831 = vmatprep.subr.bf16.mxu0 %v13873_v51 }
 0xe51   :  { %11810 = vmatpush3.bf16.msra.mxu1 %v13874_v33  ;;  %11832 = vmatpush3.bf16.msra.mxu0 %v13875_v34 }
 0xe52   :  { %11811 = vmatprep.subr.bf16.mxu1 %v13876_v30  ;;  %11833 = vmatprep.subr.bf16.mxu0 %v13877_v26 }
 0xe55   :  { %11812 = vmatpush3.bf16.msra.mxu1 %v13878_v36  ;;  %11834 = vmatpush3.bf16.msra.mxu0 %v13879_v37 }
 0xe56   :  { %11813 = vmatprep.subr.bf16.mxu1 %v13880_v43  ;;  %11835 = vmatprep.subr.bf16.mxu0 %v13881_v35 }
 0xe59   :  { %11814 = vmatpush3.bf16.msra.mxu1 %v13882_v44  ;;  %11836 = vmatpush3.bf16.msra.mxu0 %v13883_v42 }
 0xf0f   :  { %v9966_v47 = vpop.f32.mrb[44].mxu1  ;;  %v10048_v7 = vpop.f32.mrb[44].mxu0 }
 0xf10   :  { %v11873_v48 = vadd.f32 %v9966_v47, %v9234_v28  ;;  %v11875_v53 = vadd.f32 %v10048_v7, %v9242_v46  ;;  %v9968_v56 = vpop.f32.mrb[45].mxu1  ;;  %v10050_v57 = vpop.f32.mrb[45].mxu0 }
 0xf11   :  { %v11874_v2 = vadd.f32 %v9968_v56, %v9238_v5  ;;  %v11876_v58 = vadd.f32 %v10050_v57, %v9246_v49  ;;  %v9970_v59 = vpop.f32.mrb[46].mxu1  ;;  %v10052_v60 = vpop.f32.mrb[46].mxu0 }
 0xf12   :  { %v11741_v61 = vmul.f32 -1.442695, %v11873_v48  ;;  %v11743_v62 = vmul.f32 -1.442695, %v11875_v53  ;;  %v9971_v63 = vpop.f32.mrb[47].mxu1  ;;  %v10053_v40 = vpop.f32.mrb[47].mxu0 }
 0xf13   :  { %v11742_v0 = vmul.f32 -1.442695, %v11874_v2  ;;  %v11744_v29 = vmul.f32 -1.442695, %v11876_v58 }
 0xf14   :  { %14052 = vpow2.f32 %v11741_v61 }
 0xf15   :  { %14054 = vpow2.f32 %v11743_v62 }
 0xf16   :  { %14056 = vpow2.f32 %v11742_v0 }
 0xf17   :  { %14058 = vpow2.f32 %v11744_v29 }
 0xf1e   :  { %v14053_v41 = vpop.eup %14052 }
 0xf1f   :  { %v14055_v52 = vpop.eup %14054  ;;  %v10067_v1 = vadd.f32 1.0, %v14053_v41 }
 0xf20   :  { %v14057_v3 = vpop.eup %14056  ;;  %v10069_v55 = vadd.f32 1.0, %v14055_v52 }
 0xf21   :  { %v14059_v50 = vpop.eup %14058  ;;  %14060 = vrcp.f32 %v10067_v1  ;;  %v10068_v54 = vadd.f32 1.0, %v14057_v3 }
 0xf22   :  { %14062 = vrcp.f32 %v10069_v55  ;;  %v10070_v6 = vadd.f32 1.0, %v14059_v50 }
 0xf23   :  { %14064 = vrcp.f32 %v10068_v54 }
 0xf24   :  { %14066 = vrcp.f32 %v10070_v6 }
 0xf2b   :  { %v14061_v8 = vpop.eup %14060 }
 0xf2c   :  { %v14063_v9 = vpop.eup %14062  ;;  %v10079_v11 = vmul.f32 %v14061_v8, %v11873_v48 }
 0xf2d   :  { %v14065_v10 = vpop.eup %14064  ;;  %v10081_v14 = vmul.f32 %v14063_v9, %v11875_v53 }
 0xf2e   :  { %v14067_v12 = vpop.eup %14066  ;;  %v10080_v15 = vmul.f32 %v14065_v10, %v11874_v2  ;;  %v10147_v17 = vpack.c.bf16 %v10079_v11, %v10079_v11 }
 0xf2f   :  { %v10082_v16 = vmul.f32 %v14067_v12, %v11876_v58  ;;  %v10149_v19 = vpack.c.bf16 %v10081_v14, %v10081_v14 }
 0xf30   :  { %v10148_v39 = vpack.c.bf16 %v10080_v15, %v10080_v15 }
 0xf31   :  { %v10150_v13 = vpack.c.bf16 %v10082_v16, %v10082_v16 }
 0xf32   :  { %10376 = vmatprep.mubr.bf16.mxu1 %v10148_v39 }
 0xf33   :  { %10416 = vmatprep.mubr.bf16.mxu0 %v10150_v13  ;;  %10377 = vmatmul.mubr.bf16.vlgmr.msra.gmra.mrb[48].mxu1 %v10147_v17 }
 0xf34   :  { %10417 = vmatmul.mubr.bf16.vlgmr.msra.gmra.mrb[48].mxu0 %v10149_v19 }
0x1006   :  { %v11815_v20 = vpop.f32.mrb[48].mxu1 }
0x1007   :  { %v11837_v22 = vpop.f32.mrb[48].mxu0  ;;  %v11816_v18 = vpop.f32.mrb[49].mxu1 }
0x1008   :  { %v11817_v24 = vadd.f32 %v11816_v18, %v11815_v20  ;;  %v11838_v25 = vpop.f32.mrb[49].mxu0  ;;  %v11818_v38 = vpop.f32.mrb[50].mxu1 }
0x1009   :  { %v11839_v21 = vadd.f32 %v11838_v25, %v11837_v22  ;;  %v11840_v31 = vpop.f32.mrb[50].mxu0  ;;  %v11819_v32 = vpop.f32.mrb[51].mxu1 }
0x100a   :  { %v10379_v27 = vadd.f32 %v11817_v24, %v10151_v23  ;;  %v11841_v45 = vpop.f32.mrb[51].mxu0 }
0x100c   :  { %v10419_v51 = vadd.f32 %v11839_v21, %v10379_v27 }
0x100e   :  { %10425 = vst [vmem:[%s14675_s9 + $0x8] sm:$0xff] %v10419_v51 }
0x100f   :  { %10430 = vsyncpa [#allocation3], 1 }
0x1010   :  { %10431 = vsyncpa [#allocation5], 1 }
0x1011   :  { %10432 = vsyncpa [#allocation8], 1 }
0x1012   :  { %10433 = vsyncpa [#allocation11], 1 }
0x1013   :  { %10434 = vsyncpa [#allocation14], 1 }

</bundles_post_ra>
